<compile_context>
chip_gen: v5e
topology: v5e:2x2
jax: 0.10.0
libtpu: 0.0.40
codegen_flags: <defaults>
</compile_context>

<pallas_src>
import functools

import jax
import jax.numpy as jnp
from jax.experimental import pallas as pl
from jax.experimental.pallas import tpu as pltpu


# --------------------------------------------------------------------------
# Kernel
# --------------------------------------------------------------------------
def _disc_kernel(x_ref, w1_ref, b1_ref, w2_ref, b2_ref, w3_ref, b3_ref,
                 o_ref, acc_ref):
    k = pl.program_id(0)

    @pl.when(k == 0)
    def _init():
        # Fold fc1 bias into the accumulator init.
        acc_ref[...] = jnp.broadcast_to(b1_ref[...], acc_ref.shape)

    # fc1 partial contraction over this K-tile (bf16 x bf16 -> f32 on the MXU).
    acc_ref[...] += jnp.dot(x_ref[...], w1_ref[...],
                            preferred_element_type=jnp.float32)

    @pl.when(k == pl.num_programs(0) - 1)
    def _finish():
        # relu(fc1)
        h1 = jnp.maximum(acc_ref[...], 0.0)
        # fc2 + relu  (bf16 inputs, f32 accumulate)
        h2 = jnp.dot(h1.astype(jnp.bfloat16), w2_ref[...],
                     preferred_element_type=jnp.float32)
        h2 = jnp.maximum(h2 + b2_ref[...], 0.0)
        # fc3 + sigmoid (tiny, keep f32)
        logit = jnp.dot(h2, w3_ref[...],
                        preferred_element_type=jnp.float32) + b3_ref[...]
        sig = pl.reciprocal(1.0 + jnp.exp(-logit), approx=True)
        o_ref[...] = sig.astype(o_ref.dtype)


# --------------------------------------------------------------------------
# Parameter preparation (runs ONCE, outside the jitted forward)
# --------------------------------------------------------------------------
def _choose_tiling(K, H1, dtype_bytes, max_tile_bytes=8 << 20):
    """Pick (tk, K_pad): tk multiple of 128, K_pad multiple of tk, tile <= cap."""
    n_blocks = pl.cdiv(K, 128)
    for steps in range(1, n_blocks + 1):
        blocks_per_step = pl.cdiv(n_blocks, steps)
        tk = blocks_per_step * 128
        if tk * H1 * dtype_bytes <= max_tile_bytes:
            return tk, steps * tk
    return 128, n_blocks * 128


def prepare_params(params):
    """Pad + cast weights once (hoisted out of the per-call forward)."""
    w1, b1, w2, b2, w3, b3 = params
    K, H1 = w1.shape

    tk, K_pad = _choose_tiling(K, H1, dtype_bytes=2)  # bf16 w1
    if K_pad != K:
        w1 = jnp.pad(w1, ((0, K_pad - K), (0, 0)))    # zero rows: no-op in fc1

    w1 = w1.astype(jnp.bfloat16)                      # big stream -> bf16
    w2 = w2.astype(jnp.bfloat16)
    b1 = b1.reshape(1, -1).astype(jnp.float32)
    b2 = b2.reshape(1, -1).astype(jnp.float32)
    w3 = w3.astype(jnp.float32)                       # 256x1: keep f32
    b3 = b3.reshape(1, -1).astype(jnp.float32)

    prepared = (w1, b1, w2, b2, w3, b3)
    prepared = jax.tree_util.tree_map(jax.device_put, prepared)
    return prepared, tk


# --------------------------------------------------------------------------
# Forward
# --------------------------------------------------------------------------
@functools.partial(jax.jit, static_argnames=("tk",))
def discriminator_forward(text_embedding, spectrogram, prepared, *, tk):
    """Pallas implementation of Discriminator.forward with prepared params."""
    w1, b1, w2, b2, w3, b3 = prepared
    B = text_embedding.shape[0]

    # Glue: concat + flatten (matches torch.cat((text, spec.view(B,-1)), 1)).
    x = jnp.concatenate(
        [text_embedding.astype(jnp.bfloat16),
         spectrogram.reshape(B, -1).astype(jnp.bfloat16)], axis=1)
    K = x.shape[1]
    K_pad = w1.shape[0]
    assert K_pad % tk == 0 and K <= K_pad
    if K_pad != K:
        # x is tiny (~tens of KB); padding activations per call is free.
        x = jnp.pad(x, ((0, 0), (0, K_pad - K)))

    H1 = w1.shape[1]          # 512
    H2 = w2.shape[1]          # 256
    OUT = w3.shape[1]         # 1

    grid = (K_pad // tk,)

    out = pl.pallas_call(
        _disc_kernel,
        out_shape=jax.ShapeDtypeStruct((B, OUT), jnp.float32),
        grid_spec=pltpu.PrefetchScalarGridSpec(
            num_scalar_prefetch=0,
            grid=grid,
            in_specs=[
                pl.BlockSpec((B, tk), lambda k: (0, k)),      # x K-tile (bf16)
                pl.BlockSpec((tk, H1), lambda k: (k, 0)),     # w1 K-tile (bf16)
                pl.BlockSpec((1, H1), lambda k: (0, 0)),      # b1 (resident)
                pl.BlockSpec((H1, H2), lambda k: (0, 0)),     # w2 (resident)
                pl.BlockSpec((1, H2), lambda k: (0, 0)),      # b2
                pl.BlockSpec((H2, OUT), lambda k: (0, 0)),    # w3
                pl.BlockSpec((1, OUT), lambda k: (0, 0)),     # b3
            ],
            out_specs=pl.BlockSpec((B, OUT), lambda k: (0, 0)),
            scratch_shapes=[pltpu.VMEM((B, H1), jnp.float32)],  # fc1 accumulator
        ),
        compiler_params=pltpu.CompilerParams(
            dimension_semantics=("arbitrary",),   # K is a reduction axis
            vmem_limit_bytes=32 << 20,            # valid on v5e/v6e/v7x
        ),
    )(x, w1, b1, w2, b2, w3, b3)
    return out


# --------------------------------------------------------------------------
# Init + reference
# --------------------------------------------------------------------------
def init_params(key, text_embedding_dim):
    """Deterministic init matching nn.Linear shapes (weights stored (in, out))."""
    k1, k2, k3, k4, k5, k6 = jax.random.split(key, 6)
    in1 = text_embedding_dim + 128 * 128

    def u(k, shape, fan_in):
        bound = 1.0 / jnp.sqrt(fan_in)
        return jax.random.uniform(k, shape, jnp.float32, -bound, bound)

    w1 = u(k1, (in1, 512), in1)
    b1 = u(k2, (512,), in1)
    w2 = u(k3, (512, 256), 512)
    b2 = u(k4, (256,), 512)
    w3 = u(k5, (256, 1), 256)
    b3 = u(k6, (1,), 256)
    return (w1, b1, w2, b2, w3, b3)


def reference_forward(text_embedding, spectrogram, params):
    w1, b1, w2, b2, w3, b3 = params
    B = text_embedding.shape[0]
    x = jnp.concatenate([text_embedding, spectrogram.reshape(B, -1)], axis=1)
    x = jax.nn.relu(x @ w1 + b1)
    x = jax.nn.relu(x @ w2 + b2)
    return jax.nn.sigmoid(x @ w3 + b3)


def _bf16_round(a):
    return a.astype(jnp.bfloat16).astype(jnp.float32)


# --------------------------------------------------------------------------
# Main
# --------------------------------------------------------------------------
if __name__ == "__main__":
    key = jax.random.PRNGKey(0)
    k_param, k_text, k_spec = jax.random.split(key, 3)

    batch = 2
    text_embedding_dim = 64          # small text embedding; spectrogram is 128x128

    params = init_params(k_param, text_embedding_dim)
    prepared, tk = prepare_params(params)   # pad + bf16-cast ONCE, outside jit

    text_embedding = jax.random.normal(k_text, (batch, text_embedding_dim), jnp.float32)
    spectrogram = jax.random.normal(k_spec, (batch, 128, 128), jnp.float32)

    out = discriminator_forward(text_embedding, spectrogram, prepared, tk=tk)
    out = jax.block_until_ready(out)

    # Reference 1: same bf16-rounded weights/activations (tight check).
    w1, b1, w2, b2, w3, b3 = params
    ref_bf16 = reference_forward(
        _bf16_round(text_embedding), _bf16_round(spectrogram),
        (_bf16_round(w1), b1, _bf16_round(w2), b2, w3, b3))
    # Reference 2: full-f32 PyTorch-equivalent (loose check; bf16 weights).
    ref_f32 = reference_forward(text_embedding, spectrogram, params)

    assert out.shape == (batch, 1)
    assert jnp.allclose(out, ref_bf16, atol=5e-3, rtol=5e-3), (out, ref_bf16)
    assert jnp.allclose(out, ref_f32, atol=3e-2, rtol=3e-2), (out, ref_f32)

    print("KERNEL_OK")
</pallas_src>

<mosaic_0001>
module attributes {stable_mosaic.version = 11 : i64} {
  func.func @_disc_kernel(%arg0: i32, %arg1: memref<2x5504xbf16, #tpu.memory_space<vmem>>, %arg2: memref<5504x512xbf16, #tpu.memory_space<vmem>>, %arg3: memref<1x512xf32, #tpu.memory_space<vmem>>, %arg4: memref<512x256xbf16, #tpu.memory_space<vmem>>, %arg5: memref<1x256xf32, #tpu.memory_space<vmem>>, %arg6: memref<256x1xf32, #tpu.memory_space<vmem>>, %arg7: memref<1x1xf32, #tpu.memory_space<vmem>>, %arg8: memref<2x1xf32, #tpu.memory_space<vmem>>, %arg9: memref<2x512xf32, #tpu.memory_space<vmem>>) attributes {dimension_semantics = [#tpu.dimension_semantics<arbitrary>], iteration_bounds = array<i64: 3>, scalar_prefetch = 0 : i64, scratch_operands = 1 : i64, tpu.core_type = #tpu.core_type<tc>, window_params = [{transform_indices = @transform_0, window_bounds = array<i64: 2, 5504>}, {transform_indices = @transform_1, window_bounds = array<i64: 5504, 512>}, {pipeline_mode = #tpu.pipeline_mode<synchronous>, transform_indices = @transform_2, window_bounds = array<i64: 1, 512>}, {pipeline_mode = #tpu.pipeline_mode<synchronous>, transform_indices = @transform_3, window_bounds = array<i64: 512, 256>}, {pipeline_mode = #tpu.pipeline_mode<synchronous>, transform_indices = @transform_4, window_bounds = array<i64: 1, 256>}, {pipeline_mode = #tpu.pipeline_mode<synchronous>, transform_indices = @transform_5, window_bounds = array<i64: 256, 1>}, {pipeline_mode = #tpu.pipeline_mode<synchronous>, transform_indices = @transform_6, window_bounds = array<i64: 1, 1>}, {pipeline_mode = #tpu.pipeline_mode<synchronous>, transform_indices = @transform_7, window_bounds = array<i64: 2, 1>}]} {
    %c0_i32 = arith.constant 0 : i32
    %0 = arith.cmpi eq, %arg0, %c0_i32 : i32
    %1 = arith.extui %0 : i1 to i32
    %c0_i32_0 = arith.constant 0 : i32
    %2 = arith.cmpi ne, %1, %c0_i32_0 : i32
    scf.if %2 {
      %c0_9 = arith.constant 0 : index
      %c0_10 = arith.constant 0 : index
      %12 = vector.load %arg3[%c0_9, %c0_10] : memref<1x512xf32, #tpu.memory_space<vmem>>, vector<1x512xf32>
      %13 = vector.shape_cast %12 : vector<1x512xf32> to vector<1x512xf32>
      %14 = vector.broadcast %13 : vector<1x512xf32> to vector<2x512xf32>
      %c0_11 = arith.constant 0 : index
      %c0_12 = arith.constant 0 : index
      %15 = vector.load %arg9[%c0_11, %c0_12] : memref<2x512xf32, #tpu.memory_space<vmem>>, vector<2x512xf32>
      tpu.vector_store %arg9[%c0_11, %c0_12], %14 {strides = array<i32>} : memref<2x512xf32, #tpu.memory_space<vmem>>, vector<2x512xf32>,
    } else {
    }
    %c0 = arith.constant 0 : index
    %c0_1 = arith.constant 0 : index
    %3 = vector.load %arg9[%c0, %c0_1] : memref<2x512xf32, #tpu.memory_space<vmem>>, vector<2x512xf32>
    %c0_2 = arith.constant 0 : index
    %c0_3 = arith.constant 0 : index
    %4 = vector.load %arg1[%c0_2, %c0_3] : memref<2x5504xbf16, #tpu.memory_space<vmem>>, vector<2x5504xbf16>
    %c0_4 = arith.constant 0 : index
    %c0_5 = arith.constant 0 : index
    %5 = vector.load %arg2[%c0_4, %c0_5] : memref<5504x512xbf16, #tpu.memory_space<vmem>>, vector<5504x512xbf16>
    %cst = arith.constant dense<0.000000e+00> : vector<2x512xf32>
    %6 = tpu.matmul %4, %5, %cst {dimension_numbers = #tpu.dot_dimension_numbers<[1], [0], [0], [1], [0, 0, 1, 1], [], []>} : vector<2x5504xbf16>, vector<5504x512xbf16>, vector<2x512xf32> -> vector<2x512xf32>
    %7 = arith.addf %3, %6 : vector<2x512xf32>
    %c0_6 = arith.constant 0 : index
    %c0_7 = arith.constant 0 : index
    %8 = vector.load %arg9[%c0_6, %c0_7] : memref<2x512xf32, #tpu.memory_space<vmem>>, vector<2x512xf32>
    tpu.vector_store %arg9[%c0_6, %c0_7], %7 {strides = array<i32>} : memref<2x512xf32, #tpu.memory_space<vmem>>, vector<2x512xf32>,
    %c2_i32 = arith.constant 2 : i32
    %9 = arith.cmpi eq, %arg0, %c2_i32 : i32
    %10 = arith.extui %9 : i1 to i32
    %c0_i32_8 = arith.constant 0 : i32
    %11 = arith.cmpi ne, %10, %c0_i32_8 : i32
    scf.if %11 {
      %c0_9 = arith.constant 0 : index
      %c0_10 = arith.constant 0 : index
      %12 = vector.load %arg9[%c0_9, %c0_10] : memref<2x512xf32, #tpu.memory_space<vmem>>, vector<2x512xf32>
      %cst_11 = arith.constant 0.000000e+00 : f32
      %13 = vector.broadcast %cst_11 : f32 to vector<2x512xf32>
      %14 = arith.maximumf %12, %13 : vector<2x512xf32>
      %15 = arith.truncf %14 : vector<2x512xf32> to vector<2x512xbf16>
      %c0_12 = arith.constant 0 : index
      %c0_13 = arith.constant 0 : index
      %16 = vector.load %arg4[%c0_12, %c0_13] : memref<512x256xbf16, #tpu.memory_space<vmem>>, vector<512x256xbf16>
      %cst_14 = arith.constant dense<0.000000e+00> : vector<2x256xf32>
      %17 = tpu.matmul %15, %16, %cst_14 {dimension_numbers = #tpu.dot_dimension_numbers<[1], [0], [0], [1], [0, 0, 1, 1], [], []>} : vector<2x512xbf16>, vector<512x256xbf16>, vector<2x256xf32> -> vector<2x256xf32>
      %c0_15 = arith.constant 0 : index
      %c0_16 = arith.constant 0 : index
      %18 = vector.load %arg5[%c0_15, %c0_16] : memref<1x256xf32, #tpu.memory_space<vmem>>, vector<1x256xf32>
      %19 = vector.broadcast %18 : vector<1x256xf32> to vector<2x256xf32>
      %20 = arith.addf %17, %19 : vector<2x256xf32>
      %cst_17 = arith.constant 0.000000e+00 : f32
      %21 = vector.broadcast %cst_17 : f32 to vector<2x256xf32>
      %22 = arith.maximumf %20, %21 : vector<2x256xf32>
      %c0_18 = arith.constant 0 : index
      %c0_19 = arith.constant 0 : index
      %23 = vector.load %arg6[%c0_18, %c0_19] : memref<256x1xf32, #tpu.memory_space<vmem>>, vector<256x1xf32>
      %cst_20 = arith.constant dense<0.000000e+00> : vector<2x1xf32>
      %24 = tpu.matmul %22, %23, %cst_20 {dimension_numbers = #tpu.dot_dimension_numbers<[1], [0], [0], [1], [0, 0, 1, 1], [], []>} : vector<2x256xf32>, vector<256x1xf32>, vector<2x1xf32> -> vector<2x1xf32>
      %c0_21 = arith.constant 0 : index
      %c0_22 = arith.constant 0 : index
      %25 = vector.load %arg7[%c0_21, %c0_22] : memref<1x1xf32, #tpu.memory_space<vmem>>, vector<1x1xf32>
      %26 = vector.broadcast %25 : vector<1x1xf32> to vector<2x1xf32>
      %27 = arith.addf %24, %26 : vector<2x1xf32>
      %cst_23 = arith.constant 0.000000e+00 : f32
      %28 = vector.broadcast %cst_23 : f32 to vector<2x1xf32>
      %29 = arith.subf %28, %27 : vector<2x1xf32>
      %30 = math.exp %29 : vector<2x1xf32>
      %cst_24 = arith.constant 1.000000e+00 : f32
      %31 = vector.broadcast %cst_24 : f32 to vector<2x1xf32>
      %32 = arith.addf %31, %30 : vector<2x1xf32>
      %33 = tpu.reciprocal %32 {approx = true} : vector<2x1xf32> -> vector<2x1xf32>
      %c0_25 = arith.constant 0 : index
      %c0_26 = arith.constant 0 : index
      %34 = vector.load %arg8[%c0_25, %c0_26] : memref<2x1xf32, #tpu.memory_space<vmem>>, vector<2x1xf32>
      tpu.vector_store %arg8[%c0_25, %c0_26], %33 {strides = array<i32>} : memref<2x1xf32, #tpu.memory_space<vmem>>, vector<2x1xf32>,
    } else {
    }
    return
  }
  func.func @transform_0(%arg0: i32) -> (i32, i32) {
    %c0_i32 = arith.constant 0 : i32
    %c0_i32_0 = arith.constant 0 : i32
    return %c0_i32, %arg0 : i32, i32
  }
  func.func @transform_1(%arg0: i32) -> (i32, i32) {
    %c0_i32 = arith.constant 0 : i32
    %c0_i32_0 = arith.constant 0 : i32
    return %arg0, %c0_i32 : i32, i32
  }
  func.func @transform_2(%arg0: i32) -> (i32, i32) {
    %c0_i32 = arith.constant 0 : i32
    %c0_i32_0 = arith.constant 0 : i32
    %c0_i32_1 = arith.constant 0 : i32
    return %c0_i32, %c0_i32_0 : i32, i32
  }
  func.func @transform_3(%arg0: i32) -> (i32, i32) {
    %c0_i32 = arith.constant 0 : i32
    %c0_i32_0 = arith.constant 0 : i32
    %c0_i32_1 = arith.constant 0 : i32
    return %c0_i32, %c0_i32_0 : i32, i32
  }
  func.func @transform_4(%arg0: i32) -> (i32, i32) {
    %c0_i32 = arith.constant 0 : i32
    %c0_i32_0 = arith.constant 0 : i32
    %c0_i32_1 = arith.constant 0 : i32
    return %c0_i32, %c0_i32_0 : i32, i32
  }
  func.func @transform_5(%arg0: i32) -> (i32, i32) {
    %c0_i32 = arith.constant 0 : i32
    %c0_i32_0 = arith.constant 0 : i32
    %c0_i32_1 = arith.constant 0 : i32
    return %c0_i32, %c0_i32_0 : i32, i32
  }
  func.func @transform_6(%arg0: i32) -> (i32, i32) {
    %c0_i32 = arith.constant 0 : i32
    %c0_i32_0 = arith.constant 0 : i32
    %c0_i32_1 = arith.constant 0 : i32
    return %c0_i32, %c0_i32_0 : i32, i32
  }
  func.func @transform_7(%arg0: i32) -> (i32, i32) {
    %c0_i32 = arith.constant 0 : i32
    %c0_i32_0 = arith.constant 0 : i32
    %c0_i32_1 = arith.constant 0 : i32
    return %c0_i32, %c0_i32_0 : i32, i32
  }
}

</mosaic_0001>

<bundles_post_ra>
// kernel: discriminator_forward.1
= control target key start
LH: loop header
LB: loop body
LE: loop exit
PB: predicated region body
PF: predicated region fallthrough
CT: control target
= control target key end

     0   :  { %s22551_s0 = inlined_call_operand.vmem [shape: bf16[2,16512], index: 0, kind: input, shape index: {}]   ;;  %s22552_s1 = inlined_call_operand.hbm [shape: bf16[16512,512], index: 1, kind: input, shape index: {}]   ;;  %s22553_s2 = inlined_call_operand.hbm [shape: f32[1,512], index: 2, kind: input, shape index: {}]   ;;  %s22554_s3 = inlined_call_operand.hbm [shape: bf16[512,256], index: 3, kind: input, shape index: {}]   ;;  %s22555_s4 = inlined_call_operand.hbm [shape: f32[1,256], index: 4, kind: input, shape index: {}]   ;;  %s22556_s5 = inlined_call_operand.vmem [shape: f32[256,1], index: 5, kind: input, shape index: {}]   ;;  %s22557_s6 = inlined_call_operand.<no memory space> [shape: f32[1,1], index: 6, kind: input, shape index: {}]   ;;  %s22558_s7 = inlined_call_operand.vmem [shape: f32[2,1], index: 7, kind: output, shape index: {}]  }
   0x1   :  { %v12_v0 = vstv %s22557_s6 }
   0x2   :  { %13 = vst [vmem:[#allocation3] sm:$0x1] %v12_v0 }
   0x3   :  { %14 = vsyncpa [#allocation5], 0 }
   0x4   :  { %16 = vsyncpa [#allocation5 + $0x1], 0 }
   0x5   :  { %17 = vsyncpa [#allocation7], 0 }
   0x6   :  { %18 = vsyncpa [#allocation10], 0  ;;  %s19188_s26 = smov 0   ;;  %s19190_s27 = smov 0  }
   0x7   :  { %s19192_s28 = smov 0   ;;  %s19194_s29 = smov 0  }
   0x8 LB: > { %s19207_s6 = sadd.s32 4294967295, %s19136_s29   ;;  %p70_p0 = scmp.ne.s32.totalorder %s19128_s27, %s19124_s26  ;;  %s19136_s29 = sphi %s19194_s29, %s22605_s29   ;;  %s19132_s28 = sphi %s19192_s28, %s22604_s28   ;;  %s19128_s27 = sphi %s19190_s27, %s22603_s27   ;;  %s19124_s26 = sphi %s19188_s26, %s22602_s26  }
   0x9   : > { %p71_p1 = scmp.eq.s32.totalorder %s19207_s6, 0  ;;  %p11666_p2 = scmp.ge.s32.totalorder %s19136_s29, 1 }
   0xa   : > { %p207_p3 = scmp.lt.s32.totalorder %s19136_s29, 4  ;;  %p11667_p4 = scmp.ne.s32.totalorder %s19207_s6, 0 }
   0xb   : > { %p19216_p5 = por %p71_p1, %p70_p0  ;;  %s219_s10 = sshll.u32 %s22553_s2, 4  ;;  %s220_s10 = int_to_ptr.hbm [resolvable:$true] %s219_s10 }
   0xc   : > { %p19223_p6 = pnand %p11666_p2, %p207_p3  ;;  %s19138_s12 = smov [#allocation6]  }
   0xd   : > { %s221_s13 = sshll.u32 %s19138_s12, 4  ;;  %s230_s16 = sshll.u32 %s22554_s3, 4  ;;  %s222_s13 = int_to_ptr.vmem [resolvable:$true] %s221_s13  ;;  %s231_s16 = int_to_ptr.hbm [resolvable:$true] %s230_s16 }
   0xe   : > { %p18900_p7 = pneg %p19223_p6  ;;  %s19139_s18 = smov [#allocation8]  }
   0xf   : > { %s232_s19 = sshll.u32 %s19139_s18, 4  ;;  %s19140_s20 = smov 128   ;;  %s233_s19 = int_to_ptr.vmem [resolvable:$true] %s232_s19 }
  0x10   : > { %p19234_p8 = pnand %p18900_p7, %p71_p1  ;;  %s19141_s21 = smov 8  }
  0x11   : > { %s245_s24 = sshll.u32 %s22555_s4, 4  ;;  %s19142_s25 = smov [#allocation9]   ;;  %s246_s24 = int_to_ptr.hbm [resolvable:$true] %s245_s24 }
  0x12   : > { %18903 = dma.hbm_to_vmem [thread:$0]  (!%p19234_p8), %s220_s10, 64, %s222_s13, [#allocation7]  }
  0x13   : > { %18906 = dma.hbm_to_vmem [thread:$0]  (!%p19234_p8), %s231_s16, 8192, %s233_s19, [#allocation7], %s19140_s20, %s19140_s20, %s19141_s21  }
  0x14   : > { %s247_s26 = sshll.u32 %s19142_s25, 4  ;;  %s19248_s8 = sadd.s32 1, %s19136_s29   ;;  %s248_s26 = int_to_ptr.vmem [resolvable:$true] %s247_s26 }
  0x15   : > { %18909 = dma.hbm_to_vmem [thread:$0]  (!%p19234_p8), %s246_s24, 32, %s248_s26, [#allocation10]  }
  0x16   : > { %s54_s9 = ssub.s32 %s19136_s29, %s19248_s8  ;;  %s57_s10 = sadd.s32 1, %s19132_s28 }
  0x17   : > { %p55_p9 = scmp.eq.s32.totalorder %s54_s9, 0  ;;  %p64_p10 = scmp.ne.s32.totalorder %s19132_s28, %s19128_s27 }
  0x18   : > { %p65_p11 = scmp.eq.s32.totalorder %s19136_s29, 0  ;;  %p18917_p12 = scmp.lt.s32.totalorder %s19136_s29, 3 }
  0x19   : > { %s19258_s12 = scalar_select %p55_p9, %s19132_s28, %s57_s10  }
  0x1a   : > { %p66_p13 = por %p65_p11, %p64_p10  ;;  %s272_s13 = sand.u32 1, %s19132_s28  }
  0x1b   : > { %s18884_s14 = smul.u32 11008, %s272_s13  ;;  %s273_s23 = scalar_lea.sflag [#allocation5], %s272_s13 }
  0x1c   : > { %s18883_s15 = smul.u32 11008, %s19136_s29  ;;  %p19262_p0 = pnand %p18917_p12, %p66_p13 }
  0x1d   : > { %s276_s20 = scalar_lea.vmem [#allocation4], %s18884_s14  ;;  %s19071_s9 = scalar_lea.hbm %s22552_s1, 33024 }
  0x1e   : > { %s282_s19 = scalar_lea.hbm %s22552_s1, %s18883_s15  ;;  %s285_s21 = sshll.u32 %s276_s20, 4  ;;  %s286_s21 = int_to_ptr.vmem [resolvable:$true] %s285_s21 }
  0x1f   : > { %s283_s22 = sshll.u32 %s282_s19, 4  ;;  %p19068_p3 = pneg %p19262_p0  ;;  %s284_s22 = int_to_ptr.hbm [resolvable:$true] %s283_s22 }
  0x20   : > { %s19064_s24 = sshra.s32 %s284_s22, 4  ;;  %s19065_s24 = int_to_ptr.hbm [resolvable:$true] %s19064_s24 }
  0x21   : > { %s19066_s25 = scalar_lea.hbm %s19065_s24, 11008  ;;  %p19072_p9 = scmp.lt.s32.totalorder %s19065_s24, %s22552_s1 }
  0x22   : > { %p19067_p2 = scmp.ne.s32.totalorder %s19065_s24, %s19066_s25  ;;  %p19073_p10 = scmp.lt.s32.totalorder %s19071_s9, %s19066_s25 }
  0x24   : > { %p19069_p7 = pnand %p19068_p3, %p19067_p2  ;;  %p19074_p11 = por %p19073_p10, %p19072_p9 }
  0x26   : > { %p19070_p8 = pneg %p19069_p7 }
  0x28   : > { %p19075_p12 = pnand %p19074_p11, %p19070_p8 }
  0x2a   : > { %19078 = shalt.err (!%p19075_p12)
}
  0x2b   : > { %s19143_s13 = smov 256   ;;  %s19144_s14 = smov 16  }
  0x2c   : > { %18913 = dma.hbm_to_vmem [thread:$0]  (!%p19262_p0), %s284_s22, 176128, %s286_s21, %s273_s23, %s19143_s13, %s19143_s13, %s19144_s14  }
  0x2d   : > { %297 = sbr.rel (%p19223_p6) target bundleno = 1972 (0x7b4), region = 48 }
  0x32   : > { %s299_s17 = sand.u32 1, %s19128_s27  }
  0x33   : > { %s18885_s18 = smul.u32 11008, %s299_s17  ;;  %s300_s19 = scalar_lea.sflag [#allocation5], %s299_s17 }
  0x35   : > { %s19282_s20 = scalar_lea.vmem [#allocation4], %s18885_s18 }
  0x36   : > { %19111 = dma.done.wait (%p19216_p5), %s300_s19, 176128  }
  0x37   : > { %19113 = vsyncadd (%p19216_p5), %s300_s19, 4294791168 }
  0x38   : > { %19115 = dma.done.wait (%p71_p1), [#allocation7], 8256  }
  0x39   : > { %19117 = vsyncadd (%p71_p1), [#allocation7], 4294959040 }
  0x3a   : > { %19119 = dma.done.wait (%p71_p1), [#allocation10], 32  }
  0x3b   : > { %19121 = vsyncadd (%p71_p1), [#allocation10], 4294967264  ;;  %s349_s11 = smul.u32 43, %s19207_s6 }
  0x3c   : > { %358 = sbr.rel (%p11667_p4) target bundleno = 73 (0x49), region = 68 }
  0x3d   : > { %p350_p6 = scmp.lt.s32.totalorder %s349_s11, 128 }
  0x3f   : > { %s22607_s11 = smov (!%p350_p6, %s349_s11), 128 }
  0x40   : > { %s19300_s30 = scalar_lea.vmem %s22551_s0, %s22607_s11 }
  0x41   : > { %v359_v1 = vld [vmem:[#allocation6] sm:$0xf]  ;;  %vm368_vm0 = vcmask 1041408   ;;  %vm370_vm1 = vcmask 1045508   ;;  %vm372_vm2 = vcmask 1043456  }
  0x42   : > { %v361_v2 = vperm.slane %v359_v1, 0  ;;  %v362_v3 = vperm.slane %v359_v1, 1  ;;  %v363_v4 = vperm.slane %v359_v1, 2  ;;  %v364_v5 = vperm.slane %v359_v1, 3 }
  0x44   : > { %v365_v6 = vrot.slane %v362_v3, 6  ;;  %v366_v7 = vrot.slane %v363_v4, 4  ;;  %v367_v8 = vrot.slane %v364_v5, 2 }
  0x46   : > { %v369_v9 = vsel %vm368_vm0, %v361_v2, %v365_v6  ;;  %v371_v10 = vsel %vm370_vm1, %v366_v7, %v367_v8 }
  0x47   : > { %v373_v11 = vsel %vm372_vm2, %v369_v9, %v371_v10 }
  0x48   : > { %375 = vst [vmem:[#allocation2] sm:$0xff] %v373_v11 }
  0x49 PF: > { %v11792_v12 = vld [vmem:[%s19282_s20 + $0xe0] sm:$0xf]  ;;  %v17473_v13 = vld [vmem:[%s19282_s20 + $0xec] sm:$0xf0]  ;;  %vm10980_vm3 = vcmask 1041408   ;;  %vm10982_vm4 = vcmask 1045508  }
  0x4a   : > { %v11920_v14 = vld [vmem:[%s19282_s20 + $0x1e0] sm:$0xf]  ;;  %v11793_v15 = vor.u32 %v17473_v13, %v11792_v12  ;;  %v17505_v16 = vld [vmem:[%s19282_s20 + $0x1ec] sm:$0xf0]  ;;  %vm10984_vm5 = vcmask 1043456   ;;  %p17182_p1 = scmp.ne.s32.totalorder %s19207_s6, 2 }
  0x4b   : > { %v12048_v17 = vld [vmem:[%s19282_s20 + $0x2e0] sm:$0xf]  ;;  %v17537_v18 = vld [vmem:[%s19282_s20 + $0x2ec] sm:$0xf0]  ;;  %v11921_v19 = vor.u32 %v17505_v16, %v11920_v14 }
  0x4c   : > { %v12049_v20 = vor.u32 %v17537_v18, %v12048_v17  ;;  %v12176_v21 = vld [vmem:[%s19282_s20 + $0x3e0] sm:$0xf]  ;;  %v17569_v22 = vld [vmem:[%s19282_s20 + $0x3ec] sm:$0xf0]  ;;  %8737 = vmatpush.bf16.msra.mxu0 %v11793_v15 }
  0x4d   : > { %v11776_v23 = vld [vmem:[%s19282_s20 + $0xc0] sm:$0xf]  ;;  %v12177_v24 = vor.u32 %v17569_v22, %v12176_v21  ;;  %v17469_v25 = vld [vmem:[%s19282_s20 + $0xcc] sm:$0xf0]  ;;  %8750 = vmatpush.bf16.msra.mxu1 %v11921_v19 }
  0x4e   : > { %v11904_v26 = vld [vmem:[%s19282_s20 + $0x1c0] sm:$0xf]  ;;  %v17501_v27 = vld [vmem:[%s19282_s20 + $0x1cc] sm:$0xf0]  ;;  %8763 = vmatpush.bf16.msra.mxu2 %v12049_v20  ;;  %v11777_v28 = vor.u32 %v17469_v25, %v11776_v23 }
  0x4f   : > { %v11905_v29 = vor.u32 %v17501_v27, %v11904_v26  ;;  %v12032_v30 = vld [vmem:[%s19282_s20 + $0x2c0] sm:$0xf]  ;;  %v17533_v31 = vld [vmem:[%s19282_s20 + $0x2cc] sm:$0xf0]  ;;  %8776 = vmatpush.bf16.msra.mxu3 %v12177_v24 }
  0x50   : > { %v12160_v32 = vld [vmem:[%s19282_s20 + $0x3c0] sm:$0xf]  ;;  %v12033_v33 = vor.u32 %v17533_v31, %v12032_v30  ;;  %v17565_v34 = vld [vmem:[%s19282_s20 + $0x3cc] sm:$0xf0]  ;;  %8738 = vmatpush.bf16.msra.mxu0 %v11777_v28 }
  0x51   : > { %v11760_v35 = vld [vmem:[%s19282_s20 + $0xa0] sm:$0xf]  ;;  %v17465_v36 = vld [vmem:[%s19282_s20 + $0xac] sm:$0xf0]  ;;  %v12161_v37 = vor.u32 %v17565_v34, %v12160_v32  ;;  %8751 = vmatpush.bf16.msra.mxu1 %v11905_v29 }
  0x52   : > { %v11888_v38 = vld [vmem:[%s19282_s20 + $0x1a0] sm:$0xf]  ;;  %v17497_v39 = vld [vmem:[%s19282_s20 + $0x1ac] sm:$0xf0]  ;;  %v11761_v41 = vor.u32 %v17465_v36, %v11760_v35  ;;  %8764 = vmatpush.bf16.msra.mxu2 %v12033_v33 }
  0x53   : > { %v12016_v40 = vld [vmem:[%s19282_s20 + $0x2a0] sm:$0xf]  ;;  %v17529_v42 = vld [vmem:[%s19282_s20 + $0x2ac] sm:$0xf0]  ;;  %v11889_v45 = vor.u32 %v17497_v39, %v11888_v38  ;;  %8777 = vmatpush.bf16.msra.mxu3 %v12161_v37 }
  0x54   : > { %v12144_v43 = vld [vmem:[%s19282_s20 + $0x3a0] sm:$0xf]  ;;  %v17561_v44 = vld [vmem:[%s19282_s20 + $0x3ac] sm:$0xf0]  ;;  %v12017_v46 = vor.u32 %v17529_v42, %v12016_v40  ;;  %8739 = vmatpush.bf16.msra.mxu0 %v11761_v41 }
  0x55   : > { %v11744_v47 = vld [vmem:[%s19282_s20 + $0x80] sm:$0xf]  ;;  %v17461_v48 = vld [vmem:[%s19282_s20 + $0x8c] sm:$0xf0]  ;;  %v12145_v50 = vor.u32 %v17561_v44, %v12144_v43  ;;  %8752 = vmatpush.bf16.msra.mxu1 %v11889_v45 }
  0x56   : > { %v11872_v49 = vld [vmem:[%s19282_s20 + $0x180] sm:$0xf]  ;;  %v17493_v51 = vld [vmem:[%s19282_s20 + $0x18c] sm:$0xf0]  ;;  %v11745_v56 = vor.u32 %v17461_v48, %v11744_v47  ;;  %8765 = vmatpush.bf16.msra.mxu2 %v12017_v46 }
  0x57   : > { %v12000_v52 = vld [vmem:[%s19282_s20 + $0x280] sm:$0xf]  ;;  %v17525_v53 = vld [vmem:[%s19282_s20 + $0x28c] sm:$0xf0]  ;;  %v11873_v57 = vor.u32 %v17493_v51, %v11872_v49  ;;  %8778 = vmatpush.bf16.msra.mxu3 %v12145_v50 }
  0x58   : > { %v12128_v54 = vld [vmem:[%s19282_s20 + $0x380] sm:$0xf]  ;;  %v17557_v55 = vld [vmem:[%s19282_s20 + $0x38c] sm:$0xf0]  ;;  %v12001_v58 = vor.u32 %v17525_v53, %v12000_v52  ;;  %8740 = vmatpush.bf16.msra.mxu0 %v11745_v56 }
  0x59   : > { %v11728_v59 = vld [vmem:[%s19282_s20 + $0x60] sm:$0xf]  ;;  %v17457_v60 = vld [vmem:[%s19282_s20 + $0x6c] sm:$0xf0]  ;;  %v12129_v62 = vor.u32 %v17557_v55, %v12128_v54  ;;  %8753 = vmatpush.bf16.msra.mxu1 %v11873_v57 }
  0x5a   : > { %v11856_v61 = vld [vmem:[%s19282_s20 + $0x160] sm:$0xf]  ;;  %v17489_v63 = vld [vmem:[%s19282_s20 + $0x16c] sm:$0xf0]  ;;  %v11729_v4 = vor.u32 %v17457_v60, %v11728_v59  ;;  %8766 = vmatpush.bf16.msra.mxu2 %v12001_v58 }
  0x5b   : > { %v11984_v0 = vld [vmem:[%s19282_s20 + $0x260] sm:$0xf]  ;;  %v17521_v1 = vld [vmem:[%s19282_s20 + $0x26c] sm:$0xf0]  ;;  %v11857_v5 = vor.u32 %v17489_v63, %v11856_v61  ;;  %8779 = vmatpush.bf16.msra.mxu3 %v12129_v62 }
  0x5c   : > { %v12112_v2 = vld [vmem:[%s19282_s20 + $0x360] sm:$0xf]  ;;  %v17553_v3 = vld [vmem:[%s19282_s20 + $0x36c] sm:$0xf0]  ;;  %v11985_v6 = vor.u32 %v17521_v1, %v11984_v0  ;;  %8741 = vmatpush.bf16.msra.mxu0 %v11729_v4 }
  0x5d   : > { %v11712_v7 = vld [vmem:[%s19282_s20 + $0x40] sm:$0xf]  ;;  %v17453_v8 = vld [vmem:[%s19282_s20 + $0x4c] sm:$0xf0]  ;;  %v12113_v10 = vor.u32 %v17553_v3, %v12112_v2  ;;  %8754 = vmatpush.bf16.msra.mxu1 %v11857_v5 }
  0x5e   : > { %v11840_v9 = vld [vmem:[%s19282_s20 + $0x140] sm:$0xf]  ;;  %v17485_v11 = vld [vmem:[%s19282_s20 + $0x14c] sm:$0xf0]  ;;  %v11713_v16 = vor.u32 %v17453_v8, %v11712_v7  ;;  %8767 = vmatpush.bf16.msra.mxu2 %v11985_v6 }
  0x5f   : > { %v11968_v12 = vld [vmem:[%s19282_s20 + $0x240] sm:$0xf]  ;;  %v17517_v13 = vld [vmem:[%s19282_s20 + $0x24c] sm:$0xf0]  ;;  %v11841_v17 = vor.u32 %v17485_v11, %v11840_v9  ;;  %8780 = vmatpush.bf16.msra.mxu3 %v12113_v10 }
  0x60   : > { %v12096_v14 = vld [vmem:[%s19282_s20 + $0x340] sm:$0xf]  ;;  %v17549_v15 = vld [vmem:[%s19282_s20 + $0x34c] sm:$0xf0]  ;;  %v11969_v18 = vor.u32 %v17517_v13, %v11968_v12  ;;  %8742 = vmatpush.bf16.msra.mxu0 %v11713_v16 }
  0x61   : > { %v11696_v19 = vld [vmem:[%s19282_s20 + $0x20] sm:$0xf]  ;;  %v17449_v20 = vld [vmem:[%s19282_s20 + $0x2c] sm:$0xf0]  ;;  %v12097_v22 = vor.u32 %v17549_v15, %v12096_v14  ;;  %8755 = vmatpush.bf16.msra.mxu1 %v11841_v17 }
  0x62   : > { %v11824_v21 = vld [vmem:[%s19282_s20 + $0x120] sm:$0xf]  ;;  %v17481_v23 = vld [vmem:[%s19282_s20 + $0x12c] sm:$0xf0]  ;;  %v11697_v28 = vor.u32 %v17449_v20, %v11696_v19  ;;  %8768 = vmatpush.bf16.msra.mxu2 %v11969_v18 }
  0x63   : > { %v11952_v24 = vld [vmem:[%s19282_s20 + $0x220] sm:$0xf]  ;;  %v17513_v25 = vld [vmem:[%s19282_s20 + $0x22c] sm:$0xf0]  ;;  %v11825_v31 = vor.u32 %v17481_v23, %v11824_v21  ;;  %8781 = vmatpush.bf16.msra.mxu3 %v12097_v22 }
  0x64   : > { %v12080_v26 = vld [vmem:[%s19282_s20 + $0x320] sm:$0xf]  ;;  %v17545_v27 = vld [vmem:[%s19282_s20 + $0x32c] sm:$0xf0]  ;;  %v11953_v32 = vor.u32 %v17513_v25, %v11952_v24  ;;  %8743 = vmatpush.bf16.msra.mxu0 %v11697_v28 }
  0x65   : > { %v11680_v29 = vld [vmem:[%s19282_s20] sm:$0xf]  ;;  %v17445_v30 = vld [vmem:[%s19282_s20 + $0xc] sm:$0xf0]  ;;  %v12081_v36 = vor.u32 %v17545_v27, %v12080_v26  ;;  %8756 = vmatpush.bf16.msra.mxu1 %v11825_v31 }
  0x66   : > { %v11808_v33 = vld [vmem:[%s19282_s20 + $0x100] sm:$0xf]  ;;  %v17477_v34 = vld [vmem:[%s19282_s20 + $0x10c] sm:$0xf0]  ;;  %v11681_v43 = vor.u32 %v17445_v30, %v11680_v29  ;;  %8769 = vmatpush.bf16.msra.mxu2 %v11953_v32 }
  0x67   : > { %v11936_v35 = vld [vmem:[%s19282_s20 + $0x200] sm:$0xf]  ;;  %v17509_v37 = vld [vmem:[%s19282_s20 + $0x20c] sm:$0xf0]  ;;  %v11809_v47 = vor.u32 %v17477_v34, %v11808_v33  ;;  %8782 = vmatpush.bf16.msra.mxu3 %v12081_v36 }
  0x68   : > { %v12064_v38 = vld [vmem:[%s19282_s20 + $0x300] sm:$0xf]  ;;  %v17541_v39 = vld [vmem:[%s19282_s20 + $0x30c] sm:$0xf0]  ;;  %v11937_v48 = vor.u32 %v17509_v37, %v11936_v35  ;;  %8744 = vmatpush.bf16.msra.mxu0 %v11681_v43 }
  0x69   : > { %v12304_v40 = vld [vmem:[%s19282_s20 + $0x4e0] sm:$0xf]  ;;  %v17601_v41 = vld [vmem:[%s19282_s20 + $0x4ec] sm:$0xf0]  ;;  %v12065_v51 = vor.u32 %v17541_v39, %v12064_v38  ;;  %8757 = vmatpush.bf16.msra.mxu1 %v11809_v47 }
  0x6a   : > { %v12432_v42 = vld [vmem:[%s19282_s20 + $0x5e0] sm:$0xf]  ;;  %v17633_v44 = vld [vmem:[%s19282_s20 + $0x5ec] sm:$0xf0]  ;;  %v12305_v52 = vor.u32 %v17601_v41, %v12304_v40  ;;  %8770 = vmatpush.bf16.msra.mxu2 %v11937_v48 }
  0x6b   : > { %v12560_v45 = vld [vmem:[%s19282_s20 + $0x6e0] sm:$0xf]  ;;  %v17665_v46 = vld [vmem:[%s19282_s20 + $0x6ec] sm:$0xf0]  ;;  %v12433_v53 = vor.u32 %v17633_v44, %v12432_v42  ;;  %8783 = vmatpush.bf16.msra.mxu3 %v12065_v51 }
  0x6c   : > { %v12688_v49 = vld [vmem:[%s19282_s20 + $0x7e0] sm:$0xf]  ;;  %v17697_v50 = vld [vmem:[%s19282_s20 + $0x7ec] sm:$0xf0]  ;;  %v12561_v54 = vor.u32 %v17665_v46, %v12560_v45  ;;  %8789 = vmatpush.bf16.msrb.mxu0 %v12305_v52 }
  0x6d   : > { %v12288_v55 = vld [vmem:[%s19282_s20 + $0x4c0] sm:$0xf]  ;;  %v17597_v56 = vld [vmem:[%s19282_s20 + $0x4cc] sm:$0xf0]  ;;  %v12689_v58 = vor.u32 %v17697_v50, %v12688_v49  ;;  %8802 = vmatpush.bf16.msrb.mxu1 %v12433_v53 }
  0x6e   : > { %v12416_v57 = vld [vmem:[%s19282_s20 + $0x5c0] sm:$0xf]  ;;  %v17629_v59 = vld [vmem:[%s19282_s20 + $0x5cc] sm:$0xf0]  ;;  %v12289_v0 = vor.u32 %v17597_v56, %v12288_v55  ;;  %8815 = vmatpush.bf16.msrb.mxu2 %v12561_v54 }
  0x6f   : > { %v12544_v60 = vld [vmem:[%s19282_s20 + $0x6c0] sm:$0xf]  ;;  %v17661_v61 = vld [vmem:[%s19282_s20 + $0x6cc] sm:$0xf0]  ;;  %v12417_v3 = vor.u32 %v17629_v59, %v12416_v57  ;;  %8828 = vmatpush.bf16.msrb.mxu3 %v12689_v58 }
  0x70   : > { %v12672_v62 = vld [vmem:[%s19282_s20 + $0x7c0] sm:$0xf]  ;;  %v17693_v63 = vld [vmem:[%s19282_s20 + $0x7cc] sm:$0xf0]  ;;  %v12545_v4 = vor.u32 %v17661_v61, %v12544_v60  ;;  %8790 = vmatpush.bf16.msrb.mxu0 %v12289_v0 }
  0x71   : > { %v12272_v1 = vld [vmem:[%s19282_s20 + $0x4a0] sm:$0xf]  ;;  %v17593_v2 = vld [vmem:[%s19282_s20 + $0x4ac] sm:$0xf0]  ;;  %v12673_v8 = vor.u32 %v17693_v63, %v12672_v62  ;;  %8803 = vmatpush.bf16.msrb.mxu1 %v12417_v3 }
  0x72   : > { %v12400_v5 = vld [vmem:[%s19282_s20 + $0x5a0] sm:$0xf]  ;;  %v17625_v6 = vld [vmem:[%s19282_s20 + $0x5ac] sm:$0xf0]  ;;  %v12273_v13 = vor.u32 %v17593_v2, %v12272_v1  ;;  %8816 = vmatpush.bf16.msrb.mxu2 %v12545_v4 }
  0x73   : > { %v377_v7 = vld [vmem:[%s19300_s30] sm:$0xff]  ;;  %v12528_v9 = vld [vmem:[%s19282_s20 + $0x6a0] sm:$0xf]  ;;  %v12401_v14 = vor.u32 %v17625_v6, %v12400_v5  ;;  %8829 = vmatpush.bf16.msrb.mxu3 %v12673_v8 }
  0x74   : > { %v17657_v10 = vld [vmem:[%s19282_s20 + $0x6ac] sm:$0xf0]  ;;  %1760 = vst [vmem:[#allocation1] ss:$9 sm:$0xff] %v377_v7  ;;  %v12656_v11 = vld [vmem:[%s19282_s20 + $0x7a0] sm:$0xf]  ;;  %8791 = vmatpush.bf16.msrb.mxu0 %v12273_v13 }
  0x75   : > { %v17689_v12 = vld [vmem:[%s19282_s20 + $0x7ac] sm:$0xf0]  ;;  %v12529_v15 = vor.u32 %v17657_v10, %v12528_v9  ;;  %v12256_v16 = vld [vmem:[%s19282_s20 + $0x480] sm:$0xf]  ;;  %8804 = vmatpush.bf16.msrb.mxu1 %v12401_v14  ;;  %v378_v9 = vld [vmem:[%s19300_s30 + $0x8] sm:$0xff] }
  0x76   : > { %v17589_v17 = vld [vmem:[%s19282_s20 + $0x48c] sm:$0xf0]  ;;  %v12384_v18 = vld [vmem:[%s19282_s20 + $0x580] sm:$0xf]  ;;  %v12657_v19 = vor.u32 %v17689_v12, %v12656_v11 }
  0x77   : > { %v17621_v20 = vld [vmem:[%s19282_s20 + $0x58c] sm:$0xf0]  ;;  %v12512_v21 = vld [vmem:[%s19282_s20 + $0x680] sm:$0xf]  ;;  %v12257_v26 = vor.u32 %v17589_v17, %v12256_v16  ;;  %8817 = vmatpush.bf16.msrb.mxu2 %v12529_v15 }
  0x78   : > { %v17653_v22 = vld [vmem:[%s19282_s20 + $0x68c] sm:$0xf0]  ;;  %v12640_v23 = vld [vmem:[%s19282_s20 + $0x780] sm:$0xf]  ;;  %v12385_v30 = vor.u32 %v17621_v20, %v12384_v18  ;;  %8830 = vmatpush.bf16.msrb.mxu3 %v12657_v19 }
  0x79   : > { %v17685_v24 = vld [vmem:[%s19282_s20 + $0x78c] sm:$0xf0]  ;;  %v12240_v25 = vld [vmem:[%s19282_s20 + $0x460] sm:$0xf]  ;;  %v12513_v31 = vor.u32 %v17653_v22, %v12512_v21  ;;  %8792 = vmatpush.bf16.msrb.mxu0 %v12257_v26 }
  0x7a   : > { %v17585_v27 = vld [vmem:[%s19282_s20 + $0x46c] sm:$0xf0]  ;;  %v12368_v28 = vld [vmem:[%s19282_s20 + $0x560] sm:$0xf]  ;;  %v12641_v35 = vor.u32 %v17685_v24, %v12640_v23  ;;  %8805 = vmatpush.bf16.msrb.mxu1 %v12385_v30 }
  0x7b   : > { %v17617_v29 = vld [vmem:[%s19282_s20 + $0x56c] sm:$0xf0]  ;;  %v19405_v32 = vld [vmem:[#allocation1 + $0x12] sm:$0xff]  ;;  %v19414_v38 = vld [vmem:[#allocation1 + $0x9] sm:$0xff]  ;;  %v12241_v41 = vor.u32 %v17585_v27, %v12240_v25  ;;  %8818 = vmatpush.bf16.msrb.mxu2 %v12513_v31 }
  0x7c   : > { %v19407_v33 = vld [vmem:[#allocation1] sm:$0xff]  ;;  %v12496_v36 = vld [vmem:[%s19282_s20 + $0x660] sm:$0xf]  ;;  %8771 = vmatmul.bf16.vlgmr.msra.gmra.mxu2 %v19405_v32  ;;  %8758 = vmatmul.bf16.vlgmr.msra.gmra.mxu1 %v19414_v38  ;;  %v12369_v42 = vor.u32 %v17617_v29, %v12368_v28  ;;  %v19443_v8 = vld [vmem:[#allocation1 + $0x36] sm:$0xff] }
  0x7d   : > { %v19409_v34 = vld [vmem:[#allocation1 + $0x1b] sm:$0xff]  ;;  %v12624_v39 = vld [vmem:[%s19282_s20 + $0x760] sm:$0xf]  ;;  %8745 = vmatmul.bf16.vlgmr.msra.gmra.mxu0 %v19407_v33  ;;  %8831 = vmatpush.bf16.msrb.mxu3 %v12641_v35  ;;  %v19446_v12 = vld [vmem:[#allocation1 + $0x24] sm:$0xff] }
  0x7e   : > { %v17649_v37 = vld [vmem:[%s19282_s20 + $0x66c] sm:$0xf0]  ;;  %8784 = vmatmul.bf16.vlgmr.msra.gmra.mxu3 %v19409_v34  ;;  %v12224_v44 = vld [vmem:[%s19282_s20 + $0x440] sm:$0xf]  ;;  %8793 = vmatpush.bf16.msrb.mxu0 %v12241_v41 }
  0x7f   : > { %v17681_v40 = vld [vmem:[%s19282_s20 + $0x76c] sm:$0xf0]  ;;  %v12497_v43 = vor.u32 %v17649_v37, %v12496_v36  ;;  %v12352_v46 = vld [vmem:[%s19282_s20 + $0x540] sm:$0xf]  ;;  %8806 = vmatpush.bf16.msrb.mxu1 %v12369_v42 }
  0x80   : > { %v17581_v45 = vld [vmem:[%s19282_s20 + $0x44c] sm:$0xf0]  ;;  %v12625_v47 = vor.u32 %v17681_v40, %v12624_v39  ;;  %v12480_v49 = vld [vmem:[%s19282_s20 + $0x640] sm:$0xf] }
  0x81   : > { %v17613_v48 = vld [vmem:[%s19282_s20 + $0x54c] sm:$0xf0]  ;;  %v12608_v51 = vld [vmem:[%s19282_s20 + $0x740] sm:$0xf]  ;;  %v12225_v53 = vor.u32 %v17581_v45, %v12224_v44  ;;  %8819 = vmatpush.bf16.msrb.mxu2 %v12497_v43 }
  0x82   : > { %v17645_v50 = vld [vmem:[%s19282_s20 + $0x64c] sm:$0xf0]  ;;  %v12208_v54 = vld [vmem:[%s19282_s20 + $0x420] sm:$0xf]  ;;  %v12353_v55 = vor.u32 %v17613_v48, %v12352_v46  ;;  %8832 = vmatpush.bf16.msrb.mxu3 %v12625_v47 }
  0x83   : > { %v17677_v52 = vld [vmem:[%s19282_s20 + $0x74c] sm:$0xf0]  ;;  %v12481_v56 = vor.u32 %v17645_v50, %v12480_v49  ;;  %v12336_v58 = vld [vmem:[%s19282_s20 + $0x520] sm:$0xf]  ;;  %8794 = vmatpush.bf16.msrb.mxu0 %v12225_v53 }
  0x84   : > { %v17577_v57 = vld [vmem:[%s19282_s20 + $0x42c] sm:$0xf0]  ;;  %v12609_v60 = vor.u32 %v17677_v52, %v12608_v51  ;;  %v12464_v61 = vld [vmem:[%s19282_s20 + $0x620] sm:$0xf]  ;;  %8807 = vmatpush.bf16.msrb.mxu1 %v12353_v55 }
  0x85   : > { %v17609_v59 = vld [vmem:[%s19282_s20 + $0x52c] sm:$0xf0]  ;;  %v12592_v63 = vld [vmem:[%s19282_s20 + $0x720] sm:$0xf]  ;;  %v12209_v3 = vor.u32 %v17577_v57, %v12208_v54  ;;  %8820 = vmatpush.bf16.msrb.mxu2 %v12481_v56 }
  0x86   : > { %v17641_v62 = vld [vmem:[%s19282_s20 + $0x62c] sm:$0xf0]  ;;  %v12192_v1 = vld [vmem:[%s19282_s20 + $0x400] sm:$0xf]  ;;  %v12337_v10 = vor.u32 %v17609_v59, %v12336_v58  ;;  %8833 = vmatpush.bf16.msrb.mxu3 %v12609_v60 }
  0x87   : > { %v17673_v0 = vld [vmem:[%s19282_s20 + $0x72c] sm:$0xf0]  ;;  %v12320_v4 = vld [vmem:[%s19282_s20 + $0x500] sm:$0xf]  ;;  %v12465_v11 = vor.u32 %v17641_v62, %v12464_v61  ;;  %8795 = vmatpush.bf16.msrb.mxu0 %v12209_v3 }
  0x88   : > { %v17573_v2 = vld [vmem:[%s19282_s20 + $0x40c] sm:$0xf0]  ;;  %v12448_v6 = vld [vmem:[%s19282_s20 + $0x600] sm:$0xf]  ;;  %v12593_v15 = vor.u32 %v17673_v0, %v12592_v63  ;;  %8808 = vmatpush.bf16.msrb.mxu1 %v12337_v10 }
  0x89   : > { %v17605_v5 = vld [vmem:[%s19282_s20 + $0x50c] sm:$0xf0]  ;;  %v19450_v14 = vld [vmem:[#allocation1 + $0x2d] sm:$0xff]  ;;  %v12193_v21 = vor.u32 %v17573_v2, %v12192_v1  ;;  %8821 = vmatpush.bf16.msrb.mxu2 %v12465_v11 }
  0x8a   : > { %v17637_v7 = vld [vmem:[%s19282_s20 + $0x60c] sm:$0xf0]  ;;  %v12576_v16 = vld [vmem:[%s19282_s20 + $0x700] sm:$0xf]  ;;  %v12321_v25 = vor.u32 %v17605_v5, %v12320_v4  ;;  %8834 = vmatpush.bf16.msrb.mxu3 %v12593_v15 }
  0x8b   : > { %v19448_v13 = vld [vmem:[#allocation1 + $0x3f] sm:$0xff]  ;;  %v12816_v18 = vld [vmem:[%s19282_s20 + $0x8e0] sm:$0xf]  ;;  %v12449_v26 = vor.u32 %v17637_v7, %v12448_v6  ;;  %8796 = vmatpush.bf16.msrb.mxu0 %v12193_v21 }
  0x8c   : > { %v17669_v17 = vld [vmem:[%s19282_s20 + $0x70c] sm:$0xf0]  ;;  %1770 = vst [vmem:[#allocation1] ss:$9 sm:$0xff] %v378_v9  ;;  %v12944_v20 = vld [vmem:[%s19282_s20 + $0x9e0] sm:$0xf]  ;;  %8809 = vmatpush.bf16.msrb.mxu1 %v12321_v25 }
  0x8d   : > { %v17729_v19 = vld [vmem:[%s19282_s20 + $0x8ec] sm:$0xf0]  ;;  %v13072_v23 = vld [vmem:[%s19282_s20 + $0xae0] sm:$0xf]  ;;  %v12577_v29 = vor.u32 %v17669_v17, %v12576_v16  ;;  %8822 = vmatpush.bf16.msrb.mxu2 %v12449_v26 }
  0x8e   : > { %v17761_v22 = vld [vmem:[%s19282_s20 + $0x9ec] sm:$0xf0]  ;;  %v13200_v27 = vld [vmem:[%s19282_s20 + $0xbe0] sm:$0xf]  ;;  %v12817_v30 = vor.u32 %v17729_v19, %v12816_v18  ;;  %8797 = vmatmul.bf16.vlgmr.msrb.gmra.mxu0 %v19446_v12 }
  0x8f   : > { %v17793_v24 = vld [vmem:[%s19282_s20 + $0xaec] sm:$0xf0]  ;;  %v12945_v31 = vor.u32 %v17761_v22, %v12944_v20  ;;  %v12800_v36 = vld [vmem:[%s19282_s20 + $0x8c0] sm:$0xf]  ;;  %8835 = vmatpush.bf16.msrb.mxu3 %v12577_v29  ;;  %8810 = vmatmul.bf16.vlgmr.msrb.gmra.mxu1 %v19450_v14 }
  0x90   : > { %v17825_v28 = vld [vmem:[%s19282_s20 + $0xbec] sm:$0xf0]  ;;  %v13073_v35 = vor.u32 %v17793_v24, %v13072_v23  ;;  %v12928_v39 = vld [vmem:[%s19282_s20 + $0x9c0] sm:$0xf]  ;;  %8841 = vmatpush.bf16.msra.mxu0 %v12817_v30  ;;  %8823 = vmatmul.bf16.vlgmr.msrb.gmra.mxu2 %v19443_v8 }
  0x91   : > { %v17725_v37 = vld [vmem:[%s19282_s20 + $0x8cc] sm:$0xf0]  ;;  %v13201_v40 = vor.u32 %v17825_v28, %v13200_v27  ;;  %v13056_v42 = vld [vmem:[%s19282_s20 + $0xac0] sm:$0xf]  ;;  %8854 = vmatpush.bf16.msra.mxu1 %v12945_v31 }
  0x92   : > { %v17757_v41 = vld [vmem:[%s19282_s20 + $0x9cc] sm:$0xf0]  ;;  %v13184_v44 = vld [vmem:[%s19282_s20 + $0xbc0] sm:$0xf]  ;;  %v12801_v46 = vor.u32 %v17725_v37, %v12800_v36  ;;  %8867 = vmatpush.bf16.msra.mxu2 %v13073_v35  ;;  %8836 = vmatmul.bf16.vlgmr.msrb.gmra.mxu3 %v19448_v13 }
  0x93   : > { %v17789_v43 = vld [vmem:[%s19282_s20 + $0xacc] sm:$0xf0]  ;;  %v12929_v47 = vor.u32 %v17757_v41, %v12928_v39  ;;  %v12784_v49 = vld [vmem:[%s19282_s20 + $0x8a0] sm:$0xf]  ;;  %8880 = vmatpush.bf16.msra.mxu3 %v13201_v40 }
  0x94   : > { %v17821_v45 = vld [vmem:[%s19282_s20 + $0xbcc] sm:$0xf0]  ;;  %v13057_v48 = vor.u32 %v17789_v43, %v13056_v42  ;;  %v12912_v51 = vld [vmem:[%s19282_s20 + $0x9a0] sm:$0xf]  ;;  %8842 = vmatpush.bf16.msra.mxu0 %v12801_v46 }
  0x95   : > { %v17721_v50 = vld [vmem:[%s19282_s20 + $0x8ac] sm:$0xf0]  ;;  %v13185_v52 = vor.u32 %v17821_v45, %v13184_v44  ;;  %v13040_v54 = vld [vmem:[%s19282_s20 + $0xaa0] sm:$0xf]  ;;  %8855 = vmatpush.bf16.msra.mxu1 %v12929_v47 }
  0x96   : > { %v17753_v53 = vld [vmem:[%s19282_s20 + $0x9ac] sm:$0xf0]  ;;  %v13168_v56 = vld [vmem:[%s19282_s20 + $0xba0] sm:$0xf]  ;;  %v12785_v58 = vor.u32 %v17721_v50, %v12784_v49  ;;  %8868 = vmatpush.bf16.msra.mxu2 %v13057_v48 }
  0x97   : > { %v17785_v55 = vld [vmem:[%s19282_s20 + $0xaac] sm:$0xf0]  ;;  %v12913_v59 = vor.u32 %v17753_v53, %v12912_v51  ;;  %v12768_v61 = vld [vmem:[%s19282_s20 + $0x880] sm:$0xf]  ;;  %8881 = vmatpush.bf16.msra.mxu3 %v13185_v52 }
  0x98   : > { %v17817_v57 = vld [vmem:[%s19282_s20 + $0xbac] sm:$0xf0]  ;;  %v13041_v60 = vor.u32 %v17785_v55, %v13040_v54  ;;  %v12896_v63 = vld [vmem:[%s19282_s20 + $0x980] sm:$0xf]  ;;  %8843 = vmatpush.bf16.msra.mxu0 %v12785_v58 }
  0x99   : > { %v17717_v62 = vld [vmem:[%s19282_s20 + $0x88c] sm:$0xf0]  ;;  %v13169_v0 = vor.u32 %v17817_v57, %v13168_v56  ;;  %v13024_v2 = vld [vmem:[%s19282_s20 + $0xa80] sm:$0xf]  ;;  %8856 = vmatpush.bf16.msra.mxu1 %v12913_v59 }
  0x9a   : > { %v17749_v1 = vld [vmem:[%s19282_s20 + $0x98c] sm:$0xf0]  ;;  %v13152_v4 = vld [vmem:[%s19282_s20 + $0xb80] sm:$0xf]  ;;  %v12769_v6 = vor.u32 %v17717_v62, %v12768_v61  ;;  %8869 = vmatpush.bf16.msra.mxu2 %v13041_v60 }
  0x9b   : > { %v17781_v3 = vld [vmem:[%s19282_s20 + $0xa8c] sm:$0xf0]  ;;  %v12897_v7 = vor.u32 %v17749_v1, %v12896_v63  ;;  %v12752_v10 = vld [vmem:[%s19282_s20 + $0x860] sm:$0xf]  ;;  %8882 = vmatpush.bf16.msra.mxu3 %v13169_v0 }
  0x9c   : > { %v17813_v5 = vld [vmem:[%s19282_s20 + $0xb8c] sm:$0xf0]  ;;  %v13025_v9 = vor.u32 %v17781_v3, %v13024_v2  ;;  %v12880_v15 = vld [vmem:[%s19282_s20 + $0x960] sm:$0xf]  ;;  %8844 = vmatpush.bf16.msra.mxu0 %v12769_v6 }
  0x9d   : > { %v17713_v11 = vld [vmem:[%s19282_s20 + $0x86c] sm:$0xf0]  ;;  %v13153_v16 = vor.u32 %v17813_v5, %v13152_v4  ;;  %v13008_v18 = vld [vmem:[%s19282_s20 + $0xa60] sm:$0xf]  ;;  %8857 = vmatpush.bf16.msra.mxu1 %v12897_v7 }
  0x9e   : > { %v17745_v17 = vld [vmem:[%s19282_s20 + $0x96c] sm:$0xf0]  ;;  %v13136_v20 = vld [vmem:[%s19282_s20 + $0xb60] sm:$0xf]  ;;  %v12753_v22 = vor.u32 %v17713_v11, %v12752_v10  ;;  %8870 = vmatpush.bf16.msra.mxu2 %v13025_v9 }
  0x9f   : > { %v17777_v19 = vld [vmem:[%s19282_s20 + $0xa6c] sm:$0xf0]  ;;  %v12881_v23 = vor.u32 %v17745_v17, %v12880_v15  ;;  %v12736_v25 = vld [vmem:[%s19282_s20 + $0x840] sm:$0xf]  ;;  %8883 = vmatpush.bf16.msra.mxu3 %v13153_v16 }
  0xa0   : > { %v17809_v21 = vld [vmem:[%s19282_s20 + $0xb6c] sm:$0xf0]  ;;  %v13009_v24 = vor.u32 %v17777_v19, %v13008_v18  ;;  %v12864_v27 = vld [vmem:[%s19282_s20 + $0x940] sm:$0xf]  ;;  %8845 = vmatpush.bf16.msra.mxu0 %v12753_v22 }
  0xa1   : > { %v17709_v26 = vld [vmem:[%s19282_s20 + $0x84c] sm:$0xf0]  ;;  %v13137_v28 = vor.u32 %v17809_v21, %v13136_v20  ;;  %v12992_v30 = vld [vmem:[%s19282_s20 + $0xa40] sm:$0xf]  ;;  %8858 = vmatpush.bf16.msra.mxu1 %v12881_v23 }
  0xa2   : > { %v17741_v29 = vld [vmem:[%s19282_s20 + $0x94c] sm:$0xf0]  ;;  %v13120_v35 = vld [vmem:[%s19282_s20 + $0xb40] sm:$0xf]  ;;  %v12737_v37 = vor.u32 %v17709_v26, %v12736_v25  ;;  %8871 = vmatpush.bf16.msra.mxu2 %v13009_v24 }
  0xa3   : > { %v17773_v31 = vld [vmem:[%s19282_s20 + $0xa4c] sm:$0xf0]  ;;  %v12865_v39 = vor.u32 %v17741_v29, %v12864_v27  ;;  %v12720_v41 = vld [vmem:[%s19282_s20 + $0x820] sm:$0xf]  ;;  %8884 = vmatpush.bf16.msra.mxu3 %v13137_v28  ;;  %v19542_v28 = vld [vmem:[#allocation1 + $0x9] sm:$0xff] }
  0xa4   : > { %v17805_v36 = vld [vmem:[%s19282_s20 + $0xb4c] sm:$0xf0]  ;;  %v12993_v40 = vor.u32 %v17773_v31, %v12992_v30  ;;  %v12848_v43 = vld [vmem:[%s19282_s20 + $0x920] sm:$0xf]  ;;  %8846 = vmatpush.bf16.msra.mxu0 %v12737_v37 }
  0xa5   : > { %v17705_v42 = vld [vmem:[%s19282_s20 + $0x82c] sm:$0xf0]  ;;  %v13121_v44 = vor.u32 %v17805_v36, %v13120_v35  ;;  %v12976_v46 = vld [vmem:[%s19282_s20 + $0xa20] sm:$0xf]  ;;  %8859 = vmatpush.bf16.msra.mxu1 %v12865_v39 }
  0xa6   : > { %v17737_v45 = vld [vmem:[%s19282_s20 + $0x92c] sm:$0xf0]  ;;  %v13104_v48 = vld [vmem:[%s19282_s20 + $0xb20] sm:$0xf]  ;;  %v12721_v50 = vor.u32 %v17705_v42, %v12720_v41  ;;  %8872 = vmatpush.bf16.msra.mxu2 %v12993_v40 }
  0xa7   : > { %v17769_v47 = vld [vmem:[%s19282_s20 + $0xa2c] sm:$0xf0]  ;;  %v12704_v51 = vld [vmem:[%s19282_s20 + $0x800] sm:$0xf]  ;;  %v12849_v53 = vor.u32 %v17737_v45, %v12848_v43  ;;  %8885 = vmatpush.bf16.msra.mxu3 %v13121_v44 }
  0xa8   : > { %v17801_v49 = vld [vmem:[%s19282_s20 + $0xb2c] sm:$0xf0]  ;;  %v12977_v54 = vor.u32 %v17769_v47, %v12976_v46  ;;  %v12832_v55 = vld [vmem:[%s19282_s20 + $0x900] sm:$0xf]  ;;  %8847 = vmatpush.bf16.msra.mxu0 %v12721_v50 }
  0xa9   : > { %v17701_v52 = vld [vmem:[%s19282_s20 + $0x80c] sm:$0xf0]  ;;  %v12960_v57 = vld [vmem:[%s19282_s20 + $0xa00] sm:$0xf]  ;;  %v13105_v58 = vor.u32 %v17801_v49, %v13104_v48  ;;  %8860 = vmatpush.bf16.msra.mxu1 %v12849_v53 }
  0xaa   : > { %v17733_v56 = vld [vmem:[%s19282_s20 + $0x90c] sm:$0xf0]  ;;  %v13088_v60 = vld [vmem:[%s19282_s20 + $0xb00] sm:$0xf]  ;;  %v12705_v1 = vor.u32 %v17701_v52, %v12704_v51  ;;  %8873 = vmatpush.bf16.msra.mxu2 %v12977_v54 }
  0xab   : > { %v17765_v59 = vld [vmem:[%s19282_s20 + $0xa0c] sm:$0xf0]  ;;  %v13328_v62 = vld [vmem:[%s19282_s20 + $0xce0] sm:$0xf]  ;;  %v12833_v5 = vor.u32 %v17733_v56, %v12832_v55  ;;  %8886 = vmatpush.bf16.msra.mxu3 %v13105_v58 }
  0xac   : > { %v17797_v61 = vld [vmem:[%s19282_s20 + $0xb0c] sm:$0xf0]  ;;  %v13456_v0 = vld [vmem:[%s19282_s20 + $0xde0] sm:$0xf]  ;;  %v12961_v6 = vor.u32 %v17765_v59, %v12960_v57  ;;  %8848 = vmatpush.bf16.msra.mxu0 %v12705_v1 }
  0xad   : > { %v17857_v63 = vld [vmem:[%s19282_s20 + $0xcec] sm:$0xf0]  ;;  %v13584_v3 = vld [vmem:[%s19282_s20 + $0xee0] sm:$0xf]  ;;  %v13089_v10 = vor.u32 %v17797_v61, %v13088_v60  ;;  %8861 = vmatpush.bf16.msra.mxu1 %v12833_v5 }
  0xae   : > { %v17889_v2 = vld [vmem:[%s19282_s20 + $0xdec] sm:$0xf0]  ;;  %v13712_v7 = vld [vmem:[%s19282_s20 + $0xfe0] sm:$0xf]  ;;  %v13329_v11 = vor.u32 %v17857_v63, %v13328_v62  ;;  %8874 = vmatpush.bf16.msra.mxu2 %v12961_v6 }
  0xaf   : > { %v17921_v4 = vld [vmem:[%s19282_s20 + $0xeec] sm:$0xf0]  ;;  %v13457_v15 = vor.u32 %v17889_v2, %v13456_v0  ;;  %v13312_v17 = vld [vmem:[%s19282_s20 + $0xcc0] sm:$0xf]  ;;  %8887 = vmatpush.bf16.msra.mxu3 %v13089_v10 }
  0xb0   : > { %v17953_v9 = vld [vmem:[%s19282_s20 + $0xfec] sm:$0xf0]  ;;  %v13585_v16 = vor.u32 %v17921_v4, %v13584_v3  ;;  %v13440_v19 = vld [vmem:[%s19282_s20 + $0xdc0] sm:$0xf]  ;;  %8893 = vmatpush.bf16.msrb.mxu0 %v13329_v11  ;;  %8862 = vmatmul.bf16.vlgmr.msra.gmra.mxu1 %v19542_v28 }
  0xb1   : > { %v17853_v18 = vld [vmem:[%s19282_s20 + $0xccc] sm:$0xf0]  ;;  %v13713_v20 = vor.u32 %v17953_v9, %v13712_v7  ;;  %v13568_v22 = vld [vmem:[%s19282_s20 + $0xec0] sm:$0xf]  ;;  %8906 = vmatpush.bf16.msrb.mxu1 %v13457_v15 }
  0xb2   : > { %v17885_v21 = vld [vmem:[%s19282_s20 + $0xdcc] sm:$0xf0]  ;;  %v13696_v25 = vld [vmem:[%s19282_s20 + $0xfc0] sm:$0xf]  ;;  %v13313_v30 = vor.u32 %v17853_v18, %v13312_v17  ;;  %8919 = vmatpush.bf16.msrb.mxu2 %v13585_v16 }
  0xb3   : > { %v17917_v23 = vld [vmem:[%s19282_s20 + $0xecc] sm:$0xf0]  ;;  %v19540_v27 = vld [vmem:[#allocation1 + $0x12] sm:$0xff]  ;;  %v13441_v31 = vor.u32 %v17885_v21, %v13440_v19  ;;  %8932 = vmatpush.bf16.msrb.mxu3 %v13713_v20 }
  0xb4   : > { %v19536_v24 = vld [vmem:[#allocation1] sm:$0xff]  ;;  %v13569_v35 = vor.u32 %v17917_v23, %v13568_v22  ;;  %v13296_v36 = vld [vmem:[%s19282_s20 + $0xca0] sm:$0xf]  ;;  %8875 = vmatmul.bf16.vlgmr.msra.gmra.mxu2 %v19540_v27  ;;  %8894 = vmatpush.bf16.msrb.mxu0 %v13313_v30 }
  0xb5   : > { %v17949_v26 = vld [vmem:[%s19282_s20 + $0xfcc] sm:$0xf0]  ;;  %v13424_v39 = vld [vmem:[%s19282_s20 + $0xda0] sm:$0xf]  ;;  %8849 = vmatmul.bf16.vlgmr.msra.gmra.mxu0 %v19536_v24  ;;  %8907 = vmatpush.bf16.msrb.mxu1 %v13441_v31 }
  0xb6   : > { %v19544_v29 = vld [vmem:[#allocation1 + $0x1b] sm:$0xff]  ;;  %v13697_v40 = vor.u32 %v17949_v26, %v13696_v25  ;;  %v13552_v42 = vld [vmem:[%s19282_s20 + $0xea0] sm:$0xf]  ;;  %8920 = vmatpush.bf16.msrb.mxu2 %v13569_v35 }
  0xb7   : > { %v17849_v37 = vld [vmem:[%s19282_s20 + $0xcac] sm:$0xf0]  ;;  %v13680_v44 = vld [vmem:[%s19282_s20 + $0xfa0] sm:$0xf]  ;;  %8888 = vmatmul.bf16.vlgmr.msra.gmra.mxu3 %v19544_v29 }
  0xb8   : > { %v17881_v41 = vld [vmem:[%s19282_s20 + $0xdac] sm:$0xf0]  ;;  %v13297_v46 = vor.u32 %v17849_v37, %v13296_v36  ;;  %v13280_v49 = vld [vmem:[%s19282_s20 + $0xc80] sm:$0xf]  ;;  %8933 = vmatpush.bf16.msrb.mxu3 %v13697_v40 }
  0xb9   : > { %v17913_v43 = vld [vmem:[%s19282_s20 + $0xeac] sm:$0xf0]  ;;  %v13425_v47 = vor.u32 %v17881_v41, %v13424_v39  ;;  %v13408_v51 = vld [vmem:[%s19282_s20 + $0xd80] sm:$0xf] }
  0xba   : > { %v17945_v45 = vld [vmem:[%s19282_s20 + $0xfac] sm:$0xf0]  ;;  %v13553_v48 = vor.u32 %v17913_v43, %v13552_v42  ;;  %v13536_v54 = vld [vmem:[%s19282_s20 + $0xe80] sm:$0xf]  ;;  %8895 = vmatpush.bf16.msrb.mxu0 %v13297_v46 }
  0xbb   : > { %v17845_v50 = vld [vmem:[%s19282_s20 + $0xc8c] sm:$0xf0]  ;;  %v13681_v52 = vor.u32 %v17945_v45, %v13680_v44  ;;  %v13664_v56 = vld [vmem:[%s19282_s20 + $0xf80] sm:$0xf]  ;;  %8908 = vmatpush.bf16.msrb.mxu1 %v13425_v47 }
  0xbc   : > { %v17877_v53 = vld [vmem:[%s19282_s20 + $0xd8c] sm:$0xf0]  ;;  %v13281_v58 = vor.u32 %v17845_v50, %v13280_v49  ;;  %8921 = vmatpush.bf16.msrb.mxu2 %v13553_v48  ;;  %v13264_v61 = vld [vmem:[%s19282_s20 + $0xc60] sm:$0xf] }
  0xbd   : > { %v17909_v55 = vld [vmem:[%s19282_s20 + $0xe8c] sm:$0xf0]  ;;  %v13409_v59 = vor.u32 %v17877_v53, %v13408_v51  ;;  %v13392_v63 = vld [vmem:[%s19282_s20 + $0xd60] sm:$0xf]  ;;  %8934 = vmatpush.bf16.msrb.mxu3 %v13681_v52 }
  0xbe   : > { %v17941_v57 = vld [vmem:[%s19282_s20 + $0xf8c] sm:$0xf0]  ;;  %v13537_v60 = vor.u32 %v17909_v55, %v13536_v54  ;;  %v13520_v2 = vld [vmem:[%s19282_s20 + $0xe60] sm:$0xf]  ;;  %8896 = vmatpush.bf16.msrb.mxu0 %v13281_v58 }
  0xbf   : > { %v17841_v62 = vld [vmem:[%s19282_s20 + $0xc6c] sm:$0xf0]  ;;  %v13665_v0 = vor.u32 %v17941_v57, %v13664_v56  ;;  %v13648_v4 = vld [vmem:[%s19282_s20 + $0xf60] sm:$0xf]  ;;  %8909 = vmatpush.bf16.msrb.mxu1 %v13409_v59  ;;  %v19604_v59 = vld [vmem:[#allocation1 + $0x36] sm:$0xff] }
  0xc0   : > { %v17873_v1 = vld [vmem:[%s19282_s20 + $0xd6c] sm:$0xf0]  ;;  %v13265_v6 = vor.u32 %v17841_v62, %v13264_v61  ;;  %8922 = vmatpush.bf16.msrb.mxu2 %v13537_v60  ;;  %v13248_v10 = vld [vmem:[%s19282_s20 + $0xc40] sm:$0xf] }
  0xc1   : > { %v17905_v3 = vld [vmem:[%s19282_s20 + $0xe6c] sm:$0xf0]  ;;  %v13393_v7 = vor.u32 %v17873_v1, %v13392_v63  ;;  %v13376_v15 = vld [vmem:[%s19282_s20 + $0xd40] sm:$0xf]  ;;  %8935 = vmatpush.bf16.msrb.mxu3 %v13665_v0 }
  0xc2   : > { %v17937_v5 = vld [vmem:[%s19282_s20 + $0xf6c] sm:$0xf0]  ;;  %v13521_v9 = vor.u32 %v17905_v3, %v13520_v2  ;;  %v13504_v18 = vld [vmem:[%s19282_s20 + $0xe40] sm:$0xf]  ;;  %8897 = vmatpush.bf16.msrb.mxu0 %v13265_v6 }
  0xc3   : > { %v17837_v11 = vld [vmem:[%s19282_s20 + $0xc4c] sm:$0xf0]  ;;  %v13649_v16 = vor.u32 %v17937_v5, %v13648_v4  ;;  %v13632_v20 = vld [vmem:[%s19282_s20 + $0xf40] sm:$0xf]  ;;  %8910 = vmatpush.bf16.msrb.mxu1 %v13393_v7 }
  0xc4   : > { %v17869_v17 = vld [vmem:[%s19282_s20 + $0xd4c] sm:$0xf0]  ;;  %v13249_v22 = vor.u32 %v17837_v11, %v13248_v10  ;;  %v13232_v23 = vld [vmem:[%s19282_s20 + $0xc20] sm:$0xf]  ;;  %8923 = vmatpush.bf16.msrb.mxu2 %v13521_v9 }
  0xc5   : > { %v17901_v19 = vld [vmem:[%s19282_s20 + $0xe4c] sm:$0xf0]  ;;  %v13377_v25 = vor.u32 %v17869_v17, %v13376_v15  ;;  %v13360_v31 = vld [vmem:[%s19282_s20 + $0xd20] sm:$0xf]  ;;  %8936 = vmatpush.bf16.msrb.mxu3 %v13649_v16 }
  0xc6   : > { %v17933_v21 = vld [vmem:[%s19282_s20 + $0xf4c] sm:$0xf0]  ;;  %v13505_v26 = vor.u32 %v17901_v19, %v13504_v18  ;;  %v13488_v37 = vld [vmem:[%s19282_s20 + $0xe20] sm:$0xf]  ;;  %8898 = vmatpush.bf16.msrb.mxu0 %v13249_v22 }
  0xc7   : > { %v17833_v30 = vld [vmem:[%s19282_s20 + $0xc2c] sm:$0xf0]  ;;  %v13633_v36 = vor.u32 %v17933_v21, %v13632_v20  ;;  %v13616_v40 = vld [vmem:[%s19282_s20 + $0xf20] sm:$0xf]  ;;  %8911 = vmatpush.bf16.msrb.mxu1 %v13377_v25 }
  0xc8   : > { %v17865_v35 = vld [vmem:[%s19282_s20 + $0xd2c] sm:$0xf0]  ;;  %v13216_v42 = vld [vmem:[%s19282_s20 + $0xc00] sm:$0xf]  ;;  %v13233_v44 = vor.u32 %v17833_v30, %v13232_v23  ;;  %8924 = vmatpush.bf16.msrb.mxu2 %v13505_v26 }
  0xc9   : > { %v17897_v39 = vld [vmem:[%s19282_s20 + $0xe2c] sm:$0xf0]  ;;  %v13344_v45 = vld [vmem:[%s19282_s20 + $0xd00] sm:$0xf]  ;;  %v13361_v49 = vor.u32 %v17865_v35, %v13360_v31  ;;  %8937 = vmatpush.bf16.msrb.mxu3 %v13633_v36 }
  0xca   : > { %v17929_v41 = vld [vmem:[%s19282_s20 + $0xf2c] sm:$0xf0]  ;;  %v13472_v47 = vld [vmem:[%s19282_s20 + $0xe00] sm:$0xf]  ;;  %v13489_v50 = vor.u32 %v17897_v39, %v13488_v37  ;;  %8899 = vmatpush.bf16.msrb.mxu0 %v13233_v44 }
  0xcb   : > { %v17829_v43 = vld [vmem:[%s19282_s20 + $0xc0c] sm:$0xf0]  ;;  %v13600_v51 = vld [vmem:[%s19282_s20 + $0xf00] sm:$0xf]  ;;  %v13617_v55 = vor.u32 %v17929_v41, %v13616_v40  ;;  %8912 = vmatpush.bf16.msrb.mxu1 %v13361_v49 }
  0xcc   : > { %v17861_v46 = vld [vmem:[%s19282_s20 + $0xd0c] sm:$0xf0]  ;;  %v13840_v53 = vld [vmem:[%s19282_s20 + $0x10e0] sm:$0xf]  ;;  %v13217_v63 = vor.u32 %v17829_v43, %v13216_v42  ;;  %8925 = vmatpush.bf16.msrb.mxu2 %v13489_v50 }
  0xcd   : > { %v17893_v48 = vld [vmem:[%s19282_s20 + $0xe0c] sm:$0xf0]  ;;  %v13968_v56 = vld [vmem:[%s19282_s20 + $0x11e0] sm:$0xf]  ;;  %v13345_v2 = vor.u32 %v17861_v46, %v13344_v45  ;;  %8938 = vmatpush.bf16.msrb.mxu3 %v13617_v55 }
  0xce   : > { %v17925_v52 = vld [vmem:[%s19282_s20 + $0xf0c] sm:$0xf0]  ;;  %v19606_v60 = vld [vmem:[#allocation1 + $0x2d] sm:$0xff]  ;;  %v13473_v3 = vor.u32 %v17893_v48, %v13472_v47  ;;  %8900 = vmatpush.bf16.msrb.mxu0 %v13217_v63 }
  0xcf   : > { %v17985_v54 = vld [vmem:[%s19282_s20 + $0x10ec] sm:$0xf0]  ;;  %v379_v62 = vld [vmem:[%s19300_s30 + $0x10] sm:$0xff]  ;;  %v13601_v6 = vor.u32 %v17925_v52, %v13600_v51  ;;  %8913 = vmatpush.bf16.msrb.mxu1 %v13345_v2 }
  0xd0   : > { %v18017_v57 = vld [vmem:[%s19282_s20 + $0x11ec] sm:$0xf0]  ;;  %v14096_v0 = vld [vmem:[%s19282_s20 + $0x12e0] sm:$0xf]  ;;  %v13841_v7 = vor.u32 %v17985_v54, %v13840_v53  ;;  %8926 = vmatpush.bf16.msrb.mxu2 %v13473_v3 }
  0xd1   : > { %v19602_v58 = vld [vmem:[#allocation1 + $0x24] sm:$0xff]  ;;  %v14224_v4 = vld [vmem:[%s19282_s20 + $0x13e0] sm:$0xf]  ;;  %v13969_v9 = vor.u32 %v18017_v57, %v13968_v56  ;;  %8939 = vmatpush.bf16.msrb.mxu3 %v13601_v6 }
  0xd2   : > { %v19608_v61 = vld [vmem:[#allocation1 + $0x3f] sm:$0xff]  ;;  %v13824_v11 = vld [vmem:[%s19282_s20 + $0x10c0] sm:$0xf]  ;;  %8945 = vmatpush.bf16.msra.mxu0 %v13841_v7  ;;  %8914 = vmatmul.bf16.vlgmr.msrb.gmra.mxu1 %v19606_v60 }
  0xd3   : > { %v18049_v1 = vld [vmem:[%s19282_s20 + $0x12ec] sm:$0xf0]  ;;  %1780 = vst [vmem:[#allocation1] ss:$9 sm:$0xff] %v379_v62  ;;  %v13952_v16 = vld [vmem:[%s19282_s20 + $0x11c0] sm:$0xf]  ;;  %8958 = vmatpush.bf16.msra.mxu1 %v13969_v9  ;;  %8901 = vmatmul.bf16.vlgmr.msrb.gmra.mxu0 %v19602_v58 }
  0xd4   : > { %v18081_v5 = vld [vmem:[%s19282_s20 + $0x13ec] sm:$0xf0]  ;;  %v14097_v10 = vor.u32 %v18049_v1, %v14096_v0  ;;  %v14080_v19 = vld [vmem:[%s19282_s20 + $0x12c0] sm:$0xf]  ;;  %8927 = vmatmul.bf16.vlgmr.msrb.gmra.mxu2 %v19604_v59  ;;  %8940 = vmatmul.bf16.vlgmr.msrb.gmra.mxu3 %v19608_v61 }
  0xd5   : > { %v17981_v15 = vld [vmem:[%s19282_s20 + $0x10cc] sm:$0xf0]  ;;  %v14225_v17 = vor.u32 %v18081_v5, %v14224_v4  ;;  %v14208_v21 = vld [vmem:[%s19282_s20 + $0x13c0] sm:$0xf] }
  0xd6   : > { %v18013_v18 = vld [vmem:[%s19282_s20 + $0x11cc] sm:$0xf0]  ;;  %v13825_v23 = vor.u32 %v17981_v15, %v13824_v11  ;;  %8971 = vmatpush.bf16.msra.mxu2 %v14097_v10  ;;  %v13808_v30 = vld [vmem:[%s19282_s20 + $0x10a0] sm:$0xf] }
  0xd7   : > { %v18045_v20 = vld [vmem:[%s19282_s20 + $0x12cc] sm:$0xf0]  ;;  %v13953_v25 = vor.u32 %v18013_v18, %v13952_v16  ;;  %v13936_v35 = vld [vmem:[%s19282_s20 + $0x11a0] sm:$0xf]  ;;  %8984 = vmatpush.bf16.msra.mxu3 %v14225_v17 }
  0xd8   : > { %v18077_v22 = vld [vmem:[%s19282_s20 + $0x13cc] sm:$0xf0]  ;;  %v14081_v26 = vor.u32 %v18045_v20, %v14080_v19  ;;  %v14064_v39 = vld [vmem:[%s19282_s20 + $0x12a0] sm:$0xf]  ;;  %8946 = vmatpush.bf16.msra.mxu0 %v13825_v23 }
  0xd9   : > { %v17977_v31 = vld [vmem:[%s19282_s20 + $0x10ac] sm:$0xf0]  ;;  %v14209_v36 = vor.u32 %v18077_v22, %v14208_v21  ;;  %v14192_v41 = vld [vmem:[%s19282_s20 + $0x13a0] sm:$0xf]  ;;  %8959 = vmatpush.bf16.msra.mxu1 %v13953_v25 }
  0xda   : > { %v18009_v37 = vld [vmem:[%s19282_s20 + $0x11ac] sm:$0xf0]  ;;  %v13809_v43 = vor.u32 %v17977_v31, %v13808_v30  ;;  %8972 = vmatpush.bf16.msra.mxu2 %v14081_v26  ;;  %v13792_v46 = vld [vmem:[%s19282_s20 + $0x1080] sm:$0xf] }
  0xdb   : > { %v18041_v40 = vld [vmem:[%s19282_s20 + $0x12ac] sm:$0xf0]  ;;  %v13937_v44 = vor.u32 %v18009_v37, %v13936_v35  ;;  %v13920_v48 = vld [vmem:[%s19282_s20 + $0x1180] sm:$0xf]  ;;  %8985 = vmatpush.bf16.msra.mxu3 %v14209_v36 }
  0xdc   : > { %v18073_v42 = vld [vmem:[%s19282_s20 + $0x13ac] sm:$0xf0]  ;;  %v14065_v45 = vor.u32 %v18041_v40, %v14064_v39  ;;  %v14048_v51 = vld [vmem:[%s19282_s20 + $0x1280] sm:$0xf]  ;;  %8947 = vmatpush.bf16.msra.mxu0 %v13809_v43 }
  0xdd   : > { %v17973_v47 = vld [vmem:[%s19282_s20 + $0x108c] sm:$0xf0]  ;;  %v14193_v49 = vor.u32 %v18073_v42, %v14192_v41  ;;  %v14176_v53 = vld [vmem:[%s19282_s20 + $0x1380] sm:$0xf]  ;;  %8960 = vmatpush.bf16.msra.mxu1 %v13937_v44 }
  0xde   : > { %v18005_v50 = vld [vmem:[%s19282_s20 + $0x118c] sm:$0xf0]  ;;  %v13793_v55 = vor.u32 %v17973_v47, %v13792_v46  ;;  %8973 = vmatpush.bf16.msra.mxu2 %v14065_v45  ;;  %v13776_v62 = vld [vmem:[%s19282_s20 + $0x1060] sm:$0xf] }
  0xdf   : > { %v18037_v52 = vld [vmem:[%s19282_s20 + $0x128c] sm:$0xf0]  ;;  %v13921_v56 = vor.u32 %v18005_v50, %v13920_v48  ;;  %v13904_v0 = vld [vmem:[%s19282_s20 + $0x1160] sm:$0xf]  ;;  %8986 = vmatpush.bf16.msra.mxu3 %v14193_v49 }
  0xe0   : > { %v18069_v54 = vld [vmem:[%s19282_s20 + $0x138c] sm:$0xf0]  ;;  %v14049_v57 = vor.u32 %v18037_v52, %v14048_v51  ;;  %v14032_v3 = vld [vmem:[%s19282_s20 + $0x1260] sm:$0xf]  ;;  %8948 = vmatpush.bf16.msra.mxu0 %v13793_v55 }
  0xe1   : > { %v17969_v63 = vld [vmem:[%s19282_s20 + $0x106c] sm:$0xf0]  ;;  %v14177_v1 = vor.u32 %v18069_v54, %v14176_v53  ;;  %v14160_v5 = vld [vmem:[%s19282_s20 + $0x1360] sm:$0xf]  ;;  %8961 = vmatpush.bf16.msra.mxu1 %v13921_v56 }
  0xe2   : > { %v18001_v2 = vld [vmem:[%s19282_s20 + $0x116c] sm:$0xf0]  ;;  %v13777_v7 = vor.u32 %v17969_v63, %v13776_v62  ;;  %8974 = vmatpush.bf16.msra.mxu2 %v14049_v57  ;;  %v13760_v11 = vld [vmem:[%s19282_s20 + $0x1040] sm:$0xf] }
  0xe3   : > { %v18033_v4 = vld [vmem:[%s19282_s20 + $0x126c] sm:$0xf0]  ;;  %v13905_v9 = vor.u32 %v18001_v2, %v13904_v0  ;;  %v13888_v16 = vld [vmem:[%s19282_s20 + $0x1140] sm:$0xf]  ;;  %8987 = vmatpush.bf16.msra.mxu3 %v14177_v1 }
  0xe4   : > { %v18065_v6 = vld [vmem:[%s19282_s20 + $0x136c] sm:$0xf0]  ;;  %v14033_v10 = vor.u32 %v18033_v4, %v14032_v3  ;;  %v14016_v19 = vld [vmem:[%s19282_s20 + $0x1240] sm:$0xf]  ;;  %8949 = vmatpush.bf16.msra.mxu0 %v13777_v7 }
  0xe5   : > { %v17965_v15 = vld [vmem:[%s19282_s20 + $0x104c] sm:$0xf0]  ;;  %v14161_v17 = vor.u32 %v18065_v6, %v14160_v5  ;;  %v14144_v21 = vld [vmem:[%s19282_s20 + $0x1340] sm:$0xf]  ;;  %8962 = vmatpush.bf16.msra.mxu1 %v13905_v9 }
  0xe6   : > { %v17997_v18 = vld [vmem:[%s19282_s20 + $0x114c] sm:$0xf0]  ;;  %v13761_v23 = vor.u32 %v17965_v15, %v13760_v11  ;;  %8975 = vmatpush.bf16.msra.mxu2 %v14033_v10  ;;  %v13744_v30 = vld [vmem:[%s19282_s20 + $0x1020] sm:$0xf] }
  0xe7   : > { %v18029_v20 = vld [vmem:[%s19282_s20 + $0x124c] sm:$0xf0]  ;;  %v13889_v25 = vor.u32 %v17997_v18, %v13888_v16  ;;  %v13872_v35 = vld [vmem:[%s19282_s20 + $0x1120] sm:$0xf]  ;;  %8988 = vmatpush.bf16.msra.mxu3 %v14161_v17 }
  0xe8   : > { %v18061_v22 = vld [vmem:[%s19282_s20 + $0x134c] sm:$0xf0]  ;;  %v14017_v26 = vor.u32 %v18029_v20, %v14016_v19  ;;  %v14000_v39 = vld [vmem:[%s19282_s20 + $0x1220] sm:$0xf]  ;;  %8950 = vmatpush.bf16.msra.mxu0 %v13761_v23 }
  0xe9   : > { %v17961_v31 = vld [vmem:[%s19282_s20 + $0x102c] sm:$0xf0]  ;;  %v14145_v36 = vor.u32 %v18061_v22, %v14144_v21  ;;  %v14128_v41 = vld [vmem:[%s19282_s20 + $0x1320] sm:$0xf]  ;;  %8963 = vmatpush.bf16.msra.mxu1 %v13889_v25 }
  0xea   : > { %v17993_v37 = vld [vmem:[%s19282_s20 + $0x112c] sm:$0xf0]  ;;  %v13745_v43 = vor.u32 %v17961_v31, %v13744_v30  ;;  %v13728_v44 = vld [vmem:[%s19282_s20 + $0x1000] sm:$0xf]  ;;  %8976 = vmatpush.bf16.msra.mxu2 %v14017_v26  ;;  %v19695_v26 = vld [vmem:[#allocation1 + $0x9] sm:$0xff] }
  0xeb   : > { %v18025_v40 = vld [vmem:[%s19282_s20 + $0x122c] sm:$0xf0]  ;;  %v13873_v46 = vor.u32 %v17993_v37, %v13872_v35  ;;  %v13856_v48 = vld [vmem:[%s19282_s20 + $0x1100] sm:$0xf]  ;;  %8989 = vmatpush.bf16.msra.mxu3 %v14145_v36 }
  0xec   : > { %v18057_v42 = vld [vmem:[%s19282_s20 + $0x132c] sm:$0xf0]  ;;  %v14001_v47 = vor.u32 %v18025_v40, %v14000_v39  ;;  %v13984_v50 = vld [vmem:[%s19282_s20 + $0x1200] sm:$0xf]  ;;  %8951 = vmatpush.bf16.msra.mxu0 %v13745_v43 }
  0xed   : > { %v17957_v45 = vld [vmem:[%s19282_s20 + $0x100c] sm:$0xf0]  ;;  %v14129_v51 = vor.u32 %v18057_v42, %v14128_v41  ;;  %v14112_v53 = vld [vmem:[%s19282_s20 + $0x1300] sm:$0xf]  ;;  %8964 = vmatpush.bf16.msra.mxu1 %v13873_v46 }
  0xee   : > { %v17989_v49 = vld [vmem:[%s19282_s20 + $0x110c] sm:$0xf0]  ;;  %v14352_v55 = vld [vmem:[%s19282_s20 + $0x14e0] sm:$0xf]  ;;  %v13729_v62 = vor.u32 %v17957_v45, %v13728_v44  ;;  %8977 = vmatpush.bf16.msra.mxu2 %v14001_v47 }
  0xef   : > { %v18021_v52 = vld [vmem:[%s19282_s20 + $0x120c] sm:$0xf0]  ;;  %v14480_v57 = vld [vmem:[%s19282_s20 + $0x15e0] sm:$0xf]  ;;  %v13857_v2 = vor.u32 %v17989_v49, %v13856_v48  ;;  %8990 = vmatpush.bf16.msra.mxu3 %v14129_v51 }
  0xf0   : > { %v18053_v54 = vld [vmem:[%s19282_s20 + $0x130c] sm:$0xf0]  ;;  %v14608_v0 = vld [vmem:[%s19282_s20 + $0x16e0] sm:$0xf]  ;;  %v13985_v3 = vor.u32 %v18021_v52, %v13984_v50  ;;  %8952 = vmatpush.bf16.msra.mxu0 %v13729_v62 }
  0xf1   : > { %v18113_v56 = vld [vmem:[%s19282_s20 + $0x14ec] sm:$0xf0]  ;;  %v14736_v4 = vld [vmem:[%s19282_s20 + $0x17e0] sm:$0xf]  ;;  %v14113_v6 = vor.u32 %v18053_v54, %v14112_v53  ;;  %8965 = vmatpush.bf16.msra.mxu1 %v13857_v2 }
  0xf2   : > { %v18145_v63 = vld [vmem:[%s19282_s20 + $0x15ec] sm:$0xf0]  ;;  %v14353_v7 = vor.u32 %v18113_v56, %v14352_v55  ;;  %v14336_v11 = vld [vmem:[%s19282_s20 + $0x14c0] sm:$0xf]  ;;  %8978 = vmatpush.bf16.msra.mxu2 %v13985_v3 }
  0xf3   : > { %v18177_v1 = vld [vmem:[%s19282_s20 + $0x16ec] sm:$0xf0]  ;;  %v14481_v9 = vor.u32 %v18145_v63, %v14480_v57  ;;  %v14464_v16 = vld [vmem:[%s19282_s20 + $0x15c0] sm:$0xf]  ;;  %8991 = vmatpush.bf16.msra.mxu3 %v14113_v6 }
  0xf4   : > { %v18209_v5 = vld [vmem:[%s19282_s20 + $0x17ec] sm:$0xf0]  ;;  %v14609_v10 = vor.u32 %v18177_v1, %v14608_v0  ;;  %v14592_v19 = vld [vmem:[%s19282_s20 + $0x16c0] sm:$0xf]  ;;  %8997 = vmatpush.bf16.msrb.mxu0 %v14353_v7  ;;  %8966 = vmatmul.bf16.vlgmr.msra.gmra.mxu1 %v19695_v26 }
  0xf5   : > { %v18109_v15 = vld [vmem:[%s19282_s20 + $0x14cc] sm:$0xf0]  ;;  %v14737_v17 = vor.u32 %v18209_v5, %v14736_v4  ;;  %v14720_v22 = vld [vmem:[%s19282_s20 + $0x17c0] sm:$0xf]  ;;  %9010 = vmatpush.bf16.msrb.mxu1 %v14481_v9 }
  0xf6   : > { %v18141_v18 = vld [vmem:[%s19282_s20 + $0x15cc] sm:$0xf0]  ;;  %v19693_v25 = vld [vmem:[#allocation1 + $0x12] sm:$0xff]  ;;  %v14337_v31 = vor.u32 %v18109_v15, %v14336_v11  ;;  %9023 = vmatpush.bf16.msrb.mxu2 %v14609_v10 }
  0xf7   : > { %v18173_v20 = vld [vmem:[%s19282_s20 + $0x16cc] sm:$0xf0]  ;;  %v14465_v35 = vor.u32 %v18141_v18, %v14464_v16  ;;  %v14320_v37 = vld [vmem:[%s19282_s20 + $0x14a0] sm:$0xf]  ;;  %9036 = vmatpush.bf16.msrb.mxu3 %v14737_v17  ;;  %8979 = vmatmul.bf16.vlgmr.msra.gmra.mxu2 %v19693_v25 }
  0xf8   : > { %v19689_v21 = vld [vmem:[#allocation1] sm:$0xff]  ;;  %v14593_v36 = vor.u32 %v18173_v20, %v14592_v19  ;;  %v14448_v40 = vld [vmem:[%s19282_s20 + $0x15a0] sm:$0xf]  ;;  %8998 = vmatpush.bf16.msrb.mxu0 %v14337_v31 }
  0xf9   : > { %v18205_v23 = vld [vmem:[%s19282_s20 + $0x17cc] sm:$0xf0]  ;;  %8953 = vmatmul.bf16.vlgmr.msra.gmra.mxu0 %v19689_v21  ;;  %v14576_v43 = vld [vmem:[%s19282_s20 + $0x16a0] sm:$0xf]  ;;  %9011 = vmatpush.bf16.msrb.mxu1 %v14465_v35 }
  0xfa   : > { %v19697_v30 = vld [vmem:[#allocation1 + $0x1b] sm:$0xff]  ;;  %v14721_v41 = vor.u32 %v18205_v23, %v14720_v22  ;;  %v14704_v45 = vld [vmem:[%s19282_s20 + $0x17a0] sm:$0xf]  ;;  %9024 = vmatpush.bf16.msrb.mxu2 %v14593_v36 }
  0xfb   : > { %v18105_v39 = vld [vmem:[%s19282_s20 + $0x14ac] sm:$0xf0]  ;;  %8992 = vmatmul.bf16.vlgmr.msra.gmra.mxu3 %v19697_v30  ;;  %v14304_v50 = vld [vmem:[%s19282_s20 + $0x1480] sm:$0xf] }
  0xfc   : > { %v18137_v42 = vld [vmem:[%s19282_s20 + $0x15ac] sm:$0xf0]  ;;  %v14321_v47 = vor.u32 %v18105_v39, %v14320_v37  ;;  %v14432_v52 = vld [vmem:[%s19282_s20 + $0x1580] sm:$0xf]  ;;  %9037 = vmatpush.bf16.msrb.mxu3 %v14721_v41  ;;  %v8746_v41 = vpop.f32.mrf.mxu0 }
  0xfd   : > { %v18169_v44 = vld [vmem:[%s19282_s20 + $0x16ac] sm:$0xf0]  ;;  %v14449_v48 = vor.u32 %v18137_v42, %v14448_v40  ;;  %v14560_v55 = vld [vmem:[%s19282_s20 + $0x1680] sm:$0xf] }
  0xfe   : > { %v18201_v46 = vld [vmem:[%s19282_s20 + $0x17ac] sm:$0xf0]  ;;  %v14577_v49 = vor.u32 %v18169_v44, %v14576_v43  ;;  %v14688_v57 = vld [vmem:[%s19282_s20 + $0x1780] sm:$0xf]  ;;  %8999 = vmatpush.bf16.msrb.mxu0 %v14321_v47  ;;  %v8759_v47 = vpop.f32.mrf.mxu1 }
  0xff   : > { %v18101_v51 = vld [vmem:[%s19282_s20 + $0x148c] sm:$0xf0]  ;;  %v14705_v53 = vor.u32 %v18201_v46, %v14704_v45  ;;  %9012 = vmatpush.bf16.msrb.mxu1 %v14449_v48  ;;  %v14288_v2 = vld [vmem:[%s19282_s20 + $0x1460] sm:$0xf] }
 0x100   : > { %v18133_v54 = vld [vmem:[%s19282_s20 + $0x158c] sm:$0xf0]  ;;  %v14305_v63 = vor.u32 %v18101_v51, %v14304_v50  ;;  %9025 = vmatpush.bf16.msrb.mxu2 %v14577_v49  ;;  %v14416_v4 = vld [vmem:[%s19282_s20 + $0x1560] sm:$0xf] }
 0x101   : > { %v18165_v56 = vld [vmem:[%s19282_s20 + $0x168c] sm:$0xf0]  ;;  %v14433_v0 = vor.u32 %v18133_v54, %v14432_v52  ;;  %9038 = vmatpush.bf16.msrb.mxu3 %v14705_v53  ;;  %v14544_v7 = vld [vmem:[%s19282_s20 + $0x1660] sm:$0xf]  ;;  %v8760_v52 = vadd.f32 %v8759_v47, %v8746_v41 }
 0x102   : > { %v18197_v62 = vld [vmem:[%s19282_s20 + $0x178c] sm:$0xf0]  ;;  %v14561_v1 = vor.u32 %v18165_v56, %v14560_v55  ;;  %v14672_v10 = vld [vmem:[%s19282_s20 + $0x1760] sm:$0xf]  ;;  %9000 = vmatpush.bf16.msrb.mxu0 %v14305_v63 }
 0x103   : > { %v18097_v3 = vld [vmem:[%s19282_s20 + $0x146c] sm:$0xf0]  ;;  %v14689_v5 = vor.u32 %v18197_v62, %v14688_v57  ;;  %9013 = vmatpush.bf16.msrb.mxu1 %v14433_v0  ;;  %v14272_v18 = vld [vmem:[%s19282_s20 + $0x1440] sm:$0xf] }
 0x104   : > { %v18129_v6 = vld [vmem:[%s19282_s20 + $0x156c] sm:$0xf0]  ;;  %v14289_v15 = vor.u32 %v18097_v3, %v14288_v2  ;;  %9026 = vmatpush.bf16.msrb.mxu2 %v14561_v1  ;;  %v14400_v20 = vld [vmem:[%s19282_s20 + $0x1540] sm:$0xf] }
 0x105   : > { %v18161_v9 = vld [vmem:[%s19282_s20 + $0x166c] sm:$0xf0]  ;;  %v14417_v16 = vor.u32 %v18129_v6, %v14416_v4  ;;  %9039 = vmatpush.bf16.msrb.mxu3 %v14689_v5  ;;  %v14528_v31 = vld [vmem:[%s19282_s20 + $0x1640] sm:$0xf] }
 0x106   : > { %v18193_v11 = vld [vmem:[%s19282_s20 + $0x176c] sm:$0xf0]  ;;  %v14545_v17 = vor.u32 %v18161_v9, %v14544_v7  ;;  %v14656_v36 = vld [vmem:[%s19282_s20 + $0x1740] sm:$0xf]  ;;  %9001 = vmatpush.bf16.msrb.mxu0 %v14289_v15  ;;  %v8772_v7 = vpop.f32.mrf.mxu2 }
 0x107   : > { %v18093_v19 = vld [vmem:[%s19282_s20 + $0x144c] sm:$0xf0]  ;;  %v14673_v22 = vor.u32 %v18193_v11, %v14672_v10  ;;  %v14256_v40 = vld [vmem:[%s19282_s20 + $0x1420] sm:$0xf]  ;;  %9014 = vmatpush.bf16.msrb.mxu1 %v14417_v16  ;;  %v19757_v16 = vld [vmem:[#allocation1 + $0x36] sm:$0xff] }
 0x108   : > { %v18125_v23 = vld [vmem:[%s19282_s20 + $0x154c] sm:$0xf0]  ;;  %v14273_v39 = vor.u32 %v18093_v19, %v14272_v18  ;;  %9027 = vmatpush.bf16.msrb.mxu2 %v14545_v17  ;;  %v14384_v45 = vld [vmem:[%s19282_s20 + $0x1520] sm:$0xf]  ;;  %v8773_v17 = vadd.f32 %v8772_v7, %v8760_v52  ;;  %v8785_v18 = vpop.f32.mrf.mxu3 }
 0x109   : > { %v18157_v35 = vld [vmem:[%s19282_s20 + $0x164c] sm:$0xf0]  ;;  %v14401_v42 = vor.u32 %v18125_v23, %v14400_v20  ;;  %9040 = vmatpush.bf16.msrb.mxu3 %v14673_v22  ;;  %v14512_v49 = vld [vmem:[%s19282_s20 + $0x1620] sm:$0xf]  ;;  %v380_v22 = vld [vmem:[%s19300_s30 + $0x18] sm:$0xff] }
 0x10a   : > { %v18189_v37 = vld [vmem:[%s19282_s20 + $0x174c] sm:$0xf0]  ;;  %v14529_v43 = vor.u32 %v18157_v35, %v14528_v31  ;;  %v14640_v51 = vld [vmem:[%s19282_s20 + $0x1720] sm:$0xf]  ;;  %9002 = vmatpush.bf16.msrb.mxu0 %v14273_v39 }
 0x10b   : > { %v18089_v44 = vld [vmem:[%s19282_s20 + $0x142c] sm:$0xf0]  ;;  %v14657_v48 = vor.u32 %v18189_v37, %v14656_v36  ;;  %v14240_v54 = vld [vmem:[%s19282_s20 + $0x1400] sm:$0xf]  ;;  %9015 = vmatpush.bf16.msrb.mxu1 %v14401_v42  ;;  %v19766_v36 = vadd.f32 %v8785_v18, %v8773_v17  ;;  %v8748_v37 = vpop.f32.mrf.mxu0 }
 0x10c   : > { %v18121_v46 = vld [vmem:[%s19282_s20 + $0x152c] sm:$0xf0]  ;;  %v14257_v56 = vor.u32 %v18089_v44, %v14256_v40  ;;  %v14368_v57 = vld [vmem:[%s19282_s20 + $0x1500] sm:$0xf]  ;;  %9028 = vmatpush.bf16.msrb.mxu2 %v14529_v43  ;;  %v8761_v43 = vpop.f32.mrf.mxu1 }
 0x10d   : > { %v18153_v50 = vld [vmem:[%s19282_s20 + $0x162c] sm:$0xf0]  ;;  %v14496_v63 = vld [vmem:[%s19282_s20 + $0x1600] sm:$0xf]  ;;  %v14385_v1 = vor.u32 %v18121_v46, %v14384_v45  ;;  %9041 = vmatpush.bf16.msrb.mxu3 %v14657_v48 }
 0x10e   : > { %v18185_v53 = vld [vmem:[%s19282_s20 + $0x172c] sm:$0xf0]  ;;  %v14513_v2 = vor.u32 %v18153_v50, %v14512_v49  ;;  %v14624_v3 = vld [vmem:[%s19282_s20 + $0x1700] sm:$0xf]  ;;  %9003 = vmatpush.bf16.msrb.mxu0 %v14257_v56 }
 0x10f   : > { %v18085_v55 = vld [vmem:[%s19282_s20 + $0x140c] sm:$0xf0]  ;;  %v14864_v5 = vld [vmem:[%s19282_s20 + $0x18e0] sm:$0xf]  ;;  %v14641_v9 = vor.u32 %v18185_v53, %v14640_v51  ;;  %9016 = vmatpush.bf16.msrb.mxu1 %v14385_v1 }
 0x110   : > { %v18117_v62 = vld [vmem:[%s19282_s20 + $0x150c] sm:$0xf0]  ;;  %v14992_v10 = vld [vmem:[%s19282_s20 + $0x19e0] sm:$0xf]  ;;  %v14241_v23 = vor.u32 %v18085_v55, %v14240_v54  ;;  %9029 = vmatpush.bf16.msrb.mxu2 %v14513_v2 }
 0x111   : > { %v18149_v0 = vld [vmem:[%s19282_s20 + $0x160c] sm:$0xf0]  ;;  %v19759_v19 = vld [vmem:[#allocation1 + $0x2d] sm:$0xff]  ;;  %v14369_v39 = vor.u32 %v18117_v62, %v14368_v57  ;;  %9042 = vmatpush.bf16.msrb.mxu3 %v14641_v9  ;;  %v8774_v57 = vpop.f32.mrf.mxu2 }
 0x112   : > { %v18181_v4 = vld [vmem:[%s19282_s20 + $0x170c] sm:$0xf0]  ;;  %v15120_v31 = vld [vmem:[%s19282_s20 + $0x1ae0] sm:$0xf]  ;;  %v14497_v40 = vor.u32 %v18149_v0, %v14496_v63  ;;  %9004 = vmatpush.bf16.msrb.mxu0 %v14241_v23  ;;  %v8787_v63 = vpop.f32.mrf.mxu3 }
 0x113   : > { %v18241_v6 = vld [vmem:[%s19282_s20 + $0x18ec] sm:$0xf0]  ;;  %v15248_v41 = vld [vmem:[%s19282_s20 + $0x1be0] sm:$0xf]  ;;  %v14625_v44 = vor.u32 %v18181_v4, %v14624_v3  ;;  %9017 = vmatpush.bf16.msrb.mxu1 %v14369_v39 }
 0x114   : > { %v18273_v11 = vld [vmem:[%s19282_s20 + $0x19ec] sm:$0xf0]  ;;  %v14865_v45 = vor.u32 %v18241_v6, %v14864_v5  ;;  %v14848_v48 = vld [vmem:[%s19282_s20 + $0x18c0] sm:$0xf]  ;;  %9030 = vmatpush.bf16.msrb.mxu2 %v14497_v40 }
 0x115   : > { %v19755_v15 = vld [vmem:[#allocation1 + $0x24] sm:$0xff]  ;;  %v14993_v46 = vor.u32 %v18273_v11, %v14992_v10  ;;  %v14976_v50 = vld [vmem:[%s19282_s20 + $0x19c0] sm:$0xf]  ;;  %9043 = vmatpush.bf16.msrb.mxu3 %v14625_v44 }
 0x116   : > { %v19761_v20 = vld [vmem:[#allocation1 + $0x3f] sm:$0xff]  ;;  %v15104_v53 = vld [vmem:[%s19282_s20 + $0x1ac0] sm:$0xf]  ;;  %9049 = vmatpush.bf16.msra.mxu0 %v14865_v45  ;;  %9018 = vmatmul.bf16.vlgmr.msrb.gmra.mxu1 %v19759_v19  ;;  %v8798_v45 = vpop.f32.mrf.mxu0 }
 0x117   : > { %v18305_v35 = vld [vmem:[%s19282_s20 + $0x1aec] sm:$0xf0]  ;;  %1790 = vst [vmem:[#allocation1] ss:$9 sm:$0xff] %v380_v22  ;;  %v15232_v55 = vld [vmem:[%s19282_s20 + $0x1bc0] sm:$0xf]  ;;  %9062 = vmatpush.bf16.msra.mxu1 %v14993_v46  ;;  %9005 = vmatmul.bf16.vlgmr.msrb.gmra.mxu0 %v19755_v15 }
 0x118   : > { %v18337_v42 = vld [vmem:[%s19282_s20 + $0x1bec] sm:$0xf0]  ;;  %v15121_v47 = vor.u32 %v18305_v35, %v15120_v31  ;;  %v14832_v2 = vld [vmem:[%s19282_s20 + $0x18a0] sm:$0xf]  ;;  %9031 = vmatmul.bf16.vlgmr.msrb.gmra.mxu2 %v19757_v16  ;;  %9044 = vmatmul.bf16.vlgmr.msrb.gmra.mxu3 %v19761_v20 }
 0x119   : > { %v18237_v49 = vld [vmem:[%s19282_s20 + $0x18cc] sm:$0xf0]  ;;  %v15249_v51 = vor.u32 %v18337_v42, %v15248_v41  ;;  %v14960_v4 = vld [vmem:[%s19282_s20 + $0x19a0] sm:$0xf] }
 0x11a   : > { %v18269_v52 = vld [vmem:[%s19282_s20 + $0x19cc] sm:$0xf0]  ;;  %v14849_v62 = vor.u32 %v18237_v49, %v14848_v48  ;;  %9075 = vmatpush.bf16.msra.mxu2 %v15121_v47  ;;  %v15088_v7 = vld [vmem:[%s19282_s20 + $0x1aa0] sm:$0xf] }
 0x11b   : > { %v18301_v54 = vld [vmem:[%s19282_s20 + $0x1acc] sm:$0xf0]  ;;  %v14977_v0 = vor.u32 %v18269_v52, %v14976_v50  ;;  %9088 = vmatpush.bf16.msra.mxu3 %v15249_v51  ;;  %v15216_v10 = vld [vmem:[%s19282_s20 + $0x1ba0] sm:$0xf]  ;;  %v8799_v51 = vadd.f32 %v8798_v45, %v19766_v36  ;;  %v8811_v52 = vpop.f32.mrf.mxu1 }
 0x11c   : > { %v18333_v56 = vld [vmem:[%s19282_s20 + $0x1bcc] sm:$0xf0]  ;;  %v15105_v1 = vor.u32 %v18301_v54, %v15104_v53  ;;  %9050 = vmatpush.bf16.msra.mxu0 %v14849_v62  ;;  %v14816_v23 = vld [vmem:[%s19282_s20 + $0x1880] sm:$0xf] }
 0x11d   : > { %v18233_v3 = vld [vmem:[%s19282_s20 + $0x18ac] sm:$0xf0]  ;;  %v15233_v5 = vor.u32 %v18333_v56, %v15232_v55  ;;  %9063 = vmatpush.bf16.msra.mxu1 %v14977_v0  ;;  %v14944_v35 = vld [vmem:[%s19282_s20 + $0x1980] sm:$0xf]  ;;  %v8812_v63 = vadd.f32 %v8811_v52, %v8799_v51 }
 0x11e   : > { %v18265_v6 = vld [vmem:[%s19282_s20 + $0x19ac] sm:$0xf0]  ;;  %v14833_v17 = vor.u32 %v18233_v3, %v14832_v2  ;;  %9076 = vmatpush.bf16.msra.mxu2 %v15105_v1  ;;  %v15072_v40 = vld [vmem:[%s19282_s20 + $0x1a80] sm:$0xf] }
 0x11f   : > { %v18297_v9 = vld [vmem:[%s19282_s20 + $0x1aac] sm:$0xf0]  ;;  %v14961_v18 = vor.u32 %v18265_v6, %v14960_v4  ;;  %9089 = vmatpush.bf16.msra.mxu3 %v15233_v5  ;;  %v15200_v42 = vld [vmem:[%s19282_s20 + $0x1b80] sm:$0xf]  ;;  %v8824_v5 = vpop.f32.mrf.mxu2 }
 0x120   : > { %v18329_v11 = vld [vmem:[%s19282_s20 + $0x1bac] sm:$0xf0]  ;;  %v15089_v22 = vor.u32 %v18297_v9, %v15088_v7  ;;  %9051 = vmatpush.bf16.msra.mxu0 %v14833_v17  ;;  %v14800_v48 = vld [vmem:[%s19282_s20 + $0x1860] sm:$0xf]  ;;  %v8837_v17 = vpop.f32.mrf.mxu3 }
 0x121   : > { %v18229_v31 = vld [vmem:[%s19282_s20 + $0x188c] sm:$0xf0]  ;;  %v15217_v37 = vor.u32 %v18329_v11, %v15216_v10  ;;  %9064 = vmatpush.bf16.msra.mxu1 %v14961_v18  ;;  %v14928_v50 = vld [vmem:[%s19282_s20 + $0x1960] sm:$0xf]  ;;  %v8825_v11 = vadd.f32 %v8824_v5, %v8812_v63 }
 0x122   : > { %v18261_v39 = vld [vmem:[%s19282_s20 + $0x198c] sm:$0xf0]  ;;  %v14817_v44 = vor.u32 %v18229_v31, %v14816_v23  ;;  %9077 = vmatpush.bf16.msra.mxu2 %v15089_v22  ;;  %v15056_v55 = vld [vmem:[%s19282_s20 + $0x1a60] sm:$0xf] }
 0x123   : > { %v18293_v41 = vld [vmem:[%s19282_s20 + $0x1a8c] sm:$0xf0]  ;;  %v14945_v46 = vor.u32 %v18261_v39, %v14944_v35  ;;  %9090 = vmatpush.bf16.msra.mxu3 %v15217_v37  ;;  %v15184_v57 = vld [vmem:[%s19282_s20 + $0x1b60] sm:$0xf]  ;;  %v19815_v31 = vadd.f32 %v8837_v17, %v8825_v11  ;;  %v8800_v35 = vpop.f32.mrf.mxu0 }
 0x124   : > { %v18325_v43 = vld [vmem:[%s19282_s20 + $0x1b8c] sm:$0xf0]  ;;  %v15073_v47 = vor.u32 %v18293_v41, %v15072_v40  ;;  %9052 = vmatpush.bf16.msra.mxu0 %v14817_v44  ;;  %v14784_v2 = vld [vmem:[%s19282_s20 + $0x1840] sm:$0xf] }
 0x125   : > { %v18225_v49 = vld [vmem:[%s19282_s20 + $0x186c] sm:$0xf0]  ;;  %v15201_v53 = vor.u32 %v18325_v43, %v15200_v42  ;;  %9065 = vmatpush.bf16.msra.mxu1 %v14945_v46  ;;  %v14912_v4 = vld [vmem:[%s19282_s20 + $0x1940] sm:$0xf]  ;;  %v8813_v43 = vpop.f32.mrf.mxu1 }
 0x126   : > { %v18257_v54 = vld [vmem:[%s19282_s20 + $0x196c] sm:$0xf0]  ;;  %v14801_v0 = vor.u32 %v18225_v49, %v14800_v48  ;;  %9078 = vmatpush.bf16.msra.mxu2 %v15073_v47  ;;  %v15040_v9 = vld [vmem:[%s19282_s20 + $0x1a40] sm:$0xf] }
 0x127   : > { %v18289_v56 = vld [vmem:[%s19282_s20 + $0x1a6c] sm:$0xf0]  ;;  %v14929_v36 = vor.u32 %v18257_v54, %v14928_v50  ;;  %9091 = vmatpush.bf16.msra.mxu3 %v15201_v53  ;;  %v15168_v18 = vld [vmem:[%s19282_s20 + $0x1b40] sm:$0xf] }
 0x128   : > { %v18321_v62 = vld [vmem:[%s19282_s20 + $0x1b6c] sm:$0xf0]  ;;  %v15057_v1 = vor.u32 %v18289_v56, %v15056_v55  ;;  %9053 = vmatpush.bf16.msra.mxu0 %v14801_v0  ;;  %v14768_v40 = vld [vmem:[%s19282_s20 + $0x1820] sm:$0xf] }
 0x129   : > { %v18221_v3 = vld [vmem:[%s19282_s20 + $0x184c] sm:$0xf0]  ;;  %v15185_v6 = vor.u32 %v18321_v62, %v15184_v57  ;;  %9066 = vmatpush.bf16.msra.mxu1 %v14929_v36  ;;  %v14896_v42 = vld [vmem:[%s19282_s20 + $0x1920] sm:$0xf]  ;;  %v8826_v62 = vpop.f32.mrf.mxu2 }
 0x12a   : > { %v18253_v7 = vld [vmem:[%s19282_s20 + $0x194c] sm:$0xf0]  ;;  %v14785_v23 = vor.u32 %v18221_v3, %v14784_v2  ;;  %9079 = vmatpush.bf16.msra.mxu2 %v15057_v1  ;;  %v15024_v46 = vld [vmem:[%s19282_s20 + $0x1a20] sm:$0xf]  ;;  %v8839_v2 = vpop.f32.mrf.mxu3 }
 0x12b   : > { %v18285_v10 = vld [vmem:[%s19282_s20 + $0x1a4c] sm:$0xf0]  ;;  %v14913_v37 = vor.u32 %v18253_v7, %v14912_v4  ;;  %9092 = vmatpush.bf16.msra.mxu3 %v15185_v6  ;;  %v15152_v48 = vld [vmem:[%s19282_s20 + $0x1b20] sm:$0xf] }
 0x12c   : > { %v18317_v22 = vld [vmem:[%s19282_s20 + $0x1b4c] sm:$0xf0]  ;;  %v15041_v39 = vor.u32 %v18285_v10, %v15040_v9  ;;  %9054 = vmatpush.bf16.msra.mxu0 %v14785_v23  ;;  %v14752_v51 = vld [vmem:[%s19282_s20 + $0x1800] sm:$0xf] }
 0x12d   : > { %v18217_v41 = vld [vmem:[%s19282_s20 + $0x182c] sm:$0xf0]  ;;  %v15169_v44 = vor.u32 %v18317_v22, %v15168_v18  ;;  %9067 = vmatpush.bf16.msra.mxu1 %v14913_v37  ;;  %v14880_v55 = vld [vmem:[%s19282_s20 + $0x1900] sm:$0xf] }
 0x12e   : > { %v18249_v45 = vld [vmem:[%s19282_s20 + $0x192c] sm:$0xf0]  ;;  %v14769_v50 = vor.u32 %v18217_v41, %v14768_v40  ;;  %9080 = vmatpush.bf16.msra.mxu2 %v15041_v39  ;;  %v15008_v57 = vld [vmem:[%s19282_s20 + $0x1a00] sm:$0xf] }
 0x12f   : > { %v18281_v47 = vld [vmem:[%s19282_s20 + $0x1a2c] sm:$0xf0]  ;;  %v14897_v53 = vor.u32 %v18249_v45, %v14896_v42  ;;  %9093 = vmatpush.bf16.msra.mxu3 %v15169_v44  ;;  %v15136_v36 = vld [vmem:[%s19282_s20 + $0x1b00] sm:$0xf] }
 0x130   : > { %v18313_v49 = vld [vmem:[%s19282_s20 + $0x1b2c] sm:$0xf0]  ;;  %v15025_v54 = vor.u32 %v18281_v47, %v15024_v46  ;;  %v15376_v3 = vld [vmem:[%s19282_s20 + $0x1ce0] sm:$0xf]  ;;  %9055 = vmatpush.bf16.msra.mxu0 %v14769_v50 }
 0x131   : > { %v18213_v52 = vld [vmem:[%s19282_s20 + $0x180c] sm:$0xf0]  ;;  %v15153_v63 = vor.u32 %v18313_v49, %v15152_v48  ;;  %v15504_v5 = vld [vmem:[%s19282_s20 + $0x1de0] sm:$0xf]  ;;  %9068 = vmatpush.bf16.msra.mxu1 %v14897_v53 }
 0x132   : > { %v18245_v56 = vld [vmem:[%s19282_s20 + $0x190c] sm:$0xf0]  ;;  %v14753_v6 = vor.u32 %v18213_v52, %v14752_v51  ;;  %v15632_v9 = vld [vmem:[%s19282_s20 + $0x1ee0] sm:$0xf]  ;;  %9081 = vmatpush.bf16.msra.mxu2 %v15025_v54  ;;  %v19853_v51 = vld [vmem:[#allocation1 + $0x9] sm:$0xff] }
 0x133   : > { %v18277_v0 = vld [vmem:[%s19282_s20 + $0x1a0c] sm:$0xf0]  ;;  %v14881_v11 = vor.u32 %v18245_v56, %v14880_v55  ;;  %v15760_v18 = vld [vmem:[%s19282_s20 + $0x1fe0] sm:$0xf]  ;;  %9094 = vmatpush.bf16.msra.mxu3 %v15153_v63 }
 0x134   : > { %v18309_v1 = vld [vmem:[%s19282_s20 + $0x1b0c] sm:$0xf0]  ;;  %v15009_v17 = vor.u32 %v18277_v0, %v15008_v57  ;;  %v15360_v40 = vld [vmem:[%s19282_s20 + $0x1cc0] sm:$0xf]  ;;  %9056 = vmatpush.bf16.msra.mxu0 %v14753_v6 }
 0x135   : > { %v18369_v4 = vld [vmem:[%s19282_s20 + $0x1cec] sm:$0xf0]  ;;  %v15137_v23 = vor.u32 %v18309_v1, %v15136_v36  ;;  %v15488_v42 = vld [vmem:[%s19282_s20 + $0x1dc0] sm:$0xf]  ;;  %9069 = vmatpush.bf16.msra.mxu1 %v14881_v11 }
 0x136   : > { %v18401_v7 = vld [vmem:[%s19282_s20 + $0x1dec] sm:$0xf0]  ;;  %v15377_v35 = vor.u32 %v18369_v4, %v15376_v3  ;;  %v15616_v45 = vld [vmem:[%s19282_s20 + $0x1ec0] sm:$0xf]  ;;  %9082 = vmatpush.bf16.msra.mxu2 %v15009_v17 }
 0x137   : > { %v18433_v10 = vld [vmem:[%s19282_s20 + $0x1eec] sm:$0xf0]  ;;  %v15505_v37 = vor.u32 %v18401_v7, %v15504_v5  ;;  %v15744_v48 = vld [vmem:[%s19282_s20 + $0x1fc0] sm:$0xf]  ;;  %9095 = vmatpush.bf16.msra.mxu3 %v15137_v23  ;;  %v8850_v23 = vpop.f32.mrf.mxu0 }
 0x138   : > { %v18465_v22 = vld [vmem:[%s19282_s20 + $0x1fec] sm:$0xf0]  ;;  %v15633_v39 = vor.u32 %v18433_v10, %v15632_v9  ;;  %9101 = vmatpush.bf16.msrb.mxu0 %v15377_v35  ;;  %v19851_v50 = vld [vmem:[#allocation1 + $0x12] sm:$0xff]  ;;  %9070 = vmatmul.bf16.vlgmr.msra.gmra.mxu1 %v19853_v51 }
 0x139   : > { %v18365_v41 = vld [vmem:[%s19282_s20 + $0x1ccc] sm:$0xf0]  ;;  %v15761_v43 = vor.u32 %v18465_v22, %v15760_v18  ;;  %9114 = vmatpush.bf16.msrb.mxu1 %v15505_v37  ;;  %v15344_v56 = vld [vmem:[%s19282_s20 + $0x1ca0] sm:$0xf]  ;;  %9083 = vmatmul.bf16.vlgmr.msra.gmra.mxu2 %v19851_v50 }
 0x13a   : > { %v18397_v44 = vld [vmem:[%s19282_s20 + $0x1dcc] sm:$0xf0]  ;;  %v15361_v53 = vor.u32 %v18365_v41, %v15360_v40  ;;  %9127 = vmatpush.bf16.msrb.mxu2 %v15633_v39  ;;  %v15472_v62 = vld [vmem:[%s19282_s20 + $0x1da0] sm:$0xf]  ;;  %v8851_v39 = vadd.f32 %v8850_v23, %v19815_v31  ;;  %v8863_v41 = vpop.f32.mrf.mxu1 }
 0x13b   : > { %v18429_v46 = vld [vmem:[%s19282_s20 + $0x1ecc] sm:$0xf0]  ;;  %v15489_v54 = vor.u32 %v18397_v44, %v15488_v42  ;;  %9140 = vmatpush.bf16.msrb.mxu3 %v15761_v43  ;;  %v15600_v36 = vld [vmem:[%s19282_s20 + $0x1ea0] sm:$0xf] }
 0x13c   : > { %v19847_v47 = vld [vmem:[#allocation1] sm:$0xff]  ;;  %v15617_v55 = vor.u32 %v18429_v46, %v15616_v45  ;;  %v15728_v2 = vld [vmem:[%s19282_s20 + $0x1fa0] sm:$0xf]  ;;  %9102 = vmatpush.bf16.msrb.mxu0 %v15361_v53 }
 0x13d   : > { %v18461_v49 = vld [vmem:[%s19282_s20 + $0x1fcc] sm:$0xf0]  ;;  %9057 = vmatmul.bf16.vlgmr.msra.gmra.mxu0 %v19847_v47  ;;  %9115 = vmatpush.bf16.msrb.mxu1 %v15489_v54  ;;  %v15328_v7 = vld [vmem:[%s19282_s20 + $0x1c80] sm:$0xf] }
 0x13e   : > { %v19855_v52 = vld [vmem:[#allocation1 + $0x1b] sm:$0xff]  ;;  %v15745_v63 = vor.u32 %v18461_v49, %v15744_v48  ;;  %9128 = vmatpush.bf16.msrb.mxu2 %v15617_v55  ;;  %v15456_v10 = vld [vmem:[%s19282_s20 + $0x1d80] sm:$0xf]  ;;  %v8864_v49 = vadd.f32 %v8863_v41, %v8851_v39 }
 0x13f   : > { %v18361_v57 = vld [vmem:[%s19282_s20 + $0x1cac] sm:$0xf0]  ;;  %9096 = vmatmul.bf16.vlgmr.msra.gmra.mxu3 %v19855_v52  ;;  %v15584_v18 = vld [vmem:[%s19282_s20 + $0x1e80] sm:$0xf] }
 0x140   : > { %v18393_v0 = vld [vmem:[%s19282_s20 + $0x1dac] sm:$0xf0]  ;;  %v15345_v4 = vor.u32 %v18361_v57, %v15344_v56  ;;  %9141 = vmatpush.bf16.msrb.mxu3 %v15745_v63  ;;  %v15712_v35 = vld [vmem:[%s19282_s20 + $0x1f80] sm:$0xf] }
 0x141   : > { %v18425_v1 = vld [vmem:[%s19282_s20 + $0x1eac] sm:$0xf0]  ;;  %v15473_v5 = vor.u32 %v18393_v0, %v15472_v62  ;;  %v15312_v44 = vld [vmem:[%s19282_s20 + $0x1c60] sm:$0xf] }
 0x142   : > { %v18457_v3 = vld [vmem:[%s19282_s20 + $0x1fac] sm:$0xf0]  ;;  %v15601_v6 = vor.u32 %v18425_v1, %v15600_v36  ;;  %9103 = vmatpush.bf16.msrb.mxu0 %v15345_v4  ;;  %v15440_v46 = vld [vmem:[%s19282_s20 + $0x1d60] sm:$0xf]  ;;  %v8865_v23 = vpop.f32.mrf.mxu1 }
 0x143   : > { %v18357_v9 = vld [vmem:[%s19282_s20 + $0x1c8c] sm:$0xf0]  ;;  %v15729_v11 = vor.u32 %v18457_v3, %v15728_v2  ;;  %9116 = vmatpush.bf16.msrb.mxu1 %v15473_v5  ;;  %v15568_v54 = vld [vmem:[%s19282_s20 + $0x1e60] sm:$0xf]  ;;  %v8876_v3 = vpop.f32.mrf.mxu2 }
 0x144   : > { %v18389_v17 = vld [vmem:[%s19282_s20 + $0x1d8c] sm:$0xf0]  ;;  %v15329_v40 = vor.u32 %v18357_v9, %v15328_v7  ;;  %9129 = vmatpush.bf16.msrb.mxu2 %v15601_v6  ;;  %v15696_v55 = vld [vmem:[%s19282_s20 + $0x1f60] sm:$0xf]  ;;  %v8877_v7 = vadd.f32 %v8876_v3, %v8864_v49  ;;  %v8889_v9 = vpop.f32.mrf.mxu3 }
 0x145   : > { %v18421_v22 = vld [vmem:[%s19282_s20 + $0x1e8c] sm:$0xf0]  ;;  %v15457_v42 = vor.u32 %v18389_v17, %v15456_v10  ;;  %9142 = vmatpush.bf16.msrb.mxu3 %v15729_v11  ;;  %v15296_v0 = vld [vmem:[%s19282_s20 + $0x1c40] sm:$0xf]  ;;  %v8852_v17 = vpop.f32.mrf.mxu0 }
 0x146   : > { %v18453_v37 = vld [vmem:[%s19282_s20 + $0x1f8c] sm:$0xf0]  ;;  %v15585_v43 = vor.u32 %v18421_v22, %v15584_v18  ;;  %9104 = vmatpush.bf16.msrb.mxu0 %v15329_v40  ;;  %v15424_v1 = vld [vmem:[%s19282_s20 + $0x1d40] sm:$0xf] }
 0x147   : > { %v18353_v45 = vld [vmem:[%s19282_s20 + $0x1c6c] sm:$0xf0]  ;;  %v15713_v48 = vor.u32 %v18453_v37, %v15712_v35  ;;  %9117 = vmatpush.bf16.msrb.mxu1 %v15457_v42  ;;  %v15552_v5 = vld [vmem:[%s19282_s20 + $0x1e40] sm:$0xf]  ;;  %v19895_v35 = vadd.f32 %v8889_v9, %v8877_v7  ;;  %v19918_v7 = vld [vmem:[#allocation1 + $0x36] sm:$0xff] }
 0x148   : > { %v18385_v53 = vld [vmem:[%s19282_s20 + $0x1d6c] sm:$0xf0]  ;;  %v15313_v57 = vor.u32 %v18353_v45, %v15312_v44  ;;  %9130 = vmatpush.bf16.msrb.mxu2 %v15585_v43  ;;  %v15680_v10 = vld [vmem:[%s19282_s20 + $0x1f40] sm:$0xf]  ;;  %22578 = vst [vmem:[#allocation14_spill] sm:$0xff] %v19918_v7 }
 0x149   : > { %v18417_v31 = vld [vmem:[%s19282_s20 + $0x1e6c] sm:$0xf0]  ;;  %v15441_v62 = vor.u32 %v18385_v53, %v15440_v46  ;;  %9143 = vmatpush.bf16.msrb.mxu3 %v15713_v48  ;;  %v15280_v22 = vld [vmem:[%s19282_s20 + $0x1c20] sm:$0xf] }
 0x14a   : > { %v18449_v56 = vld [vmem:[%s19282_s20 + $0x1f6c] sm:$0xf0]  ;;  %v15569_v63 = vor.u32 %v18417_v31, %v15568_v54  ;;  %9105 = vmatpush.bf16.msrb.mxu0 %v15313_v57  ;;  %v15408_v41 = vld [vmem:[%s19282_s20 + $0x1d20] sm:$0xf] }
 0x14b   : > { %v18349_v36 = vld [vmem:[%s19282_s20 + $0x1c4c] sm:$0xf0]  ;;  %v15697_v2 = vor.u32 %v18449_v56, %v15696_v55  ;;  %9118 = vmatpush.bf16.msrb.mxu1 %v15441_v62  ;;  %v15536_v44 = vld [vmem:[%s19282_s20 + $0x1e20] sm:$0xf]  ;;  %v8878_v9 = vpop.f32.mrf.mxu2 }
 0x14c   : > { %v18381_v4 = vld [vmem:[%s19282_s20 + $0x1d4c] sm:$0xf0]  ;;  %v15297_v18 = vor.u32 %v18349_v36, %v15296_v0  ;;  %9131 = vmatpush.bf16.msrb.mxu2 %v15569_v63  ;;  %v15664_v46 = vld [vmem:[%s19282_s20 + $0x1f20] sm:$0xf]  ;;  %v8891_v17 = vpop.f32.mrf.mxu3 }
 0x14d   : > { %v18413_v6 = vld [vmem:[%s19282_s20 + $0x1e4c] sm:$0xf0]  ;;  %v15425_v37 = vor.u32 %v18381_v4, %v15424_v1  ;;  %9144 = vmatpush.bf16.msrb.mxu3 %v15697_v2  ;;  %v15264_v49 = vld [vmem:[%s19282_s20 + $0x1c00] sm:$0xf] }
 0x14e   : > { %v18445_v11 = vld [vmem:[%s19282_s20 + $0x1f4c] sm:$0xf0]  ;;  %v15553_v39 = vor.u32 %v18413_v6, %v15552_v5  ;;  %9106 = vmatpush.bf16.msrb.mxu0 %v15297_v18  ;;  %v15392_v31 = vld [vmem:[%s19282_s20 + $0x1d00] sm:$0xf] }
 0x14f   : > { %v18345_v40 = vld [vmem:[%s19282_s20 + $0x1c2c] sm:$0xf0]  ;;  %v15681_v43 = vor.u32 %v18445_v11, %v15680_v10  ;;  %v15520_v56 = vld [vmem:[%s19282_s20 + $0x1e00] sm:$0xf]  ;;  %9119 = vmatpush.bf16.msrb.mxu1 %v15425_v37 }
 0x150   : > { %v18377_v42 = vld [vmem:[%s19282_s20 + $0x1d2c] sm:$0xf0]  ;;  %v15281_v54 = vor.u32 %v18345_v40, %v15280_v22  ;;  %9132 = vmatpush.bf16.msrb.mxu2 %v15553_v39  ;;  %v15648_v0 = vld [vmem:[%s19282_s20 + $0x1f00] sm:$0xf] }
 0x151   : > { %v18409_v45 = vld [vmem:[%s19282_s20 + $0x1e2c] sm:$0xf0]  ;;  %v15409_v62 = vor.u32 %v18377_v42, %v15408_v41  ;;  %v15888_v1 = vld [vmem:[%s19282_s20 + $0x20e0] sm:$0xf]  ;;  %9145 = vmatpush.bf16.msrb.mxu3 %v15681_v43 }
 0x152   : > { %v18441_v48 = vld [vmem:[%s19282_s20 + $0x1f2c] sm:$0xf0]  ;;  %v15537_v63 = vor.u32 %v18409_v45, %v15536_v44  ;;  %v16016_v4 = vld [vmem:[%s19282_s20 + $0x21e0] sm:$0xf]  ;;  %9107 = vmatpush.bf16.msrb.mxu0 %v15281_v54 }
 0x153   : > { %v18341_v53 = vld [vmem:[%s19282_s20 + $0x1c0c] sm:$0xf0]  ;;  %v15665_v3 = vor.u32 %v18441_v48, %v15664_v46  ;;  %v19920_v10 = vld [vmem:[#allocation1 + $0x2d] sm:$0xff]  ;;  %9120 = vmatpush.bf16.msrb.mxu1 %v15409_v62 }
 0x154   : > { %v18373_v55 = vld [vmem:[%s19282_s20 + $0x1d0c] sm:$0xf0]  ;;  %v15265_v22 = vor.u32 %v18341_v53, %v15264_v49  ;;  %v16144_v23 = vld [vmem:[%s19282_s20 + $0x22e0] sm:$0xf]  ;;  %9133 = vmatpush.bf16.msrb.mxu2 %v15537_v63 }
 0x155   : > { %v18405_v57 = vld [vmem:[%s19282_s20 + $0x1e0c] sm:$0xf0]  ;;  %v15393_v39 = vor.u32 %v18373_v55, %v15392_v31  ;;  %v16272_v41 = vld [vmem:[%s19282_s20 + $0x23e0] sm:$0xf]  ;;  %9146 = vmatpush.bf16.msrb.mxu3 %v15665_v3 }
 0x156   : > { %v18437_v36 = vld [vmem:[%s19282_s20 + $0x1f0c] sm:$0xf0]  ;;  %v15521_v40 = vor.u32 %v18405_v57, %v15520_v56  ;;  %v15872_v48 = vld [vmem:[%s19282_s20 + $0x20c0] sm:$0xf]  ;;  %9108 = vmatpush.bf16.msrb.mxu0 %v15265_v22 }
 0x157   : > { %v18497_v2 = vld [vmem:[%s19282_s20 + $0x20ec] sm:$0xf0]  ;;  %v15649_v43 = vor.u32 %v18437_v36, %v15648_v0  ;;  %v16000_v53 = vld [vmem:[%s19282_s20 + $0x21c0] sm:$0xf]  ;;  %9121 = vmatpush.bf16.msrb.mxu1 %v15393_v39 }
 0x158   : > { %v18529_v5 = vld [vmem:[%s19282_s20 + $0x21ec] sm:$0xf0]  ;;  %v15889_v44 = vor.u32 %v18497_v2, %v15888_v1  ;;  %v16128_v31 = vld [vmem:[%s19282_s20 + $0x22c0] sm:$0xf]  ;;  %9134 = vmatpush.bf16.msrb.mxu2 %v15521_v40 }
 0x159   : > { %v19916_v6 = vld [vmem:[#allocation1 + $0x24] sm:$0xff]  ;;  %v16017_v45 = vor.u32 %v18529_v5, %v16016_v4  ;;  %v16256_v56 = vld [vmem:[%s19282_s20 + $0x23c0] sm:$0xf]  ;;  %9147 = vmatpush.bf16.msrb.mxu3 %v15649_v43 }
 0x15a   : > { %v19922_v11 = vld [vmem:[#allocation1 + $0x3f] sm:$0xff]  ;;  %9153 = vmatpush.bf16.msra.mxu0 %v15889_v44  ;;  %v15856_v1 = vld [vmem:[%s19282_s20 + $0x20a0] sm:$0xf]  ;;  %9122 = vmatmul.bf16.vlgmr.msrb.gmra.mxu1 %v19920_v10 }
 0x15b   : > { %22579 = vst [vmem:[#allocation15_spill] sm:$0xff] %v19922_v11  ;;  %v381_v18 = vld [vmem:[%s19300_s30 + $0x20] sm:$0xff]  ;;  %9166 = vmatpush.bf16.msra.mxu1 %v16017_v45  ;;  %v15984_v3 = vld [vmem:[%s19282_s20 + $0x21a0] sm:$0xf]  ;;  %9109 = vmatmul.bf16.vlgmr.msrb.gmra.mxu0 %v19916_v6 }
 0x15c   : > { %v18561_v37 = vld [vmem:[%s19282_s20 + $0x22ec] sm:$0xf0]  ;;  %1800 = vst [vmem:[#allocation1] ss:$9 sm:$0xff] %v381_v18  ;;  %v16112_v9 = vld [vmem:[%s19282_s20 + $0x22a0] sm:$0xf]  ;;  %9135 = vmatmul.bf16.vlgmr.msrb.gmra.mxu2 %v19918_v7  ;;  %9148 = vmatmul.bf16.vlgmr.msrb.gmra.mxu3 %v19922_v11 }
 0x15d   : > { %v18593_v42 = vld [vmem:[%s19282_s20 + $0x23ec] sm:$0xf0]  ;;  %v16145_v46 = vor.u32 %v18561_v37, %v16144_v23  ;;  %v16240_v18 = vld [vmem:[%s19282_s20 + $0x23a0] sm:$0xf] }
 0x15e   : > { %v18493_v49 = vld [vmem:[%s19282_s20 + $0x20cc] sm:$0xf0]  ;;  %v16273_v54 = vor.u32 %v18593_v42, %v16272_v41  ;;  %v15840_v40 = vld [vmem:[%s19282_s20 + $0x2080] sm:$0xf] }
 0x15f   : > { %v18525_v62 = vld [vmem:[%s19282_s20 + $0x21cc] sm:$0xf0]  ;;  %v15873_v63 = vor.u32 %v18493_v49, %v15872_v48  ;;  %9179 = vmatpush.bf16.msra.mxu2 %v16145_v46  ;;  %v15968_v42 = vld [vmem:[%s19282_s20 + $0x2180] sm:$0xf]  ;;  %v8902_v48 = vpop.f32.mrf.mxu0 }
 0x160   : > { %v18557_v55 = vld [vmem:[%s19282_s20 + $0x22cc] sm:$0xf0]  ;;  %v16001_v0 = vor.u32 %v18525_v62, %v16000_v53  ;;  %9192 = vmatpush.bf16.msra.mxu3 %v16273_v54  ;;  %v16096_v45 = vld [vmem:[%s19282_s20 + $0x2280] sm:$0xf]  ;;  %v8903_v54 = vadd.f32 %v8902_v48, %v19895_v35 }
 0x161   : > { %v18589_v57 = vld [vmem:[%s19282_s20 + $0x23cc] sm:$0xf0]  ;;  %v16129_v36 = vor.u32 %v18557_v55, %v16128_v31  ;;  %9154 = vmatpush.bf16.msra.mxu0 %v15873_v63  ;;  %v16224_v49 = vld [vmem:[%s19282_s20 + $0x2380] sm:$0xf]  ;;  %v8915_v31 = vpop.f32.mrf.mxu1 }
 0x162   : > { %v18489_v2 = vld [vmem:[%s19282_s20 + $0x20ac] sm:$0xf0]  ;;  %v16257_v4 = vor.u32 %v18589_v57, %v16256_v56  ;;  %9167 = vmatpush.bf16.msra.mxu1 %v16001_v0  ;;  %v15824_v57 = vld [vmem:[%s19282_s20 + $0x2060] sm:$0xf] }
 0x163   : > { %v18521_v5 = vld [vmem:[%s19282_s20 + $0x21ac] sm:$0xf0]  ;;  %v15857_v23 = vor.u32 %v18489_v2, %v15856_v1  ;;  %9180 = vmatpush.bf16.msra.mxu2 %v16129_v36  ;;  %v15952_v0 = vld [vmem:[%s19282_s20 + $0x2160] sm:$0xf]  ;;  %v8916_v1 = vadd.f32 %v8915_v31, %v8903_v54 }
 0x164   : > { %v18553_v17 = vld [vmem:[%s19282_s20 + $0x22ac] sm:$0xf0]  ;;  %v15985_v37 = vor.u32 %v18521_v5, %v15984_v3  ;;  %9193 = vmatpush.bf16.msra.mxu3 %v16257_v4  ;;  %v16080_v3 = vld [vmem:[%s19282_s20 + $0x2260] sm:$0xf] }
 0x165   : > { %v18585_v22 = vld [vmem:[%s19282_s20 + $0x23ac] sm:$0xf0]  ;;  %v16113_v39 = vor.u32 %v18553_v17, %v16112_v9  ;;  %9155 = vmatpush.bf16.msra.mxu0 %v15857_v23  ;;  %v16208_v4 = vld [vmem:[%s19282_s20 + $0x2360] sm:$0xf] }
 0x166   : > { %v18485_v41 = vld [vmem:[%s19282_s20 + $0x208c] sm:$0xf0]  ;;  %v16241_v43 = vor.u32 %v18585_v22, %v16240_v18  ;;  %9168 = vmatpush.bf16.msra.mxu1 %v15985_v37  ;;  %v15808_v22 = vld [vmem:[%s19282_s20 + $0x2040] sm:$0xf] }
 0x167   : > { %v18517_v44 = vld [vmem:[%s19282_s20 + $0x218c] sm:$0xf0]  ;;  %v15841_v62 = vor.u32 %v18485_v41, %v15840_v40  ;;  %9181 = vmatpush.bf16.msra.mxu2 %v16113_v39  ;;  %v15936_v37 = vld [vmem:[%s19282_s20 + $0x2140] sm:$0xf]  ;;  %v8928_v40 = vpop.f32.mrf.mxu2 }
 0x168   : > { %v18549_v46 = vld [vmem:[%s19282_s20 + $0x228c] sm:$0xf0]  ;;  %v15969_v55 = vor.u32 %v18517_v44, %v15968_v42  ;;  %9194 = vmatpush.bf16.msra.mxu3 %v16241_v43  ;;  %v16064_v42 = vld [vmem:[%s19282_s20 + $0x2240] sm:$0xf]  ;;  %v8929_v44 = vadd.f32 %v8928_v40, %v8916_v1 }
 0x169   : > { %v18581_v53 = vld [vmem:[%s19282_s20 + $0x238c] sm:$0xf0]  ;;  %v16097_v56 = vor.u32 %v18549_v46, %v16096_v45  ;;  %9156 = vmatpush.bf16.msra.mxu0 %v15841_v62  ;;  %v8941_v45 = vpop.f32.mrf.mxu3  ;;  %v16192_v46 = vld [vmem:[%s19282_s20 + $0x2340] sm:$0xf]  ;;  %v8917_v54 = vpop.f32.mrf.mxu1 }
 0x16a   : > { %v18481_v63 = vld [vmem:[%s19282_s20 + $0x206c] sm:$0xf0]  ;;  %v16225_v36 = vor.u32 %v18581_v53, %v16224_v49  ;;  %9169 = vmatpush.bf16.msra.mxu1 %v15969_v55  ;;  %v8904_v49 = vpop.f32.mrf.mxu0  ;;  %v19974_v62 = vadd.f32 %v8941_v45, %v8929_v44  ;;  %v16048_v1 = vld [vmem:[%s19282_s20 + $0x2220] sm:$0xf] }
 0x16b   : > { %v18513_v2 = vld [vmem:[%s19282_s20 + $0x216c] sm:$0xf0]  ;;  %v15825_v9 = vor.u32 %v18481_v63, %v15824_v57  ;;  %9182 = vmatpush.bf16.msra.mxu2 %v16097_v56  ;;  %v15792_v56 = vld [vmem:[%s19282_s20 + $0x2020] sm:$0xf] }
 0x16c   : > { %v18545_v35 = vld [vmem:[%s19282_s20 + $0x226c] sm:$0xf0]  ;;  %v15953_v17 = vor.u32 %v18513_v2, %v15952_v0  ;;  %9195 = vmatpush.bf16.msra.mxu3 %v16225_v36  ;;  %v15920_v63 = vld [vmem:[%s19282_s20 + $0x2120] sm:$0xf] }
 0x16d   : > { %v18577_v5 = vld [vmem:[%s19282_s20 + $0x236c] sm:$0xf0]  ;;  %v16081_v18 = vor.u32 %v18545_v35, %v16080_v3  ;;  %9157 = vmatpush.bf16.msra.mxu0 %v15825_v9  ;;  %v16176_v3 = vld [vmem:[%s19282_s20 + $0x2320] sm:$0xf] }
 0x16e   : > { %v18477_v23 = vld [vmem:[%s19282_s20 + $0x204c] sm:$0xf0]  ;;  %v16209_v39 = vor.u32 %v18577_v5, %v16208_v4  ;;  %9170 = vmatpush.bf16.msra.mxu1 %v15953_v17  ;;  %v15776_v5 = vld [vmem:[%s19282_s20 + $0x2000] sm:$0xf] }
 0x16f   : > { %v18509_v41 = vld [vmem:[%s19282_s20 + $0x214c] sm:$0xf0]  ;;  %v15809_v53 = vor.u32 %v18477_v23, %v15808_v22  ;;  %9183 = vmatpush.bf16.msra.mxu2 %v16081_v18  ;;  %v15904_v22 = vld [vmem:[%s19282_s20 + $0x2100] sm:$0xf] }
 0x170   : > { %v18541_v43 = vld [vmem:[%s19282_s20 + $0x224c] sm:$0xf0]  ;;  %v15937_v31 = vor.u32 %v18509_v41, %v15936_v37  ;;  %9196 = vmatpush.bf16.msra.mxu3 %v16209_v39  ;;  %v16032_v37 = vld [vmem:[%s19282_s20 + $0x2200] sm:$0xf] }
 0x171   : > { %v18573_v48 = vld [vmem:[%s19282_s20 + $0x234c] sm:$0xf0]  ;;  %v16065_v55 = vor.u32 %v18541_v43, %v16064_v42  ;;  %9158 = vmatpush.bf16.msra.mxu0 %v15809_v53  ;;  %v16160_v41 = vld [vmem:[%s19282_s20 + $0x2300] sm:$0xf]  ;;  %v8930_v43 = vpop.f32.mrf.mxu2 }
 0x172   : > { %v18473_v57 = vld [vmem:[%s19282_s20 + $0x202c] sm:$0xf0]  ;;  %v16193_v0 = vor.u32 %v18573_v48, %v16192_v46  ;;  %9171 = vmatpush.bf16.msra.mxu1 %v15937_v31  ;;  %v16400_v44 = vld [vmem:[%s19282_s20 + $0x24e0] sm:$0xf]  ;;  %v8943_v48 = vpop.f32.mrf.mxu3 }
 0x173   : > { %v18505_v36 = vld [vmem:[%s19282_s20 + $0x212c] sm:$0xf0]  ;;  %v15793_v4 = vor.u32 %v18473_v57, %v15792_v56  ;;  %9184 = vmatpush.bf16.msra.mxu2 %v16065_v55  ;;  %v16528_v46 = vld [vmem:[%s19282_s20 + $0x25e0] sm:$0xf] }
 0x174   : > { %v18537_v2 = vld [vmem:[%s19282_s20 + $0x222c] sm:$0xf0]  ;;  %v15921_v17 = vor.u32 %v18505_v36, %v15920_v63  ;;  %9197 = vmatpush.bf16.msra.mxu3 %v16193_v0  ;;  %v16656_v54 = vld [vmem:[%s19282_s20 + $0x26e0] sm:$0xf] }
 0x175   : > { %v18569_v35 = vld [vmem:[%s19282_s20 + $0x232c] sm:$0xf0]  ;;  %v16049_v18 = vor.u32 %v18537_v2, %v16048_v1  ;;  %9159 = vmatpush.bf16.msra.mxu0 %v15793_v4  ;;  %v16784_v57 = vld [vmem:[%s19282_s20 + $0x27e0] sm:$0xf] }
 0x176   : > { %v18469_v9 = vld [vmem:[%s19282_s20 + $0x200c] sm:$0xf0]  ;;  %v16177_v39 = vor.u32 %v18569_v35, %v16176_v3  ;;  %9172 = vmatpush.bf16.msra.mxu1 %v15921_v17  ;;  %v16384_v3 = vld [vmem:[%s19282_s20 + $0x24c0] sm:$0xf] }
 0x177   : > { %v18501_v23 = vld [vmem:[%s19282_s20 + $0x210c] sm:$0xf0]  ;;  %v15777_v49 = vor.u32 %v18469_v9, %v15776_v5  ;;  %9185 = vmatpush.bf16.msra.mxu2 %v16049_v18  ;;  %v16512_v4 = vld [vmem:[%s19282_s20 + $0x25c0] sm:$0xf] }
 0x178   : > { %v18533_v40 = vld [vmem:[%s19282_s20 + $0x220c] sm:$0xf0]  ;;  %v15905_v55 = vor.u32 %v18501_v23, %v15904_v22  ;;  %9198 = vmatpush.bf16.msra.mxu3 %v16177_v39  ;;  %v16640_v17 = vld [vmem:[%s19282_s20 + $0x26c0] sm:$0xf] }
 0x179   : > { %v18565_v42 = vld [vmem:[%s19282_s20 + $0x230c] sm:$0xf0]  ;;  %v16033_v56 = vor.u32 %v18533_v40, %v16032_v37  ;;  %9160 = vmatpush.bf16.msra.mxu0 %v15777_v49  ;;  %v16768_v23 = vld [vmem:[%s19282_s20 + $0x27c0] sm:$0xf]  ;;  %v20012_v40 = vld [vmem:[#allocation1 + $0x9] sm:$0xff] }
 0x17a   : > { %v18625_v45 = vld [vmem:[%s19282_s20 + $0x24ec] sm:$0xf0]  ;;  %v16161_v0 = vor.u32 %v18565_v42, %v16160_v41  ;;  %9173 = vmatpush.bf16.msra.mxu1 %v15905_v55  ;;  %v20010_v39 = vld [vmem:[#allocation1 + $0x12] sm:$0xff]  ;;  %22582 = vst [vmem:[#allocation18_spill] sm:$0xff] %v20012_v40 }
 0x17b   : > { %v18657_v53 = vld [vmem:[%s19282_s20 + $0x25ec] sm:$0xf0]  ;;  %v16401_v36 = vor.u32 %v18625_v45, %v16400_v44  ;;  %9186 = vmatpush.bf16.msra.mxu2 %v16033_v56  ;;  %22581 = vst [vmem:[#allocation17_spill] sm:$0xff] %v20010_v39  ;;  %v16368_v45 = vld [vmem:[%s19282_s20 + $0x24a0] sm:$0xf] }
 0x17c   : > { %v18689_v31 = vld [vmem:[%s19282_s20 + $0x26ec] sm:$0xf0]  ;;  %v16529_v1 = vor.u32 %v18657_v53, %v16528_v46  ;;  %9199 = vmatpush.bf16.msra.mxu3 %v16161_v0  ;;  %v16496_v48 = vld [vmem:[%s19282_s20 + $0x25a0] sm:$0xf] }
 0x17d   : > { %v18721_v63 = vld [vmem:[%s19282_s20 + $0x27ec] sm:$0xf0]  ;;  %v16657_v2 = vor.u32 %v18689_v31, %v16656_v54  ;;  %9205 = vmatpush.bf16.msrb.mxu0 %v16401_v36  ;;  %v16624_v54 = vld [vmem:[%s19282_s20 + $0x26a0] sm:$0xf]  ;;  %9174 = vmatmul.bf16.vlgmr.msra.gmra.mxu1 %v20012_v40 }
 0x17e   : > { %v18621_v35 = vld [vmem:[%s19282_s20 + $0x24cc] sm:$0xf0]  ;;  %v16785_v5 = vor.u32 %v18721_v63, %v16784_v57  ;;  %9218 = vmatpush.bf16.msrb.mxu1 %v16529_v1  ;;  %9187 = vmatmul.bf16.vlgmr.msra.gmra.mxu2 %v20010_v39  ;;  %v16752_v55 = vld [vmem:[%s19282_s20 + $0x27a0] sm:$0xf]  ;;  %v17471_v39 = vld [vmem:[%s19282_s20 + $0xe4] sm:$0xf] }
 0x17f   : > { %v18653_v9 = vld [vmem:[%s19282_s20 + $0x25cc] sm:$0xf0]  ;;  %v16385_v42 = vor.u32 %v18621_v35, %v16384_v3  ;;  %9231 = vmatpush.bf16.msrb.mxu2 %v16657_v2  ;;  %v16352_v36 = vld [vmem:[%s19282_s20 + $0x2480] sm:$0xf] }
 0x180   : > { %v18685_v18 = vld [vmem:[%s19282_s20 + $0x26cc] sm:$0xf0]  ;;  %v16513_v43 = vor.u32 %v18653_v9, %v16512_v4  ;;  %9244 = vmatpush.bf16.msrb.mxu3 %v16785_v5  ;;  %v16480_v2 = vld [vmem:[%s19282_s20 + $0x2580] sm:$0xf]  ;;  %v8954_v9 = vpop.f32.mrf.mxu0 }
 0x181   : > { %v20006_v22 = vld [vmem:[#allocation1] sm:$0xff]  ;;  %v16641_v44 = vor.u32 %v18685_v18, %v16640_v17  ;;  %9206 = vmatpush.bf16.msrb.mxu0 %v16385_v42  ;;  %v16608_v4 = vld [vmem:[%s19282_s20 + $0x2680] sm:$0xf]  ;;  %v8967_v42 = vpop.f32.mrf.mxu1 }
 0x182   : > { %22580 = vst [vmem:[#allocation16_spill] sm:$0xff] %v20006_v22  ;;  %v18717_v37 = vld [vmem:[%s19282_s20 + $0x27cc] sm:$0xf0]  ;;  %9161 = vmatmul.bf16.vlgmr.msra.gmra.mxu0 %v20006_v22  ;;  %9219 = vmatpush.bf16.msrb.mxu1 %v16513_v43  ;;  %v16736_v17 = vld [vmem:[%s19282_s20 + $0x2780] sm:$0xf] }
 0x183   : > { %v20014_v41 = vld [vmem:[#allocation1 + $0x1b] sm:$0xff]  ;;  %v16769_v49 = vor.u32 %v18717_v37, %v16768_v23  ;;  %9232 = vmatpush.bf16.msrb.mxu2 %v16641_v44  ;;  %v8955_v23 = vadd.f32 %v8954_v9, %v19974_v62  ;;  %v16896_v40 = vld [vmem:[%s19282_s20 + $0x28c0] sm:$0xf] }
 0x184   : > { %22583 = vst [vmem:[#allocation19_spill] sm:$0xff] %v20014_v41  ;;  %v18617_v46 = vld [vmem:[%s19282_s20 + $0x24ac] sm:$0xf0]  ;;  %9200 = vmatmul.bf16.vlgmr.msra.gmra.mxu3 %v20014_v41  ;;  %v11794_v41 = vld [vmem:[%s19282_s20 + $0xf0] sm:$0xf0] }
 0x185   : > { %v18649_v53 = vld [vmem:[%s19282_s20 + $0x25ac] sm:$0xf0]  ;;  %v16369_v57 = vor.u32 %v18617_v46, %v16368_v45  ;;  %9245 = vmatpush.bf16.msrb.mxu3 %v16769_v49  ;;  %v16336_v45 = vld [vmem:[%s19282_s20 + $0x2460] sm:$0xf] }
 0x186   : > { %v18681_v31 = vld [vmem:[%s19282_s20 + $0x26ac] sm:$0xf0]  ;;  %v16497_v63 = vor.u32 %v18649_v53, %v16496_v48  ;;  %v16464_v48 = vld [vmem:[%s19282_s20 + $0x2560] sm:$0xf]  ;;  %v8968_v53 = vadd.f32 %v8967_v42, %v8955_v23 }
 0x187   : > { %v18713_v56 = vld [vmem:[%s19282_s20 + $0x27ac] sm:$0xf0]  ;;  %v16625_v0 = vor.u32 %v18681_v31, %v16624_v54  ;;  %9207 = vmatpush.bf16.msrb.mxu0 %v16369_v57  ;;  %v16592_v31 = vld [vmem:[%s19282_s20 + $0x2660] sm:$0xf] }
 0x188   : > { %v18613_v1 = vld [vmem:[%s19282_s20 + $0x248c] sm:$0xf0]  ;;  %v16753_v3 = vor.u32 %v18713_v56, %v16752_v55  ;;  %9220 = vmatpush.bf16.msrb.mxu1 %v16497_v63  ;;  %v16720_v55 = vld [vmem:[%s19282_s20 + $0x2760] sm:$0xf]  ;;  %v8956_v42 = vpop.f32.mrf.mxu0 }
 0x189   : > { %v18645_v35 = vld [vmem:[%s19282_s20 + $0x258c] sm:$0xf0]  ;;  %v16353_v37 = vor.u32 %v18613_v1, %v16352_v36  ;;  %9233 = vmatpush.bf16.msrb.mxu2 %v16625_v0  ;;  %v16320_v36 = vld [vmem:[%s19282_s20 + $0x2440] sm:$0xf] }
 0x18a   : > { %v18677_v5 = vld [vmem:[%s19282_s20 + $0x268c] sm:$0xf0]  ;;  %v16481_v43 = vor.u32 %v18645_v35, %v16480_v2  ;;  %9246 = vmatpush.bf16.msrb.mxu3 %v16753_v3  ;;  %v16448_v2 = vld [vmem:[%s19282_s20 + $0x2540] sm:$0xf]  ;;  %v8980_v35 = vpop.f32.mrf.mxu2 }
 0x18b   : > { %v18709_v18 = vld [vmem:[%s19282_s20 + $0x278c] sm:$0xf0]  ;;  %v16609_v44 = vor.u32 %v18677_v5, %v16608_v4  ;;  %9208 = vmatpush.bf16.msrb.mxu0 %v16353_v37  ;;  %v16576_v5 = vld [vmem:[%s19282_s20 + $0x2640] sm:$0xf] }
 0x18c   : > { %v18609_v46 = vld [vmem:[%s19282_s20 + $0x246c] sm:$0xf0]  ;;  %v16737_v49 = vor.u32 %v18709_v18, %v16736_v17  ;;  %9221 = vmatpush.bf16.msrb.mxu1 %v16481_v43  ;;  %v8981_v17 = vadd.f32 %v8980_v35, %v8968_v53  ;;  %v8993_v18 = vpop.f32.mrf.mxu3  ;;  %v16704_v23 = vld [vmem:[%s19282_s20 + $0x2740] sm:$0xf] }
 0x18d   : > { %v18641_v54 = vld [vmem:[%s19282_s20 + $0x256c] sm:$0xf0]  ;;  %v16337_v57 = vor.u32 %v18609_v46, %v16336_v45  ;;  %9234 = vmatpush.bf16.msrb.mxu2 %v16609_v44  ;;  %v16304_v44 = vld [vmem:[%s19282_s20 + $0x2420] sm:$0xf]  ;;  %v8969_v45 = vpop.f32.mrf.mxu1 }
 0x18e   : > { %v18673_v62 = vld [vmem:[%s19282_s20 + $0x266c] sm:$0xf0]  ;;  %v16465_v63 = vor.u32 %v18641_v54, %v16464_v48  ;;  %9247 = vmatpush.bf16.msrb.mxu3 %v16737_v49  ;;  %v20054_v46 = vadd.f32 %v8993_v18, %v8981_v17  ;;  %v16432_v54 = vld [vmem:[%s19282_s20 + $0x2520] sm:$0xf] }
 0x18f   : > { %v18705_v56 = vld [vmem:[%s19282_s20 + $0x276c] sm:$0xf0]  ;;  %v16593_v0 = vor.u32 %v18673_v62, %v16592_v31  ;;  %9209 = vmatpush.bf16.msrb.mxu0 %v16337_v57  ;;  %v16688_v57 = vld [vmem:[%s19282_s20 + $0x2720] sm:$0xf] }
 0x190   : > { %v18605_v1 = vld [vmem:[%s19282_s20 + $0x244c] sm:$0xf0]  ;;  %v16721_v3 = vor.u32 %v18705_v56, %v16720_v55  ;;  %9222 = vmatpush.bf16.msrb.mxu1 %v16465_v63  ;;  %v16560_v55 = vld [vmem:[%s19282_s20 + $0x2620] sm:$0xf] }
 0x191   : > { %v18637_v4 = vld [vmem:[%s19282_s20 + $0x254c] sm:$0xf0]  ;;  %v16321_v43 = vor.u32 %v18605_v1, %v16320_v36  ;;  %9235 = vmatpush.bf16.msrb.mxu2 %v16593_v0  ;;  %v16288_v0 = vld [vmem:[%s19282_s20 + $0x2400] sm:$0xf] }
 0x192   : > { %v18669_v9 = vld [vmem:[%s19282_s20 + $0x264c] sm:$0xf0]  ;;  %v16449_v48 = vor.u32 %v18637_v4, %v16448_v2  ;;  %9248 = vmatpush.bf16.msrb.mxu3 %v16721_v3  ;;  %v16416_v2 = vld [vmem:[%s19282_s20 + $0x2500] sm:$0xf] }
 0x193   : > { %v18701_v37 = vld [vmem:[%s19282_s20 + $0x274c] sm:$0xf0]  ;;  %v16577_v49 = vor.u32 %v18669_v9, %v16576_v5  ;;  %9210 = vmatpush.bf16.msrb.mxu0 %v16321_v43  ;;  %v16544_v4 = vld [vmem:[%s19282_s20 + $0x2600] sm:$0xf] }
 0x194   : > { %v18601_v53 = vld [vmem:[%s19282_s20 + $0x242c] sm:$0xf0]  ;;  %v16705_v62 = vor.u32 %v18701_v37, %v16704_v23  ;;  %9223 = vmatpush.bf16.msrb.mxu1 %v16449_v48  ;;  %v16672_v17 = vld [vmem:[%s19282_s20 + $0x2700] sm:$0xf]  ;;  %v8982_v48 = vpop.f32.mrf.mxu2 }
 0x195   : > { %v18633_v31 = vld [vmem:[%s19282_s20 + $0x252c] sm:$0xf0]  ;;  %v16305_v1 = vor.u32 %v18601_v53, %v16304_v44  ;;  %9236 = vmatpush.bf16.msrb.mxu2 %v16577_v49  ;;  %v16912_v23 = vld [vmem:[%s19282_s20 + $0x28e0] sm:$0xf]  ;;  %v20077_v53 = vld [vmem:[#allocation1 + $0x36] sm:$0xff] }
 0x196   : > { %v18665_v56 = vld [vmem:[%s19282_s20 + $0x262c] sm:$0xf0]  ;;  %v16433_v3 = vor.u32 %v18633_v31, %v16432_v54  ;;  %9249 = vmatpush.bf16.msrb.mxu3 %v16705_v62  ;;  %v17040_v43 = vld [vmem:[%s19282_s20 + $0x29e0] sm:$0xf]  ;;  %v8995_v31 = vpop.f32.mrf.mxu3 }
 0x197   : > { %v18697_v63 = vld [vmem:[%s19282_s20 + $0x272c] sm:$0xf0]  ;;  %v16561_v9 = vor.u32 %v18665_v56, %v16560_v55  ;;  %v20079_v49 = vld [vmem:[#allocation1 + $0x2d] sm:$0xff]  ;;  %v382_v55 = vld [vmem:[%s19300_s30 + $0x28] sm:$0x7]  ;;  %9211 = vmatpush.bf16.msrb.mxu0 %v16305_v1 }
 0x198   : > { %v18597_v36 = vld [vmem:[%s19282_s20 + $0x240c] sm:$0xf0]  ;;  %v16689_v42 = vor.u32 %v18697_v63, %v16688_v57  ;;  %22585 = vst [vmem:[#allocation21_spill] sm:$0xff] %v20079_v49  ;;  %v17168_v62 = vld [vmem:[%s19282_s20 + $0x2ae0] sm:$0xf]  ;;  %9224 = vmatpush.bf16.msrb.mxu1 %v16433_v3  ;;  %v11797_v3 = vor.u32 %v17471_v39, %v11794_v41 }
 0x199   : > { %v18629_v35 = vld [vmem:[%s19282_s20 + $0x250c] sm:$0xf0]  ;;  %v16289_v56 = vor.u32 %v18597_v36, %v16288_v0  ;;  %9237 = vmatpush.bf16.msrb.mxu2 %v16561_v9  ;;  %v17024_v7 = vld [vmem:[%s19282_s20 + $0x29c0] sm:$0xf] }
 0x19a   : > { %v18661_v5 = vld [vmem:[%s19282_s20 + $0x260c] sm:$0xf0]  ;;  %v16417_v63 = vor.u32 %v18629_v35, %v16416_v2  ;;  %9250 = vmatpush.bf16.msrb.mxu3 %v16689_v42  ;;  %v17152_v2 = vld [vmem:[%s19282_s20 + $0x2ac0] sm:$0xf] }
 0x19b   : > { %v18693_v18 = vld [vmem:[%s19282_s20 + $0x270c] sm:$0xf0]  ;;  %v16545_v48 = vor.u32 %v18661_v5, %v16544_v4  ;;  %9212 = vmatpush.bf16.msrb.mxu0 %v16289_v56  ;;  %v17467_v4 = vld [vmem:[%s19282_s20 + $0xc4] sm:$0xf]  ;;  %v11778_v5 = vld [vmem:[%s19282_s20 + $0xd0] sm:$0xf0] }
 0x19c   : > { %v18753_v37 = vld [vmem:[%s19282_s20 + $0x28ec] sm:$0xf0]  ;;  %v16673_v1 = vor.u32 %v18693_v18, %v16672_v17  ;;  %9225 = vmatpush.bf16.msrb.mxu1 %v16417_v63  ;;  %v16880_v18 = vld [vmem:[%s19282_s20 + $0x28a0] sm:$0xf]  ;;  %v11781_v42 = vor.u32 %v17467_v4, %v11778_v5  ;;  %v9019_v5 = vpop.f32.mrf.mxu1 }
 0x19d   : > { %v18785_v44 = vld [vmem:[%s19282_s20 + $0x29ec] sm:$0xf0]  ;;  %v16913_v31 = vor.u32 %v18753_v37, %v16912_v23  ;;  %9238 = vmatpush.bf16.msrb.mxu2 %v16545_v48  ;;  %v17008_v37 = vld [vmem:[%s19282_s20 + $0x29a0] sm:$0xf] }
 0x19e   : > { %v20075_v45 = vld [vmem:[#allocation1 + $0x24] sm:$0xff]  ;;  %v17041_v0 = vor.u32 %v18785_v44, %v17040_v43  ;;  %9251 = vmatpush.bf16.msrb.mxu3 %v16673_v1  ;;  %v17136_v44 = vld [vmem:[%s19282_s20 + $0x2aa0] sm:$0xf] }
 0x19f   : > { %22584 = vst [vmem:[#allocation20_spill] sm:$0xff] %v20075_v45  ;;  %v20081_v54 = vld [vmem:[#allocation1 + $0x3f] sm:$0xff]  ;;  %9257 = vmatpush.bf16.msra.mxu0 %v16913_v31  ;;  %9226 = vmatmul.bf16.vlgmr.msrb.gmra.mxu1 %v20079_v49  ;;  %v16992_v48 = vld [vmem:[%s19282_s20 + $0x2980] sm:$0xf] }
 0x1a0   : > { %v18817_v57 = vld [vmem:[%s19282_s20 + $0x2aec] sm:$0xf0]  ;;  %1810 = vst [vmem:[#allocation1] ss:$9 sm:$0xff] %v382_v55  ;;  %9270 = vmatpush.bf16.msra.mxu1 %v17041_v0  ;;  %9213 = vmatmul.bf16.vlgmr.msrb.gmra.mxu0 %v20075_v45  ;;  %v17120_v0 = vld [vmem:[%s19282_s20 + $0x2a80] sm:$0xf] }
 0x1a1   : > { %v17169_v36 = vor.u32 %v18817_v57, %v17168_v62  ;;  %v18749_v22 = vld [vmem:[%s19282_s20 + $0x28cc] sm:$0xf0]  ;;  %9239 = vmatmul.bf16.vlgmr.msrb.gmra.mxu2 %v20077_v53  ;;  %9252 = vmatmul.bf16.vlgmr.msrb.gmra.mxu3 %v20081_v54  ;;  %v16864_v57 = vld [vmem:[%s19282_s20 + $0x2880] sm:$0xf] }
 0x1a2   : > { %v18781_v9 = vld [vmem:[%s19282_s20 + $0x29cc] sm:$0xf0]  ;;  %v16897_v17 = vor.u32 %v18749_v22, %v16896_v40  ;;  %9296 = vmatpush.bf16.msra.mxu3 %v11797_v3  ;;  %v11762_v22 = vld [vmem:[%s19282_s20 + $0xb0] sm:$0xf0]  ;;  %v9006_v3 = vpop.f32.mrf.mxu0 }
 0x1a3   : > { %v18813_v35 = vld [vmem:[%s19282_s20 + $0x2acc] sm:$0xf0]  ;;  %9283 = vmatpush.bf16.msra.mxu2 %v17169_v36  ;;  %v17025_v39 = vor.u32 %v18781_v9, %v17024_v7  ;;  %v17463_v7 = vld [vmem:[%s19282_s20 + $0xa4] sm:$0xf] }
 0x1a4   : > { %v17153_v41 = vor.u32 %v18813_v35, %v17152_v2  ;;  %v18745_v23 = vld [vmem:[%s19282_s20 + $0x28ac] sm:$0xf0]  ;;  %9258 = vmatpush.bf16.msra.mxu0 %v16897_v17  ;;  %v11765_v1 = vor.u32 %v17463_v7, %v11762_v22  ;;  %v17459_v9 = vld [vmem:[%s19282_s20 + $0x84] sm:$0xf]  ;;  %v11746_v2 = vld [vmem:[%s19282_s20 + $0x90] sm:$0xf0]  ;;  %v9007_v35 = vadd.f32 %v9006_v3, %v20054_v46 }
 0x1a5   : > { %v18777_v43 = vld [vmem:[%s19282_s20 + $0x29ac] sm:$0xf0]  ;;  %v16881_v40 = vor.u32 %v18745_v23, %v16880_v18  ;;  %9271 = vmatpush.bf16.msra.mxu1 %v17025_v39  ;;  %v16976_v23 = vld [vmem:[%s19282_s20 + $0x2960] sm:$0xf]  ;;  %v11730_v7 = vld [vmem:[%s19282_s20 + $0x70] sm:$0xf0] }
 0x1a6   : > { %v18809_v55 = vld [vmem:[%s19282_s20 + $0x2aac] sm:$0xf0]  ;;  %v17009_v56 = vor.u32 %v18777_v43, %v17008_v37  ;;  %9297 = vmatpush.bf16.msra.mxu3 %v11781_v42  ;;  %v11749_v37 = vor.u32 %v17459_v9, %v11746_v2  ;;  %v9020_v42 = vadd.f32 %v9019_v5, %v9007_v35  ;;  %v9045_v9 = vpop.f32.mrf.mxu3  ;;  %v17451_v2 = vld [vmem:[%s19282_s20 + $0x44] sm:$0xf]  ;;  %v11714_v35 = vld [vmem:[%s19282_s20 + $0x50] sm:$0xf0] }
 0x1a7   : > { %9284 = vmatpush.bf16.msra.mxu2 %v17153_v41  ;;  %v17137_v62 = vor.u32 %v18809_v55, %v17136_v44  ;;  %v18741_v63 = vld [vmem:[%s19282_s20 + $0x288c] sm:$0xf0]  ;;  %v16848_v41 = vld [vmem:[%s19282_s20 + $0x2860] sm:$0xf]  ;;  %v17455_v55 = vld [vmem:[%s19282_s20 + $0x64] sm:$0xf] }
 0x1a8   : > { %v18773_v31 = vld [vmem:[%s19282_s20 + $0x298c] sm:$0xf0]  ;;  %9259 = vmatpush.bf16.msra.mxu0 %v16881_v40  ;;  %v16865_v4 = vor.u32 %v18741_v63, %v16864_v57  ;;  %v17104_v44 = vld [vmem:[%s19282_s20 + $0x2a60] sm:$0xf] }
 0x1a9   : > { %v18805_v36 = vld [vmem:[%s19282_s20 + $0x2a8c] sm:$0xf0]  ;;  %9272 = vmatpush.bf16.msra.mxu1 %v17009_v56  ;;  %v16993_v17 = vor.u32 %v18773_v31, %v16992_v48  ;;  %v16960_v63 = vld [vmem:[%s19282_s20 + $0x2940] sm:$0xf]  ;;  %v11733_v48 = vor.u32 %v17455_v55, %v11730_v7  ;;  %v17447_v7 = vld [vmem:[%s19282_s20 + $0x24] sm:$0xf] }
 0x1aa   : > { %v17121_v39 = vor.u32 %v18805_v36, %v17120_v0  ;;  %v18737_v18 = vld [vmem:[%s19282_s20 + $0x286c] sm:$0xf0]  ;;  %9298 = vmatpush.bf16.msra.mxu3 %v11765_v1  ;;  %v9032_v1 = vpop.f32.mrf.mxu2  ;;  %v17088_v0 = vld [vmem:[%s19282_s20 + $0x2a40] sm:$0xf] }
 0x1ab   : > { %9285 = vmatpush.bf16.msra.mxu2 %v17137_v62  ;;  %v18769_v43 = vld [vmem:[%s19282_s20 + $0x296c] sm:$0xf0]  ;;  %v16849_v22 = vor.u32 %v18737_v18, %v16848_v41  ;;  %v16832_v62 = vld [vmem:[%s19282_s20 + $0x2840] sm:$0xf]  ;;  %v9033_v3 = vadd.f32 %v9032_v1, %v9020_v42 }
 0x1ac   : > { %v18801_v46 = vld [vmem:[%s19282_s20 + $0x2a6c] sm:$0xf0]  ;;  %9260 = vmatpush.bf16.msra.mxu0 %v16865_v4  ;;  %v16977_v40 = vor.u32 %v18769_v43, %v16976_v23  ;;  %v9008_v4 = vpop.f32.mrf.mxu0  ;;  %v16816_v23 = vld [vmem:[%s19282_s20 + $0x2820] sm:$0xf]  ;;  %v11717_v43 = vor.u32 %v17451_v2, %v11714_v35  ;;  %v17503_v35 = vld [vmem:[%s19282_s20 + $0x1e4] sm:$0xf] }
 0x1ad   : > { %9273 = vmatpush.bf16.msra.mxu1 %v16993_v17  ;;  %v17105_v56 = vor.u32 %v18801_v46, %v17104_v44  ;;  %v18733_v57 = vld [vmem:[%s19282_s20 + $0x284c] sm:$0xf0]  ;;  %v9021_v17 = vpop.f32.mrf.mxu1  ;;  %v16944_v42 = vld [vmem:[%s19282_s20 + $0x2920] sm:$0xf]  ;;  %v11922_v4 = vld [vmem:[%s19282_s20 + $0x1f0] sm:$0xf0] }
 0x1ae   : > { %9299 = vmatpush.bf16.msra.mxu3 %v11749_v37  ;;  %v18765_v31 = vld [vmem:[%s19282_s20 + $0x294c] sm:$0xf0]  ;;  %v16833_v5 = vor.u32 %v18733_v57, %v16832_v62  ;;  %v17072_v46 = vld [vmem:[%s19282_s20 + $0x2a20] sm:$0xf]  ;;  %v9047_v17 = vpop.f32.mrf.mxu3 }
 0x1af   : > { %9286 = vmatpush.bf16.msra.mxu2 %v17121_v39  ;;  %v18797_v36 = vld [vmem:[%s19282_s20 + $0x2a4c] sm:$0xf0]  ;;  %v20133_v39 = vadd.f32 %v9045_v9, %v9033_v3  ;;  %v16961_v41 = vor.u32 %v18765_v31, %v16960_v63  ;;  %v17056_v31 = vld [vmem:[%s19282_s20 + $0x2a00] sm:$0xf]  ;;  %v17443_v3 = vld [vmem:[%s19282_s20 + $0x4] sm:$0xf] }
 0x1b0   : > { %9261 = vmatpush.bf16.msra.mxu0 %v16849_v22  ;;  %v17089_v18 = vor.u32 %v18797_v36, %v17088_v0  ;;  %v18729_v37 = vld [vmem:[%s19282_s20 + $0x282c] sm:$0xf0]  ;;  %v11698_v22 = vld [vmem:[%s19282_s20 + $0x30] sm:$0xf0] }
 0x1b1   : > { %9274 = vmatpush.bf16.msra.mxu1 %v16977_v40  ;;  %v18761_v44 = vld [vmem:[%s19282_s20 + $0x292c] sm:$0xf0]  ;;  %v16817_v40 = vor.u32 %v18729_v37, %v16816_v23  ;;  %v11701_v0 = vor.u32 %v17447_v7, %v11698_v22  ;;  %v11682_v9 = vld [vmem:[%s19282_s20 + $0x10] sm:$0xf0]  ;;  %v17567_v23 = vld [vmem:[%s19282_s20 + $0x3e4] sm:$0xf]  ;;  %v11925_v7 = vor.u32 %v17503_v35, %v11922_v4 }
 0x1b2   : > { %9300 = vmatpush.bf16.msra.mxu3 %v11733_v48  ;;  %v18793_v55 = vld [vmem:[%s19282_s20 + $0x2a2c] sm:$0xf0]  ;;  %v16945_v57 = vor.u32 %v18761_v44, %v16944_v42  ;;  %v16928_v48 = vld [vmem:[%s19282_s20 + $0x2900] sm:$0xf]  ;;  %v9034_v2 = vpop.f32.mrf.mxu2  ;;  %v12178_v37 = vld [vmem:[%s19282_s20 + $0x3f0] sm:$0xf0] }
 0x1b3   : > { %9287 = vmatpush.bf16.msra.mxu2 %v17105_v56  ;;  %v16800_v56 = vld [vmem:[%s19282_s20 + $0x2800] sm:$0xf]  ;;  %v18725_v62 = vld [vmem:[%s19282_s20 + $0x280c] sm:$0xf0]  ;;  %v17073_v63 = vor.u32 %v18793_v55, %v17072_v46  ;;  %v17599_v44 = vld [vmem:[%s19282_s20 + $0x4e4] sm:$0xf]  ;;  %v11685_v55 = vor.u32 %v17443_v3, %v11682_v9 }
 0x1b4   : > { %9262 = vmatpush.bf16.msra.mxu0 %v16833_v5  ;;  %v18757_v1 = vld [vmem:[%s19282_s20 + $0x290c] sm:$0xf0]  ;;  %v17535_v5 = vld [vmem:[%s19282_s20 + $0x2e4] sm:$0xf]  ;;  %v12306_v46 = vld [vmem:[%s19282_s20 + $0x4f0] sm:$0xf0] }
 0x1b5   : > { %9275 = vmatpush.bf16.msra.mxu1 %v16961_v41  ;;  %v18789_v36 = vld [vmem:[%s19282_s20 + $0x2a0c] sm:$0xf0]  ;;  %v16801_v41 = vor.u32 %v18725_v62, %v16800_v56  ;;  %v16929_v42 = vor.u32 %v18757_v1, %v16928_v48  ;;  %v17499_v56 = vld [vmem:[%s19282_s20 + $0x1c4] sm:$0xf]  ;;  %v11906_v62 = vld [vmem:[%s19282_s20 + $0x1d0] sm:$0xf0] }
 0x1b6   : > { %9301 = vmatpush.bf16.msra.mxu3 %v11717_v43  ;;  %v17057_v43 = vor.u32 %v18789_v36, %v17056_v31  ;;  %v17531_v2 = vld [vmem:[%s19282_s20 + $0x2c4] sm:$0xf]  ;;  %v12034_v17 = vld [vmem:[%s19282_s20 + $0x2d0] sm:$0xf0]  ;;  %v1812_v3 = vld [vmem:[#allocation1 + $0x9] sm:$0xff]  ;;  %v11909_v9 = vor.u32 %v17499_v56, %v11906_v62 }
 0x1b7   : > { %9288 = vmatpush.bf16.msra.mxu2 %v17089_v18  ;;  %v12050_v18 = vld [vmem:[%s19282_s20 + $0x2f0] sm:$0xf0]  ;;  %v17595_v31 = vld [vmem:[%s19282_s20 + $0x4c4] sm:$0xf]  ;;  %v12037_v35 = vor.u32 %v17531_v2, %v12034_v17 }
 0x1b8   : > { %9263 = vmatpush.bf16.msra.mxu0 %v16817_v40  ;;  %v12053_v22 = vor.u32 %v17535_v5, %v12050_v18  ;;  %v12181_v40 = vor.u32 %v17567_v23, %v12178_v37  ;;  %v12162_v48 = vld [vmem:[%s19282_s20 + $0x3d0] sm:$0xf0]  ;;  %v1813_v36 = vld [vmem:[#allocation1 + $0x12] sm:$0xff] }
 0x1b9   : > { %9276 = vmatpush.bf16.msra.mxu1 %v16945_v57  ;;  %v12309_v57 = vor.u32 %v17599_v44, %v12306_v46  ;;  %v1811_v1 = vld [vmem:[#allocation1] sm:$0xff]  ;;  %v17495_v5 = vld [vmem:[%s19282_s20 + $0x1a4] sm:$0xf] }
 0x1ba   : > { %9302 = vmatpush.bf16.msra.mxu3 %v11701_v0  ;;  %v12290_v0 = vld [vmem:[%s19282_s20 + $0x4d0] sm:$0xf0]  ;;  %v17527_v18 = vld [vmem:[%s19282_s20 + $0x2a4] sm:$0xf] }
 0x1bb   : > { %9289 = vmatpush.bf16.msra.mxu2 %v17073_v63  ;;  %v17563_v63 = vld [vmem:[%s19282_s20 + $0x3c4] sm:$0xf]  ;;  %v12293_v23 = vor.u32 %v17595_v31, %v12290_v0  ;;  %v12018_v37 = vld [vmem:[%s19282_s20 + $0x2b0] sm:$0xf0] }
 0x1bc   : > { %9264 = vmatpush.bf16.msra.mxu0 %v16801_v41  ;;  %v12165_v4 = vor.u32 %v17563_v63, %v12162_v48  ;;  %v11890_v41 = vld [vmem:[%s19282_s20 + $0x1b0] sm:$0xf0]  ;;  %v17591_v44 = vld [vmem:[%s19282_s20 + $0x4a4] sm:$0xf]  ;;  %v9058_v48 = vpop.f32.mrf.mxu0 }
 0x1bd   : > { %9277 = vmatpush.bf16.msra.mxu1 %v16929_v42  ;;  %v17559_v42 = vld [vmem:[%s19282_s20 + $0x3a4] sm:$0xf]  ;;  %v12274_v46 = vld [vmem:[%s19282_s20 + $0x4b0] sm:$0xf0]  ;;  %v9059_v0 = vadd.f32 %v9058_v48, %v20133_v39 }
 0x1be   : > { %9303 = vmatpush.bf16.msra.mxu3 %v11685_v55  ;;  %v11893_v55 = vor.u32 %v17495_v5, %v11890_v41  ;;  %v11874_v56 = vld [vmem:[%s19282_s20 + $0x190] sm:$0xf0]  ;;  %v17523_v62 = vld [vmem:[%s19282_s20 + $0x284] sm:$0xf]  ;;  %v12277_v2 = vor.u32 %v17591_v44, %v12274_v46 }
 0x1bf   : > { %9290 = vmatpush.bf16.msra.mxu2 %v17057_v43  ;;  %9265 = vmatmul.bf16.vlgmr.msra.gmra.mxu0 %v1811_v1  ;;  %v12146_v43 = vld [vmem:[%s19282_s20 + $0x3b0] sm:$0xf0]  ;;  %v17555_v17 = vld [vmem:[%s19282_s20 + $0x384] sm:$0xf] }
 0x1c0   : > { %9309 = vmatpush.bf16.msrb.mxu0 %v11925_v7  ;;  %9278 = vmatmul.bf16.vlgmr.msra.gmra.mxu1 %v1812_v3  ;;  %v12021_v7 = vor.u32 %v17527_v18, %v12018_v37  ;;  %v12130_v63 = vld [vmem:[%s19282_s20 + $0x390] sm:$0xf0]  ;;  %v17587_v1 = vld [vmem:[%s19282_s20 + $0x484] sm:$0xf]  ;;  %v9071_v3 = vpop.f32.mrf.mxu1 }
 0x1c1   : > { %9322 = vmatpush.bf16.msrb.mxu1 %v12053_v22  ;;  %9304 = vmatmul.bf16.vlgmr.msra.gmra.mxu3 %v19407_v33  ;;  %v12149_v22 = vor.u32 %v17559_v42, %v12146_v43  ;;  %v12258_v31 = vld [vmem:[%s19282_s20 + $0x490] sm:$0xf0]  ;;  %v17519_v41 = vld [vmem:[%s19282_s20 + $0x264] sm:$0xf] }
 0x1c2   : > { %9348 = vmatpush.bf16.msrb.mxu3 %v12309_v57  ;;  %9291 = vmatmul.bf16.vlgmr.msra.gmra.mxu2 %v1813_v36  ;;  %v12002_v57 = vld [vmem:[%s19282_s20 + $0x290] sm:$0xf0]  ;;  %v12261_v18 = vor.u32 %v17587_v1, %v12258_v31  ;;  %v17551_v42 = vld [vmem:[%s19282_s20 + $0x364] sm:$0xf]  ;;  %v9097_v1 = vpop.f32.mrf.mxu3 }
 0x1c3   : > { %9335 = vmatpush.bf16.msrb.mxu2 %v12181_v40  ;;  %v17491_v40 = vld [vmem:[%s19282_s20 + $0x184] sm:$0xf]  ;;  %v11858_v5 = vld [vmem:[%s19282_s20 + $0x170] sm:$0xf0] }
 0x1c4   : > { %9310 = vmatpush.bf16.msrb.mxu0 %v11909_v9  ;;  %v11877_v36 = vor.u32 %v17491_v40, %v11874_v56  ;;  %v12005_v9 = vor.u32 %v17523_v62, %v12002_v57  ;;  %v11986_v37 = vld [vmem:[%s19282_s20 + $0x270] sm:$0xf0]  ;;  %v17583_v43 = vld [vmem:[%s19282_s20 + $0x464] sm:$0xf] }
 0x1c5   : > { %9323 = vmatpush.bf16.msrb.mxu1 %v12037_v35  ;;  %v12133_v35 = vor.u32 %v17555_v17, %v12130_v63  ;;  %v12114_v39 = vld [vmem:[%s19282_s20 + $0x370] sm:$0xf0]  ;;  %v17515_v56 = vld [vmem:[%s19282_s20 + $0x244] sm:$0xf] }
 0x1c6   : > { %9349 = vmatpush.bf16.msrb.mxu3 %v12293_v23  ;;  %v9072_v23 = vadd.f32 %v9071_v3, %v9059_v0  ;;  %v12242_v44 = vld [vmem:[%s19282_s20 + $0x470] sm:$0xf0]  ;;  %v17547_v17 = vld [vmem:[%s19282_s20 + $0x344] sm:$0xf] }
 0x1c7   : > { %9336 = vmatpush.bf16.msrb.mxu2 %v12165_v4  ;;  %v17487_v4 = vld [vmem:[%s19282_s20 + $0x164] sm:$0xf]  ;;  %v11842_v40 = vld [vmem:[%s19282_s20 + $0x150] sm:$0xf0]  ;;  %v12245_v62 = vor.u32 %v17583_v43, %v12242_v44 }
 0x1c8   : > { %9311 = vmatpush.bf16.msrb.mxu0 %v11893_v55  ;;  %v11861_v46 = vor.u32 %v17487_v4, %v11858_v5  ;;  %v11989_v55 = vor.u32 %v17519_v41, %v11986_v37  ;;  %v11970_v57 = vld [vmem:[%s19282_s20 + $0x250] sm:$0xf0]  ;;  %v17579_v31 = vld [vmem:[%s19282_s20 + $0x444] sm:$0xf] }
 0x1c9   : > { %9324 = vmatpush.bf16.msrb.mxu1 %v12021_v7  ;;  %v12117_v7 = vor.u32 %v17551_v42, %v12114_v39  ;;  %v12098_v63 = vld [vmem:[%s19282_s20 + $0x350] sm:$0xf0]  ;;  %v11973_v4 = vor.u32 %v17515_v56, %v11970_v57  ;;  %v17479_v41 = vld [vmem:[%s19282_s20 + $0x124] sm:$0xf] }
 0x1ca   : > { %9350 = vmatpush.bf16.msrb.mxu3 %v12277_v2  ;;  %v9084_v2 = vpop.f32.mrf.mxu2  ;;  %v12226_v0 = vld [vmem:[%s19282_s20 + $0x450] sm:$0xf0]  ;;  %v12101_v5 = vor.u32 %v17547_v17, %v12098_v63  ;;  %v17543_v39 = vld [vmem:[%s19282_s20 + $0x324] sm:$0xf] }
 0x1cb   : > { %9337 = vmatpush.bf16.msrb.mxu2 %v12149_v22  ;;  %v17483_v22 = vld [vmem:[%s19282_s20 + $0x144] sm:$0xf]  ;;  %v9085_v48 = vadd.f32 %v9084_v2, %v9072_v23  ;;  %v12229_v37 = vor.u32 %v17579_v31, %v12226_v0  ;;  %v11954_v42 = vld [vmem:[%s19282_s20 + $0x230] sm:$0xf0] }
 0x1cc   : > { %9312 = vmatpush.bf16.msrb.mxu0 %v11877_v36  ;;  %v9060_v36 = vpop.f32.mrf.mxu0  ;;  %v11845_v3 = vor.u32 %v17483_v22, %v11842_v40  ;;  %v17511_v23 = vld [vmem:[%s19282_s20 + $0x224] sm:$0xf]  ;;  %v12082_v43 = vld [vmem:[%s19282_s20 + $0x330] sm:$0xf0] }
 0x1cd   : > { %9325 = vmatpush.bf16.msrb.mxu1 %v12005_v9  ;;  %v9073_v9 = vpop.f32.mrf.mxu1  ;;  %v17575_v44 = vld [vmem:[%s19282_s20 + $0x424] sm:$0xf]  ;;  %v11810_v22 = vld [vmem:[%s19282_s20 + $0x110] sm:$0xf0]  ;;  %v11957_v40 = vor.u32 %v17511_v23, %v11954_v42  ;;  %v12085_v56 = vor.u32 %v17543_v39, %v12082_v43 }
 0x1ce   : > { %9351 = vmatpush.bf16.msrb.mxu3 %v12261_v18  ;;  %v11826_v18 = vld [vmem:[%s19282_s20 + $0x130] sm:$0xf0]  ;;  %v17539_v57 = vld [vmem:[%s19282_s20 + $0x304] sm:$0xf]  ;;  %v9099_v9 = vpop.f32.mrf.mxu3 }
 0x1cf   : > { %9338 = vmatpush.bf16.msrb.mxu2 %v12133_v35  ;;  %v20201_v35 = vadd.f32 %v9097_v1, %v9085_v48  ;;  %v11938_v2 = vld [vmem:[%s19282_s20 + $0x210] sm:$0xf0]  ;;  %v17571_v48 = vld [vmem:[%s19282_s20 + $0x404] sm:$0xf] }
 0x1d0   : > { %9313 = vmatpush.bf16.msrb.mxu0 %v11861_v46  ;;  %v12210_v46 = vld [vmem:[%s19282_s20 + $0x430] sm:$0xf0]  ;;  %v17631_v0 = vld [vmem:[%s19282_s20 + $0x5e4] sm:$0xf] }
 0x1d1   : > { %9326 = vmatpush.bf16.msrb.mxu1 %v11989_v55  ;;  %v11829_v55 = vor.u32 %v17479_v41, %v11826_v18  ;;  %v12213_v17 = vor.u32 %v17575_v44, %v12210_v46  ;;  %v12066_v63 = vld [vmem:[%s19282_s20 + $0x310] sm:$0xf0]  ;;  %v17695_v41 = vld [vmem:[%s19282_s20 + $0x7e4] sm:$0xf] }
 0x1d2   : > { %9352 = vmatpush.bf16.msrb.mxu3 %v12245_v62  ;;  %v17507_v62 = vld [vmem:[%s19282_s20 + $0x204] sm:$0xf]  ;;  %v12194_v1 = vld [vmem:[%s19282_s20 + $0x410] sm:$0xf0]  ;;  %v9086_v31 = vpop.f32.mrf.mxu2 }
 0x1d3   : > { %9339 = vmatpush.bf16.msrb.mxu2 %v12117_v7  ;;  %v17475_v7 = vld [vmem:[%s19282_s20 + $0x104] sm:$0xf]  ;;  %v12434_v36 = vld [vmem:[%s19282_s20 + $0x5f0] sm:$0xf0]  ;;  %v11941_v23 = vor.u32 %v17507_v62, %v11938_v2  ;;  %v12197_v43 = vor.u32 %v17571_v48, %v12194_v1 }
 0x1d4   : > { %9314 = vmatpush.bf16.msrb.mxu0 %v11845_v3  ;;  %v17663_v3 = vld [vmem:[%s19282_s20 + $0x6e4] sm:$0xf]  ;;  %v12690_v18 = vld [vmem:[%s19282_s20 + $0x7f0] sm:$0xf0]  ;;  %v12437_v44 = vor.u32 %v17631_v0, %v12434_v36 }
 0x1d5   : > { %9327 = vmatpush.bf16.msrb.mxu1 %v11973_v4  ;;  %v11813_v4 = vor.u32 %v17475_v7, %v11810_v22  ;;  %v17727_v42 = vld [vmem:[%s19282_s20 + $0x8e4] sm:$0xf]  ;;  %v12818_v39 = vld [vmem:[%s19282_s20 + $0x8f0] sm:$0xf0] }
 0x1d6   : > { %9353 = vmatpush.bf16.msrb.mxu3 %v12229_v37  ;;  %v12069_v37 = vor.u32 %v17539_v57, %v12066_v63  ;;  %v17627_v7 = vld [vmem:[%s19282_s20 + $0x5c4] sm:$0xf]  ;;  %v12418_v22 = vld [vmem:[%s19282_s20 + $0x5d0] sm:$0xf0] }
 0x1d7   : > { %9340 = vmatpush.bf16.msrb.mxu2 %v12101_v5  ;;  %v12562_v5 = vld [vmem:[%s19282_s20 + $0x6f0] sm:$0xf0]  ;;  %v17659_v31 = vld [vmem:[%s19282_s20 + $0x6c4] sm:$0xf]  ;;  %v12421_v63 = vor.u32 %v17627_v7, %v12418_v22 }
 0x1d8   : > { %9315 = vmatpush.bf16.msrb.mxu0 %v11829_v55  ;;  %v12565_v46 = vor.u32 %v17663_v3, %v12562_v5  ;;  %v12693_v55 = vor.u32 %v17695_v41, %v12690_v18  ;;  %v17691_v62 = vld [vmem:[%s19282_s20 + $0x7c4] sm:$0xf]  ;;  %v12674_v2 = vld [vmem:[%s19282_s20 + $0x7d0] sm:$0xf0] }
 0x1d9   : > { %9328 = vmatpush.bf16.msrb.mxu1 %v11957_v40  ;;  %v12821_v40 = vor.u32 %v17727_v42, %v12818_v39  ;;  %v17723_v57 = vld [vmem:[%s19282_s20 + $0x8c4] sm:$0xf]  ;;  %v12677_v1 = vor.u32 %v17691_v62, %v12674_v2  ;;  %v12402_v36 = vld [vmem:[%s19282_s20 + $0x5b0] sm:$0xf0] }
 0x1da   : > { %9354 = vmatpush.bf16.msrb.mxu3 %v12213_v17  ;;  %v12802_v17 = vld [vmem:[%s19282_s20 + $0x8d0] sm:$0xf0]  ;;  %v17623_v0 = vld [vmem:[%s19282_s20 + $0x5a4] sm:$0xf] }
 0x1db   : > { %9341 = vmatpush.bf16.msrb.mxu2 %v12085_v56  ;;  %v12546_v56 = vld [vmem:[%s19282_s20 + $0x6d0] sm:$0xf0]  ;;  %v17655_v3 = vld [vmem:[%s19282_s20 + $0x6a4] sm:$0xf]  ;;  %v12805_v9 = vor.u32 %v17723_v57, %v12802_v17  ;;  %v9123_v17 = vpop.f32.mrf.mxu1 }
 0x1dc   : > { %9316 = vmatpush.bf16.msrb.mxu0 %v11813_v4  ;;  %v12549_v48 = vor.u32 %v17659_v31, %v12546_v56  ;;  %v12530_v4 = vld [vmem:[%s19282_s20 + $0x6b0] sm:$0xf0]  ;;  %v17687_v5 = vld [vmem:[%s19282_s20 + $0x7a4] sm:$0xf] }
 0x1dd   : > { %9329 = vmatpush.bf16.msrb.mxu1 %v11941_v23  ;;  %v12658_v41 = vld [vmem:[%s19282_s20 + $0x7b0] sm:$0xf0]  ;;  %v17719_v18 = vld [vmem:[%s19282_s20 + $0x8a4] sm:$0xf]  ;;  %v12533_v42 = vor.u32 %v17655_v3, %v12530_v4 }
 0x1de   : > { %9355 = vmatpush.bf16.msrb.mxu3 %v12197_v43  ;;  %v12786_v23 = vld [vmem:[%s19282_s20 + $0x8b0] sm:$0xf0]  ;;  %v12661_v39 = vor.u32 %v17687_v5, %v12658_v41  ;;  %v17619_v43 = vld [vmem:[%s19282_s20 + $0x584] sm:$0xf] }
 0x1df   : > { %9342 = vmatpush.bf16.msrb.mxu2 %v12069_v37  ;;  %9317 = vmatmul.bf16.vlgmr.msrb.gmra.mxu0 %v19414_v38  ;;  %v12405_v37 = vor.u32 %v17623_v0, %v12402_v36  ;;  %v12514_v7 = vld [vmem:[%s19282_s20 + $0x690] sm:$0xf0]  ;;  %v17683_v22 = vld [vmem:[%s19282_s20 + $0x784] sm:$0xf] }
 0x1e0   : > { %9361 = vmatpush.bf16.msra.mxu0 %v12437_v44  ;;  %9330 = vmatmul.bf16.vlgmr.msrb.gmra.mxu1 %v19405_v32  ;;  %v12386_v44 = vld [vmem:[%s19282_s20 + $0x590] sm:$0xf0]  ;;  %v17715_v56 = vld [vmem:[%s19282_s20 + $0x884] sm:$0xf] }
 0x1e1   : > { %9374 = vmatpush.bf16.msra.mxu1 %v12565_v46  ;;  %9356 = vmatmul.bf16.vlgmr.msrb.gmra.mxu3 %v19446_v12  ;;  %v17651_v46 = vld [vmem:[%s19282_s20 + $0x684] sm:$0xf]  ;;  %v12642_v31 = vld [vmem:[%s19282_s20 + $0x790] sm:$0xf0]  ;;  %v12389_v57 = vor.u32 %v17619_v43, %v12386_v44 }
 0x1e2   : > { %9400 = vmatpush.bf16.msra.mxu3 %v12821_v40  ;;  %9343 = vmatmul.bf16.vlgmr.msrb.gmra.mxu2 %v19409_v34  ;;  %v9110_v40 = vpop.f32.mrf.mxu0  ;;  %v12770_v62 = vld [vmem:[%s19282_s20 + $0x890] sm:$0xf0]  ;;  %v17647_v36 = vld [vmem:[%s19282_s20 + $0x664] sm:$0xf] }
 0x1e3   : > { %9387 = vmatpush.bf16.msra.mxu2 %v12693_v55  ;;  %v12789_v55 = vor.u32 %v17719_v18, %v12786_v23  ;;  %v9111_v2 = vadd.f32 %v9110_v40, %v20201_v35  ;;  %v12370_v0 = vld [vmem:[%s19282_s20 + $0x570] sm:$0xf0]  ;;  %v12773_v3 = vor.u32 %v17715_v56, %v12770_v62  ;;  %v17679_v5 = vld [vmem:[%s19282_s20 + $0x764] sm:$0xf]  ;;  %v9149_v56 = vpop.f32.mrf.mxu3 }
 0x1e4   : > { %9362 = vmatpush.bf16.msra.mxu0 %v12421_v63  ;;  %v12517_v63 = vor.u32 %v17651_v46, %v12514_v7  ;;  %v12498_v4 = vld [vmem:[%s19282_s20 + $0x670] sm:$0xf0]  ;;  %v17711_v41 = vld [vmem:[%s19282_s20 + $0x864] sm:$0xf] }
 0x1e5   : > { %9375 = vmatpush.bf16.msra.mxu1 %v12549_v48  ;;  %v12645_v48 = vor.u32 %v17683_v22, %v12642_v31  ;;  %v12626_v35 = vld [vmem:[%s19282_s20 + $0x770] sm:$0xf0]  ;;  %v17643_v44 = vld [vmem:[%s19282_s20 + $0x644] sm:$0xf] }
 0x1e6   : > { %9401 = vmatpush.bf16.msra.mxu3 %v12805_v9  ;;  %v9124_v9 = vadd.f32 %v9123_v17, %v9111_v2  ;;  %v12754_v18 = vld [vmem:[%s19282_s20 + $0x870] sm:$0xf0]  ;;  %v17675_v22 = vld [vmem:[%s19282_s20 + $0x744] sm:$0xf] }
 0x1e7   : > { %9388 = vmatpush.bf16.msra.mxu2 %v12677_v1  ;;  %v17615_v1 = vld [vmem:[%s19282_s20 + $0x564] sm:$0xf]  ;;  %v12354_v43 = vld [vmem:[%s19282_s20 + $0x550] sm:$0xf0]  ;;  %v12757_v46 = vor.u32 %v17711_v41, %v12754_v18 }
 0x1e8   : > { %9363 = vmatpush.bf16.msra.mxu0 %v12405_v37  ;;  %v12373_v23 = vor.u32 %v17615_v1, %v12370_v0  ;;  %v12501_v37 = vor.u32 %v17647_v36, %v12498_v4  ;;  %v12482_v7 = vld [vmem:[%s19282_s20 + $0x650] sm:$0xf0]  ;;  %v17707_v62 = vld [vmem:[%s19282_s20 + $0x844] sm:$0xf] }
 0x1e9   : > { %9376 = vmatpush.bf16.msra.mxu1 %v12533_v42  ;;  %v12629_v42 = vor.u32 %v17679_v5, %v12626_v35  ;;  %v12610_v31 = vld [vmem:[%s19282_s20 + $0x750] sm:$0xf0]  ;;  %v12485_v1 = vor.u32 %v17643_v44, %v12482_v7  ;;  %v17607_v36 = vld [vmem:[%s19282_s20 + $0x524] sm:$0xf] }
 0x1ea   : > { %9402 = vmatpush.bf16.msra.mxu3 %v12789_v55  ;;  %v9136_v55 = vpop.f32.mrf.mxu2  ;;  %v12738_v2 = vld [vmem:[%s19282_s20 + $0x850] sm:$0xf0]  ;;  %v12613_v0 = vor.u32 %v17675_v22, %v12610_v31  ;;  %v17671_v35 = vld [vmem:[%s19282_s20 + $0x724] sm:$0xf] }
 0x1eb   : > { %9389 = vmatpush.bf16.msra.mxu2 %v12661_v39  ;;  %v17611_v39 = vld [vmem:[%s19282_s20 + $0x544] sm:$0xf]  ;;  %v9137_v40 = vadd.f32 %v9136_v55, %v9124_v9  ;;  %v12741_v4 = vor.u32 %v17707_v62, %v12738_v2  ;;  %v12466_v5 = vld [vmem:[%s19282_s20 + $0x630] sm:$0xf0] }
 0x1ec   : > { %9364 = vmatpush.bf16.msra.mxu0 %v12389_v57  ;;  %v9112_v57 = vpop.f32.mrf.mxu0  ;;  %v12357_v17 = vor.u32 %v17611_v39, %v12354_v43  ;;  %v17639_v9 = vld [vmem:[%s19282_s20 + $0x624] sm:$0xf]  ;;  %v12594_v41 = vld [vmem:[%s19282_s20 + $0x730] sm:$0xf0] }
 0x1ed   : > { %9377 = vmatpush.bf16.msra.mxu1 %v12517_v63  ;;  %v9125_v63 = vpop.f32.mrf.mxu1  ;;  %v17703_v18 = vld [vmem:[%s19282_s20 + $0x824] sm:$0xf]  ;;  %v12322_v39 = vld [vmem:[%s19282_s20 + $0x510] sm:$0xf0]  ;;  %v12469_v43 = vor.u32 %v17639_v9, %v12466_v5  ;;  %v12597_v44 = vor.u32 %v17671_v35, %v12594_v41 }
 0x1ee   : > { %9403 = vmatpush.bf16.msra.mxu3 %v12773_v3  ;;  %v12338_v3 = vld [vmem:[%s19282_s20 + $0x530] sm:$0xf0]  ;;  %v17667_v7 = vld [vmem:[%s19282_s20 + $0x704] sm:$0xf]  ;;  %v9151_v63 = vpop.f32.mrf.mxu3 }
 0x1ef   : > { %9390 = vmatpush.bf16.msra.mxu2 %v12645_v48  ;;  %v20272_v48 = vadd.f32 %v9149_v56, %v9137_v40  ;;  %v12450_v55 = vld [vmem:[%s19282_s20 + $0x610] sm:$0xf0]  ;;  %v17699_v40 = vld [vmem:[%s19282_s20 + $0x804] sm:$0xf] }
 0x1f0   : > { %9365 = vmatpush.bf16.msra.mxu0 %v12373_v23  ;;  %v12722_v23 = vld [vmem:[%s19282_s20 + $0x830] sm:$0xf0]  ;;  %v17759_v2 = vld [vmem:[%s19282_s20 + $0x9e4] sm:$0xf] }
 0x1f1   : > { %9378 = vmatpush.bf16.msra.mxu1 %v12501_v37  ;;  %v12341_v37 = vor.u32 %v17607_v36, %v12338_v3  ;;  %v12725_v22 = vor.u32 %v17703_v18, %v12722_v23  ;;  %v12578_v31 = vld [vmem:[%s19282_s20 + $0x710] sm:$0xf0]  ;;  %v17823_v36 = vld [vmem:[%s19282_s20 + $0xbe4] sm:$0xf] }
 0x1f2   : > { %9404 = vmatpush.bf16.msra.mxu3 %v12757_v46  ;;  %v17635_v46 = vld [vmem:[%s19282_s20 + $0x604] sm:$0xf]  ;;  %v12706_v56 = vld [vmem:[%s19282_s20 + $0x810] sm:$0xf0]  ;;  %v9138_v62 = vpop.f32.mrf.mxu2 }
 0x1f3   : > { %9391 = vmatpush.bf16.msra.mxu2 %v12629_v42  ;;  %v17603_v42 = vld [vmem:[%s19282_s20 + $0x504] sm:$0xf]  ;;  %v12946_v57 = vld [vmem:[%s19282_s20 + $0x9f0] sm:$0xf0]  ;;  %v12453_v9 = vor.u32 %v17635_v46, %v12450_v55  ;;  %v12709_v41 = vor.u32 %v17699_v40, %v12706_v56 }
 0x1f4   : > { %9366 = vmatpush.bf16.msra.mxu0 %v12357_v17  ;;  %v17791_v17 = vld [vmem:[%s19282_s20 + $0xae4] sm:$0xf]  ;;  %v13202_v3 = vld [vmem:[%s19282_s20 + $0xbf0] sm:$0xf0]  ;;  %v12949_v18 = vor.u32 %v17759_v2, %v12946_v57 }
 0x1f5   : > { %9379 = vmatpush.bf16.msra.mxu1 %v12485_v1  ;;  %v12325_v1 = vor.u32 %v17603_v42, %v12322_v39  ;;  %v17855_v5 = vld [vmem:[%s19282_s20 + $0xce4] sm:$0xf]  ;;  %v13330_v35 = vld [vmem:[%s19282_s20 + $0xcf0] sm:$0xf0] }
 0x1f6   : > { %9405 = vmatpush.bf16.msra.mxu3 %v12741_v4  ;;  %v12581_v4 = vor.u32 %v17667_v7, %v12578_v31  ;;  %v17755_v42 = vld [vmem:[%s19282_s20 + $0x9c4] sm:$0xf]  ;;  %v12930_v39 = vld [vmem:[%s19282_s20 + $0x9d0] sm:$0xf0] }
 0x1f7   : > { %9392 = vmatpush.bf16.msra.mxu2 %v12613_v0  ;;  %v13074_v0 = vld [vmem:[%s19282_s20 + $0xaf0] sm:$0xf0]  ;;  %v17787_v62 = vld [vmem:[%s19282_s20 + $0xac4] sm:$0xf]  ;;  %v12933_v31 = vor.u32 %v17755_v42, %v12930_v39 }
 0x1f8   : > { %9367 = vmatpush.bf16.msra.mxu0 %v12341_v37  ;;  %v13077_v23 = vor.u32 %v17791_v17, %v13074_v0  ;;  %v13205_v37 = vor.u32 %v17823_v36, %v13202_v3  ;;  %v17819_v46 = vld [vmem:[%s19282_s20 + $0xbc4] sm:$0xf]  ;;  %v13186_v55 = vld [vmem:[%s19282_s20 + $0xbd0] sm:$0xf0] }
 0x1f9   : > { %9380 = vmatpush.bf16.msra.mxu1 %v12469_v43  ;;  %v13333_v43 = vor.u32 %v17855_v5, %v13330_v35  ;;  %v17851_v7 = vld [vmem:[%s19282_s20 + $0xcc4] sm:$0xf]  ;;  %v13189_v56 = vor.u32 %v17819_v46, %v13186_v55  ;;  %v12914_v57 = vld [vmem:[%s19282_s20 + $0x9b0] sm:$0xf0] }
 0x1fa   : > { %9406 = vmatpush.bf16.msra.mxu3 %v12725_v22  ;;  %v13314_v22 = vld [vmem:[%s19282_s20 + $0xcd0] sm:$0xf0]  ;;  %v17751_v2 = vld [vmem:[%s19282_s20 + $0x9a4] sm:$0xf] }
 0x1fb   : > { %9393 = vmatpush.bf16.msra.mxu2 %v12597_v44  ;;  %v13058_v44 = vld [vmem:[%s19282_s20 + $0xad0] sm:$0xf0]  ;;  %v17783_v17 = vld [vmem:[%s19282_s20 + $0xaa4] sm:$0xf]  ;;  %v13317_v63 = vor.u32 %v17851_v7, %v13314_v22  ;;  %v9175_v22 = vpop.f32.mrf.mxu1 }
 0x1fc   : > { %9368 = vmatpush.bf16.msra.mxu0 %v12325_v1  ;;  %v13061_v40 = vor.u32 %v17787_v62, %v13058_v44  ;;  %v13042_v1 = vld [vmem:[%s19282_s20 + $0xab0] sm:$0xf0]  ;;  %v17815_v0 = vld [vmem:[%s19282_s20 + $0xba4] sm:$0xf] }
 0x1fd   : > { %9381 = vmatpush.bf16.msra.mxu1 %v12453_v9  ;;  %v13170_v36 = vld [vmem:[%s19282_s20 + $0xbb0] sm:$0xf0]  ;;  %v17847_v3 = vld [vmem:[%s19282_s20 + $0xca4] sm:$0xf]  ;;  %v13045_v5 = vor.u32 %v17783_v17, %v13042_v1 }
 0x1fe   : > { %9407 = vmatpush.bf16.msra.mxu3 %v12709_v41  ;;  %v13298_v9 = vld [vmem:[%s19282_s20 + $0xcb0] sm:$0xf0]  ;;  %v13173_v35 = vor.u32 %v17815_v0, %v13170_v36  ;;  %v17747_v41 = vld [vmem:[%s19282_s20 + $0x984] sm:$0xf] }
 0x1ff   : > { %9394 = vmatpush.bf16.msra.mxu2 %v12581_v4  ;;  %9369 = vmatmul.bf16.vlgmr.msra.gmra.mxu0 %v19450_v14  ;;  %v12917_v4 = vor.u32 %v17751_v2, %v12914_v57  ;;  %v13026_v42 = vld [vmem:[%s19282_s20 + $0xa90] sm:$0xf0]  ;;  %v17811_v39 = vld [vmem:[%s19282_s20 + $0xb84] sm:$0xf] }
 0x200   : > { %9413 = vmatpush.bf16.msrb.mxu0 %v12949_v18  ;;  %9382 = vmatmul.bf16.vlgmr.msra.gmra.mxu1 %v19443_v8  ;;  %v12898_v18 = vld [vmem:[%s19282_s20 + $0x990] sm:$0xf0]  ;;  %v17843_v44 = vld [vmem:[%s19282_s20 + $0xc84] sm:$0xf] }
 0x201   : > { %9426 = vmatpush.bf16.msrb.mxu1 %v13077_v23  ;;  %9408 = vmatmul.bf16.vlgmr.msra.gmra.mxu3 %v19536_v24  ;;  %v17779_v23 = vld [vmem:[%s19282_s20 + $0xa84] sm:$0xf]  ;;  %v13154_v62 = vld [vmem:[%s19282_s20 + $0xb90] sm:$0xf0]  ;;  %v12901_v7 = vor.u32 %v17747_v41, %v12898_v18 }
 0x202   : > { %9452 = vmatpush.bf16.msrb.mxu3 %v13333_v43  ;;  %9395 = vmatmul.bf16.vlgmr.msra.gmra.mxu2 %v19448_v13  ;;  %v9162_v43 = vpop.f32.mrf.mxu0  ;;  %v13282_v46 = vld [vmem:[%s19282_s20 + $0xc90] sm:$0xf0]  ;;  %v17775_v57 = vld [vmem:[%s19282_s20 + $0xa64] sm:$0xf] }
 0x203   : > { %9439 = vmatpush.bf16.msrb.mxu2 %v13205_v37  ;;  %v13301_v37 = vor.u32 %v17847_v3, %v13298_v9  ;;  %v9163_v55 = vadd.f32 %v9162_v43, %v20272_v48  ;;  %v12882_v2 = vld [vmem:[%s19282_s20 + $0x970] sm:$0xf0]  ;;  %v13285_v17 = vor.u32 %v17843_v44, %v13282_v46  ;;  %v17807_v0 = vld [vmem:[%s19282_s20 + $0xb64] sm:$0xf] }
 0x204   : > { %9414 = vmatpush.bf16.msrb.mxu0 %v12933_v31  ;;  %v13029_v31 = vor.u32 %v17779_v23, %v13026_v42  ;;  %v13010_v1 = vld [vmem:[%s19282_s20 + $0xa70] sm:$0xf0]  ;;  %v17839_v36 = vld [vmem:[%s19282_s20 + $0xc64] sm:$0xf] }
 0x205   : > { %9427 = vmatpush.bf16.msrb.mxu1 %v13061_v40  ;;  %v13157_v40 = vor.u32 %v17811_v39, %v13154_v62  ;;  %v13138_v48 = vld [vmem:[%s19282_s20 + $0xb70] sm:$0xf0]  ;;  %v17771_v18 = vld [vmem:[%s19282_s20 + $0xa44] sm:$0xf] }
 0x206   : > { %9453 = vmatpush.bf16.msrb.mxu3 %v13317_v63  ;;  %v9176_v63 = vadd.f32 %v9175_v22, %v9163_v55  ;;  %v13266_v3 = vld [vmem:[%s19282_s20 + $0xc70] sm:$0xf0]  ;;  %v17803_v39 = vld [vmem:[%s19282_s20 + $0xb44] sm:$0xf] }
 0x207   : > { %9440 = vmatpush.bf16.msrb.mxu2 %v13189_v56  ;;  %v17743_v56 = vld [vmem:[%s19282_s20 + $0x964] sm:$0xf]  ;;  %v12866_v41 = vld [vmem:[%s19282_s20 + $0x950] sm:$0xf0]  ;;  %v13269_v23 = vor.u32 %v17839_v36, %v13266_v3  ;;  %v9201_v44 = vpop.f32.mrf.mxu3 }
 0x208   : > { %9415 = vmatpush.bf16.msrb.mxu0 %v12917_v4  ;;  %v12885_v9 = vor.u32 %v17743_v56, %v12882_v2  ;;  %v13013_v4 = vor.u32 %v17775_v57, %v13010_v1  ;;  %v12994_v42 = vld [vmem:[%s19282_s20 + $0xa50] sm:$0xf0]  ;;  %v17835_v46 = vld [vmem:[%s19282_s20 + $0xc44] sm:$0xf] }
 0x209   : > { %9428 = vmatpush.bf16.msrb.mxu1 %v13045_v5  ;;  %v13141_v5 = vor.u32 %v17807_v0, %v13138_v48  ;;  %v13122_v62 = vld [vmem:[%s19282_s20 + $0xb50] sm:$0xf0]  ;;  %v12997_v56 = vor.u32 %v17771_v18, %v12994_v42  ;;  %v17735_v57 = vld [vmem:[%s19282_s20 + $0x924] sm:$0xf] }
 0x20a   : > { %9454 = vmatpush.bf16.msrb.mxu3 %v13301_v37  ;;  %v9188_v37 = vpop.f32.mrf.mxu2  ;;  %v13250_v55 = vld [vmem:[%s19282_s20 + $0xc50] sm:$0xf0]  ;;  %v13125_v2 = vor.u32 %v17803_v39, %v13122_v62  ;;  %v17799_v48 = vld [vmem:[%s19282_s20 + $0xb24] sm:$0xf] }
 0x20b   : > { %9441 = vmatpush.bf16.msrb.mxu2 %v13173_v35  ;;  %v17739_v35 = vld [vmem:[%s19282_s20 + $0x944] sm:$0xf]  ;;  %v9189_v43 = vadd.f32 %v9188_v37, %v9176_v63  ;;  %v13253_v1 = vor.u32 %v17835_v46, %v13250_v55  ;;  %v12978_v0 = vld [vmem:[%s19282_s20 + $0xa30] sm:$0xf0] }
 0x20c   : > { %9416 = vmatpush.bf16.msrb.mxu0 %v12901_v7  ;;  %v9164_v7 = vpop.f32.mrf.mxu0  ;;  %v12869_v22 = vor.u32 %v17739_v35, %v12866_v41  ;;  %v17767_v63 = vld [vmem:[%s19282_s20 + $0xa24] sm:$0xf]  ;;  %v13106_v36 = vld [vmem:[%s19282_s20 + $0xb30] sm:$0xf0] }
 0x20d   : > { %9429 = vmatpush.bf16.msrb.mxu1 %v13029_v31  ;;  %v9177_v31 = vpop.f32.mrf.mxu1  ;;  %v17831_v3 = vld [vmem:[%s19282_s20 + $0xc24] sm:$0xf]  ;;  %v12834_v35 = vld [vmem:[%s19282_s20 + $0x910] sm:$0xf0]  ;;  %v12981_v41 = vor.u32 %v17767_v63, %v12978_v0  ;;  %v13109_v18 = vor.u32 %v17799_v48, %v13106_v36 }
 0x20e   : > { %9455 = vmatpush.bf16.msrb.mxu3 %v13285_v17  ;;  %v12850_v17 = vld [vmem:[%s19282_s20 + $0x930] sm:$0xf0]  ;;  %v17795_v42 = vld [vmem:[%s19282_s20 + $0xb04] sm:$0xf] }
 0x20f   : > { %9442 = vmatpush.bf16.msrb.mxu2 %v13157_v40  ;;  %v20343_v40 = vadd.f32 %v9201_v44, %v9189_v43  ;;  %v12962_v37 = vld [vmem:[%s19282_s20 + $0xa10] sm:$0xf0]  ;;  %v17827_v43 = vld [vmem:[%s19282_s20 + $0xc04] sm:$0xf]  ;;  %v9203_v31 = vpop.f32.mrf.mxu3 }
 0x210   : > { %9417 = vmatpush.bf16.msrb.mxu0 %v12885_v9  ;;  %v13234_v9 = vld [vmem:[%s19282_s20 + $0xc30] sm:$0xf0]  ;;  %v17887_v55 = vld [vmem:[%s19282_s20 + $0xde4] sm:$0xf] }
 0x211   : > { %9430 = vmatpush.bf16.msrb.mxu1 %v13013_v4  ;;  %v12853_v4 = vor.u32 %v17735_v57, %v12850_v17  ;;  %v13237_v39 = vor.u32 %v17831_v3, %v13234_v9  ;;  %v13090_v62 = vld [vmem:[%s19282_s20 + $0xb10] sm:$0xf0]  ;;  %v17951_v57 = vld [vmem:[%s19282_s20 + $0xfe4] sm:$0xf] }
 0x212   : > { %9456 = vmatpush.bf16.msrb.mxu3 %v13269_v23  ;;  %v17763_v23 = vld [vmem:[%s19282_s20 + $0xa04] sm:$0xf]  ;;  %v13218_v44 = vld [vmem:[%s19282_s20 + $0xc10] sm:$0xf0]  ;;  %v9190_v46 = vpop.f32.mrf.mxu2 }
 0x213   : > { %9443 = vmatpush.bf16.msrb.mxu2 %v13141_v5  ;;  %v17731_v5 = vld [vmem:[%s19282_s20 + $0x904] sm:$0xf]  ;;  %v13458_v7 = vld [vmem:[%s19282_s20 + $0xdf0] sm:$0xf0]  ;;  %v12965_v63 = vor.u32 %v17763_v23, %v12962_v37  ;;  %v13221_v36 = vor.u32 %v17827_v43, %v13218_v44 }
 0x214   : > { %9418 = vmatpush.bf16.msrb.mxu0 %v12869_v22  ;;  %v17919_v22 = vld [vmem:[%s19282_s20 + $0xee4] sm:$0xf]  ;;  %v13714_v17 = vld [vmem:[%s19282_s20 + $0xff0] sm:$0xf0]  ;;  %v13461_v3 = vor.u32 %v17887_v55, %v13458_v7 }
 0x215   : > { %9431 = vmatpush.bf16.msrb.mxu1 %v12997_v56  ;;  %v12837_v56 = vor.u32 %v17731_v5, %v12834_v35  ;;  %v17983_v0 = vld [vmem:[%s19282_s20 + $0x10e4] sm:$0xf]  ;;  %v13842_v48 = vld [vmem:[%s19282_s20 + $0x10f0] sm:$0xf0] }
 0x216   : > { %9457 = vmatpush.bf16.msrb.mxu3 %v13253_v1  ;;  %v13093_v1 = vor.u32 %v17795_v42, %v13090_v62  ;;  %v17883_v5 = vld [vmem:[%s19282_s20 + $0xdc4] sm:$0xf]  ;;  %v13442_v35 = vld [vmem:[%s19282_s20 + $0xdd0] sm:$0xf0] }
 0x217   : > { %9444 = vmatpush.bf16.msrb.mxu2 %v13125_v2  ;;  %v13586_v2 = vld [vmem:[%s19282_s20 + $0xef0] sm:$0xf0]  ;;  %v17915_v46 = vld [vmem:[%s19282_s20 + $0xec4] sm:$0xf]  ;;  %v13445_v62 = vor.u32 %v17883_v5, %v13442_v35 }
 0x218   : > { %9419 = vmatpush.bf16.msrb.mxu0 %v12853_v4  ;;  %v13589_v9 = vor.u32 %v17919_v22, %v13586_v2  ;;  %v13717_v4 = vor.u32 %v17951_v57, %v13714_v17  ;;  %v17947_v23 = vld [vmem:[%s19282_s20 + $0xfc4] sm:$0xf]  ;;  %v13698_v37 = vld [vmem:[%s19282_s20 + $0xfd0] sm:$0xf0] }
 0x219   : > { %9432 = vmatpush.bf16.msrb.mxu1 %v12981_v41  ;;  %v13845_v41 = vor.u32 %v17983_v0, %v13842_v48  ;;  %v17979_v42 = vld [vmem:[%s19282_s20 + $0x10c4] sm:$0xf]  ;;  %v13701_v44 = vor.u32 %v17947_v23, %v13698_v37  ;;  %v13426_v7 = vld [vmem:[%s19282_s20 + $0xdb0] sm:$0xf0] }
 0x21a   : > { %9458 = vmatpush.bf16.msrb.mxu3 %v13237_v39  ;;  %v13826_v39 = vld [vmem:[%s19282_s20 + $0x10d0] sm:$0xf0]  ;;  %v17879_v55 = vld [vmem:[%s19282_s20 + $0xda4] sm:$0xf] }
 0x21b   : > { %9445 = vmatpush.bf16.msrb.mxu2 %v13109_v18  ;;  %v13570_v18 = vld [vmem:[%s19282_s20 + $0xed0] sm:$0xf0]  ;;  %v17911_v22 = vld [vmem:[%s19282_s20 + $0xea4] sm:$0xf]  ;;  %v13829_v31 = vor.u32 %v17979_v42, %v13826_v39 }
 0x21c   : > { %9420 = vmatpush.bf16.msrb.mxu0 %v12837_v56  ;;  %v13573_v43 = vor.u32 %v17915_v46, %v13570_v18  ;;  %v13554_v56 = vld [vmem:[%s19282_s20 + $0xeb0] sm:$0xf0]  ;;  %v17943_v2 = vld [vmem:[%s19282_s20 + $0xfa4] sm:$0xf]  ;;  %v9227_v39 = vpop.f32.mrf.mxu1 }
 0x21d   : > { %9433 = vmatpush.bf16.msrb.mxu1 %v12965_v63  ;;  %v13682_v57 = vld [vmem:[%s19282_s20 + $0xfb0] sm:$0xf0]  ;;  %v17975_v17 = vld [vmem:[%s19282_s20 + $0x10a4] sm:$0xf]  ;;  %v13557_v0 = vor.u32 %v17911_v22, %v13554_v56 }
 0x21e   : > { %9459 = vmatpush.bf16.msrb.mxu3 %v13221_v36  ;;  %v13810_v63 = vld [vmem:[%s19282_s20 + $0x10b0] sm:$0xf0]  ;;  %v13685_v48 = vor.u32 %v17943_v2, %v13682_v57  ;;  %v17875_v36 = vld [vmem:[%s19282_s20 + $0xd84] sm:$0xf] }
 0x21f   : > { %9446 = vmatpush.bf16.msrb.mxu2 %v13093_v1  ;;  %9421 = vmatmul.bf16.vlgmr.msrb.gmra.mxu0 %v19542_v28  ;;  %v13429_v1 = vor.u32 %v17879_v55, %v13426_v7  ;;  %v13538_v5 = vld [vmem:[%s19282_s20 + $0xe90] sm:$0xf0]  ;;  %v17939_v35 = vld [vmem:[%s19282_s20 + $0xf84] sm:$0xf] }
 0x220   : > { %9465 = vmatpush.bf16.msra.mxu0 %v13461_v3  ;;  %9434 = vmatmul.bf16.vlgmr.msrb.gmra.mxu1 %v19540_v27  ;;  %v13410_v3 = vld [vmem:[%s19282_s20 + $0xd90] sm:$0xf0]  ;;  %v17971_v18 = vld [vmem:[%s19282_s20 + $0x1084] sm:$0xf] }
 0x221   : > { %9478 = vmatpush.bf16.msra.mxu1 %v13589_v9  ;;  %9460 = vmatmul.bf16.vlgmr.msrb.gmra.mxu3 %v19602_v58  ;;  %v17907_v9 = vld [vmem:[%s19282_s20 + $0xe84] sm:$0xf]  ;;  %v13666_v46 = vld [vmem:[%s19282_s20 + $0xf90] sm:$0xf0]  ;;  %v13413_v42 = vor.u32 %v17875_v36, %v13410_v3 }
 0x222   : > { %9504 = vmatpush.bf16.msra.mxu3 %v13845_v41  ;;  %9447 = vmatmul.bf16.vlgmr.msrb.gmra.mxu2 %v19544_v29  ;;  %v9214_v41 = vpop.f32.mrf.mxu0  ;;  %v13794_v23 = vld [vmem:[%s19282_s20 + $0x1090] sm:$0xf0]  ;;  %v17903_v7 = vld [vmem:[%s19282_s20 + $0xe64] sm:$0xf] }
 0x223   : > { %9491 = vmatpush.bf16.msra.mxu2 %v13717_v4  ;;  %v13813_v4 = vor.u32 %v17975_v17, %v13810_v63  ;;  %v9215_v37 = vadd.f32 %v9214_v41, %v20343_v40  ;;  %v13394_v55 = vld [vmem:[%s19282_s20 + $0xd70] sm:$0xf0]  ;;  %v13797_v22 = vor.u32 %v17971_v18, %v13794_v23  ;;  %v17935_v2 = vld [vmem:[%s19282_s20 + $0xf64] sm:$0xf] }
 0x224   : > { %9466 = vmatpush.bf16.msra.mxu0 %v13445_v62  ;;  %v13541_v62 = vor.u32 %v17907_v9, %v13538_v5  ;;  %v13522_v56 = vld [vmem:[%s19282_s20 + $0xe70] sm:$0xf0]  ;;  %v17967_v57 = vld [vmem:[%s19282_s20 + $0x1064] sm:$0xf]  ;;  %v9253_v18 = vpop.f32.mrf.mxu3 }
 0x225   : > { %9479 = vmatpush.bf16.msra.mxu1 %v13573_v43  ;;  %v13669_v43 = vor.u32 %v17939_v35, %v13666_v46  ;;  %v13650_v40 = vld [vmem:[%s19282_s20 + $0xf70] sm:$0xf0]  ;;  %v17899_v3 = vld [vmem:[%s19282_s20 + $0xe44] sm:$0xf] }
 0x226   : > { %9505 = vmatpush.bf16.msra.mxu3 %v13829_v31  ;;  %v9228_v31 = vadd.f32 %v9227_v39, %v9215_v37  ;;  %v13778_v17 = vld [vmem:[%s19282_s20 + $0x1070] sm:$0xf0]  ;;  %v17931_v35 = vld [vmem:[%s19282_s20 + $0xf44] sm:$0xf] }
 0x227   : > { %9492 = vmatpush.bf16.msra.mxu2 %v13701_v44  ;;  %v17871_v44 = vld [vmem:[%s19282_s20 + $0xd64] sm:$0xf]  ;;  %v13378_v36 = vld [vmem:[%s19282_s20 + $0xd50] sm:$0xf0]  ;;  %v13781_v9 = vor.u32 %v17967_v57, %v13778_v17 }
 0x228   : > { %9467 = vmatpush.bf16.msra.mxu0 %v13429_v1  ;;  %v13397_v63 = vor.u32 %v17871_v44, %v13394_v55  ;;  %v13525_v1 = vor.u32 %v17903_v7, %v13522_v56  ;;  %v13506_v5 = vld [vmem:[%s19282_s20 + $0xe50] sm:$0xf0]  ;;  %v17963_v23 = vld [vmem:[%s19282_s20 + $0x1044] sm:$0xf] }
 0x229   : > { %9480 = vmatpush.bf16.msra.mxu1 %v13557_v0  ;;  %v13653_v0 = vor.u32 %v17935_v2, %v13650_v40  ;;  %v13634_v46 = vld [vmem:[%s19282_s20 + $0xf50] sm:$0xf0]  ;;  %v13509_v44 = vor.u32 %v17899_v3, %v13506_v5  ;;  %v17863_v7 = vld [vmem:[%s19282_s20 + $0xd24] sm:$0xf] }
 0x22a   : > { %9506 = vmatpush.bf16.msra.mxu3 %v13813_v4  ;;  %v9240_v4 = vpop.f32.mrf.mxu2  ;;  %v13762_v37 = vld [vmem:[%s19282_s20 + $0x1050] sm:$0xf0]  ;;  %v13637_v55 = vor.u32 %v17931_v35, %v13634_v46  ;;  %v17927_v40 = vld [vmem:[%s19282_s20 + $0xf24] sm:$0xf] }
 0x22b   : > { %9493 = vmatpush.bf16.msra.mxu2 %v13685_v48  ;;  %v17867_v48 = vld [vmem:[%s19282_s20 + $0xd44] sm:$0xf]  ;;  %v9241_v41 = vadd.f32 %v9240_v4, %v9228_v31  ;;  %v13765_v56 = vor.u32 %v17963_v23, %v13762_v37  ;;  %v13490_v2 = vld [vmem:[%s19282_s20 + $0xe30] sm:$0xf0] }
 0x22c   : > { %9468 = vmatpush.bf16.msra.mxu0 %v13413_v42  ;;  %v9216_v42 = vpop.f32.mrf.mxu0  ;;  %v13381_v39 = vor.u32 %v17867_v48, %v13378_v36  ;;  %v17895_v31 = vld [vmem:[%s19282_s20 + $0xe24] sm:$0xf]  ;;  %v13618_v57 = vld [vmem:[%s19282_s20 + $0xf30] sm:$0xf0] }
 0x22d   : > { %9481 = vmatpush.bf16.msra.mxu1 %v13541_v62  ;;  %v9229_v62 = vpop.f32.mrf.mxu1  ;;  %v17959_v17 = vld [vmem:[%s19282_s20 + $0x1024] sm:$0xf]  ;;  %v13346_v48 = vld [vmem:[%s19282_s20 + $0xd10] sm:$0xf0]  ;;  %v13493_v36 = vor.u32 %v17895_v31, %v13490_v2  ;;  %v13621_v3 = vor.u32 %v17927_v40, %v13618_v57 }
 0x22e   : > { %9507 = vmatpush.bf16.msra.mxu3 %v13797_v22  ;;  %v13362_v22 = vld [vmem:[%s19282_s20 + $0xd30] sm:$0xf0]  ;;  %v17923_v5 = vld [vmem:[%s19282_s20 + $0xf04] sm:$0xf]  ;;  %v9255_v62 = vpop.f32.mrf.mxu3 }
 0x22f   : > { %9494 = vmatpush.bf16.msra.mxu2 %v13669_v43  ;;  %v20414_v43 = vadd.f32 %v9253_v18, %v9241_v41  ;;  %v13474_v4 = vld [vmem:[%s19282_s20 + $0xe10] sm:$0xf0]  ;;  %v17955_v41 = vld [vmem:[%s19282_s20 + $0x1004] sm:$0xf] }
 0x230   : > { %9469 = vmatpush.bf16.msra.mxu0 %v13397_v63  ;;  %v13746_v63 = vld [vmem:[%s19282_s20 + $0x1030] sm:$0xf0]  ;;  %v18015_v37 = vld [vmem:[%s19282_s20 + $0x11e4] sm:$0xf] }
 0x231   : > { %9482 = vmatpush.bf16.msra.mxu1 %v13525_v1  ;;  %v13365_v1 = vor.u32 %v17863_v7, %v13362_v22  ;;  %v13749_v35 = vor.u32 %v17959_v17, %v13746_v63  ;;  %v13602_v46 = vld [vmem:[%s19282_s20 + $0xf10] sm:$0xf0]  ;;  %v18079_v7 = vld [vmem:[%s19282_s20 + $0x13e4] sm:$0xf] }
 0x232   : > { %9508 = vmatpush.bf16.msra.mxu3 %v13781_v9  ;;  %v17891_v9 = vld [vmem:[%s19282_s20 + $0xe04] sm:$0xf]  ;;  %v13730_v18 = vld [vmem:[%s19282_s20 + $0x1010] sm:$0xf0]  ;;  %v9242_v23 = vpop.f32.mrf.mxu2 }
 0x233   : > { %9495 = vmatpush.bf16.msra.mxu2 %v13653_v0  ;;  %v17859_v0 = vld [vmem:[%s19282_s20 + $0xd04] sm:$0xf]  ;;  %v13970_v42 = vld [vmem:[%s19282_s20 + $0x11f0] sm:$0xf0]  ;;  %v13477_v31 = vor.u32 %v17891_v9, %v13474_v4  ;;  %v13733_v57 = vor.u32 %v17955_v41, %v13730_v18 }
 0x234   : > { %9470 = vmatpush.bf16.msra.mxu0 %v13381_v39  ;;  %v18047_v39 = vld [vmem:[%s19282_s20 + $0x12e4] sm:$0xf]  ;;  %v14226_v22 = vld [vmem:[%s19282_s20 + $0x13f0] sm:$0xf0]  ;;  %v13973_v17 = vor.u32 %v18015_v37, %v13970_v42 }
 0x235   : > { %9483 = vmatpush.bf16.msra.mxu1 %v13509_v44  ;;  %v13349_v44 = vor.u32 %v17859_v0, %v13346_v48  ;;  %v18111_v2 = vld [vmem:[%s19282_s20 + $0x14e4] sm:$0xf]  ;;  %v14354_v40 = vld [vmem:[%s19282_s20 + $0x14f0] sm:$0xf0] }
 0x236   : > { %9509 = vmatpush.bf16.msra.mxu3 %v13765_v56  ;;  %v13605_v56 = vor.u32 %v17923_v5, %v13602_v46  ;;  %v18011_v0 = vld [vmem:[%s19282_s20 + $0x11c4] sm:$0xf]  ;;  %v13954_v48 = vld [vmem:[%s19282_s20 + $0x11d0] sm:$0xf0] }
 0x237   : > { %9496 = vmatpush.bf16.msra.mxu2 %v13637_v55  ;;  %v14098_v55 = vld [vmem:[%s19282_s20 + $0x12f0] sm:$0xf0]  ;;  %v18043_v23 = vld [vmem:[%s19282_s20 + $0x12c4] sm:$0xf]  ;;  %v13957_v46 = vor.u32 %v18011_v0, %v13954_v48 }
 0x238   : > { %9471 = vmatpush.bf16.msra.mxu0 %v13365_v1  ;;  %v14101_v63 = vor.u32 %v18047_v39, %v14098_v55  ;;  %v14229_v1 = vor.u32 %v18079_v7, %v14226_v22  ;;  %v18075_v9 = vld [vmem:[%s19282_s20 + $0x13c4] sm:$0xf]  ;;  %v14210_v4 = vld [vmem:[%s19282_s20 + $0x13d0] sm:$0xf0] }
 0x239   : > { %9484 = vmatpush.bf16.msra.mxu1 %v13493_v36  ;;  %v14357_v36 = vor.u32 %v18111_v2, %v14354_v40  ;;  %v18107_v5 = vld [vmem:[%s19282_s20 + $0x14c4] sm:$0xf]  ;;  %v14213_v18 = vor.u32 %v18075_v9, %v14210_v4  ;;  %v13938_v42 = vld [vmem:[%s19282_s20 + $0x11b0] sm:$0xf0] }
 0x23a   : > { %9510 = vmatpush.bf16.msra.mxu3 %v13749_v35  ;;  %v14338_v35 = vld [vmem:[%s19282_s20 + $0x14d0] sm:$0xf0]  ;;  %v18007_v37 = vld [vmem:[%s19282_s20 + $0x11a4] sm:$0xf] }
 0x23b   : > { %9497 = vmatpush.bf16.msra.mxu2 %v13621_v3  ;;  %v14082_v3 = vld [vmem:[%s19282_s20 + $0x12d0] sm:$0xf0]  ;;  %v18039_v39 = vld [vmem:[%s19282_s20 + $0x12a4] sm:$0xf]  ;;  %v14341_v62 = vor.u32 %v18107_v5, %v14338_v35 }
 0x23c   : > { %9472 = vmatpush.bf16.msra.mxu0 %v13349_v44  ;;  %v14085_v41 = vor.u32 %v18043_v23, %v14082_v3  ;;  %v14066_v44 = vld [vmem:[%s19282_s20 + $0x12b0] sm:$0xf0]  ;;  %v18071_v55 = vld [vmem:[%s19282_s20 + $0x13a4] sm:$0xf] }
 0x23d   : > { %9485 = vmatpush.bf16.msra.mxu1 %v13477_v31  ;;  %v14194_v7 = vld [vmem:[%s19282_s20 + $0x13b0] sm:$0xf0]  ;;  %v18103_v22 = vld [vmem:[%s19282_s20 + $0x14a4] sm:$0xf]  ;;  %v14069_v2 = vor.u32 %v18039_v39, %v14066_v44  ;;  %v9279_v35 = vpop.f32.mrf.mxu1 }
 0x23e   : > { %9511 = vmatpush.bf16.msra.mxu3 %v13733_v57  ;;  %v14322_v31 = vld [vmem:[%s19282_s20 + $0x14b0] sm:$0xf0]  ;;  %v14197_v40 = vor.u32 %v18071_v55, %v14194_v7  ;;  %v18003_v57 = vld [vmem:[%s19282_s20 + $0x1184] sm:$0xf] }
 0x23f   : > { %9498 = vmatpush.bf16.msra.mxu2 %v13605_v56  ;;  %9473 = vmatmul.bf16.vlgmr.msra.gmra.mxu0 %v19606_v60  ;;  %v13941_v56 = vor.u32 %v18007_v37, %v13938_v42  ;;  %v14050_v0 = vld [vmem:[%s19282_s20 + $0x1290] sm:$0xf0]  ;;  %v18067_v48 = vld [vmem:[%s19282_s20 + $0x1384] sm:$0xf] }
 0x240   : > { %9517 = vmatpush.bf16.msrb.mxu0 %v13973_v17  ;;  %9486 = vmatmul.bf16.vlgmr.msra.gmra.mxu1 %v19604_v59  ;;  %v13922_v17 = vld [vmem:[%s19282_s20 + $0x1190] sm:$0xf0]  ;;  %v18099_v3 = vld [vmem:[%s19282_s20 + $0x1484] sm:$0xf] }
 0x241   : > { %9530 = vmatpush.bf16.msrb.mxu1 %v14101_v63  ;;  %9512 = vmatmul.bf16.vlgmr.msra.gmra.mxu3 %v19689_v21  ;;  %v18035_v63 = vld [vmem:[%s19282_s20 + $0x1284] sm:$0xf]  ;;  %v14178_v23 = vld [vmem:[%s19282_s20 + $0x1390] sm:$0xf0]  ;;  %v13925_v5 = vor.u32 %v18003_v57, %v13922_v17 }
 0x242   : > { %9556 = vmatpush.bf16.msrb.mxu3 %v14357_v36  ;;  %9499 = vmatmul.bf16.vlgmr.msra.gmra.mxu2 %v19608_v61  ;;  %v9266_v36 = vpop.f32.mrf.mxu0  ;;  %v14306_v9 = vld [vmem:[%s19282_s20 + $0x1490] sm:$0xf0]  ;;  %v18031_v42 = vld [vmem:[%s19282_s20 + $0x1264] sm:$0xf] }
 0x243   : > { %9543 = vmatpush.bf16.msrb.mxu2 %v14229_v1  ;;  %v14325_v1 = vor.u32 %v18103_v22, %v14322_v31  ;;  %v9267_v4 = vadd.f32 %v9266_v36, %v20414_v43  ;;  %v13906_v37 = vld [vmem:[%s19282_s20 + $0x1170] sm:$0xf0]  ;;  %v14309_v39 = vor.u32 %v18099_v3, %v14306_v9  ;;  %v18063_v55 = vld [vmem:[%s19282_s20 + $0x1364] sm:$0xf] }
 0x244   : > { %9518 = vmatpush.bf16.msrb.mxu0 %v13957_v46  ;;  %v14053_v46 = vor.u32 %v18035_v63, %v14050_v0  ;;  %v14034_v44 = vld [vmem:[%s19282_s20 + $0x1270] sm:$0xf0]  ;;  %v18095_v7 = vld [vmem:[%s19282_s20 + $0x1464] sm:$0xf] }
 0x245   : > { %9531 = vmatpush.bf16.msrb.mxu1 %v14085_v41  ;;  %v14181_v41 = vor.u32 %v18067_v48, %v14178_v23  ;;  %v14162_v43 = vld [vmem:[%s19282_s20 + $0x1370] sm:$0xf0]  ;;  %v18027_v17 = vld [vmem:[%s19282_s20 + $0x1244] sm:$0xf] }
 0x246   : > { %9557 = vmatpush.bf16.msrb.mxu3 %v14341_v62  ;;  %v9280_v62 = vadd.f32 %v9279_v35, %v9267_v4  ;;  %v14290_v22 = vld [vmem:[%s19282_s20 + $0x1470] sm:$0xf0]  ;;  %v18059_v48 = vld [vmem:[%s19282_s20 + $0x1344] sm:$0xf]  ;;  %v20487_v4 = vpop.f32.mrf.mxu3 }
 0x247   : > { %9544 = vmatpush.bf16.msrb.mxu2 %v14213_v18  ;;  %v17999_v18 = vld [vmem:[%s19282_s20 + $0x1164] sm:$0xf]  ;;  %v13890_v57 = vld [vmem:[%s19282_s20 + $0x1150] sm:$0xf0]  ;;  %v14293_v63 = vor.u32 %v18095_v7, %v14290_v22 }
 0x248   : > { %9519 = vmatpush.bf16.msrb.mxu0 %v13941_v56  ;;  %v13909_v31 = vor.u32 %v17999_v18, %v13906_v37  ;;  %v14037_v56 = vor.u32 %v18031_v42, %v14034_v44  ;;  %v14018_v0 = vld [vmem:[%s19282_s20 + $0x1250] sm:$0xf0]  ;;  %v18091_v3 = vld [vmem:[%s19282_s20 + $0x1444] sm:$0xf] }
 0x249   : > { %9532 = vmatpush.bf16.msrb.mxu1 %v14069_v2  ;;  %v14165_v2 = vor.u32 %v18063_v55, %v14162_v43  ;;  %v14146_v23 = vld [vmem:[%s19282_s20 + $0x1350] sm:$0xf0]  ;;  %v17991_v37 = vld [vmem:[%s19282_s20 + $0x1124] sm:$0xf] }
 0x24a   : > { %9558 = vmatpush.bf16.msrb.mxu3 %v14325_v1  ;;  %v9292_v1 = vpop.f32.mrf.mxu2  ;;  %v14274_v9 = vld [vmem:[%s19282_s20 + $0x1450] sm:$0xf0]  ;;  %v14149_v18 = vor.u32 %v18059_v48, %v14146_v23  ;;  %v18055_v55 = vld [vmem:[%s19282_s20 + $0x1324] sm:$0xf] }
 0x24b   : > { %9545 = vmatpush.bf16.msrb.mxu2 %v14197_v40  ;;  %v17995_v40 = vld [vmem:[%s19282_s20 + $0x1144] sm:$0xf]  ;;  %v20483_v36 = vadd.f32 %v9292_v1, %v9280_v62  ;;  %v13874_v42 = vld [vmem:[%s19282_s20 + $0x1130] sm:$0xf0]  ;;  %v14277_v62 = vor.u32 %v18091_v3, %v14274_v9 }
 0x24c   : > { %9520 = vmatpush.bf16.msrb.mxu0 %v13925_v5  ;;  %v9268_v5 = vpop.f32.mrf.mxu0  ;;  %v13893_v35 = vor.u32 %v17995_v40, %v13890_v57  ;;  %v14002_v44 = vld [vmem:[%s19282_s20 + $0x1230] sm:$0xf0]  ;;  %v18087_v7 = vld [vmem:[%s19282_s20 + $0x1424] sm:$0xf] }
 0x24d   : > { %9533 = vmatpush.bf16.msrb.mxu1 %v14053_v46  ;;  %v9281_v46 = vpop.f32.mrf.mxu1  ;;  %v14130_v43 = vld [vmem:[%s19282_s20 + $0x1330] sm:$0xf0]  ;;  %v18051_v1 = vld [vmem:[%s19282_s20 + $0x1304] sm:$0xf] }
 0x24e   : > { %9559 = vmatpush.bf16.msrb.mxu3 %v14309_v39  ;;  %v18023_v39 = vld [vmem:[%s19282_s20 + $0x1224] sm:$0xf]  ;;  %v14258_v22 = vld [vmem:[%s19282_s20 + $0x1430] sm:$0xf0]  ;;  %v14133_v57 = vor.u32 %v18055_v55, %v14130_v43 }
 0x24f   : > { %9546 = vmatpush.bf16.msrb.mxu2 %v14181_v41  ;;  %v14021_v41 = vor.u32 %v18027_v17, %v14018_v0  ;;  %v14005_v40 = vor.u32 %v18023_v39, %v14002_v44  ;;  %v18019_v17 = vld [vmem:[%s19282_s20 + $0x1204] sm:$0xf]  ;;  %v14261_v0 = vor.u32 %v18087_v7, %v14258_v22  ;;  %v14114_v48 = vld [vmem:[%s19282_s20 + $0x1310] sm:$0xf0] }
 0x250   : > { %9521 = vmatpush.bf16.msrb.mxu0 %v13909_v31  ;;  %v13877_v31 = vor.u32 %v17991_v37, %v13874_v42  ;;  %v18083_v23 = vld [vmem:[%s19282_s20 + $0x1404] sm:$0xf]  ;;  %v14242_v3 = vld [vmem:[%s19282_s20 + $0x1410] sm:$0xf0]  ;;  %v14117_v44 = vor.u32 %v18051_v1, %v14114_v48 }
 0x251   : > { %9534 = vmatpush.bf16.msrb.mxu1 %v14037_v56  ;;  %v17987_v56 = vld [vmem:[%s19282_s20 + $0x1104] sm:$0xf]  ;;  %v14610_v37 = vld [vmem:[%s19282_s20 + $0x16f0] sm:$0xf0]  ;;  %v14245_v7 = vor.u32 %v18083_v23, %v14242_v3 }
 0x252   : > { %9560 = vmatpush.bf16.msrb.mxu3 %v14293_v63  ;;  %v13986_v63 = vld [vmem:[%s19282_s20 + $0x1210] sm:$0xf0]  ;;  %v9294_v9 = vpop.f32.mrf.mxu2  ;;  %v18143_v5 = vld [vmem:[%s19282_s20 + $0x15e4] sm:$0xf] }
 0x253   : > { %9547 = vmatpush.bf16.msrb.mxu2 %v14165_v2  ;;  %v13858_v2 = vld [vmem:[%s19282_s20 + $0x1110] sm:$0xf0]  ;;  %v18175_v46 = vld [vmem:[%s19282_s20 + $0x16e4] sm:$0xf] }
 0x254   : > { %9522 = vmatpush.bf16.msrb.mxu0 %v13893_v35  ;;  %v14482_v35 = vld [vmem:[%s19282_s20 + $0x15f0] sm:$0xf0]  ;;  %v18207_v42 = vld [vmem:[%s19282_s20 + $0x17e4] sm:$0xf] }
 0x255   : > { %9535 = vmatpush.bf16.msrb.mxu1 %v14021_v41  ;;  %v9307_v41 = vpop.f32.mrf.mxu3  ;;  %v14738_v39 = vld [vmem:[%s19282_s20 + $0x17f0] sm:$0xf0]  ;;  %v18239_v55 = vld [vmem:[%s19282_s20 + $0x18e4] sm:$0xf]  ;;  %v14485_v22 = vor.u32 %v18143_v5, %v14482_v35 }
 0x256   : > { %9561 = vmatpush.bf16.msrb.mxu3 %v14277_v62  ;;  %v13989_v62 = vor.u32 %v18019_v17, %v13986_v63  ;;  %v14866_v43 = vld [vmem:[%s19282_s20 + $0x18f0] sm:$0xf0]  ;;  %v18171_v41 = vld [vmem:[%s19282_s20 + $0x16c4] sm:$0xf] }
 0x257   : > { %9548 = vmatpush.bf16.msrb.mxu2 %v14149_v18  ;;  %v13861_v18 = vor.u32 %v17987_v56, %v13858_v2  ;;  %v14741_v56 = vor.u32 %v18207_v42, %v14738_v39  ;;  %v18139_v2 = vld [vmem:[%s19282_s20 + $0x15c4] sm:$0xf]  ;;  %v14466_v9 = vld [vmem:[%s19282_s20 + $0x15d0] sm:$0xf0] }
 0x258   : > { %9523 = vmatpush.bf16.msrb.mxu0 %v13877_v31  ;;  %v14613_v31 = vor.u32 %v18175_v46, %v14610_v37  ;;  %v18203_v17 = vld [vmem:[%s19282_s20 + $0x17c4] sm:$0xf]  ;;  %v14722_v63 = vld [vmem:[%s19282_s20 + $0x17d0] sm:$0xf0]  ;;  %v14469_v48 = vor.u32 %v18139_v2, %v14466_v9 }
 0x259   : > { %9536 = vmatpush.bf16.msrb.mxu1 %v14005_v40  ;;  %v14869_v40 = vor.u32 %v18239_v55, %v14866_v43  ;;  %v18235_v1 = vld [vmem:[%s19282_s20 + $0x18c4] sm:$0xf]  ;;  %v14725_v3 = vor.u32 %v18203_v17, %v14722_v63  ;;  %v14450_v35 = vld [vmem:[%s19282_s20 + $0x15b0] sm:$0xf0] }
 0x25a   : > { %9562 = vmatpush.bf16.msrb.mxu3 %v14261_v0  ;;  %v14850_v0 = vld [vmem:[%s19282_s20 + $0x18d0] sm:$0xf0]  ;;  %v18135_v5 = vld [vmem:[%s19282_s20 + $0x15a4] sm:$0xf] }
 0x25b   : > { %9549 = vmatpush.bf16.msrb.mxu2 %v14133_v57  ;;  %v14594_v57 = vld [vmem:[%s19282_s20 + $0x16d0] sm:$0xf0]  ;;  %v18167_v46 = vld [vmem:[%s19282_s20 + $0x16a4] sm:$0xf]  ;;  %v14453_v55 = vor.u32 %v18135_v5, %v14450_v35 }
 0x25c   : > { %9524 = vmatpush.bf16.msrb.mxu0 %v13861_v18  ;;  %v14597_v23 = vor.u32 %v18171_v41, %v14594_v57  ;;  %v14853_v18 = vor.u32 %v18235_v1, %v14850_v0  ;;  %v14578_v37 = vld [vmem:[%s19282_s20 + $0x16b0] sm:$0xf0]  ;;  %v18199_v42 = vld [vmem:[%s19282_s20 + $0x17a4] sm:$0xf]  ;;  %v9318_v1 = vpop.f32.mrf.mxu0 }
 0x25d   : > { %9537 = vmatpush.bf16.msrb.mxu1 %v13989_v62  ;;  %v14706_v39 = vld [vmem:[%s19282_s20 + $0x17b0] sm:$0xf0]  ;;  %v18231_v62 = vld [vmem:[%s19282_s20 + $0x18a4] sm:$0xf]  ;;  %v14581_v43 = vor.u32 %v18167_v46, %v14578_v37  ;;  %v9319_v35 = vadd.f32 %v9318_v1, %v20487_v4  ;;  %v9331_v46 = vpop.f32.mrf.mxu1 }
 0x25e   : > { %9563 = vmatpush.bf16.msrb.mxu3 %v14245_v7  ;;  %v14709_v7 = vor.u32 %v18199_v42, %v14706_v39  ;;  %v14562_v9 = vld [vmem:[%s19282_s20 + $0x1690] sm:$0xf0]  ;;  %v18195_v41 = vld [vmem:[%s19282_s20 + $0x1784] sm:$0xf] }
 0x25f   : > { %9550 = vmatpush.bf16.msrb.mxu2 %v14117_v44  ;;  %9525 = vmatmul.bf16.vlgmr.msrb.gmra.mxu0 %v19695_v26  ;;  %v14834_v44 = vld [vmem:[%s19282_s20 + $0x18b0] sm:$0xf0]  ;;  %v18227_v57 = vld [vmem:[%s19282_s20 + $0x1884] sm:$0xf] }
 0x260   : > { %9569 = vmatpush.bf16.msra.mxu0 %v14485_v22  ;;  %9538 = vmatmul.bf16.vlgmr.msrb.gmra.mxu1 %v19693_v25  ;;  %v18131_v22 = vld [vmem:[%s19282_s20 + $0x1584] sm:$0xf]  ;;  %v14837_v2 = vor.u32 %v18231_v62, %v14834_v44  ;;  %v14818_v17 = vld [vmem:[%s19282_s20 + $0x1890] sm:$0xf0] }
 0x261   : > { %9582 = vmatpush.bf16.msra.mxu1 %v14613_v31  ;;  %9564 = vmatmul.bf16.vlgmr.msrb.gmra.mxu3 %v19755_v15  ;;  %v14434_v31 = vld [vmem:[%s19282_s20 + $0x1590] sm:$0xf0]  ;;  %v18159_v5 = vld [vmem:[%s19282_s20 + $0x1664] sm:$0xf] }
 0x262   : > { %9608 = vmatpush.bf16.msra.mxu3 %v14869_v40  ;;  %9551 = vmatmul.bf16.vlgmr.msrb.gmra.mxu2 %v19697_v30  ;;  %v14690_v40 = vld [vmem:[%s19282_s20 + $0x1790] sm:$0xf0]  ;;  %v14437_v63 = vor.u32 %v18131_v22, %v14434_v31  ;;  %v18191_v42 = vld [vmem:[%s19282_s20 + $0x1764] sm:$0xf] }
 0x263   : > { %9595 = vmatpush.bf16.msra.mxu2 %v14741_v56  ;;  %v18163_v56 = vld [vmem:[%s19282_s20 + $0x1684] sm:$0xf]  ;;  %v14546_v37 = vld [vmem:[%s19282_s20 + $0x1670] sm:$0xf0] }
 0x264   : > { %9570 = vmatpush.bf16.msra.mxu0 %v14469_v48  ;;  %v14565_v0 = vor.u32 %v18163_v56, %v14562_v9  ;;  %v14693_v48 = vor.u32 %v18195_v41, %v14690_v40  ;;  %v14674_v39 = vld [vmem:[%s19282_s20 + $0x1770] sm:$0xf0]  ;;  %v18223_v62 = vld [vmem:[%s19282_s20 + $0x1864] sm:$0xf]  ;;  %v14549_v4 = vor.u32 %v18159_v5, %v14546_v37 }
 0x265   : > { %9583 = vmatpush.bf16.msra.mxu1 %v14597_v23  ;;  %v18127_v23 = vld [vmem:[%s19282_s20 + $0x1564] sm:$0xf]  ;;  %v14802_v44 = vld [vmem:[%s19282_s20 + $0x1870] sm:$0xf0] }
 0x266   : > { %9609 = vmatpush.bf16.msra.mxu3 %v14853_v18  ;;  %v14821_v18 = vor.u32 %v18227_v57, %v14818_v17  ;;  %v18123_v22 = vld [vmem:[%s19282_s20 + $0x1544] sm:$0xf]  ;;  %v14402_v31 = vld [vmem:[%s19282_s20 + $0x1550] sm:$0xf0]  ;;  %v14805_v9 = vor.u32 %v18223_v62, %v14802_v44 }
 0x267   : > { %9596 = vmatpush.bf16.msra.mxu2 %v14725_v3  ;;  %v14418_v3 = vld [vmem:[%s19282_s20 + $0x1570] sm:$0xf0]  ;;  %v18155_v56 = vld [vmem:[%s19282_s20 + $0x1644] sm:$0xf] }
 0x268   : > { %9571 = vmatpush.bf16.msra.mxu0 %v14453_v55  ;;  %v9332_v55 = vadd.f32 %v9331_v46, %v9319_v35  ;;  %v14530_v41 = vld [vmem:[%s19282_s20 + $0x1650] sm:$0xf0]  ;;  %v18187_v40 = vld [vmem:[%s19282_s20 + $0x1744] sm:$0xf] }
 0x269   : > { %9584 = vmatpush.bf16.msra.mxu1 %v14581_v43  ;;  %v14421_v43 = vor.u32 %v18127_v23, %v14418_v3  ;;  %v14658_v57 = vld [vmem:[%s19282_s20 + $0x1750] sm:$0xf0]  ;;  %v18219_v1 = vld [vmem:[%s19282_s20 + $0x1844] sm:$0xf]  ;;  %v9320_v3 = vpop.f32.mrf.mxu0  ;;  %v14533_v5 = vor.u32 %v18155_v56, %v14530_v41 }
 0x26a   : > { %9610 = vmatpush.bf16.msra.mxu3 %v14837_v2  ;;  %v9344_v2 = vpop.f32.mrf.mxu2  ;;  %v14661_v35 = vor.u32 %v18187_v40, %v14658_v57  ;;  %v18119_v46 = vld [vmem:[%s19282_s20 + $0x1524] sm:$0xf]  ;;  %v14514_v62 = vld [vmem:[%s19282_s20 + $0x1630] sm:$0xf0] }
 0x26b   : > { %9597 = vmatpush.bf16.msra.mxu2 %v14709_v7  ;;  %v14677_v7 = vor.u32 %v18191_v42, %v14674_v39  ;;  %v9345_v17 = vadd.f32 %v9344_v2, %v9332_v55  ;;  %v18151_v37 = vld [vmem:[%s19282_s20 + $0x1624] sm:$0xf]  ;;  %v9333_v42 = vpop.f32.mrf.mxu1  ;;  %v14642_v55 = vld [vmem:[%s19282_s20 + $0x1730] sm:$0xf0] }
 0x26c   : > { %9572 = vmatpush.bf16.msra.mxu0 %v14437_v63  ;;  %v9357_v63 = vpop.f32.mrf.mxu3  ;;  %v18183_v44 = vld [vmem:[%s19282_s20 + $0x1724] sm:$0xf]  ;;  %v14517_v56 = vor.u32 %v18151_v37, %v14514_v62  ;;  %v14498_v41 = vld [vmem:[%s19282_s20 + $0x1610] sm:$0xf0] }
 0x26d   : > { %9585 = vmatpush.bf16.msra.mxu1 %v14565_v0  ;;  %v14786_v0 = vld [vmem:[%s19282_s20 + $0x1850] sm:$0xf0]  ;;  %v20558_v23 = vadd.f32 %v9357_v63, %v9345_v17  ;;  %v14645_v2 = vor.u32 %v18183_v44, %v14642_v55  ;;  %v18179_v40 = vld [vmem:[%s19282_s20 + $0x1704] sm:$0xf] }
 0x26e   : > { %9611 = vmatpush.bf16.msra.mxu3 %v14821_v18  ;;  %v14386_v18 = vld [vmem:[%s19282_s20 + $0x1530] sm:$0xf0]  ;;  %v14789_v39 = vor.u32 %v18219_v1, %v14786_v0  ;;  %v18211_v1 = vld [vmem:[%s19282_s20 + $0x1804] sm:$0xf] }
 0x26f   : > { %9598 = vmatpush.bf16.msra.mxu2 %v14693_v48  ;;  %v14405_v48 = vor.u32 %v18123_v22, %v14402_v31  ;;  %v18115_v22 = vld [vmem:[%s19282_s20 + $0x1504] sm:$0xf]  ;;  %v14370_v31 = vld [vmem:[%s19282_s20 + $0x1510] sm:$0xf0] }
 0x270   : > { %9573 = vmatpush.bf16.msra.mxu0 %v14421_v43  ;;  %v18215_v43 = vld [vmem:[%s19282_s20 + $0x1824] sm:$0xf]  ;;  %v14626_v63 = vld [vmem:[%s19282_s20 + $0x1710] sm:$0xf0] }
 0x271   : > { %9586 = vmatpush.bf16.msra.mxu1 %v14549_v4  ;;  %v14770_v4 = vld [vmem:[%s19282_s20 + $0x1830] sm:$0xf0]  ;;  %v18271_v3 = vld [vmem:[%s19282_s20 + $0x19e4] sm:$0xf]  ;;  %v14629_v62 = vor.u32 %v18179_v40, %v14626_v63 }
 0x272   : > { %9612 = vmatpush.bf16.msra.mxu3 %v14805_v9  ;;  %v18147_v9 = vld [vmem:[%s19282_s20 + $0x1604] sm:$0xf]  ;;  %v9346_v57 = vpop.f32.mrf.mxu2  ;;  %v14773_v17 = vor.u32 %v18215_v43, %v14770_v4  ;;  %v14754_v0 = vld [vmem:[%s19282_s20 + $0x1810] sm:$0xf0] }
 0x273   : > { %9599 = vmatpush.bf16.msra.mxu2 %v14677_v7  ;;  %v14389_v7 = vor.u32 %v18119_v46, %v14386_v18  ;;  %v14373_v46 = vor.u32 %v18115_v22, %v14370_v31  ;;  %v15122_v18 = vld [vmem:[%s19282_s20 + $0x1af0] sm:$0xf0]  ;;  %v18335_v37 = vld [vmem:[%s19282_s20 + $0x1be4] sm:$0xf]  ;;  %v14757_v43 = vor.u32 %v18211_v1, %v14754_v0 }
 0x274   : > { %9574 = vmatpush.bf16.msra.mxu0 %v14405_v48  ;;  %v9359_v48 = vpop.f32.mrf.mxu3  ;;  %v15250_v42 = vld [vmem:[%s19282_s20 + $0x1bf0] sm:$0xf0]  ;;  %v18367_v44 = vld [vmem:[%s19282_s20 + $0x1ce4] sm:$0xf] }
 0x275   : > { %9587 = vmatpush.bf16.msra.mxu1 %v14533_v5  ;;  %v14994_v5 = vld [vmem:[%s19282_s20 + $0x19f0] sm:$0xf0]  ;;  %v15253_v22 = vor.u32 %v18335_v37, %v15250_v42  ;;  %v18267_v31 = vld [vmem:[%s19282_s20 + $0x19c4] sm:$0xf] }
 0x276   : > { %9613 = vmatpush.bf16.msra.mxu3 %v14789_v39  ;;  %v14501_v39 = vor.u32 %v18147_v9, %v14498_v41  ;;  %v15378_v55 = vld [vmem:[%s19282_s20 + $0x1cf0] sm:$0xf0]  ;;  %v14997_v4 = vor.u32 %v18271_v3, %v14994_v5  ;;  %v18299_v48 = vld [vmem:[%s19282_s20 + $0x1ac4] sm:$0xf] }
 0x277   : > { %9600 = vmatpush.bf16.msra.mxu2 %v14661_v35  ;;  %v18303_v35 = vld [vmem:[%s19282_s20 + $0x1ae4] sm:$0xf]  ;;  %v14978_v57 = vld [vmem:[%s19282_s20 + $0x19d0] sm:$0xf0] }
 0x278   : > { %9575 = vmatpush.bf16.msra.mxu0 %v14389_v7  ;;  %v15125_v7 = vor.u32 %v18303_v35, %v15122_v18  ;;  %v18331_v9 = vld [vmem:[%s19282_s20 + $0x1bc4] sm:$0xf]  ;;  %v15234_v41 = vld [vmem:[%s19282_s20 + $0x1bd0] sm:$0xf0]  ;;  %v14981_v63 = vor.u32 %v18267_v31, %v14978_v57 }
 0x279   : > { %9588 = vmatpush.bf16.msra.mxu1 %v14517_v56  ;;  %v15381_v56 = vor.u32 %v18367_v44, %v15378_v55  ;;  %v18363_v40 = vld [vmem:[%s19282_s20 + $0x1cc4] sm:$0xf]  ;;  %v15237_v0 = vor.u32 %v18331_v9, %v15234_v41  ;;  %v14962_v5 = vld [vmem:[%s19282_s20 + $0x19b0] sm:$0xf0] }
 0x27a   : > { %9614 = vmatpush.bf16.msra.mxu3 %v14773_v17  ;;  %v15362_v17 = vld [vmem:[%s19282_s20 + $0x1cd0] sm:$0xf0]  ;;  %v18263_v3 = vld [vmem:[%s19282_s20 + $0x19a4] sm:$0xf] }
 0x27b   : > { %9601 = vmatpush.bf16.msra.mxu2 %v14645_v2  ;;  %v15106_v2 = vld [vmem:[%s19282_s20 + $0x1ad0] sm:$0xf0]  ;;  %v18295_v35 = vld [vmem:[%s19282_s20 + $0x1aa4] sm:$0xf]  ;;  %v14965_v44 = vor.u32 %v18263_v3, %v14962_v5 }
 0x27c   : > { %9576 = vmatpush.bf16.msra.mxu0 %v14373_v46  ;;  %v15109_v1 = vor.u32 %v18299_v48, %v15106_v2  ;;  %v15365_v46 = vor.u32 %v18363_v40, %v15362_v17  ;;  %v15090_v18 = vld [vmem:[%s19282_s20 + $0x1ab0] sm:$0xf0]  ;;  %v18327_v37 = vld [vmem:[%s19282_s20 + $0x1ba4] sm:$0xf]  ;;  %v9370_v2 = vpop.f32.mrf.mxu0 }
 0x27d   : > { %9589 = vmatpush.bf16.msra.mxu1 %v14501_v39  ;;  %v15218_v42 = vld [vmem:[%s19282_s20 + $0x1bb0] sm:$0xf0]  ;;  %v18359_v39 = vld [vmem:[%s19282_s20 + $0x1ca4] sm:$0xf]  ;;  %v15093_v55 = vor.u32 %v18295_v35, %v15090_v18  ;;  %v9371_v40 = vadd.f32 %v9370_v2, %v20558_v23 }
 0x27e   : > { %9615 = vmatpush.bf16.msra.mxu3 %v14757_v43  ;;  %v15221_v43 = vor.u32 %v18327_v37, %v15218_v42  ;;  %v15074_v57 = vld [vmem:[%s19282_s20 + $0x1a90] sm:$0xf0]  ;;  %v18323_v48 = vld [vmem:[%s19282_s20 + $0x1b84] sm:$0xf] }
 0x27f   : > { %9602 = vmatpush.bf16.msra.mxu2 %v14629_v62  ;;  %9577 = vmatmul.bf16.vlgmr.msra.gmra.mxu0 %v19759_v19  ;;  %v15346_v62 = vld [vmem:[%s19282_s20 + $0x1cb0] sm:$0xf0]  ;;  %v18355_v9 = vld [vmem:[%s19282_s20 + $0x1c84] sm:$0xf] }
 0x280   : > { %9621 = vmatpush.bf16.msrb.mxu0 %v14997_v4  ;;  %9590 = vmatmul.bf16.vlgmr.msra.gmra.mxu1 %v19757_v16  ;;  %v18259_v4 = vld [vmem:[%s19282_s20 + $0x1984] sm:$0xf]  ;;  %v15349_v31 = vor.u32 %v18359_v39, %v15346_v62  ;;  %v15330_v41 = vld [vmem:[%s19282_s20 + $0x1c90] sm:$0xf0] }
 0x281   : > { %9634 = vmatpush.bf16.msrb.mxu1 %v15125_v7  ;;  %9616 = vmatmul.bf16.vlgmr.msra.gmra.mxu3 %v19847_v47  ;;  %v14946_v7 = vld [vmem:[%s19282_s20 + $0x1990] sm:$0xf0]  ;;  %v18255_v3 = vld [vmem:[%s19282_s20 + $0x1964] sm:$0xf] }
 0x282   : > { %9660 = vmatpush.bf16.msrb.mxu3 %v15381_v56  ;;  %9603 = vmatmul.bf16.vlgmr.msra.gmra.mxu2 %v19761_v20  ;;  %v15202_v56 = vld [vmem:[%s19282_s20 + $0x1b90] sm:$0xf0]  ;;  %v14949_v17 = vor.u32 %v18259_v4, %v14946_v7  ;;  %v18287_v35 = vld [vmem:[%s19282_s20 + $0x1a64] sm:$0xf] }
 0x283   : > { %9647 = vmatpush.bf16.msrb.mxu2 %v15253_v22  ;;  %v18291_v22 = vld [vmem:[%s19282_s20 + $0x1a84] sm:$0xf]  ;;  %v14930_v5 = vld [vmem:[%s19282_s20 + $0x1970] sm:$0xf0] }
 0x284   : > { %9622 = vmatpush.bf16.msrb.mxu0 %v14981_v63  ;;  %v9383_v63 = vpop.f32.mrf.mxu1  ;;  %v15058_v37 = vld [vmem:[%s19282_s20 + $0x1a70] sm:$0xf0]  ;;  %v18319_v42 = vld [vmem:[%s19282_s20 + $0x1b64] sm:$0xf] }
 0x285   : > { %9635 = vmatpush.bf16.msrb.mxu1 %v15109_v1  ;;  %v15077_v1 = vor.u32 %v18291_v22, %v15074_v57  ;;  %v9384_v18 = vadd.f32 %v9383_v63, %v9371_v40  ;;  %v15186_v23 = vld [vmem:[%s19282_s20 + $0x1b70] sm:$0xf0]  ;;  %v18351_v39 = vld [vmem:[%s19282_s20 + $0x1c64] sm:$0xf]  ;;  %v9396_v57 = vpop.f32.mrf.mxu2  ;;  %v9372_v63 = vpop.f32.mrf.mxu0 }
 0x286   : > { %9661 = vmatpush.bf16.msrb.mxu3 %v15365_v46  ;;  %v15333_v46 = vor.u32 %v18355_v9, %v15330_v41  ;;  %v15314_v62 = vld [vmem:[%s19282_s20 + $0x1c70] sm:$0xf0]  ;;  %v18251_v4 = vld [vmem:[%s19282_s20 + $0x1944] sm:$0xf]  ;;  %v9409_v41 = vpop.f32.mrf.mxu3 }
 0x287   : > { %9648 = vmatpush.bf16.msrb.mxu2 %v15237_v0  ;;  %v15205_v0 = vor.u32 %v18323_v48, %v15202_v56  ;;  %v14914_v7 = vld [vmem:[%s19282_s20 + $0x1950] sm:$0xf0]  ;;  %v18283_v22 = vld [vmem:[%s19282_s20 + $0x1a44] sm:$0xf]  ;;  %v9397_v9 = vadd.f32 %v9396_v57, %v9384_v18 }
 0x288   : > { %9623 = vmatpush.bf16.msrb.mxu0 %v14965_v44  ;;  %v14933_v44 = vor.u32 %v18255_v3, %v14930_v5  ;;  %v15042_v48 = vld [vmem:[%s19282_s20 + $0x1a50] sm:$0xf0]  ;;  %v18315_v56 = vld [vmem:[%s19282_s20 + $0x1b44] sm:$0xf] }
 0x289   : > { %9636 = vmatpush.bf16.msrb.mxu1 %v15093_v55  ;;  %v15061_v55 = vor.u32 %v18287_v35, %v15058_v37  ;;  %v15170_v2 = vld [vmem:[%s19282_s20 + $0x1b50] sm:$0xf0]  ;;  %v18347_v40 = vld [vmem:[%s19282_s20 + $0x1c44] sm:$0xf]  ;;  %v20629_v3 = vadd.f32 %v9409_v41, %v9397_v9  ;;  %v15045_v5 = vor.u32 %v18283_v22, %v15042_v48 }
 0x28a   : > { %9662 = vmatpush.bf16.msrb.mxu3 %v15349_v31  ;;  %v15317_v31 = vor.u32 %v18351_v39, %v15314_v62  ;;  %v15173_v35 = vor.u32 %v18315_v56, %v15170_v2  ;;  %v14898_v18 = vld [vmem:[%s19282_s20 + $0x1930] sm:$0xf0]  ;;  %v18279_v37 = vld [vmem:[%s19282_s20 + $0x1a24] sm:$0xf] }
 0x28b   : > { %9649 = vmatpush.bf16.msrb.mxu2 %v15221_v43  ;;  %v15189_v43 = vor.u32 %v18319_v42, %v15186_v23  ;;  %v15026_v23 = vld [vmem:[%s19282_s20 + $0x1a30] sm:$0xf0]  ;;  %v18311_v39 = vld [vmem:[%s19282_s20 + $0x1b24] sm:$0xf] }
 0x28c   : > { %9624 = vmatpush.bf16.msrb.mxu0 %v14949_v17  ;;  %v15298_v17 = vld [vmem:[%s19282_s20 + $0x1c50] sm:$0xf0]  ;;  %v15029_v22 = vor.u32 %v18279_v37, %v15026_v23  ;;  %v18275_v57 = vld [vmem:[%s19282_s20 + $0x1a04] sm:$0xf] }
 0x28d   : > { %9637 = vmatpush.bf16.msrb.mxu1 %v15077_v1  ;;  %v14917_v1 = vor.u32 %v18251_v4, %v14914_v7  ;;  %v15301_v42 = vor.u32 %v18347_v40, %v15298_v17  ;;  %v15154_v62 = vld [vmem:[%s19282_s20 + $0x1b30] sm:$0xf0]  ;;  %v18243_v4 = vld [vmem:[%s19282_s20 + $0x1904] sm:$0xf]  ;;  %v9398_v17 = vpop.f32.mrf.mxu2 }
 0x28e   : > { %9663 = vmatpush.bf16.msrb.mxu3 %v15333_v46  ;;  %v18247_v46 = vld [vmem:[%s19282_s20 + $0x1924] sm:$0xf]  ;;  %v14882_v7 = vld [vmem:[%s19282_s20 + $0x1910] sm:$0xf0] }
 0x28f   : > { %9650 = vmatpush.bf16.msrb.mxu2 %v15205_v0  ;;  %v9385_v0 = vpop.f32.mrf.mxu1  ;;  %v15010_v48 = vld [vmem:[%s19282_s20 + $0x1a10] sm:$0xf0]  ;;  %v18307_v56 = vld [vmem:[%s19282_s20 + $0x1b04] sm:$0xf] }
 0x290   : > { %9625 = vmatpush.bf16.msrb.mxu0 %v14933_v44  ;;  %v18343_v44 = vld [vmem:[%s19282_s20 + $0x1c24] sm:$0xf]  ;;  %v15138_v9 = vld [vmem:[%s19282_s20 + $0x1b10] sm:$0xf0] }
 0x291   : > { %9638 = vmatpush.bf16.msrb.mxu1 %v15061_v55  ;;  %v15282_v55 = vld [vmem:[%s19282_s20 + $0x1c30] sm:$0xf0]  ;;  %v18339_v41 = vld [vmem:[%s19282_s20 + $0x1c04] sm:$0xf]  ;;  %v15141_v23 = vor.u32 %v18307_v56, %v15138_v9 }
 0x292   : > { %9664 = vmatpush.bf16.msrb.mxu3 %v15317_v31  ;;  %v15157_v31 = vor.u32 %v18311_v39, %v15154_v62  ;;  %v15285_v2 = vor.u32 %v18343_v44, %v15282_v55  ;;  %v15266_v40 = vld [vmem:[%s19282_s20 + $0x1c10] sm:$0xf0]  ;;  %v18399_v63 = vld [vmem:[%s19282_s20 + $0x1de4] sm:$0xf] }
 0x293   : > { %9651 = vmatpush.bf16.msrb.mxu2 %v15189_v43  ;;  %v14901_v43 = vor.u32 %v18247_v46, %v14898_v18  ;;  %v18431_v0 = vld [vmem:[%s19282_s20 + $0x1ee4] sm:$0xf]  ;;  %v15634_v46 = vld [vmem:[%s19282_s20 + $0x1ef0] sm:$0xf0]  ;;  %v15269_v44 = vor.u32 %v18339_v41, %v15266_v40 }
 0x294   : > { %9626 = vmatpush.bf16.msrb.mxu0 %v14917_v1  ;;  %v15506_v1 = vld [vmem:[%s19282_s20 + $0x1df0] sm:$0xf0]  ;;  %v18463_v18 = vld [vmem:[%s19282_s20 + $0x1fe4] sm:$0xf] }
 0x295   : > { %9639 = vmatpush.bf16.msrb.mxu1 %v15045_v5  ;;  %v9411_v5 = vpop.f32.mrf.mxu3  ;;  %v15762_v37 = vld [vmem:[%s19282_s20 + $0x1ff0] sm:$0xf0]  ;;  %v18495_v39 = vld [vmem:[%s19282_s20 + $0x20e4] sm:$0xf]  ;;  %v15509_v55 = vor.u32 %v18399_v63, %v15506_v1 }
 0x296   : > { %9665 = vmatpush.bf16.msrb.mxu3 %v15301_v42  ;;  %v15013_v42 = vor.u32 %v18275_v57, %v15010_v48  ;;  %v15890_v62 = vld [vmem:[%s19282_s20 + $0x20f0] sm:$0xf0]  ;;  %v18427_v5 = vld [vmem:[%s19282_s20 + $0x1ec4] sm:$0xf] }
 0x297   : > { %9652 = vmatpush.bf16.msrb.mxu2 %v15173_v35  ;;  %v14885_v35 = vor.u32 %v18243_v4, %v14882_v7  ;;  %v15765_v4 = vor.u32 %v18463_v18, %v15762_v37  ;;  %v18395_v7 = vld [vmem:[%s19282_s20 + $0x1dc4] sm:$0xf]  ;;  %v15490_v17 = vld [vmem:[%s19282_s20 + $0x1dd0] sm:$0xf0] }
 0x298   : > { %9627 = vmatpush.bf16.msrb.mxu0 %v14901_v43  ;;  %v15637_v43 = vor.u32 %v18431_v0, %v15634_v46  ;;  %v18459_v57 = vld [vmem:[%s19282_s20 + $0x1fc4] sm:$0xf]  ;;  %v15746_v48 = vld [vmem:[%s19282_s20 + $0x1fd0] sm:$0xf0]  ;;  %v15493_v9 = vor.u32 %v18395_v7, %v15490_v17 }
 0x299   : > { %9640 = vmatpush.bf16.msrb.mxu1 %v15029_v22  ;;  %v15893_v22 = vor.u32 %v18495_v39, %v15890_v62  ;;  %v18491_v56 = vld [vmem:[%s19282_s20 + $0x20c4] sm:$0xf]  ;;  %v15749_v40 = vor.u32 %v18459_v57, %v15746_v48  ;;  %v15474_v1 = vld [vmem:[%s19282_s20 + $0x1db0] sm:$0xf0] }
 0x29a   : > { %9666 = vmatpush.bf16.msrb.mxu3 %v15285_v2  ;;  %v15874_v2 = vld [vmem:[%s19282_s20 + $0x20d0] sm:$0xf0]  ;;  %v18391_v63 = vld [vmem:[%s19282_s20 + $0x1da4] sm:$0xf] }
 0x29b   : > { %9653 = vmatpush.bf16.msrb.mxu2 %v15157_v31  ;;  %v15618_v31 = vld [vmem:[%s19282_s20 + $0x1ed0] sm:$0xf0]  ;;  %v18423_v0 = vld [vmem:[%s19282_s20 + $0x1ea4] sm:$0xf]  ;;  %v15477_v39 = vor.u32 %v18391_v63, %v15474_v1 }
 0x29c   : > { %9628 = vmatpush.bf16.msrb.mxu0 %v14885_v35  ;;  %v15621_v41 = vor.u32 %v18427_v5, %v15618_v31  ;;  %v15877_v35 = vor.u32 %v18491_v56, %v15874_v2  ;;  %v15602_v46 = vld [vmem:[%s19282_s20 + $0x1eb0] sm:$0xf0]  ;;  %v18455_v18 = vld [vmem:[%s19282_s20 + $0x1fa4] sm:$0xf]  ;;  %v9422_v31 = vpop.f32.mrf.mxu0 }
 0x29d   : > { %9641 = vmatpush.bf16.msrb.mxu1 %v15013_v42  ;;  %v15730_v37 = vld [vmem:[%s19282_s20 + $0x1fb0] sm:$0xf0]  ;;  %v18487_v42 = vld [vmem:[%s19282_s20 + $0x20a4] sm:$0xf]  ;;  %v15605_v62 = vor.u32 %v18423_v0, %v15602_v46  ;;  %v9423_v56 = vadd.f32 %v9422_v31, %v20629_v3 }
 0x29e   : > { %9667 = vmatpush.bf16.msrb.mxu3 %v15269_v44  ;;  %v15733_v44 = vor.u32 %v18455_v18, %v15730_v37  ;;  %v15586_v17 = vld [vmem:[%s19282_s20 + $0x1e90] sm:$0xf0]  ;;  %v18451_v5 = vld [vmem:[%s19282_s20 + $0x1f84] sm:$0xf] }
 0x29f   : > { %9654 = vmatpush.bf16.msrb.mxu2 %v15141_v23  ;;  %9629 = vmatmul.bf16.vlgmr.msrb.gmra.mxu0 %v19853_v51  ;;  %v15858_v23 = vld [vmem:[%s19282_s20 + $0x20b0] sm:$0xf0]  ;;  %v18483_v57 = vld [vmem:[%s19282_s20 + $0x2084] sm:$0xf] }
 0x2a0   : > { %9673 = vmatpush.bf16.msra.mxu0 %v15509_v55  ;;  %9642 = vmatmul.bf16.vlgmr.msrb.gmra.mxu1 %v19851_v50  ;;  %v18387_v55 = vld [vmem:[%s19282_s20 + $0x1d84] sm:$0xf]  ;;  %v15861_v7 = vor.u32 %v18487_v42, %v15858_v23  ;;  %v15842_v48 = vld [vmem:[%s19282_s20 + $0x2090] sm:$0xf0] }
 0x2a1   : > { %9686 = vmatpush.bf16.msra.mxu1 %v15637_v43  ;;  %9668 = vmatmul.bf16.vlgmr.msrb.gmra.mxu3 %v19916_v6  ;;  %v15458_v43 = vld [vmem:[%s19282_s20 + $0x1d90] sm:$0xf0]  ;;  %v18383_v63 = vld [vmem:[%s19282_s20 + $0x1d64] sm:$0xf] }
 0x2a2   : > { %9712 = vmatpush.bf16.msra.mxu3 %v15893_v22  ;;  %9655 = vmatmul.bf16.vlgmr.msrb.gmra.mxu2 %v19855_v52  ;;  %v15714_v22 = vld [vmem:[%s19282_s20 + $0x1f90] sm:$0xf0]  ;;  %v15461_v2 = vor.u32 %v18387_v55, %v15458_v43  ;;  %v18415_v0 = vld [vmem:[%s19282_s20 + $0x1e64] sm:$0xf] }
 0x2a3   : > { %9699 = vmatpush.bf16.msra.mxu2 %v15765_v4  ;;  %v18419_v4 = vld [vmem:[%s19282_s20 + $0x1e84] sm:$0xf]  ;;  %v15442_v1 = vld [vmem:[%s19282_s20 + $0x1d70] sm:$0xf0] }
 0x2a4   : > { %9674 = vmatpush.bf16.msra.mxu0 %v15493_v9  ;;  %v9435_v9 = vpop.f32.mrf.mxu1  ;;  %v15570_v18 = vld [vmem:[%s19282_s20 + $0x1e70] sm:$0xf0]  ;;  %v18447_v37 = vld [vmem:[%s19282_s20 + $0x1f64] sm:$0xf] }
 0x2a5   : > { %9687 = vmatpush.bf16.msra.mxu1 %v15621_v41  ;;  %v15589_v41 = vor.u32 %v18419_v4, %v15586_v17  ;;  %v9436_v46 = vadd.f32 %v9435_v9, %v9423_v56  ;;  %v15698_v3 = vld [vmem:[%s19282_s20 + $0x1f70] sm:$0xf0]  ;;  %v18479_v42 = vld [vmem:[%s19282_s20 + $0x2064] sm:$0xf]  ;;  %v9448_v17 = vpop.f32.mrf.mxu2  ;;  %v9424_v9 = vpop.f32.mrf.mxu0 }
 0x2a6   : > { %9713 = vmatpush.bf16.msra.mxu3 %v15877_v35  ;;  %v15845_v35 = vor.u32 %v18483_v57, %v15842_v48  ;;  %v15826_v23 = vld [vmem:[%s19282_s20 + $0x2070] sm:$0xf0]  ;;  %v18379_v55 = vld [vmem:[%s19282_s20 + $0x1d44] sm:$0xf]  ;;  %v9461_v48 = vpop.f32.mrf.mxu3 }
 0x2a7   : > { %9700 = vmatpush.bf16.msra.mxu2 %v15749_v40  ;;  %v15717_v40 = vor.u32 %v18451_v5, %v15714_v22  ;;  %v15426_v43 = vld [vmem:[%s19282_s20 + $0x1d50] sm:$0xf0]  ;;  %v18411_v4 = vld [vmem:[%s19282_s20 + $0x1e44] sm:$0xf]  ;;  %v9449_v57 = vadd.f32 %v9448_v17, %v9436_v46 }
 0x2a8   : > { %9675 = vmatpush.bf16.msra.mxu0 %v15477_v39  ;;  %v15445_v39 = vor.u32 %v18383_v63, %v15442_v1  ;;  %v15554_v5 = vld [vmem:[%s19282_s20 + $0x1e50] sm:$0xf0]  ;;  %v18443_v22 = vld [vmem:[%s19282_s20 + $0x1f44] sm:$0xf] }
 0x2a9   : > { %9688 = vmatpush.bf16.msra.mxu1 %v15605_v62  ;;  %v15573_v62 = vor.u32 %v18415_v0, %v15570_v18  ;;  %v15682_v31 = vld [vmem:[%s19282_s20 + $0x1f50] sm:$0xf0]  ;;  %v18475_v56 = vld [vmem:[%s19282_s20 + $0x2044] sm:$0xf]  ;;  %v20700_v63 = vadd.f32 %v9461_v48, %v9449_v57  ;;  %v15557_v1 = vor.u32 %v18411_v4, %v15554_v5 }
 0x2aa   : > { %9714 = vmatpush.bf16.msra.mxu3 %v15861_v7  ;;  %v15829_v7 = vor.u32 %v18479_v42, %v15826_v23  ;;  %v15685_v0 = vor.u32 %v18443_v22, %v15682_v31  ;;  %v15410_v46 = vld [vmem:[%s19282_s20 + $0x1d30] sm:$0xf0]  ;;  %v18407_v18 = vld [vmem:[%s19282_s20 + $0x1e24] sm:$0xf] }
 0x2ab   : > { %9701 = vmatpush.bf16.msra.mxu2 %v15733_v44  ;;  %v15701_v44 = vor.u32 %v18447_v37, %v15698_v3  ;;  %v15538_v3 = vld [vmem:[%s19282_s20 + $0x1e30] sm:$0xf0]  ;;  %v18439_v42 = vld [vmem:[%s19282_s20 + $0x1f24] sm:$0xf] }
 0x2ac   : > { %9676 = vmatpush.bf16.msra.mxu0 %v15461_v2  ;;  %v15810_v2 = vld [vmem:[%s19282_s20 + $0x2050] sm:$0xf0]  ;;  %v15541_v4 = vor.u32 %v18407_v18, %v15538_v3  ;;  %v18403_v17 = vld [vmem:[%s19282_s20 + $0x1e04] sm:$0xf] }
 0x2ad   : > { %9689 = vmatpush.bf16.msra.mxu1 %v15589_v41  ;;  %v15429_v41 = vor.u32 %v18379_v55, %v15426_v43  ;;  %v15813_v37 = vor.u32 %v18475_v56, %v15810_v2  ;;  %v15666_v23 = vld [vmem:[%s19282_s20 + $0x1f30] sm:$0xf0]  ;;  %v18371_v55 = vld [vmem:[%s19282_s20 + $0x1d04] sm:$0xf]  ;;  %v9450_v2 = vpop.f32.mrf.mxu2 }
 0x2ae   : > { %9715 = vmatpush.bf16.msra.mxu3 %v15845_v35  ;;  %v18375_v35 = vld [vmem:[%s19282_s20 + $0x1d24] sm:$0xf]  ;;  %v15394_v43 = vld [vmem:[%s19282_s20 + $0x1d10] sm:$0xf0] }
 0x2af   : > { %9702 = vmatpush.bf16.msra.mxu2 %v15717_v40  ;;  %v9437_v40 = vpop.f32.mrf.mxu1  ;;  %v15522_v5 = vld [vmem:[%s19282_s20 + $0x1e10] sm:$0xf0]  ;;  %v18435_v22 = vld [vmem:[%s19282_s20 + $0x1f04] sm:$0xf] }
 0x2b0   : > { %9677 = vmatpush.bf16.msra.mxu0 %v15445_v39  ;;  %v18471_v39 = vld [vmem:[%s19282_s20 + $0x2024] sm:$0xf]  ;;  %v15650_v57 = vld [vmem:[%s19282_s20 + $0x1f10] sm:$0xf0] }
 0x2b1   : > { %9690 = vmatpush.bf16.msra.mxu1 %v15573_v62  ;;  %v15794_v62 = vld [vmem:[%s19282_s20 + $0x2030] sm:$0xf0]  ;;  %v18467_v48 = vld [vmem:[%s19282_s20 + $0x2004] sm:$0xf]  ;;  %v15653_v3 = vor.u32 %v18435_v22, %v15650_v57 }
 0x2b2   : > { %9716 = vmatpush.bf16.msra.mxu3 %v15829_v7  ;;  %v15669_v7 = vor.u32 %v18439_v42, %v15666_v23  ;;  %v15797_v31 = vor.u32 %v18471_v39, %v15794_v62  ;;  %v15778_v56 = vld [vmem:[%s19282_s20 + $0x2010] sm:$0xf0]  ;;  %v18527_v9 = vld [vmem:[%s19282_s20 + $0x21e4] sm:$0xf] }
 0x2b3   : > { %9703 = vmatpush.bf16.msra.mxu2 %v15701_v44  ;;  %v15413_v44 = vor.u32 %v18375_v35, %v15410_v46  ;;  %v18559_v40 = vld [vmem:[%s19282_s20 + $0x22e4] sm:$0xf]  ;;  %v16146_v35 = vld [vmem:[%s19282_s20 + $0x22f0] sm:$0xf0]  ;;  %v15781_v39 = vor.u32 %v18467_v48, %v15778_v56 }
 0x2b4   : > { %9678 = vmatpush.bf16.msra.mxu0 %v15429_v41  ;;  %v16018_v41 = vld [vmem:[%s19282_s20 + $0x21f0] sm:$0xf0]  ;;  %v18591_v46 = vld [vmem:[%s19282_s20 + $0x23e4] sm:$0xf] }
 0x2b5   : > { %9691 = vmatpush.bf16.msra.mxu1 %v15557_v1  ;;  %v9463_v1 = vpop.f32.mrf.mxu3  ;;  %v16274_v18 = vld [vmem:[%s19282_s20 + $0x23f0] sm:$0xf0]  ;;  %v18623_v42 = vld [vmem:[%s19282_s20 + $0x24e4] sm:$0xf]  ;;  %v16021_v62 = vor.u32 %v18527_v9, %v16018_v41 }
 0x2b6   : > { %9717 = vmatpush.bf16.msra.mxu3 %v15813_v37  ;;  %v15525_v37 = vor.u32 %v18403_v17, %v15522_v5  ;;  %v16402_v23 = vld [vmem:[%s19282_s20 + $0x24f0] sm:$0xf0]  ;;  %v18555_v1 = vld [vmem:[%s19282_s20 + $0x22c4] sm:$0xf] }
 0x2b7   : > { %9704 = vmatpush.bf16.msra.mxu2 %v15685_v0  ;;  %v15397_v0 = vor.u32 %v18371_v55, %v15394_v43  ;;  %v16277_v55 = vor.u32 %v18591_v46, %v16274_v18  ;;  %v18523_v43 = vld [vmem:[%s19282_s20 + $0x21c4] sm:$0xf]  ;;  %v16002_v2 = vld [vmem:[%s19282_s20 + $0x21d0] sm:$0xf0] }
 0x2b8   : > { %9679 = vmatpush.bf16.msra.mxu0 %v15413_v44  ;;  %v16149_v44 = vor.u32 %v18559_v40, %v16146_v35  ;;  %v18587_v17 = vld [vmem:[%s19282_s20 + $0x23c4] sm:$0xf]  ;;  %v16258_v5 = vld [vmem:[%s19282_s20 + $0x23d0] sm:$0xf0]  ;;  %v16005_v57 = vor.u32 %v18523_v43, %v16002_v2 }
 0x2b9   : > { %9692 = vmatpush.bf16.msra.mxu1 %v15541_v4  ;;  %v16405_v4 = vor.u32 %v18623_v42, %v16402_v23  ;;  %v18619_v22 = vld [vmem:[%s19282_s20 + $0x24c4] sm:$0xf]  ;;  %v16261_v56 = vor.u32 %v18587_v17, %v16258_v5  ;;  %v15986_v41 = vld [vmem:[%s19282_s20 + $0x21b0] sm:$0xf0] }
 0x2ba   : > { %9718 = vmatpush.bf16.msra.mxu3 %v15797_v31  ;;  %v16386_v31 = vld [vmem:[%s19282_s20 + $0x24d0] sm:$0xf0]  ;;  %v18519_v9 = vld [vmem:[%s19282_s20 + $0x21a4] sm:$0xf] }
 0x2bb   : > { %9705 = vmatpush.bf16.msra.mxu2 %v15669_v7  ;;  %v16130_v7 = vld [vmem:[%s19282_s20 + $0x22d0] sm:$0xf0]  ;;  %v18551_v40 = vld [vmem:[%s19282_s20 + $0x22a4] sm:$0xf] }
 0x2bc   : > { %9680 = vmatpush.bf16.msra.mxu0 %v15397_v0  ;;  %v16133_v48 = vor.u32 %v18555_v1, %v16130_v7  ;;  %v16389_v0 = vor.u32 %v18619_v22, %v16386_v31  ;;  %v16114_v35 = vld [vmem:[%s19282_s20 + $0x22b0] sm:$0xf0]  ;;  %v18583_v46 = vld [vmem:[%s19282_s20 + $0x23a4] sm:$0xf]  ;;  %v9474_v5 = vpop.f32.mrf.mxu0 }
 0x2bd   : > { %9693 = vmatpush.bf16.msra.mxu1 %v15525_v37  ;;  %v16242_v18 = vld [vmem:[%s19282_s20 + $0x23b0] sm:$0xf0]  ;;  %v22586_v37 = vld [vmem:[#allocation14_spill] sm:$0xff] }
 0x2be   : > { %9719 = vmatpush.bf16.msra.mxu3 %v15781_v39  ;;  %v16370_v42 = vld [vmem:[%s19282_s20 + $0x24b0] sm:$0xf0]  ;;  %v15989_v39 = vor.u32 %v18519_v9, %v15986_v41  ;;  %v18547_v2 = vld [vmem:[%s19282_s20 + $0x2284] sm:$0xf] }
 0x2bf   : > { %9706 = vmatpush.bf16.msra.mxu2 %v15653_v3  ;;  %9681 = vmatmul.bf16.vlgmr.msra.gmra.mxu0 %v19920_v10  ;;  %v18615_v3 = vld [vmem:[%s19282_s20 + $0x24a4] sm:$0xf]  ;;  %v22587_v23 = vld [vmem:[#allocation16_spill] sm:$0xff] }
 0x2c0   : > { %9725 = vmatpush.bf16.msrb.mxu0 %v16021_v62  ;;  %9694 = vmatmul.bf16.vlgmr.msra.gmra.mxu1 %v22586_v37  ;;  %v16117_v62 = vor.u32 %v18551_v40, %v16114_v35  ;;  %v15970_v43 = vld [vmem:[%s19282_s20 + $0x2190] sm:$0xf0]  ;;  %v16373_v1 = vor.u32 %v18615_v3, %v16370_v42  ;;  %v18579_v7 = vld [vmem:[%s19282_s20 + $0x2384] sm:$0xf] }
 0x2c1   : > { %9738 = vmatpush.bf16.msrb.mxu1 %v16149_v44  ;;  %9720 = vmatmul.bf16.vlgmr.msra.gmra.mxu3 %v22587_v23  ;;  %v16245_v44 = vor.u32 %v18583_v46, %v16242_v18  ;;  %v16226_v17 = vld [vmem:[%s19282_s20 + $0x2390] sm:$0xf0]  ;;  %v18611_v22 = vld [vmem:[%s19282_s20 + $0x2484] sm:$0xf] }
 0x2c2   : > { %9764 = vmatpush.bf16.msrb.mxu3 %v16405_v4  ;;  %9707 = vmatmul.bf16.vlgmr.msra.gmra.mxu2 %v19922_v11  ;;  %v16098_v4 = vld [vmem:[%s19282_s20 + $0x2290] sm:$0xf0]  ;;  %v16229_v41 = vor.u32 %v18579_v7, %v16226_v17  ;;  %v18511_v40 = vld [vmem:[%s19282_s20 + $0x2164] sm:$0xf] }
 0x2c3   : > { %9751 = vmatpush.bf16.msrb.mxu2 %v16277_v55  ;;  %v18515_v55 = vld [vmem:[%s19282_s20 + $0x2184] sm:$0xf]  ;;  %v16354_v31 = vld [vmem:[%s19282_s20 + $0x2490] sm:$0xf0]  ;;  %v16101_v9 = vor.u32 %v18547_v2, %v16098_v4 }
 0x2c4   : > { %9726 = vmatpush.bf16.msrb.mxu0 %v16005_v57  ;;  %v9475_v57 = vadd.f32 %v9474_v5, %v20700_v63  ;;  %v18543_v35 = vld [vmem:[%s19282_s20 + $0x2264] sm:$0xf]  ;;  %v16357_v46 = vor.u32 %v18611_v22, %v16354_v31  ;;  %v16082_v3 = vld [vmem:[%s19282_s20 + $0x2270] sm:$0xf0] }
 0x2c5   : > { %9739 = vmatpush.bf16.msrb.mxu1 %v16133_v48  ;;  %v15973_v48 = vor.u32 %v18515_v55, %v15970_v43  ;;  %v18575_v42 = vld [vmem:[%s19282_s20 + $0x2364] sm:$0xf]  ;;  %v16210_v63 = vld [vmem:[%s19282_s20 + $0x2370] sm:$0xf0]  ;;  %v16085_v55 = vor.u32 %v18543_v35, %v16082_v3  ;;  %v9500_v17 = vpop.f32.mrf.mxu2 }
 0x2c6   : > { %9765 = vmatpush.bf16.msrb.mxu3 %v16389_v0  ;;  %v15954_v0 = vld [vmem:[%s19282_s20 + $0x2170] sm:$0xf0]  ;;  %v16213_v43 = vor.u32 %v18575_v42, %v16210_v63  ;;  %v18507_v2 = vld [vmem:[%s19282_s20 + $0x2144] sm:$0xf] }
 0x2c7   : > { %9752 = vmatpush.bf16.msrb.mxu2 %v16261_v56  ;;  %v9487_v56 = vpop.f32.mrf.mxu1  ;;  %v18539_v4 = vld [vmem:[%s19282_s20 + $0x2244] sm:$0xf]  ;;  %v16066_v5 = vld [vmem:[%s19282_s20 + $0x2250] sm:$0xf0] }
 0x2c8   : > { %9727 = vmatpush.bf16.msrb.mxu0 %v15989_v39  ;;  %v9488_v18 = vadd.f32 %v9487_v56, %v9475_v57  ;;  %v18607_v39 = vld [vmem:[%s19282_s20 + $0x2464] sm:$0xf]  ;;  %v16194_v31 = vld [vmem:[%s19282_s20 + $0x2350] sm:$0xf0] }
 0x2c9   : > { %9740 = vmatpush.bf16.msrb.mxu1 %v16117_v62  ;;  %v16338_v62 = vld [vmem:[%s19282_s20 + $0x2470] sm:$0xf0]  ;;  %v18571_v22 = vld [vmem:[%s19282_s20 + $0x2344] sm:$0xf] }
 0x2ca   : > { %9766 = vmatpush.bf16.msrb.mxu3 %v16373_v1  ;;  %v15938_v1 = vld [vmem:[%s19282_s20 + $0x2150] sm:$0xf0]  ;;  %v16341_v7 = vor.u32 %v18607_v39, %v16338_v62  ;;  %v9501_v57 = vadd.f32 %v9500_v17, %v9488_v18  ;;  %v18603_v56 = vld [vmem:[%s19282_s20 + $0x2444] sm:$0xf]  ;;  %v16197_v18 = vor.u32 %v18571_v22, %v16194_v31 }
 0x2cb   : > { %9753 = vmatpush.bf16.msrb.mxu2 %v16245_v44  ;;  %v15957_v44 = vor.u32 %v18511_v40, %v15954_v0  ;;  %v15941_v40 = vor.u32 %v18507_v2, %v15938_v1  ;;  %v18503_v3 = vld [vmem:[%s19282_s20 + $0x2124] sm:$0xf]  ;;  %v15922_v42 = vld [vmem:[%s19282_s20 + $0x2130] sm:$0xf0] }
 0x2cc   : > { %9728 = vmatpush.bf16.msrb.mxu0 %v15973_v48  ;;  %v9513_v48 = vpop.f32.mrf.mxu3  ;;  %v18535_v63 = vld [vmem:[%s19282_s20 + $0x2224] sm:$0xf]  ;;  %v16050_v62 = vld [vmem:[%s19282_s20 + $0x2230] sm:$0xf0]  ;;  %v15925_v1 = vor.u32 %v18503_v3, %v15922_v42 }
 0x2cd   : > { %9741 = vmatpush.bf16.msrb.mxu1 %v16101_v9  ;;  %v16322_v9 = vld [vmem:[%s19282_s20 + $0x2450] sm:$0xf0]  ;;  %v20771_v35 = vadd.f32 %v9513_v48, %v9501_v57  ;;  %v18531_v22 = vld [vmem:[%s19282_s20 + $0x2204] sm:$0xf] }
 0x2ce   : > { %9767 = vmatpush.bf16.msrb.mxu3 %v16357_v46  ;;  %v16069_v46 = vor.u32 %v18539_v4, %v16066_v5  ;;  %v16325_v39 = vor.u32 %v18603_v56, %v16322_v9  ;;  %v16178_v2 = vld [vmem:[%s19282_s20 + $0x2330] sm:$0xf0]  ;;  %v18499_v4 = vld [vmem:[%s19282_s20 + $0x2104] sm:$0xf] }
 0x2cf   : > { %9754 = vmatpush.bf16.msrb.mxu2 %v16229_v41  ;;  %v9476_v41 = vpop.f32.mrf.mxu0  ;;  %v9489_v0 = vpop.f32.mrf.mxu1  ;;  %v15906_v17 = vld [vmem:[%s19282_s20 + $0x2110] sm:$0xf0]  ;;  %v18563_v57 = vld [vmem:[%s19282_s20 + $0x2304] sm:$0xf] }
 0x2d0   : > { %9729 = vmatpush.bf16.msrb.mxu0 %v15957_v44  ;;  %v18567_v44 = vld [vmem:[%s19282_s20 + $0x2324] sm:$0xf]  ;;  %v16034_v31 = vld [vmem:[%s19282_s20 + $0x2210] sm:$0xf0]  ;;  %v15909_v42 = vor.u32 %v18499_v4, %v15906_v17 }
 0x2d1   : > { %9742 = vmatpush.bf16.msrb.mxu1 %v16085_v55  ;;  %v18599_v55 = vld [vmem:[%s19282_s20 + $0x2424] sm:$0xf]  ;;  %v16181_v5 = vor.u32 %v18567_v44, %v16178_v2  ;;  %v16162_v56 = vld [vmem:[%s19282_s20 + $0x2310] sm:$0xf0] }
 0x2d2   : > { %9768 = vmatpush.bf16.msrb.mxu3 %v16341_v7  ;;  %v16053_v7 = vor.u32 %v18535_v63, %v16050_v62  ;;  %v18595_v9 = vld [vmem:[%s19282_s20 + $0x2404] sm:$0xf]  ;;  %v16290_v41 = vld [vmem:[%s19282_s20 + $0x2410] sm:$0xf0]  ;;  %v16165_v2 = vor.u32 %v18563_v57, %v16162_v56 }
 0x2d3   : > { %9755 = vmatpush.bf16.msrb.mxu2 %v16213_v43  ;;  %v16306_v43 = vld [vmem:[%s19282_s20 + $0x2430] sm:$0xf0]  ;;  %v18655_v0 = vld [vmem:[%s19282_s20 + $0x25e4] sm:$0xf] }
 0x2d4   : > { %9730 = vmatpush.bf16.msrb.mxu0 %v15941_v40  ;;  %v16309_v48 = vor.u32 %v18599_v55, %v16306_v43  ;;  %v9502_v40 = vpop.f32.mrf.mxu2  ;;  %v16530_v3 = vld [vmem:[%s19282_s20 + $0x25f0] sm:$0xf0]  ;;  %v18719_v62 = vld [vmem:[%s19282_s20 + $0x27e4] sm:$0xf] }
 0x2d5   : > { %9743 = vmatpush.bf16.msrb.mxu1 %v16069_v46  ;;  %v18687_v46 = vld [vmem:[%s19282_s20 + $0x26e4] sm:$0xf]  ;;  %v16658_v63 = vld [vmem:[%s19282_s20 + $0x26f0] sm:$0xf0]  ;;  %v16533_v40 = vor.u32 %v18655_v0, %v16530_v3 }
 0x2d6   : > { %9769 = vmatpush.bf16.msrb.mxu3 %v16325_v39  ;;  %v16786_v44 = vld [vmem:[%s19282_s20 + $0x27f0] sm:$0xf0]  ;;  %v16037_v39 = vor.u32 %v18531_v22, %v16034_v31  ;;  %v18751_v55 = vld [vmem:[%s19282_s20 + $0x28e4] sm:$0xf]  ;;  %v16661_v4 = vor.u32 %v18687_v46, %v16658_v63 }
 0x2d7   : > { %9756 = vmatpush.bf16.msrb.mxu2 %v16197_v18  ;;  %v9515_v18 = vpop.f32.mrf.mxu3  ;;  %v16914_v43 = vld [vmem:[%s19282_s20 + $0x28f0] sm:$0xf0]  ;;  %v16789_v17 = vor.u32 %v18719_v62, %v16786_v44  ;;  %v18683_v23 = vld [vmem:[%s19282_s20 + $0x26c4] sm:$0xf] }
 0x2d8   : > { %9731 = vmatpush.bf16.msrb.mxu0 %v15925_v1  ;;  %v16293_v1 = vor.u32 %v18595_v9, %v16290_v41  ;;  %v18651_v18 = vld [vmem:[%s19282_s20 + $0x25c4] sm:$0xf]  ;;  %v16514_v11 = vld [vmem:[%s19282_s20 + $0x25d0] sm:$0xf0] }
 0x2d9   : > { %9744 = vmatpush.bf16.msrb.mxu1 %v16053_v7  ;;  %v16917_v7 = vor.u32 %v18751_v55, %v16914_v43  ;;  %v18715_v22 = vld [vmem:[%s19282_s20 + $0x27c4] sm:$0xf]  ;;  %v16770_v31 = vld [vmem:[%s19282_s20 + $0x27d0] sm:$0xf0]  ;;  %v16517_v56 = vor.u32 %v18651_v18, %v16514_v11 }
 0x2da   : > { %9770 = vmatpush.bf16.msrb.mxu3 %v16309_v48  ;;  %v18747_v57 = vld [vmem:[%s19282_s20 + $0x28c4] sm:$0xf]  ;;  %v16898_v48 = vld [vmem:[%s19282_s20 + $0x28d0] sm:$0xf0]  ;;  %v16773_v41 = vor.u32 %v18715_v22, %v16770_v31 }
 0x2db   : > { %9757 = vmatpush.bf16.msrb.mxu2 %v16181_v5  ;;  %v16642_v5 = vld [vmem:[%s19282_s20 + $0x26d0] sm:$0xf0]  ;;  %v18647_v0 = vld [vmem:[%s19282_s20 + $0x25a4] sm:$0xf]  ;;  %v16901_v63 = vor.u32 %v18747_v57, %v16898_v48 }
 0x2dc   : > { %9732 = vmatpush.bf16.msrb.mxu0 %v15909_v42  ;;  %v16645_v9 = vor.u32 %v18683_v23, %v16642_v5  ;;  %v16498_v3 = vld [vmem:[%s19282_s20 + $0x25b0] sm:$0xf0]  ;;  %v18679_v46 = vld [vmem:[%s19282_s20 + $0x26a4] sm:$0xf]  ;;  %v9526_v57 = vpop.f32.mrf.mxu0 }
 0x2dd   : > { %9745 = vmatpush.bf16.msrb.mxu1 %v16037_v39  ;;  %v22588_v42 = vld [vmem:[#allocation18_spill] sm:$0xff]  ;;  %v16626_v62 = vld [vmem:[%s19282_s20 + $0x26b0] sm:$0xf0]  ;;  %v16501_v43 = vor.u32 %v18647_v0, %v16498_v3  ;;  %v9539_v0 = vpop.f32.mrf.mxu1 }
 0x2de   : > { %9771 = vmatpush.bf16.msrb.mxu3 %v16293_v1  ;;  %v18711_v44 = vld [vmem:[%s19282_s20 + $0x27a4] sm:$0xf]  ;;  %v16754_v39 = vld [vmem:[%s19282_s20 + $0x27b0] sm:$0xf0]  ;;  %v16629_v1 = vor.u32 %v18679_v46, %v16626_v62 }
 0x2df   : > { %9758 = vmatpush.bf16.msrb.mxu2 %v16165_v2  ;;  %9733 = vmatmul.bf16.vlgmr.msrb.gmra.mxu0 %v22588_v42  ;;  %v22589_v11 = vld [vmem:[#allocation19_spill] sm:$0xff]  ;;  %v22590_v2 = vld [vmem:[#allocation17_spill] sm:$0xff] }
 0x2e0   : > { %9777 = vmatpush.bf16.msra.mxu0 %v16533_v40  ;;  %9746 = vmatmul.bf16.vlgmr.msrb.gmra.mxu1 %v22590_v2  ;;  %v18743_v23 = vld [vmem:[%s19282_s20 + $0x28a4] sm:$0xf]  ;;  %v16882_v55 = vld [vmem:[%s19282_s20 + $0x28b0] sm:$0xf0]  ;;  %v16757_v40 = vor.u32 %v18711_v44, %v16754_v39 }
 0x2e1   : > { %9790 = vmatpush.bf16.msra.mxu1 %v16661_v4  ;;  %9772 = vmatmul.bf16.vlgmr.msrb.gmra.mxu3 %v20075_v45  ;;  %v18643_v4 = vld [vmem:[%s19282_s20 + $0x2584] sm:$0xf]  ;;  %v16610_v5 = vld [vmem:[%s19282_s20 + $0x2690] sm:$0xf0] }
 0x2e2   : > { %9816 = vmatpush.bf16.msra.mxu3 %v16917_v7  ;;  %9759 = vmatmul.bf16.vlgmr.msrb.gmra.mxu2 %v22589_v11  ;;  %v18675_v18 = vld [vmem:[%s19282_s20 + $0x2684] sm:$0xf]  ;;  %v16885_v7 = vor.u32 %v18743_v23, %v16882_v55  ;;  %v16738_v31 = vld [vmem:[%s19282_s20 + $0x2790] sm:$0xf0] }
 0x2e3   : > { %9803 = vmatpush.bf16.msra.mxu2 %v16789_v17  ;;  %v16482_v17 = vld [vmem:[%s19282_s20 + $0x2590] sm:$0xf0]  ;;  %v18707_v22 = vld [vmem:[%s19282_s20 + $0x2784] sm:$0xf]  ;;  %v16613_v3 = vor.u32 %v18675_v18, %v16610_v5 }
 0x2e4   : > { %9778 = vmatpush.bf16.msra.mxu0 %v16517_v56  ;;  %v18739_v48 = vld [vmem:[%s19282_s20 + $0x2884] sm:$0xf]  ;;  %v16866_v56 = vld [vmem:[%s19282_s20 + $0x2890] sm:$0xf0]  ;;  %v16741_v46 = vor.u32 %v18707_v22, %v16738_v31 }
 0x2e5   : > { %9791 = vmatpush.bf16.msra.mxu1 %v16645_v9  ;;  %v9527_v9 = vadd.f32 %v9526_v57, %v20771_v35  ;;  %v16466_v62 = vld [vmem:[%s19282_s20 + $0x2570] sm:$0xf0]  ;;  %v18671_v44 = vld [vmem:[%s19282_s20 + $0x2664] sm:$0xf]  ;;  %v16869_v39 = vor.u32 %v18739_v48, %v16866_v56  ;;  %v9552_v57 = vpop.f32.mrf.mxu2 }
 0x2e6   : > { %9817 = vmatpush.bf16.msra.mxu3 %v16901_v63  ;;  %v18639_v63 = vld [vmem:[%s19282_s20 + $0x2564] sm:$0xf]  ;;  %v16594_v55 = vld [vmem:[%s19282_s20 + $0x2670] sm:$0xf0] }
 0x2e7   : > { %9804 = vmatpush.bf16.msra.mxu2 %v16773_v41  ;;  %v16485_v41 = vor.u32 %v18643_v4, %v16482_v17  ;;  %v9540_v23 = vadd.f32 %v9539_v0, %v9527_v9  ;;  %v16722_v35 = vld [vmem:[%s19282_s20 + $0x2770] sm:$0xf0]  ;;  %v18735_v4 = vld [vmem:[%s19282_s20 + $0x2864] sm:$0xf]  ;;  %v16597_v17 = vor.u32 %v18671_v44, %v16594_v55  ;;  %v9565_v0 = vpop.f32.mrf.mxu3  ;;  %v9541_v44 = vpop.f32.mrf.mxu1 }
 0x2e8   : > { %9779 = vmatpush.bf16.msra.mxu0 %v16501_v43  ;;  %v18703_v43 = vld [vmem:[%s19282_s20 + $0x2764] sm:$0xf]  ;;  %v16450_v5 = vld [vmem:[%s19282_s20 + $0x2550] sm:$0xf0] }
 0x2e9   : > { %9792 = vmatpush.bf16.msra.mxu1 %v16629_v1  ;;  %v16850_v1 = vld [vmem:[%s19282_s20 + $0x2870] sm:$0xf0]  ;;  %v16725_v18 = vor.u32 %v18703_v43, %v16722_v35  ;;  %v18667_v22 = vld [vmem:[%s19282_s20 + $0x2644] sm:$0xf] }
 0x2ea   : > { %9818 = vmatpush.bf16.msra.mxu3 %v16885_v7  ;;  %v18635_v7 = vld [vmem:[%s19282_s20 + $0x2544] sm:$0xf]  ;;  %v16853_v31 = vor.u32 %v18735_v4, %v16850_v1  ;;  %v16578_v48 = vld [vmem:[%s19282_s20 + $0x2650] sm:$0xf0] }
 0x2eb   : > { %9805 = vmatpush.bf16.msra.mxu2 %v16757_v40  ;;  %v16469_v40 = vor.u32 %v18639_v63, %v16466_v62  ;;  %v18699_v56 = vld [vmem:[%s19282_s20 + $0x2744] sm:$0xf]  ;;  %v16706_v9 = vld [vmem:[%s19282_s20 + $0x2750] sm:$0xf0]  ;;  %v16453_v62 = vor.u32 %v18635_v7, %v16450_v5  ;;  %v16581_v55 = vor.u32 %v18667_v22, %v16578_v48 }
 0x2ec   : > { %9780 = vmatpush.bf16.msra.mxu0 %v16485_v41  ;;  %v9553_v41 = vadd.f32 %v9552_v57, %v9540_v23  ;;  %v18731_v63 = vld [vmem:[%s19282_s20 + $0x2844] sm:$0xf]  ;;  %v16709_v23 = vor.u32 %v18699_v56, %v16706_v9  ;;  %v16434_v35 = vld [vmem:[%s19282_s20 + $0x2530] sm:$0xf0] }
 0x2ed   : > { %9793 = vmatpush.bf16.msra.mxu1 %v16613_v3  ;;  %v16834_v3 = vld [vmem:[%s19282_s20 + $0x2850] sm:$0xf0]  ;;  %v18631_v43 = vld [vmem:[%s19282_s20 + $0x2524] sm:$0xf]  ;;  %v9554_v44 = vpop.f32.mrf.mxu2 }
 0x2ee   : > { %9819 = vmatpush.bf16.msra.mxu3 %v16869_v39  ;;  %v20842_v39 = vadd.f32 %v9565_v0, %v9553_v41  ;;  %v18663_v4 = vld [vmem:[%s19282_s20 + $0x2624] sm:$0xf]  ;;  %v16837_v1 = vor.u32 %v18731_v63, %v16834_v3  ;;  %v16690_v5 = vld [vmem:[%s19282_s20 + $0x2730] sm:$0xf0]  ;;  %v16437_v57 = vor.u32 %v18631_v43, %v16434_v35  ;;  %v17506_v44 = vld [vmem:[%s19282_s20 + $0x1f4] sm:$0xf0] }
 0x2ef   : > { %9806 = vmatpush.bf16.msra.mxu2 %v16741_v46  ;;  %v9528_v46 = vpop.f32.mrf.mxu0  ;;  %v18695_v7 = vld [vmem:[%s19282_s20 + $0x2724] sm:$0xf]  ;;  %v16418_v48 = vld [vmem:[%s19282_s20 + $0x2510] sm:$0xf0] }
 0x2f0   : > { %9781 = vmatpush.bf16.msra.mxu0 %v16469_v40  ;;  %v16562_v40 = vld [vmem:[%s19282_s20 + $0x2630] sm:$0xf0]  ;;  %v18627_v22 = vld [vmem:[%s19282_s20 + $0x2504] sm:$0xf]  ;;  %v16693_v56 = vor.u32 %v18695_v7, %v16690_v5  ;;  %v11800_v7 = vld [vmem:[%s19282_s20 + $0xe8] sm:$0xf] }
 0x2f1   : > { %9794 = vmatpush.bf16.msra.mxu1 %v16597_v17  ;;  %v18727_v17 = vld [vmem:[%s19282_s20 + $0x2824] sm:$0xf]  ;;  %v16546_v41 = vld [vmem:[%s19282_s20 + $0x2610] sm:$0xf0]  ;;  %v17474_v5 = vld [vmem:[%s19282_s20 + $0xf4] sm:$0xf0] }
 0x2f2   : > { %9820 = vmatpush.bf16.msra.mxu3 %v16853_v31  ;;  %v16565_v31 = vor.u32 %v18663_v4, %v16562_v40  ;;  %v18659_v9 = vld [vmem:[%s19282_s20 + $0x2604] sm:$0xf]  ;;  %v16674_v3 = vld [vmem:[%s19282_s20 + $0x2710] sm:$0xf0]  ;;  %v16421_v4 = vor.u32 %v18627_v22, %v16418_v48  ;;  %v11801_v48 = vor.u32 %v17474_v5, %v11800_v7  ;;  %v11768_v7 = vld [vmem:[%s19282_s20 + $0xa8] sm:$0xf] }
 0x2f3   : > { %9807 = vmatpush.bf16.msra.mxu2 %v16725_v18  ;;  %v16818_v18 = vld [vmem:[%s19282_s20 + $0x2830] sm:$0xf0]  ;;  %v18691_v0 = vld [vmem:[%s19282_s20 + $0x2704] sm:$0xf]  ;;  %v17466_v5 = vld [vmem:[%s19282_s20 + $0xb4] sm:$0xf0] }
 0x2f4   : > { %9782 = vmatpush.bf16.msra.mxu0 %v16453_v62  ;;  %v16821_v63 = vor.u32 %v18727_v17, %v16818_v18  ;;  %v18723_v46 = vld [vmem:[%s19282_s20 + $0x2804] sm:$0xf]  ;;  %v16802_v62 = vld [vmem:[%s19282_s20 + $0x2810] sm:$0xf0]  ;;  %v16677_v17 = vor.u32 %v18691_v0, %v16674_v3  ;;  %v11928_v18 = vld [vmem:[%s19282_s20 + $0x1e8] sm:$0xf] }
 0x2f5   : > { %9795 = vmatpush.bf16.msra.mxu1 %v16581_v55  ;;  %v18783_v43 = vld [vmem:[%s19282_s20 + $0x29e4] sm:$0xf]  ;;  %v17042_v35 = vld [vmem:[%s19282_s20 + $0x29f0] sm:$0xf0]  ;;  %v11912_v0 = vld [vmem:[%s19282_s20 + $0x1c8] sm:$0xf] }
 0x2f6   : > { %9821 = vmatpush.bf16.msra.mxu3 %v16837_v1  ;;  %v18815_v55 = vld [vmem:[%s19282_s20 + $0x2ae4] sm:$0xf]  ;;  %v17170_v40 = vld [vmem:[%s19282_s20 + $0x2af0] sm:$0xf0]  ;;  %v16549_v1 = vor.u32 %v18659_v9, %v16546_v41  ;;  %v11784_v9 = vld [vmem:[%s19282_s20 + $0xc8] sm:$0xf] }
 0x2f7   : > { %9808 = vmatpush.bf16.msra.mxu2 %v16709_v23  ;;  %v9567_v23 = vpop.f32.mrf.mxu3  ;;  %v17173_v22 = vor.u32 %v18815_v55, %v17170_v40  ;;  %v18779_v11 = vld [vmem:[%s19282_s20 + $0x29c4] sm:$0xf]  ;;  %v17026_v45 = vld [vmem:[%s19282_s20 + $0x29d0] sm:$0xf0]  ;;  %v17470_v41 = vld [vmem:[%s19282_s20 + $0xd4] sm:$0xf0] }
 0x2f8   : > { %9783 = vmatpush.bf16.msra.mxu0 %v16437_v57  ;;  %v16805_v57 = vor.u32 %v18723_v46, %v16802_v62  ;;  %v17045_v23 = vor.u32 %v18783_v43, %v17042_v35  ;;  %v18811_v2 = vld [vmem:[%s19282_s20 + $0x2ac4] sm:$0xf]  ;;  %v17029_v3 = vor.u32 %v18779_v11, %v17026_v45  ;;  %v11785_v62 = vor.u32 %v17470_v41, %v11784_v9  ;;  %v17010_v35 = vld [vmem:[%s19282_s20 + $0x29b0] sm:$0xf0]  ;;  %v11896_v45 = vld [vmem:[%s19282_s20 + $0x1a8] sm:$0xf] }
 0x2f9   : > { %9796 = vmatpush.bf16.msra.mxu1 %v16565_v31  ;;  %v11929_v31 = vor.u32 %v17506_v44, %v11928_v18  ;;  %v18775_v43 = vld [vmem:[%s19282_s20 + $0x29a4] sm:$0xf]  ;;  %v17138_v40 = vld [vmem:[%s19282_s20 + $0x2ab0] sm:$0xf0]  ;;  %v17498_v11 = vld [vmem:[%s19282_s20 + $0x1b4] sm:$0xf0]  ;;  %v11769_v18 = vor.u32 %v17466_v5, %v11768_v7 }
 0x2fa   : > { %9822 = vmatpush.bf16.msra.mxu3 %v16821_v63  ;;  %v17502_v63 = vld [vmem:[%s19282_s20 + $0x1d4] sm:$0xf0]  ;;  %v18807_v55 = vld [vmem:[%s19282_s20 + $0x2aa4] sm:$0xf]  ;;  %v11880_v41 = vld [vmem:[%s19282_s20 + $0x188] sm:$0xf] }
 0x2fb   : > { %9809 = vmatpush.bf16.msra.mxu2 %v16693_v56  ;;  %v17154_v56 = vld [vmem:[%s19282_s20 + $0x2ad0] sm:$0xf0]  ;;  %v18771_v44 = vld [vmem:[%s19282_s20 + $0x2984] sm:$0xf] }
 0x2fc   : > { %9784 = vmatpush.bf16.msra.mxu0 %v16421_v4  ;;  %v17157_v46 = vor.u32 %v18811_v2, %v17154_v56  ;;  %v11913_v4 = vor.u32 %v17502_v63, %v11912_v0  ;;  %v18960_v2 = vld [vmem:[#allocation1] sm:$0xff]  ;;  %v17462_v56 = vld [vmem:[%s19282_s20 + $0x94] sm:$0xf0]  ;;  %v9578_v9 = vpop.f32.mrf.mxu0 }
 0x2fd   : > { %9797 = vmatpush.bf16.msra.mxu1 %v16549_v1  ;;  %v17013_v1 = vor.u32 %v18775_v43, %v17010_v35  ;;  %v17494_v0 = vld [vmem:[%s19282_s20 + $0x194] sm:$0xf0]  ;;  %v9579_v63 = vadd.f32 %v9578_v9, %v20842_v39  ;;  %v18767_v35 = vld [vmem:[%s19282_s20 + $0x2964] sm:$0xf]  ;;  %v17106_v5 = vld [vmem:[%s19282_s20 + $0x2a70] sm:$0xf0] }
 0x2fe   : > { %9823 = vmatpush.bf16.msra.mxu3 %v16805_v57  ;;  %v16994_v57 = vld [vmem:[%s19282_s20 + $0x2990] sm:$0xf0]  ;;  %v17458_v39 = vld [vmem:[%s19282_s20 + $0x74] sm:$0xf0] }
 0x2ff   : > { %9810 = vmatpush.bf16.msra.mxu2 %v16677_v17  ;;  %9785 = vmatmul.bf16.vlgmr.msra.gmra.mxu0 %v20079_v49  ;;  %v17141_v17 = vor.u32 %v18807_v55, %v17138_v40  ;;  %v16978_v55 = vld [vmem:[%s19282_s20 + $0x2970] sm:$0xf0]  ;;  %v11881_v40 = vor.u32 %v17494_v0, %v11880_v41  ;;  %v17454_v9 = vld [vmem:[%s19282_s20 + $0x54] sm:$0xf0] }
 0x300   : > { %9829 = vmatpush.bf16.msrb.mxu0 %v17045_v23  ;;  %9798 = vmatmul.bf16.vlgmr.msra.gmra.mxu1 %v20077_v53  ;;  %v18803_v23 = vld [vmem:[%s19282_s20 + $0x2a84] sm:$0xf] }
 0x301   : > { %9842 = vmatpush.bf16.msrb.mxu1 %v17173_v22  ;;  %9824 = vmatmul.bf16.vlgmr.msra.gmra.mxu3 %v18960_v2  ;;  %v11897_v22 = vor.u32 %v17498_v11, %v11896_v45  ;;  %v11736_v45 = vld [vmem:[%s19282_s20 + $0x68] sm:$0xf]  ;;  %v17490_v2 = vld [vmem:[%s19282_s20 + $0x174] sm:$0xf0] }
 0x302   : > { %9868 = vmatpush.bf16.msrb.mxu3 %v11929_v31  ;;  %9811 = vmatmul.bf16.vlgmr.msra.gmra.mxu2 %v20081_v54  ;;  %v11752_v31 = vld [vmem:[%s19282_s20 + $0x88] sm:$0xf] }
 0x303   : > { %9855 = vmatpush.bf16.msrb.mxu2 %v11801_v48  ;;  %v17122_v48 = vld [vmem:[%s19282_s20 + $0x2a90] sm:$0xf0]  ;;  %v11753_v43 = vor.u32 %v17462_v56, %v11752_v31  ;;  %v11864_v11 = vld [vmem:[%s19282_s20 + $0x168] sm:$0xf] }
 0x304   : > { %9830 = vmatpush.bf16.msrb.mxu0 %v17029_v3  ;;  %v16997_v3 = vor.u32 %v18771_v44, %v16994_v57  ;;  %v18763_v44 = vld [vmem:[%s19282_s20 + $0x2944] sm:$0xf]  ;;  %v16962_v57 = vld [vmem:[%s19282_s20 + $0x2950] sm:$0xf0]  ;;  %v11720_v56 = vld [vmem:[%s19282_s20 + $0x48] sm:$0xf]  ;;  %v9617_v0 = vpop.f32.mrf.mxu3 }
 0x305   : > { %9843 = vmatpush.bf16.msrb.mxu1 %v17157_v46  ;;  %v9591_v46 = vpop.f32.mrf.mxu1  ;;  %v17090_v31 = vld [vmem:[%s19282_s20 + $0x2a50] sm:$0xf0] }
 0x306   : > { %9869 = vmatpush.bf16.msrb.mxu3 %v11913_v4  ;;  %v18799_v4 = vld [vmem:[%s19282_s20 + $0x2a64] sm:$0xf]  ;;  %v9592_v7 = vadd.f32 %v9591_v46, %v9579_v63  ;;  %v11848_v63 = vld [vmem:[%s19282_s20 + $0x148] sm:$0xf]  ;;  %v9580_v46 = vpop.f32.mrf.mxu0 }
 0x307   : > { %9856 = vmatpush.bf16.msrb.mxu2 %v11785_v62  ;;  %v17125_v62 = vor.u32 %v18803_v23, %v17122_v48  ;;  %v18795_v23 = vld [vmem:[%s19282_s20 + $0x2a44] sm:$0xf]  ;;  %v9604_v48 = vpop.f32.mrf.mxu2  ;;  %v12056_v46 = vld [vmem:[%s19282_s20 + $0x2e8] sm:$0xf] }
 0x308   : > { %9831 = vmatpush.bf16.msrb.mxu0 %v17013_v1  ;;  %v16981_v1 = vor.u32 %v18767_v35, %v16978_v55  ;;  %v9605_v41 = vadd.f32 %v9604_v48, %v9592_v7  ;;  %v17093_v55 = vor.u32 %v18795_v23, %v17090_v31  ;;  %v16946_v7 = vld [vmem:[%s19282_s20 + $0x2930] sm:$0xf0]  ;;  %v18787_v48 = vld [vmem:[%s19282_s20 + $0x2a04] sm:$0xf] }
 0x309   : > { %9844 = vmatpush.bf16.msrb.mxu1 %v17141_v17  ;;  %v17109_v17 = vor.u32 %v18799_v4, %v17106_v5  ;;  %v11721_v4 = vor.u32 %v17454_v9, %v11720_v56  ;;  %v18791_v5 = vld [vmem:[%s19282_s20 + $0x2a24] sm:$0xf]  ;;  %v17058_v31 = vld [vmem:[%s19282_s20 + $0x2a10] sm:$0xf0]  ;;  %v11688_v56 = vld [vmem:[%s19282_s20 + $0x8] sm:$0xf] }
 0x30a   : > { %9870 = vmatpush.bf16.msrb.mxu3 %v11897_v22  ;;  %v11865_v22 = vor.u32 %v17490_v2, %v11864_v11  ;;  %v20912_v35 = vadd.f32 %v9617_v0, %v9605_v41  ;;  %v11704_v11 = vld [vmem:[%s19282_s20 + $0x28] sm:$0xf]  ;;  %v17450_v2 = vld [vmem:[%s19282_s20 + $0x34] sm:$0xf0] }
 0x30b   : > { %9857 = vmatpush.bf16.msrb.mxu2 %v11769_v18  ;;  %v11737_v18 = vor.u32 %v17458_v39, %v11736_v45  ;;  %v17074_v39 = vld [vmem:[%s19282_s20 + $0x2a30] sm:$0xf0]  ;;  %v17446_v41 = vld [vmem:[%s19282_s20 + $0x14] sm:$0xf0]  ;;  %v11816_v0 = vld [vmem:[%s19282_s20 + $0x108] sm:$0xf] }
 0x30c   : > { %9832 = vmatpush.bf16.msrb.mxu0 %v16997_v3  ;;  %v17486_v3 = vld [vmem:[%s19282_s20 + $0x154] sm:$0xf0]  ;;  %v17077_v23 = vor.u32 %v18791_v5, %v17074_v39  ;;  %v11689_v39 = vor.u32 %v17446_v41, %v11688_v56  ;;  %v12424_v56 = vld [vmem:[%s19282_s20 + $0x5c8] sm:$0xf] }
 0x30d   : > { %9845 = vmatpush.bf16.msrb.mxu1 %v17125_v62  ;;  %v16965_v62 = vor.u32 %v18763_v44, %v16962_v57  ;;  %v11849_v45 = vor.u32 %v17486_v3, %v11848_v63  ;;  %v18755_v44 = vld [vmem:[%s19282_s20 + $0x2904] sm:$0xf]  ;;  %v16930_v57 = vld [vmem:[%s19282_s20 + $0x2910] sm:$0xf0]  ;;  %v17478_v63 = vld [vmem:[%s19282_s20 + $0x114] sm:$0xf0] }
 0x30e   : > { %9871 = vmatpush.bf16.msrb.mxu3 %v11881_v40  ;;  %v18759_v40 = vld [vmem:[%s19282_s20 + $0x2924] sm:$0xf]  ;;  %v17602_v5 = vld [vmem:[%s19282_s20 + $0x4f4] sm:$0xf0] }
 0x30f   : > { %9858 = vmatpush.bf16.msrb.mxu2 %v11753_v43  ;;  %v9593_v43 = vpop.f32.mrf.mxu1  ;;  %v9606_v3 = vpop.f32.mrf.mxu2 }
 0x310   : > { %9833 = vmatpush.bf16.msrb.mxu0 %v16981_v1  ;;  %v11832_v1 = vld [vmem:[%s19282_s20 + $0x128] sm:$0xf]  ;;  %v17534_v3 = vld [vmem:[%s19282_s20 + $0x2d4] sm:$0xf0] }
 0x311   : > { %9846 = vmatpush.bf16.msrb.mxu1 %v17109_v17  ;;  %v17482_v17 = vld [vmem:[%s19282_s20 + $0x134] sm:$0xf0]  ;;  %v12184_v43 = vld [vmem:[%s19282_s20 + $0x3e8] sm:$0xf] }
 0x312   : > { %9872 = vmatpush.bf16.msrb.mxu3 %v11865_v22  ;;  %v11705_v22 = vor.u32 %v17450_v2, %v11704_v11  ;;  %v11833_v9 = vor.u32 %v17482_v17, %v11832_v1  ;;  %v12440_v11 = vld [vmem:[%s19282_s20 + $0x5e8] sm:$0xf]  ;;  %v17634_v2 = vld [vmem:[%s19282_s20 + $0x5f4] sm:$0xf0]  ;;  %v11817_v1 = vor.u32 %v17478_v63, %v11816_v0 }
 0x313   : > { %9859 = vmatpush.bf16.msrb.mxu2 %v11737_v18  ;;  %v16949_v18 = vor.u32 %v18759_v40, %v16946_v7  ;;  %v17570_v40 = vld [vmem:[%s19282_s20 + $0x3f4] sm:$0xf0]  ;;  %v12312_v7 = vld [vmem:[%s19282_s20 + $0x4e8] sm:$0xf] }
 0x314   : > { %9834 = vmatpush.bf16.msrb.mxu0 %v16965_v62  ;;  %v17538_v62 = vld [vmem:[%s19282_s20 + $0x2f4] sm:$0xf0] }
 0x315   : > { %9847 = vmatpush.bf16.msrb.mxu1 %v17093_v55  ;;  %v9619_v55 = vpop.f32.mrf.mxu3  ;;  %v12057_v17 = vor.u32 %v17538_v62, %v12056_v46  ;;  %v12024_v46 = vld [vmem:[%s19282_s20 + $0x2a8] sm:$0xf]  ;;  %v17530_v62 = vld [vmem:[%s19282_s20 + $0x2b4] sm:$0xf0] }
 0x316   : > { %9873 = vmatpush.bf16.msrb.mxu3 %v11849_v45  ;;  %v17061_v45 = vor.u32 %v18787_v48, %v17058_v31  ;;  %v12168_v55 = vld [vmem:[%s19282_s20 + $0x3c8] sm:$0xf]  ;;  %v17598_v31 = vld [vmem:[%s19282_s20 + $0x4d4] sm:$0xf0] }
 0x317   : > { %9860 = vmatpush.bf16.msrb.mxu2 %v11721_v4  ;;  %v16933_v4 = vor.u32 %v18755_v44, %v16930_v57  ;;  %v12313_v44 = vor.u32 %v17602_v5, %v12312_v7  ;;  %v12040_v57 = vld [vmem:[%s19282_s20 + $0x2c8] sm:$0xf]  ;;  %v17562_v7 = vld [vmem:[%s19282_s20 + $0x3b4] sm:$0xf0] }
 0x318   : > { %9835 = vmatpush.bf16.msrb.mxu0 %v16949_v18  ;;  %v12185_v18 = vor.u32 %v17570_v40, %v12184_v43  ;;  %v12296_v48 = vld [vmem:[%s19282_s20 + $0x4c8] sm:$0xf]  ;;  %v12041_v41 = vor.u32 %v17534_v3, %v12040_v57  ;;  %v17526_v57 = vld [vmem:[%s19282_s20 + $0x294] sm:$0xf0] }
 0x319   : > { %9848 = vmatpush.bf16.msrb.mxu1 %v17077_v23  ;;  %v12441_v23 = vor.u32 %v17634_v2, %v12440_v11  ;;  %v12297_v63 = vor.u32 %v17598_v31, %v12296_v48  ;;  %v12152_v43 = vld [vmem:[%s19282_s20 + $0x3a8] sm:$0xf]  ;;  %v17626_v2 = vld [vmem:[%s19282_s20 + $0x5b4] sm:$0xf0] }
 0x31a   : > { %9874 = vmatpush.bf16.msrb.mxu3 %v11833_v9  ;;  %v17630_v9 = vld [vmem:[%s19282_s20 + $0x5d4] sm:$0xf0]  ;;  %v12280_v5 = vld [vmem:[%s19282_s20 + $0x4a8] sm:$0xf] }
 0x31b   : > { %9861 = vmatpush.bf16.msrb.mxu2 %v11705_v22  ;;  %v17566_v22 = vld [vmem:[%s19282_s20 + $0x3d4] sm:$0xf0]  ;;  %v12425_v40 = vor.u32 %v17630_v9, %v12424_v56  ;;  %v12408_v11 = vld [vmem:[%s19282_s20 + $0x5a8] sm:$0xf] }
 0x31c   : > { %9836 = vmatpush.bf16.msrb.mxu0 %v16933_v4  ;;  %v12169_v0 = vor.u32 %v17566_v22, %v12168_v55  ;;  %v18961_v4 = vld [vmem:[#allocation1 + $0x9] sm:$0xff]  ;;  %v12136_v3 = vld [vmem:[%s19282_s20 + $0x388] sm:$0xf]  ;;  %v12409_v55 = vor.u32 %v17626_v2, %v12408_v11  ;;  %v9630_v31 = vpop.f32.mrf.mxu0 }
 0x31d   : > { %9849 = vmatpush.bf16.msrb.mxu1 %v17061_v45  ;;  %v17594_v45 = vld [vmem:[%s19282_s20 + $0x4b4] sm:$0xf0]  ;;  %v12264_v22 = vld [vmem:[%s19282_s20 + $0x488] sm:$0xf] }
 0x31e   : > { %9875 = vmatpush.bf16.msrb.mxu3 %v11817_v1  ;;  %v12025_v1 = vor.u32 %v17530_v62, %v12024_v46  ;;  %v17590_v48 = vld [vmem:[%s19282_s20 + $0x494] sm:$0xf0]  ;;  %v12392_v56 = vld [vmem:[%s19282_s20 + $0x588] sm:$0xf] }
 0x31f   : > { %9862 = vmatpush.bf16.msrb.mxu2 %v11689_v39  ;;  %9837 = vmatmul.bf16.vlgmr.msrb.gmra.mxu0 %v18961_v4  ;;  %v18962_v39 = vld [vmem:[#allocation1 + $0x12] sm:$0xff]  ;;  %v17622_v9 = vld [vmem:[%s19282_s20 + $0x594] sm:$0xf0]  ;;  %v12265_v62 = vor.u32 %v17590_v48, %v12264_v22 }
 0x320   : > { %9881 = vmatpush.bf16.msra.mxu0 %v12057_v17  ;;  %9850 = vmatmul.bf16.vlgmr.msrb.gmra.mxu1 %v18962_v39  ;;  %v12153_v17 = vor.u32 %v17562_v7, %v12152_v43  ;;  %v11992_v43 = vld [vmem:[%s19282_s20 + $0x268] sm:$0xf]  ;;  %v17522_v4 = vld [vmem:[%s19282_s20 + $0x274] sm:$0xf0]  ;;  %v12393_v7 = vor.u32 %v17622_v9, %v12392_v56 }
 0x321   : > { %9894 = vmatpush.bf16.msra.mxu1 %v12185_v18  ;;  %9876 = vmatmul.bf16.vlgmr.msrb.gmra.mxu3 %v19414_v38  ;;  %v12281_v18 = vor.u32 %v17594_v45, %v12280_v5  ;;  %v17554_v45 = vld [vmem:[%s19282_s20 + $0x374] sm:$0xf0]  ;;  %v12248_v39 = vld [vmem:[%s19282_s20 + $0x468] sm:$0xf] }
 0x322   : > { %9920 = vmatpush.bf16.msra.mxu3 %v12441_v23  ;;  %9863 = vmatmul.bf16.vlgmr.msrb.gmra.mxu2 %v19407_v33  ;;  %v17558_v23 = vld [vmem:[%s19282_s20 + $0x394] sm:$0xf0]  ;;  %v12376_v11 = vld [vmem:[%s19282_s20 + $0x568] sm:$0xf] }
 0x323   : > { %9907 = vmatpush.bf16.msra.mxu2 %v12313_v44  ;;  %v12008_v44 = vld [vmem:[%s19282_s20 + $0x288] sm:$0xf]  ;;  %v12137_v46 = vor.u32 %v17558_v23, %v12136_v3  ;;  %v17618_v2 = vld [vmem:[%s19282_s20 + $0x574] sm:$0xf0] }
 0x324   : > { %9882 = vmatpush.bf16.msra.mxu0 %v12041_v41  ;;  %v9631_v41 = vadd.f32 %v9630_v31, %v20912_v35  ;;  %v17586_v35 = vld [vmem:[%s19282_s20 + $0x474] sm:$0xf0]  ;;  %v12104_v3 = vld [vmem:[%s19282_s20 + $0x348] sm:$0xf]  ;;  %v9669_v9 = vpop.f32.mrf.mxu3 }
 0x325   : > { %9895 = vmatpush.bf16.msra.mxu1 %v12169_v0  ;;  %v12009_v0 = vor.u32 %v17526_v57, %v12008_v44  ;;  %v11976_v44 = vld [vmem:[%s19282_s20 + $0x248] sm:$0xf]  ;;  %v17518_v57 = vld [vmem:[%s19282_s20 + $0x254] sm:$0xf0]  ;;  %v9656_v23 = vpop.f32.mrf.mxu2 }
 0x326   : > { %9921 = vmatpush.bf16.msra.mxu3 %v12425_v40  ;;  %v12120_v40 = vld [vmem:[%s19282_s20 + $0x368] sm:$0xf]  ;;  %v17550_v22 = vld [vmem:[%s19282_s20 + $0x354] sm:$0xf0] }
 0x327   : > { %9908 = vmatpush.bf16.msra.mxu2 %v12297_v63  ;;  %v9643_v63 = vpop.f32.mrf.mxu1  ;;  %v12232_v48 = vld [vmem:[%s19282_s20 + $0x448] sm:$0xf]  ;;  %v17582_v31 = vld [vmem:[%s19282_s20 + $0x454] sm:$0xf0] }
 0x328   : > { %9883 = vmatpush.bf16.msra.mxu0 %v12025_v1  ;;  %v9644_v5 = vadd.f32 %v9643_v63, %v9631_v41  ;;  %v11993_v1 = vor.u32 %v17522_v4, %v11992_v43  ;;  %v12360_v41 = vld [vmem:[%s19282_s20 + $0x548] sm:$0xf]  ;;  %v9632_v63 = vpop.f32.mrf.mxu0  ;;  %v12105_v4 = vor.u32 %v17550_v22, %v12104_v3  ;;  %v17542_v22 = vld [vmem:[%s19282_s20 + $0x314] sm:$0xf0] }
 0x329   : > { %9896 = vmatpush.bf16.msra.mxu1 %v12153_v17  ;;  %v12121_v17 = vor.u32 %v17554_v45, %v12120_v40  ;;  %v12233_v40 = vor.u32 %v17582_v31, %v12232_v48  ;;  %v12088_v45 = vld [vmem:[%s19282_s20 + $0x328] sm:$0xf] }
 0x32a   : > { %9922 = vmatpush.bf16.msra.mxu3 %v12409_v55  ;;  %v12377_v55 = vor.u32 %v17618_v2, %v12376_v11  ;;  %v9657_v56 = vadd.f32 %v9656_v23, %v9644_v5  ;;  %v17514_v5 = vld [vmem:[%s19282_s20 + $0x234] sm:$0xf0]  ;;  %v12216_v11 = vld [vmem:[%s19282_s20 + $0x428] sm:$0xf] }
 0x32b   : > { %9909 = vmatpush.bf16.msra.mxu2 %v12281_v18  ;;  %v12249_v18 = vor.u32 %v17586_v35, %v12248_v39  ;;  %v17546_v35 = vld [vmem:[%s19282_s20 + $0x334] sm:$0xf0]  ;;  %v12072_v23 = vld [vmem:[%s19282_s20 + $0x308] sm:$0xf] }
 0x32c   : > { %9884 = vmatpush.bf16.msra.mxu0 %v12009_v0  ;;  %v17614_v0 = vld [vmem:[%s19282_s20 + $0x554] sm:$0xf0]  ;;  %v20981_v43 = vadd.f32 %v9669_v9, %v9657_v56  ;;  %v12089_v3 = vor.u32 %v17546_v35, %v12088_v45  ;;  %v12200_v48 = vld [vmem:[%s19282_s20 + $0x408] sm:$0xf] }
 0x32d   : > { %9897 = vmatpush.bf16.msra.mxu1 %v12137_v46  ;;  %v11977_v46 = vor.u32 %v17518_v57, %v11976_v44  ;;  %v12361_v39 = vor.u32 %v17614_v0, %v12360_v41  ;;  %v17578_v2 = vld [vmem:[%s19282_s20 + $0x434] sm:$0xf0]  ;;  %v11944_v44 = vld [vmem:[%s19282_s20 + $0x208] sm:$0xf]  ;;  %v9658_v0 = vpop.f32.mrf.mxu2 }
 0x32e   : > { %9923 = vmatpush.bf16.msra.mxu3 %v12393_v7  ;;  %v11960_v7 = vld [vmem:[%s19282_s20 + $0x228] sm:$0xf]  ;;  %v17510_v57 = vld [vmem:[%s19282_s20 + $0x214] sm:$0xf0] }
 0x32f   : > { %9910 = vmatpush.bf16.msra.mxu2 %v12265_v62  ;;  %v9645_v62 = vpop.f32.mrf.mxu1  ;;  %v17574_v56 = vld [vmem:[%s19282_s20 + $0x414] sm:$0xf0]  ;;  %v12328_v9 = vld [vmem:[%s19282_s20 + $0x508] sm:$0xf] }
 0x330   : > { %9885 = vmatpush.bf16.msra.mxu0 %v11993_v1  ;;  %v12344_v1 = vld [vmem:[%s19282_s20 + $0x528] sm:$0xf]  ;;  %v17606_v41 = vld [vmem:[%s19282_s20 + $0x514] sm:$0xf0]  ;;  %v12201_v35 = vor.u32 %v17574_v56, %v12200_v48 }
 0x331   : > { %9898 = vmatpush.bf16.msra.mxu1 %v12121_v17  ;;  %v17610_v17 = vld [vmem:[%s19282_s20 + $0x534] sm:$0xf0]  ;;  %v12568_v63 = vld [vmem:[%s19282_s20 + $0x6e8] sm:$0xf] }
 0x332   : > { %9924 = vmatpush.bf16.msra.mxu3 %v12377_v55  ;;  %v12217_v55 = vor.u32 %v17578_v2, %v12216_v11  ;;  %v12345_v31 = vor.u32 %v17610_v17, %v12344_v1  ;;  %v12696_v62 = vld [vmem:[%s19282_s20 + $0x7e8] sm:$0xf]  ;;  %v17730_v45 = vld [vmem:[%s19282_s20 + $0x8f4] sm:$0xf0]  ;;  %v12329_v1 = vor.u32 %v17606_v41, %v12328_v9 }
 0x333   : > { %9911 = vmatpush.bf16.msra.mxu2 %v12249_v18  ;;  %v11961_v18 = vor.u32 %v17514_v5, %v11960_v7  ;;  %v17698_v7 = vld [vmem:[%s19282_s20 + $0x7f4] sm:$0xf0]  ;;  %v12824_v5 = vld [vmem:[%s19282_s20 + $0x8e8] sm:$0xf] }
 0x334   : > { %9886 = vmatpush.bf16.msra.mxu0 %v11977_v46  ;;  %v17666_v46 = vld [vmem:[%s19282_s20 + $0x6f4] sm:$0xf0]  ;;  %v12952_v11 = vld [vmem:[%s19282_s20 + $0x9e8] sm:$0xf] }
 0x335   : > { %9899 = vmatpush.bf16.msra.mxu1 %v12105_v4  ;;  %v9671_v4 = vpop.f32.mrf.mxu3  ;;  %v17762_v2 = vld [vmem:[%s19282_s20 + $0x9f4] sm:$0xf0]  ;;  %v12569_v17 = vor.u32 %v17666_v46, %v12568_v63  ;;  %v12936_v48 = vld [vmem:[%s19282_s20 + $0x9c8] sm:$0xf] }
 0x336   : > { %9925 = vmatpush.bf16.msra.mxu3 %v12361_v39  ;;  %v12073_v39 = vor.u32 %v17542_v22, %v12072_v23  ;;  %v17662_v0 = vld [vmem:[%s19282_s20 + $0x6d4] sm:$0xf0]  ;;  %v12680_v4 = vld [vmem:[%s19282_s20 + $0x7c8] sm:$0xf] }
 0x337   : > { %9912 = vmatpush.bf16.msra.mxu2 %v12233_v40  ;;  %v11945_v40 = vor.u32 %v17510_v57, %v11944_v44  ;;  %v12825_v44 = vor.u32 %v17730_v45, %v12824_v5  ;;  %v12552_v57 = vld [vmem:[%s19282_s20 + $0x6c8] sm:$0xf]  ;;  %v17726_v22 = vld [vmem:[%s19282_s20 + $0x8d4] sm:$0xf0] }
 0x338   : > { %9887 = vmatpush.bf16.msra.mxu0 %v11961_v18  ;;  %v12697_v18 = vor.u32 %v17698_v7, %v12696_v62  ;;  %v12808_v23 = vld [vmem:[%s19282_s20 + $0x8c8] sm:$0xf]  ;;  %v12553_v56 = vor.u32 %v17662_v0, %v12552_v57  ;;  %v17658_v46 = vld [vmem:[%s19282_s20 + $0x6b4] sm:$0xf0] }
 0x339   : > { %9900 = vmatpush.bf16.msra.mxu1 %v12089_v3  ;;  %v12953_v3 = vor.u32 %v17762_v2, %v12952_v11  ;;  %v12809_v41 = vor.u32 %v17726_v22, %v12808_v23  ;;  %v12536_v63 = vld [vmem:[%s19282_s20 + $0x6a8] sm:$0xf]  ;;  %v17690_v7 = vld [vmem:[%s19282_s20 + $0x7b4] sm:$0xf0] }
 0x33a   : > { %9926 = vmatpush.bf16.msra.mxu3 %v12345_v31  ;;  %v17758_v31 = vld [vmem:[%s19282_s20 + $0x9d4] sm:$0xf0]  ;;  %v12664_v62 = vld [vmem:[%s19282_s20 + $0x7a8] sm:$0xf]  ;;  %v12537_v11 = vor.u32 %v17658_v46, %v12536_v63 }
 0x33b   : > { %9913 = vmatpush.bf16.msra.mxu2 %v12217_v55  ;;  %v17694_v55 = vld [vmem:[%s19282_s20 + $0x7d4] sm:$0xf0]  ;;  %v12792_v5 = vld [vmem:[%s19282_s20 + $0x8a8] sm:$0xf]  ;;  %v12665_v2 = vor.u32 %v17690_v7, %v12664_v62 }
 0x33c   : > { %9888 = vmatpush.bf16.msra.mxu0 %v11945_v40  ;;  %v12681_v9 = vor.u32 %v17694_v55, %v12680_v4  ;;  %v12937_v40 = vor.u32 %v17758_v31, %v12936_v48  ;;  %v17722_v45 = vld [vmem:[%s19282_s20 + $0x8b4] sm:$0xf0]  ;;  %v12776_v4 = vld [vmem:[%s19282_s20 + $0x888] sm:$0xf]  ;;  %v9682_v55 = vpop.f32.mrf.mxu0 }
 0x33d   : > { %9901 = vmatpush.bf16.msra.mxu1 %v12073_v39  ;;  %v12920_v39 = vld [vmem:[%s19282_s20 + $0x9a8] sm:$0xf]  ;;  %v17686_v0 = vld [vmem:[%s19282_s20 + $0x794] sm:$0xf0]  ;;  %v9683_v48 = vadd.f32 %v9682_v55, %v20981_v43 }
 0x33e   : > { %9927 = vmatpush.bf16.msra.mxu3 %v12329_v1  ;;  %v12793_v1 = vor.u32 %v17722_v45, %v12792_v5  ;;  %v12904_v23 = vld [vmem:[%s19282_s20 + $0x988] sm:$0xf]  ;;  %v17750_v22 = vld [vmem:[%s19282_s20 + $0x994] sm:$0xf0] }
 0x33f   : > { %9914 = vmatpush.bf16.msra.mxu2 %v12201_v35  ;;  %9889 = vmatmul.bf16.vlgmr.msra.gmra.mxu0 %v19405_v32  ;;  %v17754_v35 = vld [vmem:[%s19282_s20 + $0x9b4] sm:$0xf0]  ;;  %v12504_v63 = vld [vmem:[%s19282_s20 + $0x668] sm:$0xf] }
 0x340   : > { %9933 = vmatpush.bf16.msrb.mxu0 %v12569_v17  ;;  %9902 = vmatmul.bf16.vlgmr.msra.gmra.mxu1 %v19409_v34  ;;  %v12520_v17 = vld [vmem:[%s19282_s20 + $0x688] sm:$0xf]  ;;  %v12921_v57 = vor.u32 %v17754_v35, %v12920_v39  ;;  %v17650_v46 = vld [vmem:[%s19282_s20 + $0x674] sm:$0xf0] }
 0x341   : > { %9946 = vmatpush.bf16.msrb.mxu1 %v12697_v18  ;;  %9928 = vmatmul.bf16.vlgmr.msra.gmra.mxu3 %v19450_v14  ;;  %v17654_v18 = vld [vmem:[%s19282_s20 + $0x694] sm:$0xf0]  ;;  %v12632_v62 = vld [vmem:[%s19282_s20 + $0x768] sm:$0xf] }
 0x342   : > { %9972 = vmatpush.bf16.msrb.mxu3 %v12953_v3  ;;  %9915 = vmatmul.bf16.vlgmr.msra.gmra.mxu2 %v19446_v12  ;;  %v17718_v3 = vld [vmem:[%s19282_s20 + $0x894] sm:$0xf0]  ;;  %v12521_v31 = vor.u32 %v17654_v18, %v12520_v17  ;;  %v12760_v45 = vld [vmem:[%s19282_s20 + $0x868] sm:$0xf] }
 0x343   : > { %9959 = vmatpush.bf16.msrb.mxu2 %v12825_v44  ;;  %v12648_v44 = vld [vmem:[%s19282_s20 + $0x788] sm:$0xf]  ;;  %v17682_v5 = vld [vmem:[%s19282_s20 + $0x774] sm:$0xf0] }
 0x344   : > { %9934 = vmatpush.bf16.msrb.mxu0 %v12553_v56  ;;  %v9695_v56 = vpop.f32.mrf.mxu1  ;;  %v17714_v43 = vld [vmem:[%s19282_s20 + $0x874] sm:$0xf0]  ;;  %v12888_v39 = vld [vmem:[%s19282_s20 + $0x968] sm:$0xf] }
 0x345   : > { %9947 = vmatpush.bf16.msrb.mxu1 %v12681_v9  ;;  %v12649_v9 = vor.u32 %v17686_v0, %v12648_v44  ;;  %v9696_v7 = vadd.f32 %v9695_v56, %v9683_v48  ;;  %v17746_v35 = vld [vmem:[%s19282_s20 + $0x974] sm:$0xf0]  ;;  %v12488_v17 = vld [vmem:[%s19282_s20 + $0x648] sm:$0xf]  ;;  %v9708_v0 = vpop.f32.mrf.mxu2  ;;  %v9684_v56 = vpop.f32.mrf.mxu0 }
 0x346   : > { %9973 = vmatpush.bf16.msrb.mxu3 %v12937_v40  ;;  %v12905_v40 = vor.u32 %v17750_v22, %v12904_v23  ;;  %v17646_v18 = vld [vmem:[%s19282_s20 + $0x654] sm:$0xf0]  ;;  %v12616_v44 = vld [vmem:[%s19282_s20 + $0x748] sm:$0xf]  ;;  %v9721_v22 = vpop.f32.mrf.mxu3 }
 0x347   : > { %9960 = vmatpush.bf16.msrb.mxu2 %v12809_v41  ;;  %v12777_v41 = vor.u32 %v17718_v3, %v12776_v4  ;;  %v17678_v4 = vld [vmem:[%s19282_s20 + $0x754] sm:$0xf0]  ;;  %v12744_v3 = vld [vmem:[%s19282_s20 + $0x848] sm:$0xf]  ;;  %v9709_v23 = vadd.f32 %v9708_v0, %v9696_v7 }
 0x348   : > { %9935 = vmatpush.bf16.msrb.mxu0 %v12537_v11  ;;  %v12505_v11 = vor.u32 %v17650_v46, %v12504_v63  ;;  %v17710_v55 = vld [vmem:[%s19282_s20 + $0x854] sm:$0xf0]  ;;  %v12872_v48 = vld [vmem:[%s19282_s20 + $0x948] sm:$0xf]  ;;  %v12617_v46 = vor.u32 %v17678_v4, %v12616_v44 }
 0x349   : > { %9948 = vmatpush.bf16.msrb.mxu1 %v12665_v2  ;;  %v12633_v2 = vor.u32 %v17682_v5, %v12632_v62  ;;  %v21052_v63 = vadd.f32 %v9721_v22, %v9709_v23  ;;  %v12745_v62 = vor.u32 %v17710_v55, %v12744_v3  ;;  %v17642_v7 = vld [vmem:[%s19282_s20 + $0x634] sm:$0xf0]  ;;  %v12600_v5 = vld [vmem:[%s19282_s20 + $0x728] sm:$0xf] }
 0x34a   : > { %9974 = vmatpush.bf16.msrb.mxu3 %v12921_v57  ;;  %v12889_v57 = vor.u32 %v17746_v35, %v12888_v39  ;;  %v12728_v39 = vld [vmem:[%s19282_s20 + $0x828] sm:$0xf]  ;;  %v17706_v35 = vld [vmem:[%s19282_s20 + $0x834] sm:$0xf0] }
 0x34b   : > { %9961 = vmatpush.bf16.msrb.mxu2 %v12793_v1  ;;  %v12761_v1 = vor.u32 %v17714_v43, %v12760_v45  ;;  %v17674_v43 = vld [vmem:[%s19282_s20 + $0x734] sm:$0xf0]  ;;  %v12584_v0 = vld [vmem:[%s19282_s20 + $0x708] sm:$0xf] }
 0x34c   : > { %9936 = vmatpush.bf16.msrb.mxu0 %v12521_v31  ;;  %v17742_v31 = vld [vmem:[%s19282_s20 + $0x954] sm:$0xf0]  ;;  %v12601_v44 = vor.u32 %v17674_v43, %v12600_v5  ;;  %v12712_v3 = vld [vmem:[%s19282_s20 + $0x808] sm:$0xf] }
 0x34d   : > { %9949 = vmatpush.bf16.msrb.mxu1 %v12649_v9  ;;  %v12489_v9 = vor.u32 %v17646_v18, %v12488_v17  ;;  %v12873_v45 = vor.u32 %v17742_v31, %v12872_v48  ;;  %v12456_v17 = vld [vmem:[%s19282_s20 + $0x608] sm:$0xf]  ;;  %v17638_v18 = vld [vmem:[%s19282_s20 + $0x614] sm:$0xf0]  ;;  %v9710_v31 = vpop.f32.mrf.mxu2 }
 0x34e   : > { %9975 = vmatpush.bf16.msrb.mxu3 %v12905_v40  ;;  %v12472_v40 = vld [vmem:[%s19282_s20 + $0x628] sm:$0xf]  ;;  %v17670_v4 = vld [vmem:[%s19282_s20 + $0x714] sm:$0xf0] }
 0x34f   : > { %9962 = vmatpush.bf16.msrb.mxu2 %v12777_v41  ;;  %v9697_v41 = vpop.f32.mrf.mxu1  ;;  %v17702_v23 = vld [vmem:[%s19282_s20 + $0x814] sm:$0xf0]  ;;  %v12840_v22 = vld [vmem:[%s19282_s20 + $0x908] sm:$0xf] }
 0x350   : > { %9937 = vmatpush.bf16.msrb.mxu0 %v12505_v11  ;;  %v12856_v11 = vld [vmem:[%s19282_s20 + $0x928] sm:$0xf]  ;;  %v17734_v48 = vld [vmem:[%s19282_s20 + $0x914] sm:$0xf0]  ;;  %v12713_v43 = vor.u32 %v17702_v23, %v12712_v3 }
 0x351   : > { %9950 = vmatpush.bf16.msrb.mxu1 %v12633_v2  ;;  %v17738_v2 = vld [vmem:[%s19282_s20 + $0x934] sm:$0xf0]  ;;  %v13080_v56 = vld [vmem:[%s19282_s20 + $0xae8] sm:$0xf] }
 0x352   : > { %9976 = vmatpush.bf16.msrb.mxu3 %v12889_v57  ;;  %v12729_v57 = vor.u32 %v17706_v35, %v12728_v39  ;;  %v12857_v55 = vor.u32 %v17738_v2, %v12856_v11  ;;  %v13208_v41 = vld [vmem:[%s19282_s20 + $0xbe8] sm:$0xf]  ;;  %v17858_v5 = vld [vmem:[%s19282_s20 + $0xcf4] sm:$0xf0]  ;;  %v12841_v11 = vor.u32 %v17734_v48, %v12840_v22 }
 0x353   : > { %9963 = vmatpush.bf16.msrb.mxu2 %v12761_v1  ;;  %v12473_v1 = vor.u32 %v17642_v7, %v12472_v40  ;;  %v17826_v40 = vld [vmem:[%s19282_s20 + $0xbf4] sm:$0xf0]  ;;  %v13336_v7 = vld [vmem:[%s19282_s20 + $0xce8] sm:$0xf] }
 0x354   : > { %9938 = vmatpush.bf16.msrb.mxu0 %v12489_v9  ;;  %v17794_v9 = vld [vmem:[%s19282_s20 + $0xaf4] sm:$0xf0]  ;;  %v13464_v39 = vld [vmem:[%s19282_s20 + $0xde8] sm:$0xf] }
 0x355   : > { %9951 = vmatpush.bf16.msrb.mxu1 %v12617_v46  ;;  %v9723_v46 = vpop.f32.mrf.mxu3  ;;  %v17890_v35 = vld [vmem:[%s19282_s20 + $0xdf4] sm:$0xf0]  ;;  %v13081_v2 = vor.u32 %v17794_v9, %v13080_v56  ;;  %v13448_v3 = vld [vmem:[%s19282_s20 + $0xdc8] sm:$0xf] }
 0x356   : > { %9977 = vmatpush.bf16.msrb.mxu3 %v12873_v45  ;;  %v12585_v45 = vor.u32 %v17670_v4, %v12584_v0  ;;  %v17790_v31 = vld [vmem:[%s19282_s20 + $0xad4] sm:$0xf0]  ;;  %v13192_v46 = vld [vmem:[%s19282_s20 + $0xbc8] sm:$0xf] }
 0x357   : > { %9964 = vmatpush.bf16.msrb.mxu2 %v12745_v62  ;;  %v12457_v62 = vor.u32 %v17638_v18, %v12456_v17  ;;  %v13337_v17 = vor.u32 %v17858_v5, %v13336_v7  ;;  %v13064_v18 = vld [vmem:[%s19282_s20 + $0xac8] sm:$0xf]  ;;  %v17854_v4 = vld [vmem:[%s19282_s20 + $0xcd4] sm:$0xf0] }
 0x358   : > { %9939 = vmatpush.bf16.msrb.mxu0 %v12473_v1  ;;  %v13209_v1 = vor.u32 %v17826_v40, %v13208_v41  ;;  %v13320_v0 = vld [vmem:[%s19282_s20 + $0xcc8] sm:$0xf]  ;;  %v13065_v23 = vor.u32 %v17790_v31, %v13064_v18  ;;  %v17786_v9 = vld [vmem:[%s19282_s20 + $0xab4] sm:$0xf0] }
 0x359   : > { %9952 = vmatpush.bf16.msrb.mxu1 %v12601_v44  ;;  %v13465_v44 = vor.u32 %v17890_v35, %v13464_v39  ;;  %v13321_v48 = vor.u32 %v17854_v4, %v13320_v0  ;;  %v13048_v56 = vld [vmem:[%s19282_s20 + $0xaa8] sm:$0xf]  ;;  %v17818_v40 = vld [vmem:[%s19282_s20 + $0xbb4] sm:$0xf0] }
 0x35a   : > { %9978 = vmatpush.bf16.msrb.mxu3 %v12857_v55  ;;  %v17886_v55 = vld [vmem:[%s19282_s20 + $0xdd4] sm:$0xf0]  ;;  %v13176_v41 = vld [vmem:[%s19282_s20 + $0xba8] sm:$0xf]  ;;  %v13049_v39 = vor.u32 %v17786_v9, %v13048_v56 }
 0x35b   : > { %9965 = vmatpush.bf16.msrb.mxu2 %v12729_v57  ;;  %v17822_v57 = vld [vmem:[%s19282_s20 + $0xbd4] sm:$0xf0]  ;;  %v13304_v7 = vld [vmem:[%s19282_s20 + $0xca8] sm:$0xf]  ;;  %v13177_v35 = vor.u32 %v17818_v40, %v13176_v41 }
 0x35c   : > { %9940 = vmatpush.bf16.msrb.mxu0 %v12457_v62  ;;  %v13193_v22 = vor.u32 %v17822_v57, %v13192_v46  ;;  %v13449_v62 = vor.u32 %v17886_v55, %v13448_v3  ;;  %v17850_v5 = vld [vmem:[%s19282_s20 + $0xcb4] sm:$0xf0]  ;;  %v13288_v46 = vld [vmem:[%s19282_s20 + $0xc88] sm:$0xf]  ;;  %v9734_v57 = vpop.f32.mrf.mxu0 }
 0x35d   : > { %9953 = vmatpush.bf16.msrb.mxu1 %v12585_v45  ;;  %v13432_v45 = vld [vmem:[%s19282_s20 + $0xda8] sm:$0xf]  ;;  %v17814_v31 = vld [vmem:[%s19282_s20 + $0xb94] sm:$0xf0]  ;;  %v9735_v3 = vadd.f32 %v9734_v57, %v21052_v63 }
 0x35e   : > { %9979 = vmatpush.bf16.msrb.mxu3 %v12841_v11  ;;  %v13305_v11 = vor.u32 %v17850_v5, %v13304_v7  ;;  %v13416_v0 = vld [vmem:[%s19282_s20 + $0xd88] sm:$0xf]  ;;  %v17878_v4 = vld [vmem:[%s19282_s20 + $0xd94] sm:$0xf0] }
 0x35f   : > { %9966 = vmatpush.bf16.msrb.mxu2 %v12713_v43  ;;  %9941 = vmatmul.bf16.vlgmr.msrb.gmra.mxu0 %v19443_v8  ;;  %v17882_v43 = vld [vmem:[%s19282_s20 + $0xdb4] sm:$0xf0]  ;;  %v13016_v56 = vld [vmem:[%s19282_s20 + $0xa68] sm:$0xf] }
 0x360   : > { %9985 = vmatpush.bf16.msra.mxu0 %v13081_v2  ;;  %9954 = vmatmul.bf16.vlgmr.msrb.gmra.mxu1 %v19448_v13  ;;  %v13032_v2 = vld [vmem:[%s19282_s20 + $0xa88] sm:$0xf]  ;;  %v13433_v18 = vor.u32 %v17882_v43, %v13432_v45  ;;  %v17778_v9 = vld [vmem:[%s19282_s20 + $0xa74] sm:$0xf0] }
 0x361   : > { %9998 = vmatpush.bf16.msra.mxu1 %v13209_v1  ;;  %9980 = vmatmul.bf16.vlgmr.msrb.gmra.mxu3 %v19542_v28  ;;  %v17782_v1 = vld [vmem:[%s19282_s20 + $0xa94] sm:$0xf0]  ;;  %v13144_v41 = vld [vmem:[%s19282_s20 + $0xb68] sm:$0xf] }
 0x362   : > { %10024 = vmatpush.bf16.msra.mxu3 %v13465_v44  ;;  %9967 = vmatmul.bf16.vlgmr.msrb.gmra.mxu2 %v19536_v24  ;;  %v17846_v44 = vld [vmem:[%s19282_s20 + $0xc94] sm:$0xf0]  ;;  %v13033_v55 = vor.u32 %v17782_v1, %v13032_v2  ;;  %v13272_v5 = vld [vmem:[%s19282_s20 + $0xc68] sm:$0xf] }
 0x363   : > { %10011 = vmatpush.bf16.msra.mxu2 %v13337_v17  ;;  %v13160_v17 = vld [vmem:[%s19282_s20 + $0xb88] sm:$0xf]  ;;  %v17810_v7 = vld [vmem:[%s19282_s20 + $0xb74] sm:$0xf0] }
 0x364   : > { %9986 = vmatpush.bf16.msra.mxu0 %v13065_v23  ;;  %v9747_v23 = vpop.f32.mrf.mxu1  ;;  %v17842_v63 = vld [vmem:[%s19282_s20 + $0xc74] sm:$0xf0]  ;;  %v13400_v45 = vld [vmem:[%s19282_s20 + $0xd68] sm:$0xf] }
 0x365   : > { %9999 = vmatpush.bf16.msra.mxu1 %v13193_v22  ;;  %v13161_v22 = vor.u32 %v17814_v31, %v13160_v17  ;;  %v9748_v40 = vadd.f32 %v9747_v23, %v9735_v3  ;;  %v17874_v43 = vld [vmem:[%s19282_s20 + $0xd74] sm:$0xf0]  ;;  %v13000_v2 = vld [vmem:[%s19282_s20 + $0xa48] sm:$0xf]  ;;  %v9760_v31 = vpop.f32.mrf.mxu2  ;;  %v9736_v23 = vpop.f32.mrf.mxu0 }
 0x366   : > { %10025 = vmatpush.bf16.msra.mxu3 %v13449_v62  ;;  %v13417_v62 = vor.u32 %v17878_v4, %v13416_v0  ;;  %v17774_v1 = vld [vmem:[%s19282_s20 + $0xa54] sm:$0xf0]  ;;  %v13128_v17 = vld [vmem:[%s19282_s20 + $0xb48] sm:$0xf]  ;;  %v9773_v4 = vpop.f32.mrf.mxu3 }
 0x367   : > { %10012 = vmatpush.bf16.msra.mxu2 %v13321_v48  ;;  %v13289_v48 = vor.u32 %v17846_v44, %v13288_v46  ;;  %v17806_v46 = vld [vmem:[%s19282_s20 + $0xb54] sm:$0xf0]  ;;  %v13256_v44 = vld [vmem:[%s19282_s20 + $0xc48] sm:$0xf]  ;;  %v9761_v0 = vadd.f32 %v9760_v31, %v9748_v40 }
 0x368   : > { %9987 = vmatpush.bf16.msra.mxu0 %v13049_v39  ;;  %v13017_v39 = vor.u32 %v17778_v9, %v13016_v56  ;;  %v17838_v57 = vld [vmem:[%s19282_s20 + $0xc54] sm:$0xf0]  ;;  %v13384_v3 = vld [vmem:[%s19282_s20 + $0xd48] sm:$0xf]  ;;  %v13129_v9 = vor.u32 %v17806_v46, %v13128_v17 }
 0x369   : > { %10000 = vmatpush.bf16.msra.mxu1 %v13177_v35  ;;  %v13145_v35 = vor.u32 %v17810_v7, %v13144_v41  ;;  %v21123_v56 = vadd.f32 %v9773_v4, %v9761_v0  ;;  %v13257_v41 = vor.u32 %v17838_v57, %v13256_v44  ;;  %v17770_v40 = vld [vmem:[%s19282_s20 + $0xa34] sm:$0xf0]  ;;  %v13112_v7 = vld [vmem:[%s19282_s20 + $0xb28] sm:$0xf] }
 0x36a   : > { %10026 = vmatpush.bf16.msra.mxu3 %v13433_v18  ;;  %v13401_v18 = vor.u32 %v17874_v43, %v13400_v45  ;;  %v13240_v45 = vld [vmem:[%s19282_s20 + $0xc28] sm:$0xf]  ;;  %v17834_v43 = vld [vmem:[%s19282_s20 + $0xc34] sm:$0xf0] }
 0x36b   : > { %10013 = vmatpush.bf16.msra.mxu2 %v13305_v11  ;;  %v13273_v11 = vor.u32 %v17842_v63, %v13272_v5  ;;  %v17802_v63 = vld [vmem:[%s19282_s20 + $0xb34] sm:$0xf0]  ;;  %v13096_v31 = vld [vmem:[%s19282_s20 + $0xb08] sm:$0xf] }
 0x36c   : > { %9988 = vmatpush.bf16.msra.mxu0 %v13033_v55  ;;  %v17870_v55 = vld [vmem:[%s19282_s20 + $0xd54] sm:$0xf0]  ;;  %v13113_v17 = vor.u32 %v17802_v63, %v13112_v7  ;;  %v13224_v44 = vld [vmem:[%s19282_s20 + $0xc08] sm:$0xf] }
 0x36d   : > { %10001 = vmatpush.bf16.msra.mxu1 %v13161_v22  ;;  %v13001_v22 = vor.u32 %v17774_v1, %v13000_v2  ;;  %v13385_v5 = vor.u32 %v17870_v55, %v13384_v3  ;;  %v12968_v2 = vld [vmem:[%s19282_s20 + $0xa08] sm:$0xf]  ;;  %v17766_v1 = vld [vmem:[%s19282_s20 + $0xa14] sm:$0xf0]  ;;  %v9762_v55 = vpop.f32.mrf.mxu2 }
 0x36e   : > { %10027 = vmatpush.bf16.msra.mxu3 %v13417_v62  ;;  %v12984_v62 = vld [vmem:[%s19282_s20 + $0xa28] sm:$0xf]  ;;  %v17798_v46 = vld [vmem:[%s19282_s20 + $0xb14] sm:$0xf0] }
 0x36f   : > { %10014 = vmatpush.bf16.msra.mxu2 %v13289_v48  ;;  %v9749_v48 = vpop.f32.mrf.mxu1  ;;  %v17830_v0 = vld [vmem:[%s19282_s20 + $0xc14] sm:$0xf0]  ;;  %v13352_v4 = vld [vmem:[%s19282_s20 + $0xd08] sm:$0xf] }
 0x370   : > { %9989 = vmatpush.bf16.msra.mxu0 %v13017_v39  ;;  %v13368_v39 = vld [vmem:[%s19282_s20 + $0xd28] sm:$0xf]  ;;  %v17862_v3 = vld [vmem:[%s19282_s20 + $0xd14] sm:$0xf0]  ;;  %v13225_v63 = vor.u32 %v17830_v0, %v13224_v44 }
 0x371   : > { %10002 = vmatpush.bf16.msra.mxu1 %v13145_v35  ;;  %v17866_v35 = vld [vmem:[%s19282_s20 + $0xd34] sm:$0xf0]  ;;  %v13592_v23 = vld [vmem:[%s19282_s20 + $0xee8] sm:$0xf] }
 0x372   : > { %10028 = vmatpush.bf16.msra.mxu3 %v13401_v18  ;;  %v13241_v18 = vor.u32 %v17834_v43, %v13240_v45  ;;  %v13369_v57 = vor.u32 %v17866_v35, %v13368_v39  ;;  %v13720_v48 = vld [vmem:[%s19282_s20 + $0xfe8] sm:$0xf]  ;;  %v17986_v7 = vld [vmem:[%s19282_s20 + $0x10f4] sm:$0xf0]  ;;  %v13353_v39 = vor.u32 %v17862_v3, %v13352_v4 }
 0x373   : > { %10015 = vmatpush.bf16.msra.mxu2 %v13273_v11  ;;  %v12985_v11 = vor.u32 %v17770_v40, %v12984_v62  ;;  %v17954_v62 = vld [vmem:[%s19282_s20 + $0xff4] sm:$0xf0]  ;;  %v13848_v40 = vld [vmem:[%s19282_s20 + $0x10e8] sm:$0xf] }
 0x374   : > { %9990 = vmatpush.bf16.msra.mxu0 %v13001_v22  ;;  %v17922_v22 = vld [vmem:[%s19282_s20 + $0xef4] sm:$0xf0]  ;;  %v13976_v45 = vld [vmem:[%s19282_s20 + $0x11e8] sm:$0xf] }
 0x375   : > { %10003 = vmatpush.bf16.msra.mxu1 %v13129_v9  ;;  %v9775_v9 = vpop.f32.mrf.mxu3  ;;  %v18018_v43 = vld [vmem:[%s19282_s20 + $0x11f4] sm:$0xf0]  ;;  %v13593_v35 = vor.u32 %v17922_v22, %v13592_v23  ;;  %v13960_v44 = vld [vmem:[%s19282_s20 + $0x11c8] sm:$0xf] }
 0x376   : > { %10029 = vmatpush.bf16.msra.mxu3 %v13385_v5  ;;  %v13097_v5 = vor.u32 %v17798_v46, %v13096_v31  ;;  %v17918_v55 = vld [vmem:[%s19282_s20 + $0xed4] sm:$0xf0]  ;;  %v13704_v9 = vld [vmem:[%s19282_s20 + $0xfc8] sm:$0xf] }
 0x377   : > { %10016 = vmatpush.bf16.msra.mxu2 %v13257_v41  ;;  %v12969_v41 = vor.u32 %v17766_v1, %v12968_v2  ;;  %v13849_v2 = vor.u32 %v17986_v7, %v13848_v40  ;;  %v13576_v1 = vld [vmem:[%s19282_s20 + $0xec8] sm:$0xf]  ;;  %v17982_v46 = vld [vmem:[%s19282_s20 + $0x10d4] sm:$0xf0] }
 0x378   : > { %9991 = vmatpush.bf16.msra.mxu0 %v12985_v11  ;;  %v13721_v11 = vor.u32 %v17954_v62, %v13720_v48  ;;  %v13832_v31 = vld [vmem:[%s19282_s20 + $0x10c8] sm:$0xf]  ;;  %v13577_v0 = vor.u32 %v17918_v55, %v13576_v1  ;;  %v17914_v22 = vld [vmem:[%s19282_s20 + $0xeb4] sm:$0xf0] }
 0x379   : > { %10004 = vmatpush.bf16.msra.mxu1 %v13113_v17  ;;  %v13977_v17 = vor.u32 %v18018_v43, %v13976_v45  ;;  %v13833_v3 = vor.u32 %v17982_v46, %v13832_v31  ;;  %v13560_v23 = vld [vmem:[%s19282_s20 + $0xea8] sm:$0xf]  ;;  %v17946_v62 = vld [vmem:[%s19282_s20 + $0xfb4] sm:$0xf0] }
 0x37a   : > { %10030 = vmatpush.bf16.msra.mxu3 %v13369_v57  ;;  %v18014_v57 = vld [vmem:[%s19282_s20 + $0x11d4] sm:$0xf0]  ;;  %v13688_v48 = vld [vmem:[%s19282_s20 + $0xfa8] sm:$0xf]  ;;  %v13561_v45 = vor.u32 %v17914_v22, %v13560_v23 }
 0x37b   : > { %10017 = vmatpush.bf16.msra.mxu2 %v13241_v18  ;;  %v17950_v18 = vld [vmem:[%s19282_s20 + $0xfd4] sm:$0xf0]  ;;  %v13816_v40 = vld [vmem:[%s19282_s20 + $0x10a8] sm:$0xf]  ;;  %v13689_v43 = vor.u32 %v17946_v62, %v13688_v48 }
 0x37c   : > { %9992 = vmatpush.bf16.msra.mxu0 %v12969_v41  ;;  %v13705_v4 = vor.u32 %v17950_v18, %v13704_v9  ;;  %v13961_v41 = vor.u32 %v18014_v57, %v13960_v44  ;;  %v17978_v7 = vld [vmem:[%s19282_s20 + $0x10b4] sm:$0xf0]  ;;  %v13800_v9 = vld [vmem:[%s19282_s20 + $0x1088] sm:$0xf]  ;;  %v9786_v18 = vpop.f32.mrf.mxu0 }
 0x37d   : > { %10005 = vmatpush.bf16.msra.mxu1 %v13097_v5  ;;  %v13944_v5 = vld [vmem:[%s19282_s20 + $0x11a8] sm:$0xf]  ;;  %v17942_v55 = vld [vmem:[%s19282_s20 + $0xf94] sm:$0xf0]  ;;  %v9787_v44 = vadd.f32 %v9786_v18, %v21123_v56 }
 0x37e   : > { %10031 = vmatpush.bf16.msra.mxu3 %v13353_v39  ;;  %v13817_v39 = vor.u32 %v17978_v7, %v13816_v40  ;;  %v13928_v31 = vld [vmem:[%s19282_s20 + $0x1188] sm:$0xf]  ;;  %v18006_v46 = vld [vmem:[%s19282_s20 + $0x1194] sm:$0xf0] }
 0x37f   : > { %10018 = vmatpush.bf16.msra.mxu2 %v13225_v63  ;;  %9993 = vmatmul.bf16.vlgmr.msra.gmra.mxu0 %v19540_v27  ;;  %v18010_v63 = vld [vmem:[%s19282_s20 + $0x11b4] sm:$0xf0]  ;;  %v13528_v23 = vld [vmem:[%s19282_s20 + $0xe68] sm:$0xf] }
 0x380   : > { %10037 = vmatpush.bf16.msrb.mxu0 %v13593_v35  ;;  %10006 = vmatmul.bf16.vlgmr.msra.gmra.mxu1 %v19544_v29  ;;  %v13544_v35 = vld [vmem:[%s19282_s20 + $0xe88] sm:$0xf]  ;;  %v13945_v1 = vor.u32 %v18010_v63, %v13944_v5  ;;  %v17906_v22 = vld [vmem:[%s19282_s20 + $0xe74] sm:$0xf0] }
 0x381   : > { %10050 = vmatpush.bf16.msrb.mxu1 %v13721_v11  ;;  %10032 = vmatmul.bf16.vlgmr.msra.gmra.mxu3 %v19606_v60  ;;  %v17910_v11 = vld [vmem:[%s19282_s20 + $0xe94] sm:$0xf0]  ;;  %v13656_v48 = vld [vmem:[%s19282_s20 + $0xf68] sm:$0xf] }
 0x382   : > { %10076 = vmatpush.bf16.msrb.mxu3 %v13977_v17  ;;  %10019 = vmatmul.bf16.vlgmr.msra.gmra.mxu2 %v19602_v58  ;;  %v17974_v17 = vld [vmem:[%s19282_s20 + $0x1094] sm:$0xf0]  ;;  %v13545_v57 = vor.u32 %v17910_v11, %v13544_v35  ;;  %v13784_v7 = vld [vmem:[%s19282_s20 + $0x1068] sm:$0xf] }
 0x383   : > { %10063 = vmatpush.bf16.msrb.mxu2 %v13849_v2  ;;  %v13672_v2 = vld [vmem:[%s19282_s20 + $0xf88] sm:$0xf]  ;;  %v17938_v40 = vld [vmem:[%s19282_s20 + $0xf74] sm:$0xf0] }
 0x384   : > { %10038 = vmatpush.bf16.msrb.mxu0 %v13577_v0  ;;  %v9799_v0 = vpop.f32.mrf.mxu1  ;;  %v17970_v56 = vld [vmem:[%s19282_s20 + $0x1074] sm:$0xf0]  ;;  %v13912_v5 = vld [vmem:[%s19282_s20 + $0x1168] sm:$0xf] }
 0x385   : > { %10051 = vmatpush.bf16.msrb.mxu1 %v13705_v4  ;;  %v13673_v4 = vor.u32 %v17942_v55, %v13672_v2  ;;  %v9800_v62 = vadd.f32 %v9799_v0, %v9787_v44  ;;  %v18002_v63 = vld [vmem:[%s19282_s20 + $0x1174] sm:$0xf0]  ;;  %v13512_v35 = vld [vmem:[%s19282_s20 + $0xe48] sm:$0xf]  ;;  %v9812_v55 = vpop.f32.mrf.mxu2  ;;  %v9788_v0 = vpop.f32.mrf.mxu0 }
 0x386   : > { %10077 = vmatpush.bf16.msrb.mxu3 %v13961_v41  ;;  %v13929_v41 = vor.u32 %v18006_v46, %v13928_v31  ;;  %v17902_v11 = vld [vmem:[%s19282_s20 + $0xe54] sm:$0xf0]  ;;  %v13640_v2 = vld [vmem:[%s19282_s20 + $0xf48] sm:$0xf]  ;;  %v9825_v46 = vpop.f32.mrf.mxu3 }
 0x387   : > { %10064 = vmatpush.bf16.msrb.mxu2 %v13833_v3  ;;  %v13801_v3 = vor.u32 %v17974_v17, %v13800_v9  ;;  %v17934_v9 = vld [vmem:[%s19282_s20 + $0xf54] sm:$0xf0]  ;;  %v13768_v17 = vld [vmem:[%s19282_s20 + $0x1048] sm:$0xf]  ;;  %v9813_v31 = vadd.f32 %v9812_v55, %v9800_v62 }
 0x388   : > { %10039 = vmatpush.bf16.msrb.mxu0 %v13561_v45  ;;  %v13529_v45 = vor.u32 %v17906_v22, %v13528_v23  ;;  %v17966_v18 = vld [vmem:[%s19282_s20 + $0x1054] sm:$0xf0]  ;;  %v13896_v44 = vld [vmem:[%s19282_s20 + $0x1148] sm:$0xf]  ;;  %v13641_v22 = vor.u32 %v17934_v9, %v13640_v2 }
 0x389   : > { %10052 = vmatpush.bf16.msrb.mxu1 %v13689_v43  ;;  %v13657_v43 = vor.u32 %v17938_v40, %v13656_v48  ;;  %v21194_v23 = vadd.f32 %v9825_v46, %v9813_v31  ;;  %v13769_v48 = vor.u32 %v17966_v18, %v13768_v17  ;;  %v17898_v62 = vld [vmem:[%s19282_s20 + $0xe34] sm:$0xf0]  ;;  %v13624_v40 = vld [vmem:[%s19282_s20 + $0xf28] sm:$0xf] }
 0x38a   : > { %10078 = vmatpush.bf16.msrb.mxu3 %v13945_v1  ;;  %v13913_v1 = vor.u32 %v18002_v63, %v13912_v5  ;;  %v13752_v5 = vld [vmem:[%s19282_s20 + $0x1028] sm:$0xf]  ;;  %v17962_v63 = vld [vmem:[%s19282_s20 + $0x1034] sm:$0xf0] }
 0x38b   : > { %10065 = vmatpush.bf16.msrb.mxu2 %v13817_v39  ;;  %v13785_v39 = vor.u32 %v17970_v56, %v13784_v7  ;;  %v17930_v56 = vld [vmem:[%s19282_s20 + $0xf34] sm:$0xf0]  ;;  %v13608_v55 = vld [vmem:[%s19282_s20 + $0xf08] sm:$0xf] }
 0x38c   : > { %10040 = vmatpush.bf16.msrb.mxu0 %v13545_v57  ;;  %v17998_v57 = vld [vmem:[%s19282_s20 + $0x1154] sm:$0xf0]  ;;  %v13625_v2 = vor.u32 %v17930_v56, %v13624_v40  ;;  %v13736_v17 = vld [vmem:[%s19282_s20 + $0x1008] sm:$0xf] }
 0x38d   : > { %10053 = vmatpush.bf16.msrb.mxu1 %v13673_v4  ;;  %v13513_v4 = vor.u32 %v17902_v11, %v13512_v35  ;;  %v13897_v7 = vor.u32 %v17998_v57, %v13896_v44  ;;  %v13480_v35 = vld [vmem:[%s19282_s20 + $0xe08] sm:$0xf]  ;;  %v17894_v11 = vld [vmem:[%s19282_s20 + $0xe14] sm:$0xf0]  ;;  %v9814_v57 = vpop.f32.mrf.mxu2 }
 0x38e   : > { %10079 = vmatpush.bf16.msrb.mxu3 %v13929_v41  ;;  %v13496_v41 = vld [vmem:[%s19282_s20 + $0xe28] sm:$0xf]  ;;  %v17926_v9 = vld [vmem:[%s19282_s20 + $0xf14] sm:$0xf0] }
 0x38f   : > { %10066 = vmatpush.bf16.msrb.mxu2 %v13801_v3  ;;  %v9801_v3 = vpop.f32.mrf.mxu1  ;;  %v17958_v31 = vld [vmem:[%s19282_s20 + $0x1014] sm:$0xf0]  ;;  %v13864_v46 = vld [vmem:[%s19282_s20 + $0x1108] sm:$0xf] }
 0x390   : > { %10041 = vmatpush.bf16.msrb.mxu0 %v13529_v45  ;;  %v13880_v45 = vld [vmem:[%s19282_s20 + $0x1128] sm:$0xf]  ;;  %v17990_v44 = vld [vmem:[%s19282_s20 + $0x1114] sm:$0xf0]  ;;  %v13737_v56 = vor.u32 %v17958_v31, %v13736_v17 }
 0x391   : > { %10054 = vmatpush.bf16.msrb.mxu1 %v13657_v43  ;;  %v17994_v43 = vld [vmem:[%s19282_s20 + $0x1134] sm:$0xf0]  ;;  %v14104_v0 = vld [vmem:[%s19282_s20 + $0x12e8] sm:$0xf] }
 0x392   : > { %10080 = vmatpush.bf16.msrb.mxu3 %v13913_v1  ;;  %v13753_v1 = vor.u32 %v17962_v63, %v13752_v5  ;;  %v13881_v18 = vor.u32 %v17994_v43, %v13880_v45  ;;  %v14232_v3 = vld [vmem:[%s19282_s20 + $0x13e8] sm:$0xf]  ;;  %v18114_v40 = vld [vmem:[%s19282_s20 + $0x14f4] sm:$0xf0]  ;;  %v13865_v45 = vor.u32 %v17990_v44, %v13864_v46 }
 0x393   : > { %10067 = vmatpush.bf16.msrb.mxu2 %v13785_v39  ;;  %v13497_v39 = vor.u32 %v17898_v62, %v13496_v41  ;;  %v18082_v41 = vld [vmem:[%s19282_s20 + $0x13f4] sm:$0xf0]  ;;  %v14360_v62 = vld [vmem:[%s19282_s20 + $0x14e8] sm:$0xf] }
 0x394   : > { %10042 = vmatpush.bf16.msrb.mxu0 %v13513_v4  ;;  %v18050_v4 = vld [vmem:[%s19282_s20 + $0x12f4] sm:$0xf0]  ;;  %v14488_v5 = vld [vmem:[%s19282_s20 + $0x15e8] sm:$0xf] }
 0x395   : > { %10055 = vmatpush.bf16.msrb.mxu1 %v13641_v22  ;;  %v9827_v22 = vpop.f32.mrf.mxu3  ;;  %v18146_v63 = vld [vmem:[%s19282_s20 + $0x15f4] sm:$0xf0]  ;;  %v14105_v43 = vor.u32 %v18050_v4, %v14104_v0  ;;  %v14472_v17 = vld [vmem:[%s19282_s20 + $0x15c8] sm:$0xf] }
 0x396   : > { %10081 = vmatpush.bf16.msrb.mxu3 %v13897_v7  ;;  %v13609_v7 = vor.u32 %v17926_v9, %v13608_v55  ;;  %v18046_v57 = vld [vmem:[%s19282_s20 + $0x12d4] sm:$0xf0]  ;;  %v14216_v22 = vld [vmem:[%s19282_s20 + $0x13c8] sm:$0xf] }
 0x397   : > { %10068 = vmatpush.bf16.msrb.mxu2 %v13769_v48  ;;  %v13481_v48 = vor.u32 %v17894_v11, %v13480_v35  ;;  %v14361_v35 = vor.u32 %v18114_v40, %v14360_v62  ;;  %v14088_v11 = vld [vmem:[%s19282_s20 + $0x12c8] sm:$0xf]  ;;  %v18110_v9 = vld [vmem:[%s19282_s20 + $0x14d4] sm:$0xf0] }
 0x398   : > { %10043 = vmatpush.bf16.msrb.mxu0 %v13497_v39  ;;  %v14233_v39 = vor.u32 %v18082_v41, %v14232_v3  ;;  %v14344_v55 = vld [vmem:[%s19282_s20 + $0x14c8] sm:$0xf]  ;;  %v14089_v31 = vor.u32 %v18046_v57, %v14088_v11  ;;  %v18042_v4 = vld [vmem:[%s19282_s20 + $0x12b4] sm:$0xf0] }
 0x399   : > { %10056 = vmatpush.bf16.msrb.mxu1 %v13625_v2  ;;  %v14489_v2 = vor.u32 %v18146_v63, %v14488_v5  ;;  %v14345_v44 = vor.u32 %v18110_v9, %v14344_v55  ;;  %v14072_v0 = vld [vmem:[%s19282_s20 + $0x12a8] sm:$0xf]  ;;  %v18074_v41 = vld [vmem:[%s19282_s20 + $0x13b4] sm:$0xf0] }
 0x39a   : > { %10082 = vmatpush.bf16.msrb.mxu3 %v13881_v18  ;;  %v18142_v18 = vld [vmem:[%s19282_s20 + $0x15d4] sm:$0xf0]  ;;  %v14200_v3 = vld [vmem:[%s19282_s20 + $0x13a8] sm:$0xf]  ;;  %v14073_v5 = vor.u32 %v18042_v4, %v14072_v0 }
 0x39b   : > { %10069 = vmatpush.bf16.msrb.mxu2 %v13753_v1  ;;  %v18078_v1 = vld [vmem:[%s19282_s20 + $0x13d4] sm:$0xf0]  ;;  %v14328_v62 = vld [vmem:[%s19282_s20 + $0x14a8] sm:$0xf]  ;;  %v14201_v63 = vor.u32 %v18074_v41, %v14200_v3 }
 0x39c   : > { %10044 = vmatpush.bf16.msrb.mxu0 %v13481_v48  ;;  %v14217_v46 = vor.u32 %v18078_v1, %v14216_v22  ;;  %v14473_v48 = vor.u32 %v18142_v18, %v14472_v17  ;;  %v18106_v40 = vld [vmem:[%s19282_s20 + $0x14b4] sm:$0xf0]  ;;  %v14312_v22 = vld [vmem:[%s19282_s20 + $0x1488] sm:$0xf]  ;;  %v9838_v1 = vpop.f32.mrf.mxu0 }
 0x39d   : > { %10057 = vmatpush.bf16.msrb.mxu1 %v13609_v7  ;;  %v14456_v7 = vld [vmem:[%s19282_s20 + $0x15a8] sm:$0xf]  ;;  %v18070_v57 = vld [vmem:[%s19282_s20 + $0x1394] sm:$0xf0]  ;;  %v9839_v17 = vadd.f32 %v9838_v1, %v21194_v23 }
 0x39e   : > { %10083 = vmatpush.bf16.msrb.mxu3 %v13865_v45  ;;  %v14329_v45 = vor.u32 %v18106_v40, %v14328_v62  ;;  %v14440_v55 = vld [vmem:[%s19282_s20 + $0x1588] sm:$0xf]  ;;  %v18134_v9 = vld [vmem:[%s19282_s20 + $0x1594] sm:$0xf0] }
 0x39f   : > { %10070 = vmatpush.bf16.msrb.mxu2 %v13737_v56  ;;  %10045 = vmatmul.bf16.vlgmr.msrb.gmra.mxu0 %v19604_v59  ;;  %v18138_v56 = vld [vmem:[%s19282_s20 + $0x15b4] sm:$0xf0]  ;;  %v14040_v0 = vld [vmem:[%s19282_s20 + $0x1268] sm:$0xf] }
 0x3a0   : > { %10089 = vmatpush.bf16.msra.mxu0 %v14105_v43  ;;  %10058 = vmatmul.bf16.vlgmr.msrb.gmra.mxu1 %v19608_v61  ;;  %v14056_v43 = vld [vmem:[%s19282_s20 + $0x1288] sm:$0xf]  ;;  %v14457_v11 = vor.u32 %v18138_v56, %v14456_v7  ;;  %v18034_v4 = vld [vmem:[%s19282_s20 + $0x1274] sm:$0xf0] }
 0x3a1   : > { %10102 = vmatpush.bf16.msra.mxu1 %v14233_v39  ;;  %10084 = vmatmul.bf16.vlgmr.msrb.gmra.mxu3 %v19695_v26  ;;  %v18038_v39 = vld [vmem:[%s19282_s20 + $0x1294] sm:$0xf0]  ;;  %v14168_v3 = vld [vmem:[%s19282_s20 + $0x1368] sm:$0xf] }
 0x3a2   : > { %10128 = vmatpush.bf16.msra.mxu3 %v14489_v2  ;;  %10071 = vmatmul.bf16.vlgmr.msrb.gmra.mxu2 %v19689_v21  ;;  %v18102_v2 = vld [vmem:[%s19282_s20 + $0x1494] sm:$0xf0]  ;;  %v14057_v18 = vor.u32 %v18038_v39, %v14056_v43  ;;  %v14296_v40 = vld [vmem:[%s19282_s20 + $0x1468] sm:$0xf] }
 0x3a3   : > { %10115 = vmatpush.bf16.msra.mxu2 %v14361_v35  ;;  %v14184_v35 = vld [vmem:[%s19282_s20 + $0x1388] sm:$0xf]  ;;  %v18066_v62 = vld [vmem:[%s19282_s20 + $0x1374] sm:$0xf0] }
 0x3a4   : > { %10090 = vmatpush.bf16.msra.mxu0 %v14089_v31  ;;  %v9851_v31 = vpop.f32.mrf.mxu1  ;;  %v18098_v23 = vld [vmem:[%s19282_s20 + $0x1474] sm:$0xf0]  ;;  %v14424_v7 = vld [vmem:[%s19282_s20 + $0x1568] sm:$0xf] }
 0x3a5   : > { %10103 = vmatpush.bf16.msra.mxu1 %v14217_v46  ;;  %v14185_v46 = vor.u32 %v18070_v57, %v14184_v35  ;;  %v9852_v41 = vadd.f32 %v9851_v31, %v9839_v17  ;;  %v18130_v56 = vld [vmem:[%s19282_s20 + $0x1574] sm:$0xf0]  ;;  %v14297_v43 = vor.u32 %v18098_v23, %v14296_v40  ;;  %v14024_v39 = vld [vmem:[%s19282_s20 + $0x1248] sm:$0xf]  ;;  %v9877_v31 = vpop.f32.mrf.mxu3 }
 0x3a6   : > { %10129 = vmatpush.bf16.msra.mxu3 %v14473_v48  ;;  %v14441_v48 = vor.u32 %v18134_v9, %v14440_v55  ;;  %v18030_v35 = vld [vmem:[%s19282_s20 + $0x1254] sm:$0xf0]  ;;  %v14280_v1 = vld [vmem:[%s19282_s20 + $0x1448] sm:$0xf]  ;;  %v9864_v9 = vpop.f32.mrf.mxu2 }
 0x3a7   : > { %10116 = vmatpush.bf16.msra.mxu2 %v14345_v44  ;;  %v14313_v44 = vor.u32 %v18102_v2, %v14312_v22  ;;  %v14425_v22 = vor.u32 %v18130_v56, %v14424_v7  ;;  %v18062_v2 = vld [vmem:[%s19282_s20 + $0x1354] sm:$0xf0]  ;;  %v14408_v17 = vld [vmem:[%s19282_s20 + $0x1548] sm:$0xf] }
 0x3a8   : > { %10091 = vmatpush.bf16.msra.mxu0 %v14073_v5  ;;  %v10977_v5 = vrot.slane %v9852_v41, 6  ;;  %v18094_v55 = vld [vmem:[%s19282_s20 + $0x1454] sm:$0xf0]  ;;  %v14264_v7 = vld [vmem:[%s19282_s20 + $0x1428] sm:$0xf] }
 0x3a9   : > { %10104 = vmatpush.bf16.msra.mxu1 %v14201_v63  ;;  %v14041_v63 = vor.u32 %v18034_v4, %v14040_v0  ;;  %v18026_v41 = vld [vmem:[%s19282_s20 + $0x1234] sm:$0xf0] }
 0x3aa   : > { %10130 = vmatpush.bf16.msra.mxu3 %v14457_v11  ;;  %v14152_v11 = vld [vmem:[%s19282_s20 + $0x1348] sm:$0xf]  ;;  %v21261_v57 = vsel %vm10980_vm3, %v20483_v36, %v10977_v5  ;;  %v21268_v36 = vadd.f32 %v9877_v31, %v9864_v9  ;;  %v18058_v23 = vld [vmem:[%s19282_s20 + $0x1334] sm:$0xf0] }
 0x3ab   : > { %10117 = vmatpush.bf16.msra.mxu2 %v14329_v45  ;;  %v14169_v45 = vor.u32 %v18066_v62, %v14168_v3  ;;  %22591 = vst [vmem:[#allocation14_spill] sm:$0xff] %v21261_v57  ;;  %v14153_v4 = vor.u32 %v18062_v2, %v14152_v11  ;;  %v14281_v3 = vor.u32 %v18094_v55, %v14280_v1  ;;  %v14136_v62 = vld [vmem:[%s19282_s20 + $0x1328] sm:$0xf]  ;;  %v18090_v56 = vld [vmem:[%s19282_s20 + $0x1434] sm:$0xf0] }
 0x3ac   : > { %10092 = vmatpush.bf16.msra.mxu0 %v14057_v18  ;;  %v18126_v18 = vld [vmem:[%s19282_s20 + $0x1554] sm:$0xf0]  ;;  %v9853_v0 = vpop.f32.mrf.mxu1  ;;  %v14392_v5 = vld [vmem:[%s19282_s20 + $0x1528] sm:$0xf]  ;;  %v14265_v11 = vor.u32 %v18090_v56, %v14264_v7 }
 0x3ad   : > { %10105 = vmatpush.bf16.msra.mxu1 %v14185_v46  ;;  %v9840_v46 = vpop.f32.mrf.mxu0  ;;  %v14409_v40 = vor.u32 %v18126_v18, %v14408_v17  ;;  %v18054_v2 = vld [vmem:[%s19282_s20 + $0x1314] sm:$0xf0]  ;;  %v14248_v1 = vld [vmem:[%s19282_s20 + $0x1408] sm:$0xf] }
 0x3ae   : > { %10131 = vmatpush.bf16.msra.mxu3 %v14441_v48  ;;  %v14008_v48 = vld [vmem:[%s19282_s20 + $0x1228] sm:$0xf]  ;;  %v18086_v9 = vld [vmem:[%s19282_s20 + $0x1414] sm:$0xf0]  ;;  %v9866_v31 = vpop.f32.mrf.mxu2 }
 0x3af   : > { %10118 = vmatpush.bf16.msra.mxu2 %v14313_v44  ;;  %v14025_v44 = vor.u32 %v18030_v35, %v14024_v39  ;;  %v18022_v39 = vld [vmem:[%s19282_s20 + $0x1214] sm:$0xf0]  ;;  %v14137_v35 = vor.u32 %v18058_v23, %v14136_v62  ;;  %v14376_v17 = vld [vmem:[%s19282_s20 + $0x1508] sm:$0xf]  ;;  %v14249_v23 = vor.u32 %v18086_v9, %v14248_v1 }
 0x3b0   : > { %10093 = vmatpush.bf16.msra.mxu0 %v14041_v63  ;;  %v18122_v63 = vld [vmem:[%s19282_s20 + $0x1534] sm:$0xf0]  ;;  %v14616_v46 = vld [vmem:[%s19282_s20 + $0x16e8] sm:$0xf] }
 0x3b1   : > { %10106 = vmatpush.bf16.msra.mxu1 %v14169_v45  ;;  %v14009_v45 = vor.u32 %v18026_v41, %v14008_v48  ;;  %v14393_v55 = vor.u32 %v18122_v63, %v14392_v5  ;;  %v18118_v18 = vld [vmem:[%s19282_s20 + $0x1514] sm:$0xf0]  ;;  %v14744_v0 = vld [vmem:[%s19282_s20 + $0x17e8] sm:$0xf] }
 0x3b2   : > { %10132 = vmatpush.bf16.msra.mxu3 %v14425_v22  ;;  %v14120_v22 = vld [vmem:[%s19282_s20 + $0x1308] sm:$0xf]  ;;  %v18210_v48 = vld [vmem:[%s19282_s20 + $0x17f4] sm:$0xf0]  ;;  %v14377_v5 = vor.u32 %v18118_v18, %v14376_v17 }
 0x3b3   : > { %10119 = vmatpush.bf16.msra.mxu2 %v14297_v43  ;;  %v13992_v43 = vld [vmem:[%s19282_s20 + $0x1208] sm:$0xf]  ;;  %v18242_v62 = vld [vmem:[%s19282_s20 + $0x18f4] sm:$0xf0] }
 0x3b4   : > { %10094 = vmatpush.bf16.msra.mxu0 %v14025_v44  ;;  %v18178_v44 = vld [vmem:[%s19282_s20 + $0x16f4] sm:$0xf0]  ;;  %v14872_v41 = vld [vmem:[%s19282_s20 + $0x18e8] sm:$0xf] }
 0x3b5   : > { %10107 = vmatpush.bf16.msra.mxu1 %v14153_v4  ;;  %v9879_v4 = vpop.f32.mrf.mxu3  ;;  %v15000_v7 = vld [vmem:[%s19282_s20 + $0x19e8] sm:$0xf]  ;;  %v18274_v56 = vld [vmem:[%s19282_s20 + $0x19f4] sm:$0xf0]  ;;  %v14617_v63 = vor.u32 %v18178_v44, %v14616_v46 }
 0x3b6   : > { %10133 = vmatpush.bf16.msra.mxu3 %v14409_v40  ;;  %v14121_v40 = vor.u32 %v18054_v2, %v14120_v22  ;;  %v18174_v31 = vld [vmem:[%s19282_s20 + $0x16d4] sm:$0xf0]  ;;  %v14728_v4 = vld [vmem:[%s19282_s20 + $0x17c8] sm:$0xf] }
 0x3b7   : > { %10120 = vmatpush.bf16.msra.mxu2 %v14281_v3  ;;  %v13993_v3 = vor.u32 %v18022_v39, %v13992_v43  ;;  %v14873_v43 = vor.u32 %v18242_v62, %v14872_v41  ;;  %v14600_v39 = vld [vmem:[%s19282_s20 + $0x16c8] sm:$0xf]  ;;  %v18238_v2 = vld [vmem:[%s19282_s20 + $0x18d4] sm:$0xf0] }
 0x3b8   : > { %10095 = vmatpush.bf16.msra.mxu0 %v14009_v45  ;;  %v14745_v45 = vor.u32 %v18210_v48, %v14744_v0  ;;  %v14856_v22 = vld [vmem:[%s19282_s20 + $0x18c8] sm:$0xf]  ;;  %v14601_v9 = vor.u32 %v18174_v31, %v14600_v39  ;;  %v18170_v44 = vld [vmem:[%s19282_s20 + $0x16b4] sm:$0xf0] }
 0x3b9   : > { %10108 = vmatpush.bf16.msra.mxu1 %v14137_v35  ;;  %v15001_v35 = vor.u32 %v18274_v56, %v15000_v7  ;;  %v14984_v1 = vld [vmem:[%s19282_s20 + $0x19c8] sm:$0xf]  ;;  %v14857_v18 = vor.u32 %v18238_v2, %v14856_v22  ;;  %v18202_v48 = vld [vmem:[%s19282_s20 + $0x17b4] sm:$0xf0] }
 0x3ba   : > { %10134 = vmatpush.bf16.msra.mxu3 %v14393_v55  ;;  %v18270_v55 = vld [vmem:[%s19282_s20 + $0x19d4] sm:$0xf0]  ;;  %v14584_v46 = vld [vmem:[%s19282_s20 + $0x16a8] sm:$0xf] }
 0x3bb   : > { %10121 = vmatpush.bf16.msra.mxu2 %v14265_v11  ;;  %v18206_v11 = vld [vmem:[%s19282_s20 + $0x17d4] sm:$0xf0]  ;;  %v14712_v0 = vld [vmem:[%s19282_s20 + $0x17a8] sm:$0xf]  ;;  %v14585_v7 = vor.u32 %v18170_v44, %v14584_v46 }
 0x3bc   : > { %10096 = vmatpush.bf16.msra.mxu0 %v13993_v3  ;;  %v14729_v17 = vor.u32 %v18206_v11, %v14728_v4  ;;  %v14985_v3 = vor.u32 %v18270_v55, %v14984_v1  ;;  %v14840_v41 = vld [vmem:[%s19282_s20 + $0x18a8] sm:$0xf]  ;;  %v18234_v62 = vld [vmem:[%s19282_s20 + $0x18b4] sm:$0xf0]  ;;  %v14713_v56 = vor.u32 %v18202_v48, %v14712_v0  ;;  %v9890_v1 = vpop.f32.mrf.mxu0 }
 0x3bd   : > { %10109 = vmatpush.bf16.msra.mxu1 %v14121_v40  ;;  %v14968_v40 = vld [vmem:[%s19282_s20 + $0x19a8] sm:$0xf]  ;;  %v18198_v31 = vld [vmem:[%s19282_s20 + $0x1794] sm:$0xf0]  ;;  %v9891_v44 = vadd.f32 %v9890_v1, %v21268_v36  ;;  %v9903_v0 = vpop.f32.mrf.mxu1 }
 0x3be   : > { %10135 = vmatpush.bf16.msra.mxu3 %v14377_v5  ;;  %v14841_v5 = vor.u32 %v18234_v62, %v14840_v41  ;;  %v14824_v4 = vld [vmem:[%s19282_s20 + $0x1888] sm:$0xf]  ;;  %v18262_v22 = vld [vmem:[%s19282_s20 + $0x1994] sm:$0xf0] }
 0x3bf   : > { %10122 = vmatpush.bf16.msra.mxu2 %v14249_v23  ;;  %10097 = vmatmul.bf16.vlgmr.msra.gmra.mxu0 %v19693_v25  ;;  %v18266_v23 = vld [vmem:[%s19282_s20 + $0x19b4] sm:$0xf0]  ;;  %v14952_v11 = vld [vmem:[%s19282_s20 + $0x1988] sm:$0xf] }
 0x3c0   : > { %10141 = vmatpush.bf16.msrb.mxu0 %v14617_v63  ;;  %10110 = vmatmul.bf16.vlgmr.msra.gmra.mxu1 %v19697_v30  ;;  %v14568_v63 = vld [vmem:[%s19282_s20 + $0x1688] sm:$0xf]  ;;  %v14969_v39 = vor.u32 %v18266_v23, %v14968_v40  ;;  %v18194_v48 = vld [vmem:[%s19282_s20 + $0x1774] sm:$0xf0] }
 0x3c1   : > { %10154 = vmatpush.bf16.msrb.mxu1 %v14745_v45  ;;  %10136 = vmatmul.bf16.vlgmr.msra.gmra.mxu3 %v19759_v19  ;;  %v18166_v45 = vld [vmem:[%s19282_s20 + $0x1694] sm:$0xf0]  ;;  %v14680_v46 = vld [vmem:[%s19282_s20 + $0x1768] sm:$0xf] }
 0x3c2   : > { %10180 = vmatpush.bf16.msrb.mxu3 %v15001_v35  ;;  %10123 = vmatmul.bf16.vlgmr.msra.gmra.mxu2 %v19755_v15  ;;  %v18230_v35 = vld [vmem:[%s19282_s20 + $0x1894] sm:$0xf0]  ;;  %v14569_v2 = vor.u32 %v18166_v45, %v14568_v63  ;;  %v14808_v41 = vld [vmem:[%s19282_s20 + $0x1868] sm:$0xf]  ;;  %v14681_v36 = vor.u32 %v18194_v48, %v14680_v46 }
 0x3c3   : > { %10167 = vmatpush.bf16.msrb.mxu2 %v14873_v43  ;;  %v14696_v43 = vld [vmem:[%s19282_s20 + $0x1788] sm:$0xf]  ;;  %v18226_v62 = vld [vmem:[%s19282_s20 + $0x1874] sm:$0xf0] }
 0x3c4   : > { %10142 = vmatpush.bf16.msrb.mxu0 %v14601_v9  ;;  %v14697_v55 = vor.u32 %v18198_v31, %v14696_v43  ;;  %v14825_v9 = vor.u32 %v18230_v35, %v14824_v4  ;;  %v14936_v40 = vld [vmem:[%s19282_s20 + $0x1968] sm:$0xf]  ;;  %v18258_v23 = vld [vmem:[%s19282_s20 + $0x1974] sm:$0xf0] }
 0x3c5   : > { %10155 = vmatpush.bf16.msrb.mxu1 %v14729_v17  ;;  %v14552_v17 = vld [vmem:[%s19282_s20 + $0x1668] sm:$0xf]  ;;  %v18158_v45 = vld [vmem:[%s19282_s20 + $0x1654] sm:$0xf0]  ;;  %v14937_v31 = vor.u32 %v18258_v23, %v14936_v40 }
 0x3c6   : > { %10181 = vmatpush.bf16.msrb.mxu3 %v14985_v3  ;;  %v14953_v3 = vor.u32 %v18262_v22, %v14952_v11  ;;  %v14536_v63 = vld [vmem:[%s19282_s20 + $0x1648] sm:$0xf]  ;;  %v18190_v4 = vld [vmem:[%s19282_s20 + $0x1754] sm:$0xf0] }
 0x3c7   : > { %10168 = vmatpush.bf16.msrb.mxu2 %v14857_v18  ;;  %v18162_v18 = vld [vmem:[%s19282_s20 + $0x1674] sm:$0xf0]  ;;  %v14664_v43 = vld [vmem:[%s19282_s20 + $0x1748] sm:$0xf] }
 0x3c8   : > { %10143 = vmatpush.bf16.msrb.mxu0 %v14585_v7  ;;  %v9904_v7 = vadd.f32 %v9903_v0, %v9891_v44  ;;  %v14792_v35 = vld [vmem:[%s19282_s20 + $0x1848] sm:$0xf]  ;;  %v18222_v11 = vld [vmem:[%s19282_s20 + $0x1854] sm:$0xf0]  ;;  %v14665_v46 = vor.u32 %v18190_v4, %v14664_v43 }
 0x3c9   : > { %10156 = vmatpush.bf16.msrb.mxu1 %v14713_v56  ;;  %v14553_v56 = vor.u32 %v18162_v18, %v14552_v17  ;;  %v14920_v1 = vld [vmem:[%s19282_s20 + $0x1948] sm:$0xf]  ;;  %v9892_v18 = vpop.f32.mrf.mxu0  ;;  %v14793_v44 = vor.u32 %v18222_v11, %v14792_v35  ;;  %v18186_v40 = vld [vmem:[%s19282_s20 + $0x1734] sm:$0xf0] }
 0x3ca   : > { %10182 = vmatpush.bf16.msrb.mxu3 %v14969_v39  ;;  %v9916_v39 = vpop.f32.mrf.mxu2  ;;  %v14520_v0 = vld [vmem:[%s19282_s20 + $0x1628] sm:$0xf]  ;;  %v18182_v4 = vld [vmem:[%s19282_s20 + $0x1714] sm:$0xf0] }
 0x3cb   : > { %10169 = vmatpush.bf16.msrb.mxu2 %v14841_v5  ;;  %v14809_v5 = vor.u32 %v18226_v62, %v14808_v41  ;;  %v9917_v22 = vadd.f32 %v9916_v39, %v9904_v7  ;;  %v14648_v48 = vld [vmem:[%s19282_s20 + $0x1728] sm:$0xf]  ;;  %v9905_v41 = vpop.f32.mrf.mxu1  ;;  %v18218_v7 = vld [vmem:[%s19282_s20 + $0x1834] sm:$0xf0] }
 0x3cc   : > { %10144 = vmatpush.bf16.msrb.mxu0 %v14569_v2  ;;  %v9929_v2 = vpop.f32.mrf.mxu3  ;;  %v14776_v23 = vld [vmem:[%s19282_s20 + $0x1828] sm:$0xf]  ;;  %v14649_v43 = vor.u32 %v18186_v40, %v14648_v48  ;;  %v18370_v41 = vld [vmem:[%s19282_s20 + $0x1cf4] sm:$0xf0] }
 0x3cd   : > { %10157 = vmatpush.bf16.msrb.mxu1 %v14697_v55  ;;  %v18254_v55 = vld [vmem:[%s19282_s20 + $0x1954] sm:$0xf0]  ;;  %v21339_v17 = vadd.f32 %v9929_v2, %v9917_v22  ;;  %v14777_v39 = vor.u32 %v18218_v7, %v14776_v23  ;;  %v14760_v35 = vld [vmem:[%s19282_s20 + $0x1808] sm:$0xf] }
 0x3ce   : > { %10183 = vmatpush.bf16.msrb.mxu3 %v14953_v3  ;;  %v18154_v3 = vld [vmem:[%s19282_s20 + $0x1634] sm:$0xf0]  ;;  %v14921_v62 = vor.u32 %v18254_v55, %v14920_v1  ;;  %v14888_v1 = vld [vmem:[%s19282_s20 + $0x1908] sm:$0xf] }
 0x3cf   : > { %10170 = vmatpush.bf16.msrb.mxu2 %v14825_v9  ;;  %v14537_v9 = vor.u32 %v18158_v45, %v14536_v63  ;;  %v14504_v63 = vld [vmem:[%s19282_s20 + $0x1608] sm:$0xf]  ;;  %v18150_v45 = vld [vmem:[%s19282_s20 + $0x1614] sm:$0xf0] }
 0x3d0   : > { %10145 = vmatpush.bf16.msrb.mxu0 %v14553_v56  ;;  %v14904_v56 = vld [vmem:[%s19282_s20 + $0x1928] sm:$0xf]  ;;  %v18214_v2 = vld [vmem:[%s19282_s20 + $0x1814] sm:$0xf0] }
 0x3d1   : > { %10158 = vmatpush.bf16.msrb.mxu1 %v14681_v36  ;;  %v18250_v36 = vld [vmem:[%s19282_s20 + $0x1934] sm:$0xf0]  ;;  %v15128_v18 = vld [vmem:[%s19282_s20 + $0x1ae8] sm:$0xf]  ;;  %v14761_v40 = vor.u32 %v18214_v2, %v14760_v35 }
 0x3d2   : > { %10184 = vmatpush.bf16.msrb.mxu3 %v14937_v31  ;;  %v14632_v31 = vld [vmem:[%s19282_s20 + $0x1708] sm:$0xf]  ;;  %v9918_v11 = vpop.f32.mrf.mxu2  ;;  %v14905_v22 = vor.u32 %v18250_v36, %v14904_v56  ;;  %v18246_v55 = vld [vmem:[%s19282_s20 + $0x1914] sm:$0xf0] }
 0x3d3   : > { %10171 = vmatpush.bf16.msrb.mxu2 %v14809_v5  ;;  %v14521_v5 = vor.u32 %v18154_v3, %v14520_v0  ;;  %v14505_v0 = vor.u32 %v18150_v45, %v14504_v63  ;;  %v18338_v3 = vld [vmem:[%s19282_s20 + $0x1bf4] sm:$0xf0]  ;;  %v15384_v48 = vld [vmem:[%s19282_s20 + $0x1ce8] sm:$0xf]  ;;  %v14889_v56 = vor.u32 %v18246_v55, %v14888_v1 }
 0x3d4   : > { %10146 = vmatpush.bf16.msrb.mxu0 %v14537_v9  ;;  %v9931_v9 = vpop.f32.mrf.mxu3  ;;  %v15512_v23 = vld [vmem:[%s19282_s20 + $0x1de8] sm:$0xf]  ;;  %v18402_v7 = vld [vmem:[%s19282_s20 + $0x1df4] sm:$0xf0]  ;;  %v15385_v63 = vor.u32 %v18370_v41, %v15384_v48 }
 0x3d5   : > { %10159 = vmatpush.bf16.msrb.mxu1 %v14665_v46  ;;  %v18306_v46 = vld [vmem:[%s19282_s20 + $0x1af4] sm:$0xf0]  ;;  %v15112_v45 = vld [vmem:[%s19282_s20 + $0x1ac8] sm:$0xf] }
 0x3d6   : > { %10185 = vmatpush.bf16.msrb.mxu3 %v14921_v62  ;;  %v14633_v62 = vor.u32 %v18182_v4, %v14632_v31  ;;  %v15129_v36 = vor.u32 %v18306_v46, %v15128_v18  ;;  %v18302_v11 = vld [vmem:[%s19282_s20 + $0x1ad4] sm:$0xf0]  ;;  %v15240_v9 = vld [vmem:[%s19282_s20 + $0x1bc8] sm:$0xf] }
 0x3d7   : > { %10172 = vmatpush.bf16.msrb.mxu2 %v14793_v44  ;;  %v15256_v44 = vld [vmem:[%s19282_s20 + $0x1be8] sm:$0xf]  ;;  %v18366_v4 = vld [vmem:[%s19282_s20 + $0x1cd4] sm:$0xf0]  ;;  %v15113_v2 = vor.u32 %v18302_v11, %v15112_v45 }
 0x3d8   : > { %10147 = vmatpush.bf16.msrb.mxu0 %v14521_v5  ;;  %v15257_v5 = vor.u32 %v18338_v3, %v15256_v44  ;;  %v15368_v31 = vld [vmem:[%s19282_s20 + $0x1cc8] sm:$0xf]  ;;  %v18298_v46 = vld [vmem:[%s19282_s20 + $0x1ab4] sm:$0xf0] }
 0x3d9   : > { %10160 = vmatpush.bf16.msrb.mxu1 %v14649_v43  ;;  %v15513_v43 = vor.u32 %v18402_v7, %v15512_v23  ;;  %v15496_v35 = vld [vmem:[%s19282_s20 + $0x1dc8] sm:$0xf]  ;;  %v15369_v55 = vor.u32 %v18366_v4, %v15368_v31  ;;  %v18330_v3 = vld [vmem:[%s19282_s20 + $0x1bb4] sm:$0xf0] }
 0x3da   : > { %10186 = vmatpush.bf16.msrb.mxu3 %v14905_v22  ;;  %v18398_v22 = vld [vmem:[%s19282_s20 + $0x1dd4] sm:$0xf0]  ;;  %v15096_v18 = vld [vmem:[%s19282_s20 + $0x1aa8] sm:$0xf] }
 0x3db   : > { %10173 = vmatpush.bf16.msrb.mxu2 %v14777_v39  ;;  %v18334_v39 = vld [vmem:[%s19282_s20 + $0x1bd4] sm:$0xf0]  ;;  %v15224_v44 = vld [vmem:[%s19282_s20 + $0x1ba8] sm:$0xf]  ;;  %v15097_v23 = vor.u32 %v18298_v46, %v15096_v18 }
 0x3dc   : > { %10148 = vmatpush.bf16.msrb.mxu0 %v14505_v0  ;;  %v15241_v1 = vor.u32 %v18334_v39, %v15240_v9  ;;  %v15497_v0 = vor.u32 %v18398_v22, %v15496_v35  ;;  %v15352_v48 = vld [vmem:[%s19282_s20 + $0x1ca8] sm:$0xf]  ;;  %v18362_v41 = vld [vmem:[%s19282_s20 + $0x1cb4] sm:$0xf0]  ;;  %v15225_v7 = vor.u32 %v18330_v3, %v15224_v44  ;;  %v9942_v39 = vpop.f32.mrf.mxu0 }
 0x3dd   : > { %10161 = vmatpush.bf16.msrb.mxu1 %v14633_v62  ;;  %v15480_v62 = vld [vmem:[%s19282_s20 + $0x1da8] sm:$0xf]  ;;  %v18326_v11 = vld [vmem:[%s19282_s20 + $0x1b94] sm:$0xf0]  ;;  %v9943_v35 = vadd.f32 %v9942_v39, %v21339_v17 }
 0x3de   : > { %10187 = vmatpush.bf16.msrb.mxu3 %v14889_v56  ;;  %v15353_v56 = vor.u32 %v18362_v41, %v15352_v48  ;;  %v15336_v9 = vld [vmem:[%s19282_s20 + $0x1c88] sm:$0xf]  ;;  %v18390_v4 = vld [vmem:[%s19282_s20 + $0x1d94] sm:$0xf0] }
 0x3df   : > { %10174 = vmatpush.bf16.msrb.mxu2 %v14761_v40  ;;  %10149 = vmatmul.bf16.vlgmr.msrb.gmra.mxu0 %v19757_v16  ;;  %v18394_v40 = vld [vmem:[%s19282_s20 + $0x1db4] sm:$0xf0]  ;;  %v15464_v31 = vld [vmem:[%s19282_s20 + $0x1d88] sm:$0xf] }
 0x3e0   : > { %10193 = vmatpush.bf16.msra.mxu0 %v15129_v36  ;;  %10162 = vmatmul.bf16.vlgmr.msrb.gmra.mxu1 %v19761_v20  ;;  %v15080_v36 = vld [vmem:[%s19282_s20 + $0x1a88] sm:$0xf]  ;;  %v15481_v45 = vor.u32 %v18394_v40, %v15480_v62  ;;  %v18290_v46 = vld [vmem:[%s19282_s20 + $0x1a74] sm:$0xf0] }
 0x3e1   : > { %10206 = vmatpush.bf16.msra.mxu1 %v15257_v5  ;;  %10188 = vmatmul.bf16.vlgmr.msrb.gmra.mxu3 %v19853_v51  ;;  %v18294_v5 = vld [vmem:[%s19282_s20 + $0x1a94] sm:$0xf0]  ;;  %v15064_v18 = vld [vmem:[%s19282_s20 + $0x1a68] sm:$0xf] }
 0x3e2   : > { %10232 = vmatpush.bf16.msra.mxu3 %v15513_v43  ;;  %10175 = vmatmul.bf16.vlgmr.msrb.gmra.mxu2 %v19847_v47  ;;  %v18358_v43 = vld [vmem:[%s19282_s20 + $0x1c94] sm:$0xf0]  ;;  %v15081_v22 = vor.u32 %v18294_v5, %v15080_v36  ;;  %v15192_v44 = vld [vmem:[%s19282_s20 + $0x1b68] sm:$0xf] }
 0x3e3   : > { %10219 = vmatpush.bf16.msra.mxu2 %v15385_v63  ;;  %v15208_v63 = vld [vmem:[%s19282_s20 + $0x1b88] sm:$0xf]  ;;  %v18322_v48 = vld [vmem:[%s19282_s20 + $0x1b74] sm:$0xf0] }
 0x3e4   : > { %10194 = vmatpush.bf16.msra.mxu0 %v15113_v2  ;;  %v9955_v2 = vpop.f32.mrf.mxu1  ;;  %v15320_v41 = vld [vmem:[%s19282_s20 + $0x1c68] sm:$0xf]  ;;  %v18354_v17 = vld [vmem:[%s19282_s20 + $0x1c74] sm:$0xf0] }
 0x3e5   : > { %10207 = vmatpush.bf16.msra.mxu1 %v15241_v1  ;;  %v15209_v1 = vor.u32 %v18326_v11, %v15208_v63  ;;  %v9956_v3 = vadd.f32 %v9955_v2, %v9943_v35  ;;  %v15448_v62 = vld [vmem:[%s19282_s20 + $0x1d68] sm:$0xf]  ;;  %v18386_v40 = vld [vmem:[%s19282_s20 + $0x1d74] sm:$0xf0]  ;;  %v9968_v11 = vpop.f32.mrf.mxu2  ;;  %v9944_v2 = vpop.f32.mrf.mxu0 }
 0x3e6   : > { %10233 = vmatpush.bf16.msra.mxu3 %v15497_v0  ;;  %v15465_v0 = vor.u32 %v18390_v4, %v15464_v31  ;;  %v15048_v36 = vld [vmem:[%s19282_s20 + $0x1a48] sm:$0xf]  ;;  %v18286_v5 = vld [vmem:[%s19282_s20 + $0x1a54] sm:$0xf0]  ;;  %v9981_v4 = vpop.f32.mrf.mxu3 }
 0x3e7   : > { %10220 = vmatpush.bf16.msra.mxu2 %v15369_v55  ;;  %v15337_v55 = vor.u32 %v18358_v43, %v15336_v9  ;;  %v15176_v63 = vld [vmem:[%s19282_s20 + $0x1b48] sm:$0xf]  ;;  %v18318_v9 = vld [vmem:[%s19282_s20 + $0x1b54] sm:$0xf0]  ;;  %v9969_v31 = vadd.f32 %v9968_v11, %v9956_v3 }
 0x3e8   : > { %10195 = vmatpush.bf16.msra.mxu0 %v15097_v23  ;;  %v15065_v23 = vor.u32 %v18290_v46, %v15064_v18  ;;  %v15304_v43 = vld [vmem:[%s19282_s20 + $0x1c48] sm:$0xf]  ;;  %v18350_v39 = vld [vmem:[%s19282_s20 + $0x1c54] sm:$0xf0]  ;;  %v15177_v46 = vor.u32 %v18318_v9, %v15176_v63 }
 0x3e9   : > { %10208 = vmatpush.bf16.msra.mxu1 %v15225_v7  ;;  %v15193_v7 = vor.u32 %v18322_v48, %v15192_v44  ;;  %v15432_v35 = vld [vmem:[%s19282_s20 + $0x1d48] sm:$0xf]  ;;  %v21410_v18 = vadd.f32 %v9981_v4, %v9969_v31  ;;  %v15305_v44 = vor.u32 %v18350_v39, %v15304_v43  ;;  %v18282_v3 = vld [vmem:[%s19282_s20 + $0x1a34] sm:$0xf0] }
 0x3ea   : > { %10234 = vmatpush.bf16.msra.mxu3 %v15481_v45  ;;  %v15449_v45 = vor.u32 %v18386_v40, %v15448_v62  ;;  %v15160_v48 = vld [vmem:[%s19282_s20 + $0x1b28] sm:$0xf]  ;;  %v18346_v40 = vld [vmem:[%s19282_s20 + $0x1c34] sm:$0xf0] }
 0x3eb   : > { %10221 = vmatpush.bf16.msra.mxu2 %v15353_v56  ;;  %v15321_v56 = vor.u32 %v18354_v17, %v15320_v41  ;;  %v18314_v17 = vld [vmem:[%s19282_s20 + $0x1b34] sm:$0xf0]  ;;  %v15288_v62 = vld [vmem:[%s19282_s20 + $0x1c28] sm:$0xf] }
 0x3ec   : > { %10196 = vmatpush.bf16.msra.mxu0 %v15081_v22  ;;  %v18382_v22 = vld [vmem:[%s19282_s20 + $0x1d54] sm:$0xf0]  ;;  %v15161_v63 = vor.u32 %v18314_v17, %v15160_v48  ;;  %v15144_v11 = vld [vmem:[%s19282_s20 + $0x1b08] sm:$0xf] }
 0x3ed   : > { %10209 = vmatpush.bf16.msra.mxu1 %v15209_v1  ;;  %v15049_v1 = vor.u32 %v18286_v5, %v15048_v36  ;;  %v15433_v41 = vor.u32 %v18382_v22, %v15432_v35  ;;  %v15016_v36 = vld [vmem:[%s19282_s20 + $0x1a08] sm:$0xf]  ;;  %v18278_v5 = vld [vmem:[%s19282_s20 + $0x1a14] sm:$0xf0]  ;;  %v9970_v22 = vpop.f32.mrf.mxu2 }
 0x3ee   : > { %10235 = vmatpush.bf16.msra.mxu3 %v15465_v0  ;;  %v15032_v0 = vld [vmem:[%s19282_s20 + $0x1a28] sm:$0xf]  ;;  %v18310_v9 = vld [vmem:[%s19282_s20 + $0x1b14] sm:$0xf0] }
 0x3ef   : > { %10222 = vmatpush.bf16.msra.mxu2 %v15337_v55  ;;  %v9957_v55 = vpop.f32.mrf.mxu1  ;;  %v15272_v43 = vld [vmem:[%s19282_s20 + $0x1c08] sm:$0xf]  ;;  %v18342_v31 = vld [vmem:[%s19282_s20 + $0x1c14] sm:$0xf0] }
 0x3f0   : > { %10197 = vmatpush.bf16.msra.mxu0 %v15065_v23  ;;  %v15416_v23 = vld [vmem:[%s19282_s20 + $0x1d28] sm:$0xf]  ;;  %v18374_v35 = vld [vmem:[%s19282_s20 + $0x1d14] sm:$0xf0]  ;;  %v15273_v17 = vor.u32 %v18342_v31, %v15272_v43 }
 0x3f1   : > { %10210 = vmatpush.bf16.msra.mxu1 %v15193_v7  ;;  %v18378_v7 = vld [vmem:[%s19282_s20 + $0x1d34] sm:$0xf0]  ;;  %v15400_v4 = vld [vmem:[%s19282_s20 + $0x1d08] sm:$0xf] }
 0x3f2   : > { %10236 = vmatpush.bf16.msra.mxu3 %v15449_v45  ;;  %v15289_v45 = vor.u32 %v18346_v40, %v15288_v62  ;;  %v15417_v39 = vor.u32 %v18378_v7, %v15416_v23  ;;  %v15640_v2 = vld [vmem:[%s19282_s20 + $0x1ee8] sm:$0xf]  ;;  %v18498_v48 = vld [vmem:[%s19282_s20 + $0x20f4] sm:$0xf0]  ;;  %v15401_v23 = vor.u32 %v18374_v35, %v15400_v4 }
 0x3f3   : > { %10223 = vmatpush.bf16.msra.mxu2 %v15321_v56  ;;  %v15033_v56 = vor.u32 %v18282_v3, %v15032_v0  ;;  %v15768_v55 = vld [vmem:[%s19282_s20 + $0x1fe8] sm:$0xf]  ;;  %v18466_v0 = vld [vmem:[%s19282_s20 + $0x1ff4] sm:$0xf0] }
 0x3f4   : > { %10198 = vmatpush.bf16.msra.mxu0 %v15049_v1  ;;  %v18434_v1 = vld [vmem:[%s19282_s20 + $0x1ef4] sm:$0xf0]  ;;  %v15896_v3 = vld [vmem:[%s19282_s20 + $0x20e8] sm:$0xf] }
 0x3f5   : > { %10211 = vmatpush.bf16.msra.mxu1 %v15177_v46  ;;  %v9983_v46 = vpop.f32.mrf.mxu3  ;;  %v16024_v62 = vld [vmem:[%s19282_s20 + $0x21e8] sm:$0xf]  ;;  %v18530_v40 = vld [vmem:[%s19282_s20 + $0x21f4] sm:$0xf0]  ;;  %v15641_v7 = vor.u32 %v18434_v1, %v15640_v2 }
 0x3f6   : > { %10237 = vmatpush.bf16.msra.mxu3 %v15433_v41  ;;  %v15145_v41 = vor.u32 %v18310_v9, %v15144_v11  ;;  %v18430_v22 = vld [vmem:[%s19282_s20 + $0x1ed4] sm:$0xf0]  ;;  %v15752_v46 = vld [vmem:[%s19282_s20 + $0x1fc8] sm:$0xf] }
 0x3f7   : > { %10224 = vmatpush.bf16.msra.mxu2 %v15305_v44  ;;  %v15017_v44 = vor.u32 %v18278_v5, %v15016_v36  ;;  %v15897_v36 = vor.u32 %v18498_v48, %v15896_v3  ;;  %v15624_v5 = vld [vmem:[%s19282_s20 + $0x1ec8] sm:$0xf]  ;;  %v18494_v9 = vld [vmem:[%s19282_s20 + $0x20d4] sm:$0xf0] }
 0x3f8   : > { %10199 = vmatpush.bf16.msra.mxu0 %v15033_v56  ;;  %v15769_v56 = vor.u32 %v18466_v0, %v15768_v55  ;;  %v15880_v11 = vld [vmem:[%s19282_s20 + $0x20c8] sm:$0xf]  ;;  %v15625_v31 = vor.u32 %v18430_v22, %v15624_v5  ;;  %v18426_v1 = vld [vmem:[%s19282_s20 + $0x1eb4] sm:$0xf0] }
 0x3f9   : > { %10212 = vmatpush.bf16.msra.mxu1 %v15161_v63  ;;  %v16025_v63 = vor.u32 %v18530_v40, %v16024_v62  ;;  %v16008_v43 = vld [vmem:[%s19282_s20 + $0x21c8] sm:$0xf]  ;;  %v15881_v35 = vor.u32 %v18494_v9, %v15880_v11  ;;  %v18458_v0 = vld [vmem:[%s19282_s20 + $0x1fb4] sm:$0xf0] }
 0x3fa   : > { %10238 = vmatpush.bf16.msra.mxu3 %v15417_v39  ;;  %v18526_v39 = vld [vmem:[%s19282_s20 + $0x21d4] sm:$0xf0]  ;;  %v15608_v2 = vld [vmem:[%s19282_s20 + $0x1ea8] sm:$0xf] }
 0x3fb   : > { %10225 = vmatpush.bf16.msra.mxu2 %v15289_v45  ;;  %v18462_v45 = vld [vmem:[%s19282_s20 + $0x1fd4] sm:$0xf0]  ;;  %v15736_v55 = vld [vmem:[%s19282_s20 + $0x1fa8] sm:$0xf]  ;;  %v15609_v62 = vor.u32 %v18426_v1, %v15608_v2 }
 0x3fc   : > { %10200 = vmatpush.bf16.msra.mxu0 %v15017_v44  ;;  %v15753_v4 = vor.u32 %v18462_v45, %v15752_v46  ;;  %v16009_v44 = vor.u32 %v18526_v39, %v16008_v43  ;;  %v15864_v3 = vld [vmem:[%s19282_s20 + $0x20a8] sm:$0xf]  ;;  %v18490_v48 = vld [vmem:[%s19282_s20 + $0x20b4] sm:$0xf0]  ;;  %v15737_v40 = vor.u32 %v18458_v0, %v15736_v55  ;;  %v9994_v45 = vpop.f32.mrf.mxu0 }
 0x3fd   : > { %10213 = vmatpush.bf16.msra.mxu1 %v15145_v41  ;;  %v15992_v41 = vld [vmem:[%s19282_s20 + $0x21a8] sm:$0xf]  ;;  %v18454_v22 = vld [vmem:[%s19282_s20 + $0x1f94] sm:$0xf0]  ;;  %v9995_v43 = vadd.f32 %v9994_v45, %v21410_v18 }
 0x3fe   : > { %10239 = vmatpush.bf16.msra.mxu3 %v15401_v23  ;;  %v15865_v23 = vor.u32 %v18490_v48, %v15864_v3  ;;  %v15848_v46 = vld [vmem:[%s19282_s20 + $0x2088] sm:$0xf]  ;;  %v18518_v9 = vld [vmem:[%s19282_s20 + $0x2194] sm:$0xf0] }
 0x3ff   : > { %10226 = vmatpush.bf16.msra.mxu2 %v15273_v17  ;;  %10201 = vmatmul.bf16.vlgmr.msra.gmra.mxu0 %v19851_v50  ;;  %v18522_v17 = vld [vmem:[%s19282_s20 + $0x21b4] sm:$0xf0]  ;;  %v15976_v11 = vld [vmem:[%s19282_s20 + $0x2188] sm:$0xf] }
 0x400   : > { %10245 = vmatpush.bf16.msrb.mxu0 %v15641_v7  ;;  %10214 = vmatmul.bf16.vlgmr.msra.gmra.mxu1 %v19855_v52  ;;  %v15592_v7 = vld [vmem:[%s19282_s20 + $0x1e88] sm:$0xf]  ;;  %v15993_v5 = vor.u32 %v18522_v17, %v15992_v41  ;;  %v18418_v1 = vld [vmem:[%s19282_s20 + $0x1e74] sm:$0xf0] }
 0x401   : > { %10258 = vmatpush.bf16.msrb.mxu1 %v15769_v56  ;;  %10240 = vmatmul.bf16.vlgmr.msra.gmra.mxu3 %v19920_v10  ;;  %v18422_v56 = vld [vmem:[%s19282_s20 + $0x1e94] sm:$0xf0]  ;;  %v15576_v2 = vld [vmem:[%s19282_s20 + $0x1e68] sm:$0xf] }
 0x402   : > { %10284 = vmatpush.bf16.msrb.mxu3 %v16025_v63  ;;  %10227 = vmatmul.bf16.vlgmr.msra.gmra.mxu2 %v19916_v6  ;;  %v18486_v63 = vld [vmem:[%s19282_s20 + $0x2094] sm:$0xf0]  ;;  %v15593_v39 = vor.u32 %v18422_v56, %v15592_v7  ;;  %v15704_v55 = vld [vmem:[%s19282_s20 + $0x1f68] sm:$0xf] }
 0x403   : > { %10271 = vmatpush.bf16.msrb.mxu2 %v15897_v36  ;;  %v15720_v36 = vld [vmem:[%s19282_s20 + $0x1f88] sm:$0xf]  ;;  %v18450_v3 = vld [vmem:[%s19282_s20 + $0x1f74] sm:$0xf0] }
 0x404   : > { %10246 = vmatpush.bf16.msrb.mxu0 %v15625_v31  ;;  %v10007_v31 = vpop.f32.mrf.mxu1  ;;  %v15832_v48 = vld [vmem:[%s19282_s20 + $0x2068] sm:$0xf]  ;;  %v18482_v18 = vld [vmem:[%s19282_s20 + $0x2074] sm:$0xf0] }
 0x405   : > { %10259 = vmatpush.bf16.msrb.mxu1 %v15753_v4  ;;  %v15721_v4 = vor.u32 %v18454_v22, %v15720_v36  ;;  %v10008_v0 = vadd.f32 %v10007_v31, %v9995_v43  ;;  %v15960_v41 = vld [vmem:[%s19282_s20 + $0x2168] sm:$0xf]  ;;  %v18514_v17 = vld [vmem:[%s19282_s20 + $0x2174] sm:$0xf0]  ;;  %v10020_v22 = vpop.f32.mrf.mxu2  ;;  %v9996_v31 = vpop.f32.mrf.mxu0 }
 0x406   : > { %10285 = vmatpush.bf16.msrb.mxu3 %v16009_v44  ;;  %v15977_v44 = vor.u32 %v18518_v9, %v15976_v11  ;;  %v15560_v7 = vld [vmem:[%s19282_s20 + $0x1e48] sm:$0xf]  ;;  %v18414_v56 = vld [vmem:[%s19282_s20 + $0x1e54] sm:$0xf0]  ;;  %v10033_v9 = vpop.f32.mrf.mxu3 }
 0x407   : > { %10272 = vmatpush.bf16.msrb.mxu2 %v15881_v35  ;;  %v15849_v35 = vor.u32 %v18486_v63, %v15848_v46  ;;  %v15688_v36 = vld [vmem:[%s19282_s20 + $0x1f48] sm:$0xf]  ;;  %v18446_v46 = vld [vmem:[%s19282_s20 + $0x1f54] sm:$0xf0]  ;;  %v10021_v11 = vadd.f32 %v10020_v22, %v10008_v0 }
 0x408   : > { %10247 = vmatpush.bf16.msrb.mxu0 %v15609_v62  ;;  %v15577_v62 = vor.u32 %v18418_v1, %v15576_v2  ;;  %v15816_v63 = vld [vmem:[%s19282_s20 + $0x2048] sm:$0xf]  ;;  %v18478_v45 = vld [vmem:[%s19282_s20 + $0x2054] sm:$0xf0]  ;;  %v15689_v1 = vor.u32 %v18446_v46, %v15688_v36 }
 0x409   : > { %10260 = vmatpush.bf16.msrb.mxu1 %v15737_v40  ;;  %v15705_v40 = vor.u32 %v18450_v3, %v15704_v55  ;;  %v15944_v43 = vld [vmem:[%s19282_s20 + $0x2148] sm:$0xf]  ;;  %v21481_v2 = vadd.f32 %v10033_v9, %v10021_v11  ;;  %v15817_v55 = vor.u32 %v18478_v45, %v15816_v63  ;;  %v18410_v0 = vld [vmem:[%s19282_s20 + $0x1e34] sm:$0xf0] }
 0x40a   : > { %10286 = vmatpush.bf16.msrb.mxu3 %v15993_v5  ;;  %v15961_v5 = vor.u32 %v18514_v17, %v15960_v41  ;;  %v15672_v3 = vld [vmem:[%s19282_s20 + $0x1f28] sm:$0xf]  ;;  %v18474_v17 = vld [vmem:[%s19282_s20 + $0x2034] sm:$0xf0] }
 0x40b   : > { %10273 = vmatpush.bf16.msrb.mxu2 %v15865_v23  ;;  %v15833_v23 = vor.u32 %v18482_v18, %v15832_v48  ;;  %v18442_v18 = vld [vmem:[%s19282_s20 + $0x1f34] sm:$0xf0]  ;;  %v15800_v41 = vld [vmem:[%s19282_s20 + $0x2028] sm:$0xf] }
 0x40c   : > { %10248 = vmatpush.bf16.msrb.mxu0 %v15593_v39  ;;  %v18510_v39 = vld [vmem:[%s19282_s20 + $0x2154] sm:$0xf0]  ;;  %v15673_v36 = vor.u32 %v18442_v18, %v15672_v3  ;;  %v15656_v22 = vld [vmem:[%s19282_s20 + $0x1f08] sm:$0xf] }
 0x40d   : > { %10261 = vmatpush.bf16.msrb.mxu1 %v15721_v4  ;;  %v15561_v4 = vor.u32 %v18414_v56, %v15560_v7  ;;  %v15945_v48 = vor.u32 %v18510_v39, %v15944_v43  ;;  %v15528_v7 = vld [vmem:[%s19282_s20 + $0x1e08] sm:$0xf]  ;;  %v18406_v56 = vld [vmem:[%s19282_s20 + $0x1e14] sm:$0xf0]  ;;  %v10022_v39 = vpop.f32.mrf.mxu2 }
 0x40e   : > { %10287 = vmatpush.bf16.msrb.mxu3 %v15977_v44  ;;  %v15544_v44 = vld [vmem:[%s19282_s20 + $0x1e28] sm:$0xf]  ;;  %v18438_v46 = vld [vmem:[%s19282_s20 + $0x1f14] sm:$0xf0] }
 0x40f   : > { %10274 = vmatpush.bf16.msrb.mxu2 %v15849_v35  ;;  %v10009_v35 = vpop.f32.mrf.mxu1  ;;  %v15784_v63 = vld [vmem:[%s19282_s20 + $0x2008] sm:$0xf]  ;;  %v18470_v11 = vld [vmem:[%s19282_s20 + $0x2014] sm:$0xf0] }
 0x410   : > { %10249 = vmatpush.bf16.msrb.mxu0 %v15577_v62  ;;  %v15928_v62 = vld [vmem:[%s19282_s20 + $0x2128] sm:$0xf]  ;;  %v18502_v43 = vld [vmem:[%s19282_s20 + $0x2114] sm:$0xf0]  ;;  %v15785_v18 = vor.u32 %v18470_v11, %v15784_v63 }
 0x411   : > { %10262 = vmatpush.bf16.msrb.mxu1 %v15705_v40  ;;  %v18506_v40 = vld [vmem:[%s19282_s20 + $0x2134] sm:$0xf0]  ;;  %v15912_v9 = vld [vmem:[%s19282_s20 + $0x2108] sm:$0xf] }
 0x412   : > { %10288 = vmatpush.bf16.msrb.mxu3 %v15961_v5  ;;  %v15801_v5 = vor.u32 %v18474_v17, %v15800_v41  ;;  %v15929_v45 = vor.u32 %v18506_v40, %v15928_v62  ;;  %v16152_v31 = vld [vmem:[%s19282_s20 + $0x22e8] sm:$0xf]  ;;  %v18626_v3 = vld [vmem:[%s19282_s20 + $0x24f4] sm:$0xf0]  ;;  %v15913_v62 = vor.u32 %v18502_v43, %v15912_v9 }
 0x413   : > { %10275 = vmatpush.bf16.msrb.mxu2 %v15833_v23  ;;  %v15545_v23 = vor.u32 %v18410_v0, %v15544_v44  ;;  %v16280_v35 = vld [vmem:[%s19282_s20 + $0x23e8] sm:$0xf]  ;;  %v18594_v44 = vld [vmem:[%s19282_s20 + $0x23f4] sm:$0xf0] }
 0x414   : > { %10250 = vmatpush.bf16.msrb.mxu0 %v15561_v4  ;;  %v18562_v4 = vld [vmem:[%s19282_s20 + $0x22f4] sm:$0xf0]  ;;  %v16408_v0 = vld [vmem:[%s19282_s20 + $0x24e8] sm:$0xf] }
 0x415   : > { %10263 = vmatpush.bf16.msrb.mxu1 %v15689_v1  ;;  %v10035_v1 = vpop.f32.mrf.mxu3  ;;  %v16536_v41 = vld [vmem:[%s19282_s20 + $0x25e8] sm:$0xf]  ;;  %v18658_v17 = vld [vmem:[%s19282_s20 + $0x25f4] sm:$0xf0]  ;;  %v16153_v40 = vor.u32 %v18562_v4, %v16152_v31 }
 0x416   : > { %10289 = vmatpush.bf16.msrb.mxu3 %v15945_v48  ;;  %v15657_v48 = vor.u32 %v18438_v46, %v15656_v22  ;;  %v18558_v39 = vld [vmem:[%s19282_s20 + $0x22d4] sm:$0xf0]  ;;  %v16264_v1 = vld [vmem:[%s19282_s20 + $0x23c8] sm:$0xf] }
 0x417   : > { %10276 = vmatpush.bf16.msrb.mxu2 %v15817_v55  ;;  %v15529_v55 = vor.u32 %v18406_v56, %v15528_v7  ;;  %v16409_v7 = vor.u32 %v18626_v3, %v16408_v0  ;;  %v16136_v56 = vld [vmem:[%s19282_s20 + $0x22c8] sm:$0xf]  ;;  %v18622_v46 = vld [vmem:[%s19282_s20 + $0x24d4] sm:$0xf0] }
 0x418   : > { %10251 = vmatpush.bf16.msrb.mxu0 %v15545_v23  ;;  %v16281_v23 = vor.u32 %v18594_v44, %v16280_v35  ;;  %v16392_v22 = vld [vmem:[%s19282_s20 + $0x24c8] sm:$0xf]  ;;  %v16137_v11 = vor.u32 %v18558_v39, %v16136_v56  ;;  %v18554_v4 = vld [vmem:[%s19282_s20 + $0x22b4] sm:$0xf0] }
 0x419   : > { %10264 = vmatpush.bf16.msrb.mxu1 %v15673_v36  ;;  %v16537_v36 = vor.u32 %v18658_v17, %v16536_v41  ;;  %v16520_v63 = vld [vmem:[%s19282_s20 + $0x25c8] sm:$0xf]  ;;  %v16393_v43 = vor.u32 %v18622_v46, %v16392_v22  ;;  %v18586_v44 = vld [vmem:[%s19282_s20 + $0x23b4] sm:$0xf0] }
 0x41a   : > { %10290 = vmatpush.bf16.msrb.mxu3 %v15929_v45  ;;  %v18654_v45 = vld [vmem:[%s19282_s20 + $0x25d4] sm:$0xf0]  ;;  %v16120_v31 = vld [vmem:[%s19282_s20 + $0x22a8] sm:$0xf] }
 0x41b   : > { %10277 = vmatpush.bf16.msrb.mxu2 %v15801_v5  ;;  %v18590_v5 = vld [vmem:[%s19282_s20 + $0x23d4] sm:$0xf0]  ;;  %v16248_v35 = vld [vmem:[%s19282_s20 + $0x23a8] sm:$0xf] }
 0x41c   : > { %10252 = vmatpush.bf16.msrb.mxu0 %v15529_v55  ;;  %v16265_v9 = vor.u32 %v18590_v5, %v16264_v1  ;;  %v16521_v55 = vor.u32 %v18654_v45, %v16520_v63  ;;  %v16376_v0 = vld [vmem:[%s19282_s20 + $0x24a8] sm:$0xf]  ;;  %v18618_v3 = vld [vmem:[%s19282_s20 + $0x24b4] sm:$0xf0]  ;;  %v10046_v46 = vpop.f32.mrf.mxu0 }
 0x41d   : > { %10265 = vmatpush.bf16.msrb.mxu1 %v15657_v48  ;;  %v22592_v48 = vld [vmem:[#allocation16_spill] sm:$0xff]  ;;  %v16504_v41 = vld [vmem:[%s19282_s20 + $0x25a8] sm:$0xf] }
 0x41e   : > { %10291 = vmatpush.bf16.msrb.mxu3 %v15913_v62  ;;  %v18650_v17 = vld [vmem:[%s19282_s20 + $0x25b4] sm:$0xf0]  ;;  %v16121_v62 = vor.u32 %v18554_v4, %v16120_v31  ;;  %v16232_v39 = vld [vmem:[%s19282_s20 + $0x2388] sm:$0xf] }
 0x41f   : > { %10278 = vmatpush.bf16.msrb.mxu2 %v15785_v18  ;;  %10253 = vmatmul.bf16.vlgmr.msrb.gmra.mxu0 %v22586_v37  ;;  %v22593_v18 = vld [vmem:[#allocation15_spill] sm:$0xff]  ;;  %v18550_v56 = vld [vmem:[%s19282_s20 + $0x2294] sm:$0xf0]  ;;  %v16505_v1 = vor.u32 %v18650_v17, %v16504_v41  ;;  %v16360_v5 = vld [vmem:[%s19282_s20 + $0x2488] sm:$0xf] }
 0x420   : > { %10297 = vmatpush.bf16.msra.mxu0 %v16153_v40  ;;  %10266 = vmatmul.bf16.vlgmr.msrb.gmra.mxu1 %v22593_v18  ;;  %v16249_v40 = vor.u32 %v18586_v44, %v16248_v35  ;;  %v18614_v22 = vld [vmem:[%s19282_s20 + $0x2494] sm:$0xf0]  ;;  %v16488_v63 = vld [vmem:[%s19282_s20 + $0x2588] sm:$0xf] }
 0x421   : > { %10310 = vmatpush.bf16.msra.mxu1 %v16281_v23  ;;  %10292 = vmatmul.bf16.vlgmr.msrb.gmra.mxu3 %v22588_v42  ;;  %v16377_v23 = vor.u32 %v18618_v3, %v16376_v0  ;;  %v18646_v45 = vld [vmem:[%s19282_s20 + $0x2594] sm:$0xf0]  ;;  %v16361_v4 = vor.u32 %v18614_v22, %v16360_v5  ;;  %v16088_v35 = vld [vmem:[%s19282_s20 + $0x2268] sm:$0xf] }
 0x422   : > { %10336 = vmatpush.bf16.msra.mxu3 %v16537_v36  ;;  %10279 = vmatmul.bf16.vlgmr.msrb.gmra.mxu2 %v22592_v48  ;;  %v18582_v36 = vld [vmem:[%s19282_s20 + $0x2394] sm:$0xf0]  ;;  %v16216_v44 = vld [vmem:[%s19282_s20 + $0x2368] sm:$0xf]  ;;  %v16489_v0 = vor.u32 %v18646_v45, %v16488_v63 }
 0x423   : > { %10323 = vmatpush.bf16.msra.mxu2 %v16409_v7  ;;  %v16104_v7 = vld [vmem:[%s19282_s20 + $0x2288] sm:$0xf]  ;;  %v16233_v31 = vor.u32 %v18582_v36, %v16232_v39  ;;  %v18578_v41 = vld [vmem:[%s19282_s20 + $0x2374] sm:$0xf0] }
 0x424   : > { %10298 = vmatpush.bf16.msra.mxu0 %v16137_v11  ;;  %v10047_v11 = vadd.f32 %v10046_v46, %v21481_v2  ;;  %v16344_v17 = vld [vmem:[%s19282_s20 + $0x2468] sm:$0xf]  ;;  %v18610_v2 = vld [vmem:[%s19282_s20 + $0x2474] sm:$0xf0] }
 0x425   : > { %10311 = vmatpush.bf16.msra.mxu1 %v16265_v9  ;;  %v16105_v9 = vor.u32 %v18550_v56, %v16104_v7  ;;  %v16217_v7 = vor.u32 %v18578_v41, %v16216_v44  ;;  %v16345_v56 = vor.u32 %v18610_v2, %v16344_v17  ;;  %v16072_v39 = vld [vmem:[%s19282_s20 + $0x2248] sm:$0xf]  ;;  %v10072_v22 = vpop.f32.mrf.mxu2  ;;  %v18574_v46 = vld [vmem:[%s19282_s20 + $0x2354] sm:$0xf0] }
 0x426   : > { %10337 = vmatpush.bf16.msra.mxu3 %v16521_v55  ;;  %v18546_v55 = vld [vmem:[%s19282_s20 + $0x2274] sm:$0xf0]  ;;  %v16200_v36 = vld [vmem:[%s19282_s20 + $0x2348] sm:$0xf] }
 0x427   : > { %10324 = vmatpush.bf16.msra.mxu2 %v16393_v43  ;;  %v10059_v43 = vpop.f32.mrf.mxu1  ;;  %v16328_v63 = vld [vmem:[%s19282_s20 + $0x2448] sm:$0xf]  ;;  %v18606_v45 = vld [vmem:[%s19282_s20 + $0x2454] sm:$0xf0] }
 0x428   : > { %10299 = vmatpush.bf16.msra.mxu0 %v16121_v62  ;;  %v10060_v3 = vadd.f32 %v10059_v43, %v10047_v11  ;;  %v16472_v62 = vld [vmem:[%s19282_s20 + $0x2568] sm:$0xf]  ;;  %v18538_v17 = vld [vmem:[%s19282_s20 + $0x2234] sm:$0xf0] }
 0x429   : > { %10312 = vmatpush.bf16.msra.mxu1 %v16249_v40  ;;  %v18642_v40 = vld [vmem:[%s19282_s20 + $0x2574] sm:$0xf0]  ;;  %v16456_v43 = vld [vmem:[%s19282_s20 + $0x2548] sm:$0xf] }
 0x42a   : > { %10338 = vmatpush.bf16.msra.mxu3 %v16505_v1  ;;  %v18542_v1 = vld [vmem:[%s19282_s20 + $0x2254] sm:$0xf0]  ;;  %v16473_v5 = vor.u32 %v18642_v40, %v16472_v62  ;;  %v10073_v11 = vadd.f32 %v10072_v22, %v10060_v3  ;;  %v16329_v3 = vor.u32 %v18606_v45, %v16328_v63  ;;  %v16056_v41 = vld [vmem:[%s19282_s20 + $0x2228] sm:$0xf] }
 0x42b   : > { %10325 = vmatpush.bf16.msra.mxu2 %v16377_v23  ;;  %v16089_v23 = vor.u32 %v18546_v55, %v16088_v35  ;;  %v16073_v35 = vor.u32 %v18542_v1, %v16072_v39  ;;  %v16184_v2 = vld [vmem:[%s19282_s20 + $0x2328] sm:$0xf]  ;;  %v18570_v40 = vld [vmem:[%s19282_s20 + $0x2334] sm:$0xf0]  ;;  %v16057_v1 = vor.u32 %v18538_v17, %v16056_v41 }
 0x42c   : > { %10300 = vmatpush.bf16.msra.mxu0 %v16105_v9  ;;  %v10085_v9 = vpop.f32.mrf.mxu3  ;;  %v18602_v39 = vld [vmem:[%s19282_s20 + $0x2434] sm:$0xf0]  ;;  %v16168_v63 = vld [vmem:[%s19282_s20 + $0x2308] sm:$0xf] }
 0x42d   : > { %10313 = vmatpush.bf16.msra.mxu1 %v16233_v31  ;;  %v18638_v31 = vld [vmem:[%s19282_s20 + $0x2554] sm:$0xf0]  ;;  %v21552_v44 = vadd.f32 %v10085_v9, %v10073_v11  ;;  %v16296_v11 = vld [vmem:[%s19282_s20 + $0x2408] sm:$0xf] }
 0x42e   : > { %10339 = vmatpush.bf16.msra.mxu3 %v16489_v0  ;;  %v16201_v0 = vor.u32 %v18574_v46, %v16200_v36  ;;  %v16457_v62 = vor.u32 %v18638_v31, %v16456_v43  ;;  %v16040_v36 = vld [vmem:[%s19282_s20 + $0x2208] sm:$0xf]  ;;  %v18534_v22 = vld [vmem:[%s19282_s20 + $0x2214] sm:$0xf0] }
 0x42f   : > { %10326 = vmatpush.bf16.msra.mxu2 %v16361_v4  ;;  %v10048_v4 = vpop.f32.mrf.mxu0  ;;  %v10061_v55 = vpop.f32.mrf.mxu1  ;;  %v18566_v45 = vld [vmem:[%s19282_s20 + $0x2314] sm:$0xf0]  ;;  %v16424_v31 = vld [vmem:[%s19282_s20 + $0x2508] sm:$0xf]  ;;  %v16041_v17 = vor.u32 %v18534_v22, %v16040_v36 }
 0x430   : > { %10301 = vmatpush.bf16.msra.mxu0 %v16089_v23  ;;  %v16312_v23 = vld [vmem:[%s19282_s20 + $0x2428] sm:$0xf]  ;;  %v18598_v43 = vld [vmem:[%s19282_s20 + $0x2414] sm:$0xf0] }
 0x431   : > { %10314 = vmatpush.bf16.msra.mxu1 %v16217_v7  ;;  %v16440_v7 = vld [vmem:[%s19282_s20 + $0x2528] sm:$0xf]  ;;  %v16313_v46 = vor.u32 %v18602_v39, %v16312_v23  ;;  %v18630_v4 = vld [vmem:[%s19282_s20 + $0x2514] sm:$0xf0]  ;;  %v16297_v39 = vor.u32 %v18598_v43, %v16296_v11 }
 0x432   : > { %10340 = vmatpush.bf16.msra.mxu3 %v16473_v5  ;;  %v16185_v5 = vor.u32 %v18570_v40, %v16184_v2  ;;  %v16664_v55 = vld [vmem:[%s19282_s20 + $0x26e8] sm:$0xf]  ;;  %v18690_v41 = vld [vmem:[%s19282_s20 + $0x26f4] sm:$0xf0] }
 0x433   : > { %10327 = vmatpush.bf16.msra.mxu2 %v16345_v56  ;;  %v18634_v56 = vld [vmem:[%s19282_s20 + $0x2534] sm:$0xf0]  ;;  %v16920_v40 = vld [vmem:[%s19282_s20 + $0x28e8] sm:$0xf] }
 0x434   : > { %10302 = vmatpush.bf16.msra.mxu0 %v16073_v35  ;;  %v16441_v9 = vor.u32 %v18634_v56, %v16440_v7  ;;  %v10074_v35 = vpop.f32.mrf.mxu2  ;;  %v18722_v2 = vld [vmem:[%s19282_s20 + $0x27f4] sm:$0xf0]  ;;  %v17048_v7 = vld [vmem:[%s19282_s20 + $0x29e8] sm:$0xf] }
 0x435   : > { %10315 = vmatpush.bf16.msra.mxu1 %v16201_v0  ;;  %v16792_v0 = vld [vmem:[%s19282_s20 + $0x27e8] sm:$0xf]  ;;  %v18754_v23 = vld [vmem:[%s19282_s20 + $0x28f4] sm:$0xf0]  ;;  %v16665_v35 = vor.u32 %v18690_v41, %v16664_v55 }
 0x436   : > { %10341 = vmatpush.bf16.msra.mxu3 %v16457_v62  ;;  %v16169_v62 = vor.u32 %v18566_v45, %v16168_v63  ;;  %v18786_v56 = vld [vmem:[%s19282_s20 + $0x29f4] sm:$0xf0]  ;;  %v16793_v36 = vor.u32 %v18722_v2, %v16792_v0  ;;  %v16921_v22 = vor.u32 %v18754_v23, %v16920_v40  ;;  %v16776_v48 = vld [vmem:[%s19282_s20 + $0x27c8] sm:$0xf] }
 0x437   : > { %10328 = vmatpush.bf16.msra.mxu2 %v16329_v3  ;;  %v10087_v3 = vpop.f32.mrf.mxu3  ;;  %v18686_v57 = vld [vmem:[%s19282_s20 + $0x26d4] sm:$0xf0]  ;;  %v16904_v63 = vld [vmem:[%s19282_s20 + $0x28c8] sm:$0xf] }
 0x438   : > { %10303 = vmatpush.bf16.msra.mxu0 %v16057_v1  ;;  %v16425_v1 = vor.u32 %v18630_v4, %v16424_v31  ;;  %v16648_v3 = vld [vmem:[%s19282_s20 + $0x26c8] sm:$0xf]  ;;  %v18750_v45 = vld [vmem:[%s19282_s20 + $0x28d4] sm:$0xf0] }
 0x439   : > { %10316 = vmatpush.bf16.msra.mxu1 %v16185_v5  ;;  %v17049_v5 = vor.u32 %v18786_v56, %v17048_v7  ;;  %v17032_v11 = vld [vmem:[%s19282_s20 + $0x29c8] sm:$0xf]  ;;  %v16649_v43 = vor.u32 %v18686_v57, %v16648_v3  ;;  %v16905_v4 = vor.u32 %v18750_v45, %v16904_v63  ;;  %v18682_v41 = vld [vmem:[%s19282_s20 + $0x26b4] sm:$0xf0] }
 0x43a   : > { %10342 = vmatpush.bf16.msra.mxu3 %v16441_v9  ;;  %v18782_v9 = vld [vmem:[%s19282_s20 + $0x29d4] sm:$0xf0]  ;;  %v16632_v55 = vld [vmem:[%s19282_s20 + $0x26a8] sm:$0xf] }
 0x43b   : > { %10329 = vmatpush.bf16.msra.mxu2 %v16313_v46  ;;  %v18718_v46 = vld [vmem:[%s19282_s20 + $0x27d4] sm:$0xf0]  ;;  %v16760_v0 = vld [vmem:[%s19282_s20 + $0x27a8] sm:$0xf]  ;;  %v17033_v2 = vor.u32 %v18782_v9, %v17032_v11  ;;  %v16633_v56 = vor.u32 %v18682_v41, %v16632_v55 }
 0x43c   : > { %10304 = vmatpush.bf16.msra.mxu0 %v16041_v17  ;;  %v16777_v31 = vor.u32 %v18718_v46, %v16776_v48  ;;  %v22594_v17 = vld [vmem:[#allocation17_spill] sm:$0xff]  ;;  %v18714_v40 = vld [vmem:[%s19282_s20 + $0x27b4] sm:$0xf0]  ;;  %v16888_v23 = vld [vmem:[%s19282_s20 + $0x28a8] sm:$0xf]  ;;  %v10098_v11 = vpop.f32.mrf.mxu0 }
 0x43d   : > { %10317 = vmatpush.bf16.msra.mxu1 %v16169_v62  ;;  %v18746_v62 = vld [vmem:[%s19282_s20 + $0x28b4] sm:$0xf0]  ;;  %v17016_v48 = vld [vmem:[%s19282_s20 + $0x29a8] sm:$0xf]  ;;  %v10111_v55 = vpop.f32.mrf.mxu1 }
 0x43e   : > { %10343 = vmatpush.bf16.msra.mxu3 %v16425_v1  ;;  %v22595_v57 = vld [vmem:[#allocation20_spill] sm:$0xff]  ;;  %v16761_v1 = vor.u32 %v18714_v40, %v16760_v0  ;;  %v16744_v3 = vld [vmem:[%s19282_s20 + $0x2788] sm:$0xf] }
 0x43f   : > { %10330 = vmatpush.bf16.msra.mxu2 %v16297_v39  ;;  %10305 = vmatmul.bf16.vlgmr.msra.gmra.mxu0 %v22594_v17  ;;  %v22596_v39 = vld [vmem:[#allocation19_spill] sm:$0xff]  ;;  %v18778_v7 = vld [vmem:[%s19282_s20 + $0x29b4] sm:$0xf0]  ;;  %v16872_v63 = vld [vmem:[%s19282_s20 + $0x2888] sm:$0xf] }
 0x440   : > { %10349 = vmatpush.bf16.msrb.mxu0 %v16665_v35  ;;  %10318 = vmatmul.bf16.vlgmr.msra.gmra.mxu1 %v22596_v39  ;;  %v16889_v35 = vor.u32 %v18746_v62, %v16888_v23  ;;  %v18710_v46 = vld [vmem:[%s19282_s20 + $0x2794] sm:$0xf0]  ;;  %v17000_v9 = vld [vmem:[%s19282_s20 + $0x2988] sm:$0xf]  ;;  %v17468_v39 = vld [vmem:[%s19282_s20 + $0xcc] sm:$0xf] }
 0x441   : > { %10362 = vmatpush.bf16.msrb.mxu1 %v16793_v36  ;;  %10344 = vmatmul.bf16.vlgmr.msra.gmra.mxu3 %v20079_v49  ;;  %v16616_v36 = vld [vmem:[%s19282_s20 + $0x2688] sm:$0xf]  ;;  %v18742_v45 = vld [vmem:[%s19282_s20 + $0x2894] sm:$0xf0]  ;;  %v16745_v41 = vor.u32 %v18710_v46, %v16744_v3 }
 0x442   : > { %10388 = vmatpush.bf16.msrb.mxu3 %v17049_v5  ;;  %10331 = vmatmul.bf16.vlgmr.msra.gmra.mxu2 %v22595_v57  ;;  %v17017_v5 = vor.u32 %v18778_v7, %v17016_v48  ;;  %v16873_v0 = vor.u32 %v18742_v45, %v16872_v63  ;;  %v18674_v40 = vld [vmem:[%s19282_s20 + $0x2674] sm:$0xf0]  ;;  %v16728_v23 = vld [vmem:[%s19282_s20 + $0x2768] sm:$0xf] }
 0x443   : > { %10375 = vmatpush.bf16.msrb.mxu2 %v16921_v22  ;;  %v18678_v22 = vld [vmem:[%s19282_s20 + $0x2694] sm:$0xf0]  ;;  %v16712_v63 = vld [vmem:[%s19282_s20 + $0x2748] sm:$0xf] }
 0x444   : > { %10350 = vmatpush.bf16.msrb.mxu0 %v16649_v43  ;;  %v18774_v43 = vld [vmem:[%s19282_s20 + $0x2994] sm:$0xf0]  ;;  %v17160_v57 = vld [vmem:[%s19282_s20 + $0x2ac8] sm:$0xf] }
 0x445   : > { %10363 = vmatpush.bf16.msrb.mxu1 %v16777_v31  ;;  %v10099_v31 = vadd.f32 %v10098_v11, %v21552_v44  ;;  %v17001_v62 = vor.u32 %v18774_v43, %v17000_v9  ;;  %v18706_v7 = vld [vmem:[%s19282_s20 + $0x2774] sm:$0xf0]  ;;  %v10124_v11 = vpop.f32.mrf.mxu2  ;;  %v16840_v43 = vld [vmem:[%s19282_s20 + $0x2848] sm:$0xf] }
 0x446   : > { %10389 = vmatpush.bf16.msrb.mxu3 %v17033_v2  ;;  %v16600_v2 = vld [vmem:[%s19282_s20 + $0x2668] sm:$0xf]  ;;  %v18738_v44 = vld [vmem:[%s19282_s20 + $0x2874] sm:$0xf0] }
 0x447   : > { %10376 = vmatpush.bf16.msrb.mxu2 %v16905_v4  ;;  %v16617_v4 = vor.u32 %v18678_v22, %v16616_v36  ;;  %v10112_v48 = vadd.f32 %v10111_v55, %v10099_v31  ;;  %v16984_v36 = vld [vmem:[%s19282_s20 + $0x2968] sm:$0xf]  ;;  %v16729_v22 = vor.u32 %v18706_v7, %v16728_v23  ;;  %v18670_v46 = vld [vmem:[%s19282_s20 + $0x2654] sm:$0xf0]  ;;  %v10137_v55 = vpop.f32.mrf.mxu3  ;;  %v10113_v23 = vpop.f32.mrf.mxu1 }
 0x448   : > { %10351 = vmatpush.bf16.msrb.mxu0 %v16633_v56  ;;  %v16856_v56 = vld [vmem:[%s19282_s20 + $0x2868] sm:$0xf]  ;;  %v18702_v9 = vld [vmem:[%s19282_s20 + $0x2754] sm:$0xf0] }
 0x449   : > { %10364 = vmatpush.bf16.msrb.mxu1 %v16761_v1  ;;  %v18770_v1 = vld [vmem:[%s19282_s20 + $0x2974] sm:$0xf0]  ;;  %v16857_v3 = vor.u32 %v18738_v44, %v16856_v56  ;;  %v16713_v7 = vor.u32 %v18702_v9, %v16712_v63  ;;  %v16568_v56 = vld [vmem:[%s19282_s20 + $0x2628] sm:$0xf] }
 0x44a   : > { %10390 = vmatpush.bf16.msrb.mxu3 %v17017_v5  ;;  %v16584_v5 = vld [vmem:[%s19282_s20 + $0x2648] sm:$0xf]  ;;  %v16985_v45 = vor.u32 %v18770_v1, %v16984_v36  ;;  %v18734_v31 = vld [vmem:[%s19282_s20 + $0x2854] sm:$0xf0] }
 0x44b   : > { %10377 = vmatpush.bf16.msrb.mxu2 %v16889_v35  ;;  %v16601_v35 = vor.u32 %v18674_v40, %v16600_v2  ;;  %v16968_v2 = vld [vmem:[%s19282_s20 + $0x2948] sm:$0xf]  ;;  %v16585_v40 = vor.u32 %v18670_v46, %v16584_v5  ;;  %v18666_v44 = vld [vmem:[%s19282_s20 + $0x2634] sm:$0xf0] }
 0x44c   : > { %10352 = vmatpush.bf16.msrb.mxu0 %v16617_v4  ;;  %v10125_v4 = vadd.f32 %v10124_v11, %v10112_v48  ;;  %v16841_v48 = vor.u32 %v18734_v31, %v16840_v43  ;;  %v16696_v36 = vld [vmem:[%s19282_s20 + $0x2728] sm:$0xf]  ;;  %v18730_v46 = vld [vmem:[%s19282_s20 + $0x2834] sm:$0xf0]  ;;  %v16569_v11 = vor.u32 %v18666_v44, %v16568_v56 }
 0x44d   : > { %10365 = vmatpush.bf16.msrb.mxu1 %v16745_v41  ;;  %v18766_v41 = vld [vmem:[%s19282_s20 + $0x2954] sm:$0xf0]  ;;  %v16824_v5 = vld [vmem:[%s19282_s20 + $0x2828] sm:$0xf]  ;;  %v10126_v23 = vpop.f32.mrf.mxu2 }
 0x44e   : > { %10391 = vmatpush.bf16.msrb.mxu3 %v17001_v62  ;;  %v21623_v62 = vadd.f32 %v10137_v55, %v10125_v4  ;;  %v16969_v1 = vor.u32 %v18766_v41, %v16968_v2  ;;  %v16552_v63 = vld [vmem:[%s19282_s20 + $0x2608] sm:$0xf]  ;;  %v18662_v9 = vld [vmem:[%s19282_s20 + $0x2614] sm:$0xf0]  ;;  %v16825_v43 = vor.u32 %v18730_v46, %v16824_v5  ;;  %v17504_v5 = vld [vmem:[%s19282_s20 + $0x1ec] sm:$0xf] }
 0x44f   : > { %10378 = vmatpush.bf16.msrb.mxu2 %v16873_v0  ;;  %v10100_v0 = vpop.f32.mrf.mxu0  ;;  %v16680_v31 = vld [vmem:[%s19282_s20 + $0x2708] sm:$0xf]  ;;  %v18694_v4 = vld [vmem:[%s19282_s20 + $0x2714] sm:$0xf0]  ;;  %v11930_v46 = vld [vmem:[%s19282_s20 + $0x1f8] sm:$0xf0] }
 0x450   : > { %10353 = vmatpush.bf16.msrb.mxu0 %v16601_v35  ;;  %v18698_v35 = vld [vmem:[%s19282_s20 + $0x2734] sm:$0xf0]  ;;  %v16808_v55 = vld [vmem:[%s19282_s20 + $0x2808] sm:$0xf]  ;;  %v12058_v23 = vld [vmem:[%s19282_s20 + $0x2f8] sm:$0xf0] }
 0x451   : > { %10366 = vmatpush.bf16.msrb.mxu1 %v16729_v22  ;;  %v16952_v22 = vld [vmem:[%s19282_s20 + $0x2928] sm:$0xf]  ;;  %v18726_v41 = vld [vmem:[%s19282_s20 + $0x2814] sm:$0xf0] }
 0x452   : > { %10392 = vmatpush.bf16.msrb.mxu3 %v16985_v45  ;;  %v16697_v45 = vor.u32 %v18698_v35, %v16696_v36  ;;  %v16936_v0 = vld [vmem:[%s19282_s20 + $0x2908] sm:$0xf]  ;;  %v18818_v44 = vld [vmem:[%s19282_s20 + $0x2af4] sm:$0xf0]  ;;  %v16553_v36 = vor.u32 %v18662_v9, %v16552_v63  ;;  %v11802_v35 = vld [vmem:[%s19282_s20 + $0xf8] sm:$0xf0]  ;;  %v11933_v9 = vor.u32 %v17504_v5, %v11930_v46 }
 0x453   : > { %10379 = vmatpush.bf16.msrb.mxu2 %v16857_v3  ;;  %v18762_v3 = vld [vmem:[%s19282_s20 + $0x2934] sm:$0xf0]  ;;  %v17176_v56 = vld [vmem:[%s19282_s20 + $0x2ae8] sm:$0xf]  ;;  %v17496_v5 = vld [vmem:[%s19282_s20 + $0x1ac] sm:$0xf] }
 0x454   : > { %10354 = vmatpush.bf16.msrb.mxu0 %v16585_v40  ;;  %v16953_v2 = vor.u32 %v18762_v3, %v16952_v22  ;;  %v18758_v40 = vld [vmem:[%s19282_s20 + $0x2914] sm:$0xf0]  ;;  %v16809_v22 = vor.u32 %v18726_v41, %v16808_v55  ;;  %v17536_v3 = vld [vmem:[%s19282_s20 + $0x2ec] sm:$0xf]  ;;  %v11898_v46 = vld [vmem:[%s19282_s20 + $0x1b8] sm:$0xf0] }
 0x455   : > { %10367 = vmatpush.bf16.msrb.mxu1 %v16713_v7  ;;  %v17472_v7 = vld [vmem:[%s19282_s20 + $0xec] sm:$0xf]  ;;  %v18814_v49 = vld [vmem:[%s19282_s20 + $0x2ad4] sm:$0xf0] }
 0x456   : > { %10393 = vmatpush.bf16.msrb.mxu3 %v16969_v1  ;;  %v16681_v1 = vor.u32 %v18694_v4, %v16680_v31  ;;  %v11805_v63 = vor.u32 %v17472_v7, %v11802_v35  ;;  %v17500_v31 = vld [vmem:[%s19282_s20 + $0x1cc] sm:$0xf]  ;;  %v11914_v4 = vld [vmem:[%s19282_s20 + $0x1d8] sm:$0xf0]  ;;  %v17161_v41 = vor.u32 %v18814_v49, %v17160_v57 }
 0x457   : > { %10380 = vmatpush.bf16.msrb.mxu2 %v16841_v48  ;;  %v10139_v48 = vpop.f32.mrf.mxu3  ;;  %v17532_v55 = vld [vmem:[%s19282_s20 + $0x2cc] sm:$0xf]  ;;  %v11770_v35 = vld [vmem:[%s19282_s20 + $0xb8] sm:$0xf0] }
 0x458   : > { %10355 = vmatpush.bf16.msrb.mxu0 %v16569_v11  ;;  %v16937_v11 = vor.u32 %v18758_v40, %v16936_v0  ;;  %v17177_v48 = vor.u32 %v18818_v44, %v17176_v56  ;;  %v11917_v40 = vor.u32 %v17500_v31, %v11914_v4  ;;  %v17144_v56 = vld [vmem:[%s19282_s20 + $0x2aa8] sm:$0xf]  ;;  %v18810_v44 = vld [vmem:[%s19282_s20 + $0x2ab4] sm:$0xf0]  ;;  %v17464_v7 = vld [vmem:[%s19282_s20 + $0xac] sm:$0xf] }
 0x459   : > { %10368 = vmatpush.bf16.msrb.mxu1 %v16697_v45  ;;  %v12061_v45 = vor.u32 %v17536_v3, %v12058_v23  ;;  %v18963_v49 = vld [vmem:[#allocation1] sm:$0xff]  ;;  %v11773_v3 = vor.u32 %v17464_v7, %v11770_v35  ;;  %v11901_v23 = vor.u32 %v17496_v5, %v11898_v46  ;;  %v11882_v31 = vld [vmem:[%s19282_s20 + $0x198] sm:$0xf0]  ;;  %v17112_v7 = vld [vmem:[%s19282_s20 + $0x2a68] sm:$0xf] }
 0x45a   : > { %10394 = vmatpush.bf16.msrb.mxu3 %v16953_v2  ;;  %v12042_v2 = vld [vmem:[%s19282_s20 + $0x2d8] sm:$0xf0]  ;;  %v17528_v57 = vld [vmem:[%s19282_s20 + $0x2ac] sm:$0xf] }
 0x45b   : > { %10381 = vmatpush.bf16.msrb.mxu2 %v16825_v43  ;;  %v11786_v43 = vld [vmem:[%s19282_s20 + $0xd8] sm:$0xf0]  ;;  %v17456_v35 = vld [vmem:[%s19282_s20 + $0x6c] sm:$0xf] }
 0x45c   : > { %10356 = vmatpush.bf16.msrb.mxu0 %v16553_v36  ;;  %v11789_v0 = vor.u32 %v17468_v39, %v11786_v43  ;;  %v12045_v36 = vor.u32 %v17532_v55, %v12042_v2  ;;  %v12026_v39 = vld [vmem:[%s19282_s20 + $0x2b8] sm:$0xf0]  ;;  %v17492_v43 = vld [vmem:[%s19282_s20 + $0x18c] sm:$0xf]  ;;  %v10150_v4 = vpop.f32.mrf.mxu0 }
 0x45d   : > { %10369 = vmatpush.bf16.msrb.mxu1 %v16681_v1  ;;  %v18964_v1 = vld [vmem:[#allocation1 + $0x9] sm:$0xff]  ;;  %v17524_v55 = vld [vmem:[%s19282_s20 + $0x28c] sm:$0xf] }
 0x45e   : > { %10395 = vmatpush.bf16.msrb.mxu3 %v16937_v11  ;;  %v17128_v11 = vld [vmem:[%s19282_s20 + $0x2a88] sm:$0xf]  ;;  %v12010_v2 = vld [vmem:[%s19282_s20 + $0x298] sm:$0xf0] }
 0x45f   : > { %10382 = vmatpush.bf16.msrb.mxu2 %v16809_v22  ;;  %10357 = vmatmul.bf16.vlgmr.msrb.gmra.mxu0 %v20077_v53  ;;  %v17145_v22 = vor.u32 %v18810_v44, %v17144_v56  ;;  %v11885_v44 = vor.u32 %v17492_v43, %v11882_v31  ;;  %v12013_v5 = vor.u32 %v17524_v55, %v12010_v2  ;;  %v11722_v43 = vld [vmem:[%s19282_s20 + $0x58] sm:$0xf0]  ;;  %v17484_v31 = vld [vmem:[%s19282_s20 + $0x14c] sm:$0xf] }
 0x460   : > { %10401 = vmatpush.bf16.msra.mxu0 %v17177_v48  ;;  %10370 = vmatmul.bf16.vlgmr.msrb.gmra.mxu1 %v20081_v54  ;;  %v18806_v48 = vld [vmem:[%s19282_s20 + $0x2a94] sm:$0xf0] }
 0x461   : > { %10414 = vmatpush.bf16.msra.mxu1 %v11805_v63  ;;  %10396 = vmatmul.bf16.vlgmr.msrb.gmra.mxu3 %v18964_v1  ;;  %v17460_v63 = vld [vmem:[%s19282_s20 + $0x8c] sm:$0xf]  ;;  %v11994_v1 = vld [vmem:[%s19282_s20 + $0x278] sm:$0xf0] }
 0x462   : > { %10440 = vmatpush.bf16.msra.mxu3 %v12061_v45  ;;  %10383 = vmatmul.bf16.vlgmr.msrb.gmra.mxu2 %v18963_v49  ;;  %v11754_v45 = vld [vmem:[%s19282_s20 + $0x98] sm:$0xf0] }
 0x463   : > { %10427 = vmatpush.bf16.msra.mxu2 %v11933_v9  ;;  %v12029_v9 = vor.u32 %v17528_v57, %v12026_v39  ;;  %v11757_v56 = vor.u32 %v17460_v63, %v11754_v45  ;;  %v11738_v49 = vld [vmem:[%s19282_s20 + $0x78] sm:$0xf0]  ;;  %v17488_v57 = vld [vmem:[%s19282_s20 + $0x16c] sm:$0xf] }
 0x464   : > { %10402 = vmatpush.bf16.msra.mxu0 %v17161_v41  ;;  %v10151_v41 = vadd.f32 %v10150_v4, %v21623_v62  ;;  %v11866_v62 = vld [vmem:[%s19282_s20 + $0x178] sm:$0xf0]  ;;  %v17520_v39 = vld [vmem:[%s19282_s20 + $0x26c] sm:$0xf]  ;;  %v10189_v2 = vpop.f32.mrf.mxu3 }
 0x465   : > { %10415 = vmatpush.bf16.msra.mxu1 %v11789_v0  ;;  %v17129_v0 = vor.u32 %v18806_v48, %v17128_v11  ;;  %v17096_v11 = vld [vmem:[%s19282_s20 + $0x2a48] sm:$0xf]  ;;  %v18798_v48 = vld [vmem:[%s19282_s20 + $0x2a54] sm:$0xf0]  ;;  %v17452_v63 = vld [vmem:[%s19282_s20 + $0x4c] sm:$0xf]  ;;  %v10176_v45 = vpop.f32.mrf.mxu2 }
 0x466   : > { %10441 = vmatpush.bf16.msra.mxu3 %v12045_v36  ;;  %v18802_v36 = vld [vmem:[%s19282_s20 + $0x2a74] sm:$0xf0]  ;;  %v11850_v4 = vld [vmem:[%s19282_s20 + $0x158] sm:$0xf0] }
 0x467   : > { %10428 = vmatpush.bf16.msra.mxu2 %v11917_v40  ;;  %v10163_v40 = vpop.f32.mrf.mxu1 }
 0x468   : > { %10403 = vmatpush.bf16.msra.mxu0 %v17145_v22  ;;  %v10164_v46 = vadd.f32 %v10163_v40, %v10151_v41  ;;  %v17113_v22 = vor.u32 %v18802_v36, %v17112_v7  ;;  %v17516_v41 = vld [vmem:[%s19282_s20 + $0x24c] sm:$0xf]  ;;  %v10152_v40 = vpop.f32.mrf.mxu0  ;;  %v11725_v36 = vor.u32 %v17452_v63, %v11722_v43  ;;  %v11690_v43 = vld [vmem:[%s19282_s20 + $0x18] sm:$0xf0] }
 0x469   : > { %10416 = vmatpush.bf16.msra.mxu1 %v11773_v3  ;;  %v11741_v3 = vor.u32 %v17456_v35, %v11738_v49  ;;  %v11853_v35 = vor.u32 %v17484_v31, %v11850_v4  ;;  %v17448_v49 = vld [vmem:[%s19282_s20 + $0x2c] sm:$0xf] }
 0x46a   : > { %10442 = vmatpush.bf16.msra.mxu3 %v12029_v9  ;;  %v11997_v9 = vor.u32 %v17520_v39, %v11994_v1  ;;  %v10177_v55 = vadd.f32 %v10176_v45, %v10164_v46  ;;  %v18794_v46 = vld [vmem:[%s19282_s20 + $0x2a34] sm:$0xf0]  ;;  %v17480_v39 = vld [vmem:[%s19282_s20 + $0x12c] sm:$0xf]  ;;  %v11834_v1 = vld [vmem:[%s19282_s20 + $0x138] sm:$0xf0] }
 0x46b   : > { %10429 = vmatpush.bf16.msra.mxu2 %v11901_v23  ;;  %v11869_v23 = vor.u32 %v17488_v57, %v11866_v62  ;;  %v11706_v62 = vld [vmem:[%s19282_s20 + $0x38] sm:$0xf0]  ;;  %v17444_v45 = vld [vmem:[%s19282_s20 + $0xc] sm:$0xf] }
 0x46c   : > { %10404 = vmatpush.bf16.msra.mxu0 %v17129_v0  ;;  %v11978_v0 = vld [vmem:[%s19282_s20 + $0x258] sm:$0xf0]  ;;  %v21692_v7 = vadd.f32 %v10189_v2, %v10177_v55  ;;  %v11709_v63 = vor.u32 %v17448_v49, %v11706_v62  ;;  %v17476_v31 = vld [vmem:[%s19282_s20 + $0x10c] sm:$0xf] }
 0x46d   : > { %10417 = vmatpush.bf16.msra.mxu1 %v11757_v56  ;;  %v17097_v56 = vor.u32 %v18798_v48, %v17096_v11  ;;  %v11981_v57 = vor.u32 %v17516_v41, %v11978_v0  ;;  %v17064_v11 = vld [vmem:[%s19282_s20 + $0x2a08] sm:$0xf]  ;;  %v18790_v48 = vld [vmem:[%s19282_s20 + $0x2a14] sm:$0xf0]  ;;  %v11818_v55 = vld [vmem:[%s19282_s20 + $0x118] sm:$0xf0]  ;;  %v10178_v0 = vpop.f32.mrf.mxu2 }
 0x46e   : > { %10443 = vmatpush.bf16.msra.mxu3 %v12013_v5  ;;  %v17080_v5 = vld [vmem:[%s19282_s20 + $0x2a28] sm:$0xf]  ;;  %v17508_v2 = vld [vmem:[%s19282_s20 + $0x20c] sm:$0xf]  ;;  %v11946_v41 = vld [vmem:[%s19282_s20 + $0x218] sm:$0xf0]  ;;  %v11821_v62 = vor.u32 %v17476_v31, %v11818_v55 }
 0x46f   : > { %10430 = vmatpush.bf16.msra.mxu2 %v11885_v44  ;;  %v10165_v44 = vpop.f32.mrf.mxu1  ;;  %v17568_v40 = vld [vmem:[%s19282_s20 + $0x3ec] sm:$0xf]  ;;  %v12442_v49 = vld [vmem:[%s19282_s20 + $0x5f8] sm:$0xf0] }
 0x470   : > { %10405 = vmatpush.bf16.msra.mxu0 %v17113_v22  ;;  %v17512_v22 = vld [vmem:[%s19282_s20 + $0x22c] sm:$0xf]  ;;  %v12170_v0 = vld [vmem:[%s19282_s20 + $0x3d8] sm:$0xf0] }
 0x471   : > { %10418 = vmatpush.bf16.msra.mxu1 %v11741_v3  ;;  %v11962_v3 = vld [vmem:[%s19282_s20 + $0x238] sm:$0xf0]  ;;  %v17600_v44 = vld [vmem:[%s19282_s20 + $0x4ec] sm:$0xf] }
 0x472   : > { %10444 = vmatpush.bf16.msra.mxu3 %v11997_v9  ;;  %v11837_v9 = vor.u32 %v17480_v39, %v11834_v1  ;;  %v11965_v4 = vor.u32 %v17512_v22, %v11962_v3  ;;  %v17664_v39 = vld [vmem:[%s19282_s20 + $0x6ec] sm:$0xf]  ;;  %v12570_v1 = vld [vmem:[%s19282_s20 + $0x6f8] sm:$0xf0]  ;;  %v11949_v22 = vor.u32 %v17508_v2, %v11946_v41 }
 0x473   : > { %10431 = vmatpush.bf16.msra.mxu2 %v11869_v23  ;;  %v17081_v23 = vor.u32 %v18794_v46, %v17080_v5  ;;  %v12314_v5 = vld [vmem:[%s19282_s20 + $0x4f8] sm:$0xf0]  ;;  %v17632_v46 = vld [vmem:[%s19282_s20 + $0x5ec] sm:$0xf] }
 0x474   : > { %10406 = vmatpush.bf16.msra.mxu0 %v17097_v56  ;;  %v12186_v56 = vld [vmem:[%s19282_s20 + $0x3f8] sm:$0xf0]  ;;  %v17660_v31 = vld [vmem:[%s19282_s20 + $0x6cc] sm:$0xf] }
 0x475   : > { %10419 = vmatpush.bf16.msra.mxu1 %v11725_v36  ;;  %v10191_v36 = vpop.f32.mrf.mxu3  ;;  %v12189_v3 = vor.u32 %v17568_v40, %v12186_v56  ;;  %v17560_v40 = vld [vmem:[%s19282_s20 + $0x3ac] sm:$0xf]  ;;  %v12154_v56 = vld [vmem:[%s19282_s20 + $0x3b8] sm:$0xf0] }
 0x476   : > { %10445 = vmatpush.bf16.msra.mxu3 %v11981_v57  ;;  %v11693_v57 = vor.u32 %v17444_v45, %v11690_v43  ;;  %v17596_v36 = vld [vmem:[%s19282_s20 + $0x4cc] sm:$0xf]  ;;  %v12426_v43 = vld [vmem:[%s19282_s20 + $0x5d8] sm:$0xf0] }
 0x477   : > { %10432 = vmatpush.bf16.msra.mxu2 %v11853_v35  ;;  %v17065_v35 = vor.u32 %v18790_v48, %v17064_v11  ;;  %v12445_v11 = vor.u32 %v17632_v46, %v12442_v49  ;;  %v17564_v48 = vld [vmem:[%s19282_s20 + $0x3cc] sm:$0xf]  ;;  %v12282_v46 = vld [vmem:[%s19282_s20 + $0x4b8] sm:$0xf0] }
 0x478   : > { %10407 = vmatpush.bf16.msra.mxu0 %v17081_v23  ;;  %v12317_v23 = vor.u32 %v17600_v44, %v12314_v5  ;;  %v17628_v45 = vld [vmem:[%s19282_s20 + $0x5cc] sm:$0xf]  ;;  %v12173_v55 = vor.u32 %v17564_v48, %v12170_v0 }
 0x479   : > { %10420 = vmatpush.bf16.msra.mxu1 %v11709_v63  ;;  %v12573_v63 = vor.u32 %v17664_v39, %v12570_v1  ;;  %v12429_v41 = vor.u32 %v17628_v45, %v12426_v43  ;;  %v17592_v44 = vld [vmem:[%s19282_s20 + $0x4ac] sm:$0xf]  ;;  %v12538_v39 = vld [vmem:[%s19282_s20 + $0x6b8] sm:$0xf0]  ;;  %v12157_v1 = vor.u32 %v17560_v40, %v12154_v56 }
 0x47a   : > { %10446 = vmatpush.bf16.msra.mxu3 %v11965_v4  ;;  %v12554_v4 = vld [vmem:[%s19282_s20 + $0x6d8] sm:$0xf0]  ;;  %v17624_v49 = vld [vmem:[%s19282_s20 + $0x5ac] sm:$0xf] }
 0x47b   : > { %10433 = vmatpush.bf16.msra.mxu2 %v11837_v9  ;;  %v12298_v9 = vld [vmem:[%s19282_s20 + $0x4d8] sm:$0xf0]  ;;  %v12557_v5 = vor.u32 %v17660_v31, %v12554_v4  ;;  %v17588_v48 = vld [vmem:[%s19282_s20 + $0x48c] sm:$0xf] }
 0x47c   : > { %10408 = vmatpush.bf16.msra.mxu0 %v17065_v35  ;;  %v12301_v2 = vor.u32 %v17596_v36, %v12298_v9  ;;  %v18965_v35 = vld [vmem:[#allocation1 + $0x12] sm:$0xff]  ;;  %v12394_v36 = vld [vmem:[%s19282_s20 + $0x598] sm:$0xf0]  ;;  %v17652_v9 = vld [vmem:[%s19282_s20 + $0x68c] sm:$0xf] }
 0x47d   : > { %10421 = vmatpush.bf16.msra.mxu1 %v11693_v57  ;;  %v12410_v57 = vld [vmem:[%s19282_s20 + $0x5b8] sm:$0xf0]  ;;  %v10215_v31 = vpop.f32.mrf.mxu1  ;;  %v17584_v40 = vld [vmem:[%s19282_s20 + $0x46c] sm:$0xf] }
 0x47e   : > { %10447 = vmatpush.bf16.msra.mxu3 %v11949_v22  ;;  %v12285_v22 = vor.u32 %v17592_v44, %v12282_v46  ;;  %v12522_v45 = vld [vmem:[%s19282_s20 + $0x698] sm:$0xf0]  ;;  %v17648_v46 = vld [vmem:[%s19282_s20 + $0x66c] sm:$0xf] }
 0x47f   : > { %10434 = vmatpush.bf16.msra.mxu2 %v11821_v62  ;;  %10409 = vmatmul.bf16.vlgmr.msra.gmra.mxu0 %v18965_v35  ;;  %v17656_v62 = vld [vmem:[%s19282_s20 + $0x6ac] sm:$0xf]  ;;  %v12525_v56 = vor.u32 %v17652_v9, %v12522_v45  ;;  %v12250_v35 = vld [vmem:[%s19282_s20 + $0x478] sm:$0xf0] }
 0x480   : > { %10453 = vmatpush.bf16.msrb.mxu0 %v12189_v3  ;;  %10422 = vmatmul.bf16.vlgmr.msra.gmra.mxu1 %v19407_v33  ;;  %v12413_v3 = vor.u32 %v17624_v49, %v12410_v57  ;;  %v12541_v0 = vor.u32 %v17656_v62, %v12538_v39  ;;  %v12506_v49 = vld [vmem:[%s19282_s20 + $0x678] sm:$0xf0]  ;;  %v12253_v62 = vor.u32 %v17584_v40, %v12250_v35  ;;  %v17576_v40 = vld [vmem:[%s19282_s20 + $0x42c] sm:$0xf] }
 0x481   : > { %10466 = vmatpush.bf16.msrb.mxu1 %v12317_v23  ;;  %10448 = vmatmul.bf16.vlgmr.msra.gmra.mxu3 %v19405_v32  ;;  %v17556_v23 = vld [vmem:[%s19282_s20 + $0x38c] sm:$0xf]  ;;  %v12490_v9 = vld [vmem:[%s19282_s20 + $0x658] sm:$0xf0] }
 0x482   : > { %10492 = vmatpush.bf16.msrb.mxu3 %v12573_v63  ;;  %10435 = vmatmul.bf16.vlgmr.msra.gmra.mxu2 %v19414_v38  ;;  %v12266_v38 = vld [vmem:[%s19282_s20 + $0x498] sm:$0xf0]  ;;  %v17620_v32 = vld [vmem:[%s19282_s20 + $0x58c] sm:$0xf]  ;;  %v10202_v63 = vpop.f32.mrf.mxu0 }
 0x483   : > { %10479 = vmatpush.bf16.msrb.mxu2 %v12445_v11  ;;  %v12138_v11 = vld [vmem:[%s19282_s20 + $0x398] sm:$0xf0]  ;;  %v10203_v33 = vadd.f32 %v10202_v63, %v21692_v7  ;;  %v12269_v4 = vor.u32 %v17588_v48, %v12266_v38  ;;  %v17644_v63 = vld [vmem:[%s19282_s20 + $0x64c] sm:$0xf] }
 0x484   : > { %10454 = vmatpush.bf16.msrb.mxu0 %v12173_v55  ;;  %v12141_v43 = vor.u32 %v17556_v23, %v12138_v11  ;;  %v12397_v55 = vor.u32 %v17620_v32, %v12394_v36  ;;  %v12378_v7 = vld [vmem:[%s19282_s20 + $0x578] sm:$0xf0]  ;;  %v12509_v23 = vor.u32 %v17648_v46, %v12506_v49  ;;  %v10241_v36 = vpop.f32.mrf.mxu3  ;;  %v17608_v35 = vld [vmem:[%s19282_s20 + $0x52c] sm:$0xf] }
 0x485   : > { %10467 = vmatpush.bf16.msrb.mxu1 %v12301_v2  ;;  %v17552_v2 = vld [vmem:[%s19282_s20 + $0x36c] sm:$0xf]  ;;  %v10216_v44 = vadd.f32 %v10215_v31, %v10203_v33  ;;  %v10228_v11 = vpop.f32.mrf.mxu2  ;;  %v12234_v48 = vld [vmem:[%s19282_s20 + $0x458] sm:$0xf0] }
 0x486   : > { %10493 = vmatpush.bf16.msrb.mxu3 %v12557_v5  ;;  %v17616_v5 = vld [vmem:[%s19282_s20 + $0x56c] sm:$0xf]  ;;  %v12362_v38 = vld [vmem:[%s19282_s20 + $0x558] sm:$0xf0] }
 0x487   : > { %10480 = vmatpush.bf16.msrb.mxu2 %v12429_v41  ;;  %v12122_v41 = vld [vmem:[%s19282_s20 + $0x378] sm:$0xf0]  ;;  %v12381_v39 = vor.u32 %v17616_v5, %v12378_v7  ;;  %v10229_v32 = vadd.f32 %v10228_v11, %v10216_v44  ;;  %v17640_v7 = vld [vmem:[%s19282_s20 + $0x62c] sm:$0xf] }
 0x488   : > { %10455 = vmatpush.bf16.msrb.mxu0 %v12157_v1  ;;  %v12125_v57 = vor.u32 %v17552_v2, %v12122_v41  ;;  %v17548_v1 = vld [vmem:[%s19282_s20 + $0x34c] sm:$0xf]  ;;  %v12090_v41 = vld [vmem:[%s19282_s20 + $0x338] sm:$0xf0] }
 0x489   : > { %10468 = vmatpush.bf16.msrb.mxu1 %v12285_v22  ;;  %v12106_v22 = vld [vmem:[%s19282_s20 + $0x358] sm:$0xf0]  ;;  %v21762_v31 = vadd.f32 %v10241_v36, %v10229_v32  ;;  %v17544_v2 = vld [vmem:[%s19282_s20 + $0x32c] sm:$0xf] }
 0x48a   : > { %10494 = vmatpush.bf16.msrb.mxu3 %v12541_v0  ;;  %v17612_v0 = vld [vmem:[%s19282_s20 + $0x54c] sm:$0xf]  ;;  %v10204_v45 = vpop.f32.mrf.mxu0  ;;  %v12109_v33 = vor.u32 %v17548_v1, %v12106_v22  ;;  %v12218_v44 = vld [vmem:[%s19282_s20 + $0x438] sm:$0xf0]  ;;  %v12093_v49 = vor.u32 %v17544_v2, %v12090_v41 }
 0x48b   : > { %10481 = vmatpush.bf16.msrb.mxu2 %v12413_v3  ;;  %v17580_v3 = vld [vmem:[%s19282_s20 + $0x44c] sm:$0xf]  ;;  %v12346_v5 = vld [vmem:[%s19282_s20 + $0x538] sm:$0xf0] }
 0x48c   : > { %10456 = vmatpush.bf16.msrb.mxu0 %v12141_v43  ;;  %v10217_v43 = vpop.f32.mrf.mxu1  ;;  %v12474_v46 = vld [vmem:[%s19282_s20 + $0x638] sm:$0xf0]  ;;  %v12349_v1 = vor.u32 %v17608_v35, %v12346_v5  ;;  %v17572_v22 = vld [vmem:[%s19282_s20 + $0x40c] sm:$0xf]  ;;  %v10243_v45 = vpop.f32.mrf.mxu3 }
 0x48d   : > { %10469 = vmatpush.bf16.msrb.mxu1 %v12269_v4  ;;  %v12237_v4 = vor.u32 %v17580_v3, %v12234_v48  ;;  %v12202_v3 = vld [vmem:[%s19282_s20 + $0x418] sm:$0xf0]  ;;  %v12477_v11 = vor.u32 %v17640_v7, %v12474_v46  ;;  %v10230_v32 = vpop.f32.mrf.mxu2  ;;  %v17696_v36 = vld [vmem:[%s19282_s20 + $0x7ec] sm:$0xf] }
 0x48e   : > { %10495 = vmatpush.bf16.msrb.mxu3 %v12525_v56  ;;  %v12493_v56 = vor.u32 %v17644_v63, %v12490_v9  ;;  %v12330_v48 = vld [vmem:[%s19282_s20 + $0x518] sm:$0xf0]  ;;  %v17728_v9 = vld [vmem:[%s19282_s20 + $0x8ec] sm:$0xf]  ;;  %v12205_v2 = vor.u32 %v17572_v22, %v12202_v3 }
 0x48f   : > { %10482 = vmatpush.bf16.msrb.mxu2 %v12397_v55  ;;  %v12365_v55 = vor.u32 %v17612_v0, %v12362_v38  ;;  %v17636_v0 = vld [vmem:[%s19282_s20 + $0x60c] sm:$0xf]  ;;  %v12458_v38 = vld [vmem:[%s19282_s20 + $0x618] sm:$0xf0] }
 0x490   : > { %10457 = vmatpush.bf16.msrb.mxu0 %v12125_v57  ;;  %v17540_v57 = vld [vmem:[%s19282_s20 + $0x30c] sm:$0xf]  ;;  %v12698_v63 = vld [vmem:[%s19282_s20 + $0x7f8] sm:$0xf0] }
 0x491   : > { %10470 = vmatpush.bf16.msrb.mxu1 %v12253_v62  ;;  %v12074_v62 = vld [vmem:[%s19282_s20 + $0x318] sm:$0xf0]  ;;  %v12701_v35 = vor.u32 %v17696_v36, %v12698_v63  ;;  %v17692_v46 = vld [vmem:[%s19282_s20 + $0x7cc] sm:$0xf] }
 0x492   : > { %10496 = vmatpush.bf16.msrb.mxu3 %v12509_v23  ;;  %v17604_v23 = vld [vmem:[%s19282_s20 + $0x50c] sm:$0xf]  ;;  %v12826_v43 = vld [vmem:[%s19282_s20 + $0x8f8] sm:$0xf0] }
 0x493   : > { %10483 = vmatpush.bf16.msrb.mxu2 %v12381_v39  ;;  %v12221_v39 = vor.u32 %v17576_v40, %v12218_v44  ;;  %v12333_v41 = vor.u32 %v17604_v23, %v12330_v48  ;;  %v17792_v40 = vld [vmem:[%s19282_s20 + $0xaec] sm:$0xf]  ;;  %v12461_v44 = vor.u32 %v17636_v0, %v12458_v38  ;;  %v12829_v5 = vor.u32 %v17728_v9, %v12826_v43  ;;  %v12938_v22 = vld [vmem:[%s19282_s20 + $0x9d8] sm:$0xf0] }
 0x494   : > { %10458 = vmatpush.bf16.msrb.mxu0 %v12109_v33  ;;  %v12077_v33 = vor.u32 %v17540_v57, %v12074_v62  ;;  %v17724_v57 = vld [vmem:[%s19282_s20 + $0x8cc] sm:$0xf]  ;;  %v13066_v23 = vld [vmem:[%s19282_s20 + $0xad8] sm:$0xf0] }
 0x495   : > { %10471 = vmatpush.bf16.msrb.mxu1 %v12237_v4  ;;  %v17760_v4 = vld [vmem:[%s19282_s20 + $0x9ec] sm:$0xf]  ;;  %v12666_v32 = vld [vmem:[%s19282_s20 + $0x7b8] sm:$0xf0] }
 0x496   : > { %10497 = vmatpush.bf16.msrb.mxu3 %v12493_v56  ;;  %v13082_v56 = vld [vmem:[%s19282_s20 + $0xaf8] sm:$0xf0]  ;;  %v17788_v3 = vld [vmem:[%s19282_s20 + $0xacc] sm:$0xf] }
 0x497   : > { %10484 = vmatpush.bf16.msrb.mxu2 %v12365_v55  ;;  %v12954_v55 = vld [vmem:[%s19282_s20 + $0x9f8] sm:$0xf0]  ;;  %v13085_v62 = vor.u32 %v17792_v40, %v13082_v56  ;;  %v17688_v38 = vld [vmem:[%s19282_s20 + $0x7ac] sm:$0xf]  ;;  %v13069_v63 = vor.u32 %v17788_v3, %v13066_v23 }
 0x498   : > { %10459 = vmatpush.bf16.msrb.mxu0 %v12093_v49  ;;  %v12957_v7 = vor.u32 %v17760_v4, %v12954_v55  ;;  %v12682_v49 = vld [vmem:[%s19282_s20 + $0x7d8] sm:$0xf0]  ;;  %v17720_v36 = vld [vmem:[%s19282_s20 + $0x8ac] sm:$0xf]  ;;  %v12669_v55 = vor.u32 %v17688_v38, %v12666_v32 }
 0x499   : > { %10472 = vmatpush.bf16.msrb.mxu1 %v12221_v39  ;;  %v12810_v39 = vld [vmem:[%s19282_s20 + $0x8d8] sm:$0xf0]  ;;  %v17752_v45 = vld [vmem:[%s19282_s20 + $0x9ac] sm:$0xf] }
 0x49a   : > { %10498 = vmatpush.bf16.msrb.mxu3 %v12477_v11  ;;  %v12685_v11 = vor.u32 %v17692_v46, %v12682_v49  ;;  %v12813_v48 = vor.u32 %v17724_v57, %v12810_v39  ;;  %v12794_v9 = vld [vmem:[%s19282_s20 + $0x8b8] sm:$0xf0]  ;;  %v17784_v43 = vld [vmem:[%s19282_s20 + $0xaac] sm:$0xf] }
 0x49b   : > { %10485 = vmatpush.bf16.msrb.mxu2 %v12349_v1  ;;  %v17756_v1 = vld [vmem:[%s19282_s20 + $0x9cc] sm:$0xf]  ;;  %v13050_v4 = vld [vmem:[%s19282_s20 + $0xab8] sm:$0xf0] }
 0x49c   : > { %10460 = vmatpush.bf16.msrb.mxu0 %v12077_v33  ;;  %v12941_v0 = vor.u32 %v17756_v1, %v12938_v22  ;;  %v12922_v33 = vld [vmem:[%s19282_s20 + $0x9b8] sm:$0xf0]  ;;  %v17680_v1 = vld [vmem:[%s19282_s20 + $0x76c] sm:$0xf] }
 0x49d   : > { %10473 = vmatpush.bf16.msrb.mxu1 %v12205_v2  ;;  %v12925_v2 = vor.u32 %v17752_v45, %v12922_v33  ;;  %v12650_v40 = vld [vmem:[%s19282_s20 + $0x798] sm:$0xf0]  ;;  %v10267_v57 = vpop.f32.mrf.mxu1  ;;  %v17712_v3 = vld [vmem:[%s19282_s20 + $0x86c] sm:$0xf] }
 0x49e   : > { %10499 = vmatpush.bf16.msrb.mxu3 %v12461_v44  ;;  %v12778_v56 = vld [vmem:[%s19282_s20 + $0x898] sm:$0xf0]  ;;  %v17748_v44 = vld [vmem:[%s19282_s20 + $0x98c] sm:$0xf] }
 0x49f   : > { %10486 = vmatpush.bf16.msrb.mxu2 %v12333_v41  ;;  %10461 = vmatmul.bf16.vlgmr.msrb.gmra.mxu0 %v19409_v34  ;;  %v17684_v41 = vld [vmem:[%s19282_s20 + $0x78c] sm:$0xf]  ;;  %v13034_v46 = vld [vmem:[%s19282_s20 + $0xa98] sm:$0xf0] }
 0x4a0   : > { %10505 = vmatpush.bf16.msra.mxu0 %v12701_v35  ;;  %10474 = vmatmul.bf16.vlgmr.msrb.gmra.mxu1 %v19446_v12  ;;  %v17716_v34 = vld [vmem:[%s19282_s20 + $0x88c] sm:$0xf]  ;;  %v12906_v35 = vld [vmem:[%s19282_s20 + $0x998] sm:$0xf0]  ;;  %v12653_v49 = vor.u32 %v17684_v41, %v12650_v40 }
 0x4a1   : > { %10518 = vmatpush.bf16.msra.mxu1 %v12829_v5  ;;  %10500 = vmatmul.bf16.vlgmr.msrb.gmra.mxu3 %v19443_v8  ;;  %v13053_v8 = vor.u32 %v17784_v43, %v13050_v4  ;;  %v10254_v5 = vpop.f32.mrf.mxu0  ;;  %v12909_v39 = vor.u32 %v17748_v44, %v12906_v35  ;;  %v12634_v22 = vld [vmem:[%s19282_s20 + $0x778] sm:$0xf0]  ;;  %v17776_v38 = vld [vmem:[%s19282_s20 + $0xa6c] sm:$0xf] }
 0x4a2   : > { %10544 = vmatpush.bf16.msra.mxu3 %v13085_v62  ;;  %10487 = vmatmul.bf16.vlgmr.msrb.gmra.mxu2 %v19450_v14  ;;  %v12797_v14 = vor.u32 %v17720_v36, %v12794_v9  ;;  %v10255_v12 = vadd.f32 %v10254_v5, %v21762_v31  ;;  %v12781_v62 = vor.u32 %v17716_v34, %v12778_v56  ;;  %v12890_v31 = vld [vmem:[%s19282_s20 + $0x978] sm:$0xf0]  ;;  %v17676_v45 = vld [vmem:[%s19282_s20 + $0x74c] sm:$0xf] }
 0x4a3   : > { %10531 = vmatpush.bf16.msra.mxu2 %v12957_v7  ;;  %v17780_v7 = vld [vmem:[%s19282_s20 + $0xa8c] sm:$0xf]  ;;  %v13018_v32 = vld [vmem:[%s19282_s20 + $0xa78] sm:$0xf0]  ;;  %v12637_v36 = vor.u32 %v17680_v1, %v12634_v22 }
 0x4a4   : > { %10506 = vmatpush.bf16.msra.mxu0 %v12685_v11  ;;  %v13037_v23 = vor.u32 %v17780_v7, %v13034_v46  ;;  %v10268_v11 = vadd.f32 %v10267_v57, %v10255_v12  ;;  %v12618_v33 = vld [vmem:[%s19282_s20 + $0x758] sm:$0xf0]  ;;  %v17708_v43 = vld [vmem:[%s19282_s20 + $0x84c] sm:$0xf]  ;;  %v13021_v4 = vor.u32 %v17776_v38, %v13018_v32  ;;  %v10293_v34 = vpop.f32.mrf.mxu3 }
 0x4a5   : > { %10519 = vmatpush.bf16.msra.mxu1 %v12813_v48  ;;  %v12762_v48 = vld [vmem:[%s19282_s20 + $0x878] sm:$0xf0]  ;;  %v12621_v35 = vor.u32 %v17676_v45, %v12618_v33  ;;  %v10269_v5 = vpop.f32.mrf.mxu1  ;;  %v17736_v22 = vld [vmem:[%s19282_s20 + $0x92c] sm:$0xf] }
 0x4a6   : > { %10545 = vmatpush.bf16.msra.mxu3 %v13069_v63  ;;  %v12765_v63 = vor.u32 %v17712_v3, %v12762_v48  ;;  %v12874_v41 = vld [vmem:[%s19282_s20 + $0x958] sm:$0xf0] }
 0x4a7   : > { %10532 = vmatpush.bf16.msra.mxu2 %v12941_v0  ;;  %v17744_v0 = vld [vmem:[%s19282_s20 + $0x96c] sm:$0xf]  ;;  %v13002_v56 = vld [vmem:[%s19282_s20 + $0xa58] sm:$0xf0] }
 0x4a8   : > { %10507 = vmatpush.bf16.msra.mxu0 %v12669_v55  ;;  %v12893_v9 = vor.u32 %v17744_v0, %v12890_v31  ;;  %v10280_v55 = vpop.f32.mrf.mxu2  ;;  %v12602_v57 = vld [vmem:[%s19282_s20 + $0x738] sm:$0xf0]  ;;  %v17668_v0 = vld [vmem:[%s19282_s20 + $0x70c] sm:$0xf] }
 0x4a9   : > { %10520 = vmatpush.bf16.msra.mxu1 %v12797_v14  ;;  %v12746_v14 = vld [vmem:[%s19282_s20 + $0x858] sm:$0xf0]  ;;  %v10281_v40 = vadd.f32 %v10280_v55, %v10268_v11  ;;  %v10256_v44 = vpop.f32.mrf.mxu0 }
 0x4aa   : > { %10546 = vmatpush.bf16.msra.mxu3 %v13053_v8  ;;  %v17772_v8 = vld [vmem:[%s19282_s20 + $0xa4c] sm:$0xf]  ;;  %v12749_v46 = vor.u32 %v17708_v43, %v12746_v14  ;;  %v12730_v1 = vld [vmem:[%s19282_s20 + $0x838] sm:$0xf0] }
 0x4ab   : > { %10533 = vmatpush.bf16.msra.mxu2 %v12925_v2  ;;  %v17740_v2 = vld [vmem:[%s19282_s20 + $0x94c] sm:$0xf]  ;;  %v21833_v7 = vadd.f32 %v10293_v34, %v10281_v40  ;;  %v12858_v3 = vld [vmem:[%s19282_s20 + $0x938] sm:$0xf0] }
 0x4ac   : > { %10508 = vmatpush.bf16.msra.mxu0 %v12653_v49  ;;  %v12877_v12 = vor.u32 %v17740_v2, %v12874_v41  ;;  %v17672_v49 = vld [vmem:[%s19282_s20 + $0x72c] sm:$0xf]  ;;  %v12986_v11 = vld [vmem:[%s19282_s20 + $0xa38] sm:$0xf0]  ;;  %v12861_v32 = vor.u32 %v17736_v22, %v12858_v3  ;;  %v10295_v40 = vpop.f32.mrf.mxu3 }
 0x4ad   : > { %10521 = vmatpush.bf16.msra.mxu1 %v12781_v62  ;;  %v17704_v62 = vld [vmem:[%s19282_s20 + $0x82c] sm:$0xf]  ;;  %v12605_v48 = vor.u32 %v17672_v49, %v12602_v57  ;;  %v12586_v31 = vld [vmem:[%s19282_s20 + $0x718] sm:$0xf0] }
 0x4ae   : > { %10547 = vmatpush.bf16.msra.mxu3 %v13037_v23  ;;  %v17768_v23 = vld [vmem:[%s19282_s20 + $0xa2c] sm:$0xf]  ;;  %v12733_v38 = vor.u32 %v17704_v62, %v12730_v1  ;;  %v12842_v33 = vld [vmem:[%s19282_s20 + $0x918] sm:$0xf0]  ;;  %v12589_v34 = vor.u32 %v17668_v0, %v12586_v31 }
 0x4af   : > { %10534 = vmatpush.bf16.msra.mxu2 %v12909_v39  ;;  %v13005_v39 = vor.u32 %v17772_v8, %v13002_v56  ;;  %v12989_v45 = vor.u32 %v17768_v23, %v12986_v11  ;;  %v17764_v43 = vld [vmem:[%s19282_s20 + $0xa0c] sm:$0xf]  ;;  %v13210_v2 = vld [vmem:[%s19282_s20 + $0xbf8] sm:$0xf0] }
 0x4b0   : > { %10509 = vmatpush.bf16.msra.mxu0 %v12637_v36  ;;  %v17700_v36 = vld [vmem:[%s19282_s20 + $0x80c] sm:$0xf]  ;;  %v10282_v55 = vpop.f32.mrf.mxu2  ;;  %v13338_v8 = vld [vmem:[%s19282_s20 + $0xcf8] sm:$0xf0] }
 0x4b1   : > { %10522 = vmatpush.bf16.msra.mxu1 %v12765_v63  ;;  %v12714_v63 = vld [vmem:[%s19282_s20 + $0x818] sm:$0xf0]  ;;  %v17824_v14 = vld [vmem:[%s19282_s20 + $0xbec] sm:$0xf] }
 0x4b2   : > { %10548 = vmatpush.bf16.msra.mxu3 %v13021_v4  ;;  %v12970_v4 = vld [vmem:[%s19282_s20 + $0xa18] sm:$0xf0]  ;;  %v17856_v41 = vld [vmem:[%s19282_s20 + $0xcec] sm:$0xf]  ;;  %v13213_v57 = vor.u32 %v17824_v14, %v13210_v2 }
 0x4b3   : > { %10535 = vmatpush.bf16.msra.mxu2 %v12893_v9  ;;  %v17732_v9 = vld [vmem:[%s19282_s20 + $0x90c] sm:$0xf]  ;;  %v13466_v44 = vld [vmem:[%s19282_s20 + $0xdf8] sm:$0xf0]  ;;  %v12973_v49 = vor.u32 %v17764_v43, %v12970_v4  ;;  %v13341_v62 = vor.u32 %v17856_v41, %v13338_v8 }
 0x4b4   : > { %10510 = vmatpush.bf16.msra.mxu0 %v12621_v35  ;;  %v17888_v56 = vld [vmem:[%s19282_s20 + $0xdec] sm:$0xf]  ;;  %v12717_v35 = vor.u32 %v17700_v36, %v12714_v63  ;;  %v12845_v5 = vor.u32 %v17732_v9, %v12842_v33  ;;  %v13194_v22 = vld [vmem:[%s19282_s20 + $0xbd8] sm:$0xf0] }
 0x4b5   : > { %10523 = vmatpush.bf16.msra.mxu1 %v12749_v46  ;;  %v17920_v46 = vld [vmem:[%s19282_s20 + $0xeec] sm:$0xf]  ;;  %v13322_v11 = vld [vmem:[%s19282_s20 + $0xcd8] sm:$0xf0] }
 0x4b6   : > { %10549 = vmatpush.bf16.msra.mxu3 %v13005_v39  ;;  %v13469_v39 = vor.u32 %v17888_v56, %v13466_v44  ;;  %v17820_v1 = vld [vmem:[%s19282_s20 + $0xbcc] sm:$0xf]  ;;  %v13450_v0 = vld [vmem:[%s19282_s20 + $0xdd8] sm:$0xf0] }
 0x4b7   : > { %10536 = vmatpush.bf16.msra.mxu2 %v12877_v12  ;;  %v13594_v12 = vld [vmem:[%s19282_s20 + $0xef8] sm:$0xf0]  ;;  %v17852_v3 = vld [vmem:[%s19282_s20 + $0xccc] sm:$0xf] }
 0x4b8   : > { %10511 = vmatpush.bf16.msra.mxu0 %v12605_v48  ;;  %v13597_v23 = vor.u32 %v17920_v46, %v13594_v12  ;;  %v17884_v48 = vld [vmem:[%s19282_s20 + $0xdcc] sm:$0xf]  ;;  %v13325_v36 = vor.u32 %v17852_v3, %v13322_v11  ;;  %v13306_v4 = vld [vmem:[%s19282_s20 + $0xcb8] sm:$0xf0] }
 0x4b9   : > { %10524 = vmatpush.bf16.msra.mxu1 %v12733_v38  ;;  %v17916_v31 = vld [vmem:[%s19282_s20 + $0xecc] sm:$0xf]  ;;  %v13578_v38 = vld [vmem:[%s19282_s20 + $0xed8] sm:$0xf0]  ;;  %v13453_v63 = vor.u32 %v17884_v48, %v13450_v0 }
 0x4ba   : > { %10550 = vmatpush.bf16.msra.mxu3 %v12989_v45  ;;  %v17816_v9 = vld [vmem:[%s19282_s20 + $0xbac] sm:$0xf]  ;;  %v13178_v45 = vld [vmem:[%s19282_s20 + $0xbb8] sm:$0xf0]  ;;  %v13581_v43 = vor.u32 %v17916_v31, %v13578_v38 }
 0x4bb   : > { %10537 = vmatpush.bf16.msra.mxu2 %v12861_v32  ;;  %v13197_v32 = vor.u32 %v17820_v1, %v13194_v22  ;;  %v17848_v33 = vld [vmem:[%s19282_s20 + $0xcac] sm:$0xf]  ;;  %v13434_v14 = vld [vmem:[%s19282_s20 + $0xdb8] sm:$0xf0] }
 0x4bc   : > { %10512 = vmatpush.bf16.msra.mxu0 %v12589_v34  ;;  %v17880_v55 = vld [vmem:[%s19282_s20 + $0xdac] sm:$0xf]  ;;  %v13562_v41 = vld [vmem:[%s19282_s20 + $0xeb8] sm:$0xf0]  ;;  %v13309_v40 = vor.u32 %v17848_v33, %v13306_v4 }
 0x4bd   : > { %10525 = vmatpush.bf16.msra.mxu1 %v12717_v35  ;;  %v17912_v2 = vld [vmem:[%s19282_s20 + $0xeac] sm:$0xf]  ;;  %v13437_v34 = vor.u32 %v17880_v55, %v13434_v14  ;;  %v13162_v56 = vld [vmem:[%s19282_s20 + $0xb98] sm:$0xf0] }
 0x4be   : > { %10551 = vmatpush.bf16.msra.mxu3 %v12973_v49  ;;  %v17812_v8 = vld [vmem:[%s19282_s20 + $0xb8c] sm:$0xf]  ;;  %v13290_v44 = vld [vmem:[%s19282_s20 + $0xc98] sm:$0xf0] }
 0x4bf   : > { %10538 = vmatpush.bf16.msra.mxu2 %v12845_v5  ;;  %10513 = vmatmul.bf16.vlgmr.msra.gmra.mxu0 %v19448_v13  ;;  %v13181_v13 = vor.u32 %v17816_v9, %v13178_v45  ;;  %v17876_v35 = vld [vmem:[%s19282_s20 + $0xd8c] sm:$0xf]  ;;  %v13418_v5 = vld [vmem:[%s19282_s20 + $0xd98] sm:$0xf0] }
 0x4c0   : > { %10557 = vmatpush.bf16.msrb.mxu0 %v13213_v57  ;;  %10526 = vmatmul.bf16.vlgmr.msra.gmra.mxu1 %v19536_v24  ;;  %v13565_v24 = vor.u32 %v17912_v2, %v13562_v41  ;;  %v17908_v46 = vld [vmem:[%s19282_s20 + $0xe8c] sm:$0xf]  ;;  %v13546_v12 = vld [vmem:[%s19282_s20 + $0xe98] sm:$0xf0]  ;;  %v13165_v57 = vor.u32 %v17812_v8, %v13162_v56  ;;  %v13421_v1 = vor.u32 %v17876_v35, %v13418_v5 }
 0x4c1   : > { %10570 = vmatpush.bf16.msrb.mxu1 %v13341_v62  ;;  %10552 = vmatmul.bf16.vlgmr.msra.gmra.mxu3 %v19540_v27  ;;  %v10306_v27 = vpop.f32.mrf.mxu0  ;;  %v10319_v62 = vpop.f32.mrf.mxu1  ;;  %v17808_v22 = vld [vmem:[%s19282_s20 + $0xb6c] sm:$0xf]  ;;  %v13146_v3 = vld [vmem:[%s19282_s20 + $0xb78] sm:$0xf0]  ;;  %v13549_v11 = vor.u32 %v17908_v46, %v13546_v12 }
 0x4c2   : > { %10596 = vmatpush.bf16.msrb.mxu3 %v13597_v23  ;;  %10539 = vmatmul.bf16.vlgmr.msra.gmra.mxu2 %v19542_v28  ;;  %v17844_v28 = vld [vmem:[%s19282_s20 + $0xc8c] sm:$0xf]  ;;  %v10307_v49 = vadd.f32 %v10306_v27, %v21833_v7  ;;  %v13274_v0 = vld [vmem:[%s19282_s20 + $0xc78] sm:$0xf0] }
 0x4c3   : > { %10583 = vmatpush.bf16.msrb.mxu2 %v13469_v39  ;;  %v13293_v39 = vor.u32 %v17844_v28, %v13290_v44  ;;  %v17840_v23 = vld [vmem:[%s19282_s20 + $0xc6c] sm:$0xf]  ;;  %v13402_v7 = vld [vmem:[%s19282_s20 + $0xd78] sm:$0xf0] }
 0x4c4   : > { %10558 = vmatpush.bf16.msrb.mxu0 %v13197_v32  ;;  %v10320_v48 = vadd.f32 %v10319_v62, %v10307_v49  ;;  %v17872_v31 = vld [vmem:[%s19282_s20 + $0xd6c] sm:$0xf]  ;;  %v13530_v32 = vld [vmem:[%s19282_s20 + $0xe78] sm:$0xf0] }
 0x4c5   : > { %10571 = vmatpush.bf16.msrb.mxu1 %v13325_v36  ;;  %v17904_v38 = vld [vmem:[%s19282_s20 + $0xe6c] sm:$0xf]  ;;  %v13149_v36 = vor.u32 %v17808_v22, %v13146_v3  ;;  %v13405_v9 = vor.u32 %v17872_v31, %v13402_v7  ;;  %v13130_v33 = vld [vmem:[%s19282_s20 + $0xb58] sm:$0xf0]  ;;  %v10332_v55 = vpop.f32.mrf.mxu2 }
 0x4c6   : > { %10597 = vmatpush.bf16.msrb.mxu3 %v13581_v43  ;;  %v17804_v45 = vld [vmem:[%s19282_s20 + $0xb4c] sm:$0xf]  ;;  %v13533_v4 = vor.u32 %v17904_v38, %v13530_v32  ;;  %v13258_v14 = vld [vmem:[%s19282_s20 + $0xc58] sm:$0xf0] }
 0x4c7   : > { %10584 = vmatpush.bf16.msrb.mxu2 %v13453_v63  ;;  %v13277_v63 = vor.u32 %v17840_v23, %v13274_v0  ;;  %v17836_v43 = vld [vmem:[%s19282_s20 + $0xc4c] sm:$0xf]  ;;  %v13386_v41 = vld [vmem:[%s19282_s20 + $0xd58] sm:$0xf0]  ;;  %v13133_v28 = vor.u32 %v17804_v45, %v13130_v33 }
 0x4c8   : > { %10559 = vmatpush.bf16.msrb.mxu0 %v13181_v13  ;;  %v17868_v2 = vld [vmem:[%s19282_s20 + $0xd4c] sm:$0xf]  ;;  %v10333_v13 = vadd.f32 %v10332_v55, %v10320_v48  ;;  %v13514_v8 = vld [vmem:[%s19282_s20 + $0xe58] sm:$0xf0]  ;;  %v13261_v35 = vor.u32 %v17836_v43, %v13258_v14 }
 0x4c9   : > { %10572 = vmatpush.bf16.msrb.mxu1 %v13309_v40  ;;  %v10345_v40 = vpop.f32.mrf.mxu3  ;;  %v10308_v56 = vpop.f32.mrf.mxu0  ;;  %v13389_v5 = vor.u32 %v17868_v2, %v13386_v41  ;;  %v17800_v27 = vld [vmem:[%s19282_s20 + $0xb2c] sm:$0xf]  ;;  %v13114_v46 = vld [vmem:[%s19282_s20 + $0xb38] sm:$0xf0] }
 0x4ca   : > { %10598 = vmatpush.bf16.msrb.mxu3 %v13565_v24  ;;  %v10321_v24 = vpop.f32.mrf.mxu1  ;;  %v21904_v44 = vadd.f32 %v10345_v40, %v10333_v13  ;;  %v17832_v12 = vld [vmem:[%s19282_s20 + $0xc2c] sm:$0xf]  ;;  %v13498_v22 = vld [vmem:[%s19282_s20 + $0xe38] sm:$0xf0]  ;;  %v13117_v3 = vor.u32 %v17800_v27, %v13114_v46 }
 0x4cb   : > { %10585 = vmatpush.bf16.msrb.mxu2 %v13437_v34  ;;  %v17900_v34 = vld [vmem:[%s19282_s20 + $0xe4c] sm:$0xf]  ;;  %v13226_v7 = vld [vmem:[%s19282_s20 + $0xc18] sm:$0xf0] }
 0x4cc   : > { %10560 = vmatpush.bf16.msrb.mxu0 %v13165_v57  ;;  %v13517_v49 = vor.u32 %v17900_v34, %v13514_v8  ;;  %v13242_v57 = vld [vmem:[%s19282_s20 + $0xc38] sm:$0xf0]  ;;  %v17864_v62 = vld [vmem:[%s19282_s20 + $0xd2c] sm:$0xf] }
 0x4cd   : > { %10573 = vmatpush.bf16.msrb.mxu1 %v13293_v39  ;;  %v13370_v39 = vld [vmem:[%s19282_s20 + $0xd38] sm:$0xf0]  ;;  %v17796_v23 = vld [vmem:[%s19282_s20 + $0xb0c] sm:$0xf]  ;;  %v13245_v48 = vor.u32 %v17832_v12, %v13242_v57  ;;  %v10334_v45 = vpop.f32.mrf.mxu2 }
 0x4ce   : > { %10599 = vmatpush.bf16.msrb.mxu3 %v13549_v11  ;;  %v13098_v11 = vld [vmem:[%s19282_s20 + $0xb18] sm:$0xf0]  ;;  %v13373_v0 = vor.u32 %v17864_v62, %v13370_v39  ;;  %v17828_v31 = vld [vmem:[%s19282_s20 + $0xc0c] sm:$0xf] }
 0x4cf   : > { %10586 = vmatpush.bf16.msrb.mxu2 %v13421_v1  ;;  %v17896_v1 = vld [vmem:[%s19282_s20 + $0xe2c] sm:$0xf]  ;;  %v13722_v43 = vld [vmem:[%s19282_s20 + $0xff8] sm:$0xf0]  ;;  %v13101_v14 = vor.u32 %v17796_v23, %v13098_v11  ;;  %v13229_v40 = vor.u32 %v17828_v31, %v13226_v7 }
 0x4d0   : > { %10561 = vmatpush.bf16.msrb.mxu0 %v13149_v36  ;;  %v17860_v38 = vld [vmem:[%s19282_s20 + $0xd0c] sm:$0xf]  ;;  %v13501_v32 = vor.u32 %v17896_v1, %v13498_v22  ;;  %v13354_v36 = vld [vmem:[%s19282_s20 + $0xd18] sm:$0xf0] }
 0x4d1   : > { %10574 = vmatpush.bf16.msrb.mxu1 %v13277_v63  ;;  %v17892_v63 = vld [vmem:[%s19282_s20 + $0xe0c] sm:$0xf]  ;;  %v10347_v55 = vpop.f32.mrf.mxu3  ;;  %v13850_v2 = vld [vmem:[%s19282_s20 + $0x10f8] sm:$0xf0]  ;;  %v13357_v34 = vor.u32 %v17860_v38, %v13354_v36 }
 0x4d2   : > { %10600 = vmatpush.bf16.msrb.mxu3 %v13533_v4  ;;  %v17952_v33 = vld [vmem:[%s19282_s20 + $0xfec] sm:$0xf]  ;;  %v13978_v13 = vld [vmem:[%s19282_s20 + $0x11f8] sm:$0xf0] }
 0x4d3   : > { %10587 = vmatpush.bf16.msrb.mxu2 %v13405_v9  ;;  %v13482_v9 = vld [vmem:[%s19282_s20 + $0xe18] sm:$0xf0]  ;;  %v17984_v4 = vld [vmem:[%s19282_s20 + $0x10ec] sm:$0xf]  ;;  %v13725_v24 = vor.u32 %v17952_v33, %v13722_v43 }
 0x4d4   : > { %10562 = vmatpush.bf16.msrb.mxu0 %v13133_v28  ;;  %v18016_v41 = vld [vmem:[%s19282_s20 + $0x11ec] sm:$0xf]  ;;  %v14106_v56 = vld [vmem:[%s19282_s20 + $0x12f8] sm:$0xf0]  ;;  %v13485_v28 = vor.u32 %v17892_v63, %v13482_v9 }
 0x4d5   : > { %10575 = vmatpush.bf16.msrb.mxu1 %v13261_v35  ;;  %v18048_v8 = vld [vmem:[%s19282_s20 + $0x12ec] sm:$0xf]  ;;  %v13853_v35 = vor.u32 %v17984_v4, %v13850_v2  ;;  %v13706_v46 = vld [vmem:[%s19282_s20 + $0xfd8] sm:$0xf0] }
 0x4d6   : > { %10601 = vmatpush.bf16.msrb.mxu3 %v13517_v49  ;;  %v17948_v27 = vld [vmem:[%s19282_s20 + $0xfcc] sm:$0xf]  ;;  %v14109_v49 = vor.u32 %v18048_v8, %v14106_v56  ;;  %v13834_v57 = vld [vmem:[%s19282_s20 + $0x10d8] sm:$0xf0] }
 0x4d7   : > { %10588 = vmatpush.bf16.msrb.mxu2 %v13389_v5  ;;  %v13981_v5 = vor.u32 %v18016_v41, %v13978_v13  ;;  %v17980_v12 = vld [vmem:[%s19282_s20 + $0x10cc] sm:$0xf]  ;;  %v13962_v39 = vld [vmem:[%s19282_s20 + $0x11d8] sm:$0xf0] }
 0x4d8   : > { %10563 = vmatpush.bf16.msrb.mxu0 %v13117_v3  ;;  %v18012_v62 = vld [vmem:[%s19282_s20 + $0x11cc] sm:$0xf]  ;;  %v14090_v22 = vld [vmem:[%s19282_s20 + $0x12d8] sm:$0xf0]  ;;  %v13709_v3 = vor.u32 %v17948_v27, %v13706_v46  ;;  %v13837_v23 = vor.u32 %v17980_v12, %v13834_v57 }
 0x4d9   : > { %10576 = vmatpush.bf16.msrb.mxu1 %v13245_v48  ;;  %v18044_v1 = vld [vmem:[%s19282_s20 + $0x12cc] sm:$0xf]  ;;  %v13965_v11 = vor.u32 %v18012_v62, %v13962_v39  ;;  %v13818_v38 = vld [vmem:[%s19282_s20 + $0x10b8] sm:$0xf0] }
 0x4da   : > { %10602 = vmatpush.bf16.msrb.mxu3 %v13501_v32  ;;  %v17944_v48 = vld [vmem:[%s19282_s20 + $0xfac] sm:$0xf]  ;;  %v14093_v7 = vor.u32 %v18044_v1, %v14090_v22  ;;  %v13946_v36 = vld [vmem:[%s19282_s20 + $0x11b8] sm:$0xf0] }
 0x4db   : > { %10589 = vmatpush.bf16.msrb.mxu2 %v13373_v0  ;;  %v13690_v0 = vld [vmem:[%s19282_s20 + $0xfb8] sm:$0xf0]  ;;  %v17976_v31 = vld [vmem:[%s19282_s20 + $0x10ac] sm:$0xf] }
 0x4dc   : > { %10564 = vmatpush.bf16.msrb.mxu0 %v13101_v14  ;;  %v18008_v32 = vld [vmem:[%s19282_s20 + $0x11ac] sm:$0xf]  ;;  %v14074_v9 = vld [vmem:[%s19282_s20 + $0x12b8] sm:$0xf0]  ;;  %v13821_v45 = vor.u32 %v17976_v31, %v13818_v38 }
 0x4dd   : > { %10577 = vmatpush.bf16.msrb.mxu1 %v13229_v40  ;;  %v18040_v63 = vld [vmem:[%s19282_s20 + $0x12ac] sm:$0xf]  ;;  %v13949_v33 = vor.u32 %v18008_v32, %v13946_v36  ;;  %v13674_v4 = vld [vmem:[%s19282_s20 + $0xf98] sm:$0xf0]  ;;  %v10371_v8 = vpop.f32.mrf.mxu1 }
 0x4de   : > { %10603 = vmatpush.bf16.msrb.mxu3 %v13485_v28  ;;  %v17940_v43 = vld [vmem:[%s19282_s20 + $0xf8c] sm:$0xf]  ;;  %v13802_v55 = vld [vmem:[%s19282_s20 + $0x1098] sm:$0xf0] }
 0x4df   : > { %10590 = vmatpush.bf16.msrb.mxu2 %v13357_v34  ;;  %10565 = vmatmul.bf16.vlgmr.msrb.gmra.mxu0 %v19544_v29  ;;  %v13693_v29 = vor.u32 %v17944_v48, %v13690_v0  ;;  %v18004_v14 = vld [vmem:[%s19282_s20 + $0x118c] sm:$0xf]  ;;  %v13930_v2 = vld [vmem:[%s19282_s20 + $0x1198] sm:$0xf0]  ;;  %v13677_v34 = vor.u32 %v17940_v43, %v13674_v4 }
 0x4e0   : > { %10609 = vmatpush.bf16.msra.mxu0 %v13725_v24  ;;  %10578 = vmatmul.bf16.vlgmr.msrb.gmra.mxu1 %v19602_v58  ;;  %v14077_v58 = vor.u32 %v18040_v63, %v14074_v9  ;;  %v18036_v41 = vld [vmem:[%s19282_s20 + $0x128c] sm:$0xf]  ;;  %v14058_v13 = vld [vmem:[%s19282_s20 + $0x1298] sm:$0xf0]  ;;  %v13933_v28 = vor.u32 %v18004_v14, %v13930_v2 }
 0x4e1   : > { %10622 = vmatpush.bf16.msra.mxu1 %v13853_v35  ;;  %10604 = vmatmul.bf16.vlgmr.msrb.gmra.mxu3 %v19604_v59  ;;  %v10358_v59 = vpop.f32.mrf.mxu0  ;;  %v17936_v24 = vld [vmem:[%s19282_s20 + $0xf6c] sm:$0xf]  ;;  %v13658_v35 = vld [vmem:[%s19282_s20 + $0xf78] sm:$0xf0]  ;;  %v14061_v27 = vor.u32 %v18036_v41, %v14058_v13 }
 0x4e2   : > { %10648 = vmatpush.bf16.msra.mxu3 %v14109_v49  ;;  %10591 = vmatmul.bf16.vlgmr.msrb.gmra.mxu2 %v19606_v60  ;;  %v17972_v60 = vld [vmem:[%s19282_s20 + $0x108c] sm:$0xf]  ;;  %v10359_v40 = vadd.f32 %v10358_v59, %v21904_v44  ;;  %v13786_v12 = vld [vmem:[%s19282_s20 + $0x1078] sm:$0xf0]  ;;  %v13661_v39 = vor.u32 %v17936_v24, %v13658_v35 }
 0x4e3   : > { %10635 = vmatpush.bf16.msra.mxu2 %v13981_v5  ;;  %v13805_v56 = vor.u32 %v17972_v60, %v13802_v55  ;;  %v17968_v5 = vld [vmem:[%s19282_s20 + $0x106c] sm:$0xf]  ;;  %v13914_v44 = vld [vmem:[%s19282_s20 + $0x1178] sm:$0xf0] }
 0x4e4   : > { %10610 = vmatpush.bf16.msra.mxu0 %v13709_v3  ;;  %v10372_v46 = vadd.f32 %v10371_v8, %v10359_v40  ;;  %v18000_v49 = vld [vmem:[%s19282_s20 + $0x116c] sm:$0xf]  ;;  %v14042_v62 = vld [vmem:[%s19282_s20 + $0x1278] sm:$0xf0]  ;;  %v13789_v1 = vor.u32 %v17968_v5, %v13786_v12  ;;  %v10397_v36 = vpop.f32.mrf.mxu3 }
 0x4e5   : > { %10623 = vmatpush.bf16.msra.mxu1 %v13837_v23  ;;  %v18032_v57 = vld [vmem:[%s19282_s20 + $0x126c] sm:$0xf]  ;;  %v13917_v22 = vor.u32 %v18000_v49, %v13914_v44  ;;  %v13642_v23 = vld [vmem:[%s19282_s20 + $0xf58] sm:$0xf0]  ;;  %v10384_v0 = vpop.f32.mrf.mxu2 }
 0x4e6   : > { %10649 = vmatpush.bf16.msra.mxu3 %v14093_v7  ;;  %v17932_v3 = vld [vmem:[%s19282_s20 + $0xf4c] sm:$0xf]  ;;  %v14045_v48 = vor.u32 %v18032_v57, %v14042_v62  ;;  %v13770_v31 = vld [vmem:[%s19282_s20 + $0x1058] sm:$0xf0]  ;;  %v10385_v32 = vadd.f32 %v10384_v0, %v10372_v46 }
 0x4e7   : > { %10636 = vmatpush.bf16.msra.mxu2 %v13965_v11  ;;  %v17964_v11 = vld [vmem:[%s19282_s20 + $0x104c] sm:$0xf]  ;;  %v13898_v38 = vld [vmem:[%s19282_s20 + $0x1158] sm:$0xf0] }
 0x4e8   : > { %10611 = vmatpush.bf16.msra.mxu0 %v13693_v29  ;;  %v17996_v7 = vld [vmem:[%s19282_s20 + $0x114c] sm:$0xf]  ;;  %v14026_v9 = vld [vmem:[%s19282_s20 + $0x1258] sm:$0xf0]  ;;  %v21975_v43 = vadd.f32 %v10397_v36, %v10385_v32  ;;  %v13773_v4 = vor.u32 %v17964_v11, %v13770_v31 }
 0x4e9   : > { %10624 = vmatpush.bf16.msra.mxu1 %v13821_v45  ;;  %v18028_v63 = vld [vmem:[%s19282_s20 + $0x124c] sm:$0xf]  ;;  %v10360_v29 = vpop.f32.mrf.mxu0  ;;  %v13645_v45 = vor.u32 %v17932_v3, %v13642_v23  ;;  %v13901_v60 = vor.u32 %v17996_v7, %v13898_v38  ;;  %v13626_v55 = vld [vmem:[%s19282_s20 + $0xf38] sm:$0xf0] }
 0x4ea   : > { %10650 = vmatpush.bf16.msra.mxu3 %v14077_v58  ;;  %v17928_v58 = vld [vmem:[%s19282_s20 + $0xf2c] sm:$0xf]  ;;  %v14029_v2 = vor.u32 %v18028_v63, %v14026_v9  ;;  %v13754_v59 = vld [vmem:[%s19282_s20 + $0x1038] sm:$0xf0] }
 0x4eb   : > { %10637 = vmatpush.bf16.msra.mxu2 %v13949_v33  ;;  %v10373_v33 = vpop.f32.mrf.mxu1  ;;  %v17960_v14 = vld [vmem:[%s19282_s20 + $0x102c] sm:$0xf]  ;;  %v13882_v13 = vld [vmem:[%s19282_s20 + $0x1138] sm:$0xf0]  ;;  %v13629_v8 = vor.u32 %v17928_v58, %v13626_v55 }
 0x4ec   : > { %10612 = vmatpush.bf16.msra.mxu0 %v13677_v34  ;;  %v17992_v41 = vld [vmem:[%s19282_s20 + $0x112c] sm:$0xf]  ;;  %v14010_v34 = vld [vmem:[%s19282_s20 + $0x1238] sm:$0xf0]  ;;  %v13757_v24 = vor.u32 %v17960_v14, %v13754_v59  ;;  %v10399_v3 = vpop.f32.mrf.mxu3 }
 0x4ed   : > { %10625 = vmatpush.bf16.msra.mxu1 %v13805_v56  ;;  %v18024_v40 = vld [vmem:[%s19282_s20 + $0x122c] sm:$0xf]  ;;  %v13885_v35 = vor.u32 %v17992_v41, %v13882_v13  ;;  %v13866_v49 = vld [vmem:[%s19282_s20 + $0x1118] sm:$0xf0]  ;;  %v10386_v62 = vpop.f32.mrf.mxu2 }
 0x4ee   : > { %10651 = vmatpush.bf16.msra.mxu3 %v14061_v27  ;;  %v17924_v56 = vld [vmem:[%s19282_s20 + $0xf0c] sm:$0xf]  ;;  %v13738_v27 = vld [vmem:[%s19282_s20 + $0x1018] sm:$0xf0]  ;;  %v14013_v12 = vor.u32 %v18024_v40, %v14010_v34 }
 0x4ef   : > { %10638 = vmatpush.bf16.msra.mxu2 %v13933_v28  ;;  %v13610_v28 = vld [vmem:[%s19282_s20 + $0xf18] sm:$0xf0]  ;;  %v17956_v5 = vld [vmem:[%s19282_s20 + $0x100c] sm:$0xf] }
 0x4f0   : > { %10613 = vmatpush.bf16.msra.mxu0 %v13661_v39  ;;  %v17988_v46 = vld [vmem:[%s19282_s20 + $0x110c] sm:$0xf]  ;;  %v13994_v57 = vld [vmem:[%s19282_s20 + $0x1218] sm:$0xf0]  ;;  %v13613_v23 = vor.u32 %v17924_v56, %v13610_v28  ;;  %v13741_v31 = vor.u32 %v17956_v5, %v13738_v27 }
 0x4f1   : > { %10626 = vmatpush.bf16.msra.mxu1 %v13789_v1  ;;  %v18020_v44 = vld [vmem:[%s19282_s20 + $0x120c] sm:$0xf]  ;;  %v14234_v1 = vld [vmem:[%s19282_s20 + $0x13f8] sm:$0xf0]  ;;  %v13869_v7 = vor.u32 %v17988_v46, %v13866_v49 }
 0x4f2   : > { %10652 = vmatpush.bf16.msra.mxu3 %v14045_v48  ;;  %v18080_v39 = vld [vmem:[%s19282_s20 + $0x13ec] sm:$0xf]  ;;  %v14362_v11 = vld [vmem:[%s19282_s20 + $0x14f8] sm:$0xf0]  ;;  %v13997_v36 = vor.u32 %v18020_v44, %v13994_v57 }
 0x4f3   : > { %10639 = vmatpush.bf16.msra.mxu2 %v13917_v22  ;;  %v18112_v22 = vld [vmem:[%s19282_s20 + $0x14ec] sm:$0xf]  ;;  %v14490_v0 = vld [vmem:[%s19282_s20 + $0x15f8] sm:$0xf0]  ;;  %v14237_v63 = vor.u32 %v18080_v39, %v14234_v1 }
 0x4f4   : > { %10614 = vmatpush.bf16.msra.mxu0 %v13645_v45  ;;  %v18144_v48 = vld [vmem:[%s19282_s20 + $0x15ec] sm:$0xf]  ;;  %v14618_v32 = vld [vmem:[%s19282_s20 + $0x16f8] sm:$0xf0]  ;;  %v14365_v9 = vor.u32 %v18112_v22, %v14362_v11 }
 0x4f5   : > { %10627 = vmatpush.bf16.msra.mxu1 %v13773_v4  ;;  %v18176_v38 = vld [vmem:[%s19282_s20 + $0x16ec] sm:$0xf]  ;;  %v14493_v29 = vor.u32 %v18144_v48, %v14490_v0  ;;  %v14218_v33 = vld [vmem:[%s19282_s20 + $0x13d8] sm:$0xf0] }
 0x4f6   : > { %10653 = vmatpush.bf16.msra.mxu3 %v14029_v2  ;;  %v18076_v45 = vld [vmem:[%s19282_s20 + $0x13cc] sm:$0xf]  ;;  %v14346_v58 = vld [vmem:[%s19282_s20 + $0x14d8] sm:$0xf0] }
 0x4f7   : > { %10640 = vmatpush.bf16.msra.mxu2 %v13901_v60  ;;  %v18108_v4 = vld [vmem:[%s19282_s20 + $0x14cc] sm:$0xf]  ;;  %v14621_v60 = vor.u32 %v18176_v38, %v14618_v32  ;;  %v14474_v14 = vld [vmem:[%s19282_s20 + $0x15d8] sm:$0xf0]  ;;  %v14221_v41 = vor.u32 %v18076_v45, %v14218_v33 }
 0x4f8   : > { %10615 = vmatpush.bf16.msra.mxu0 %v13629_v8  ;;  %v18140_v55 = vld [vmem:[%s19282_s20 + $0x15cc] sm:$0xf]  ;;  %v14602_v59 = vld [vmem:[%s19282_s20 + $0x16d8] sm:$0xf0]  ;;  %v14349_v13 = vor.u32 %v18108_v4, %v14346_v58 }
 0x4f9   : > { %10628 = vmatpush.bf16.msra.mxu1 %v13757_v24  ;;  %v18172_v2 = vld [vmem:[%s19282_s20 + $0x16cc] sm:$0xf]  ;;  %v14477_v40 = vor.u32 %v18140_v55, %v14474_v14  ;;  %v14202_v8 = vld [vmem:[%s19282_s20 + $0x13b8] sm:$0xf0] }
 0x4fa   : > { %10654 = vmatpush.bf16.msra.mxu3 %v14013_v12  ;;  %v18072_v34 = vld [vmem:[%s19282_s20 + $0x13ac] sm:$0xf]  ;;  %v14605_v28 = vor.u32 %v18172_v2, %v14602_v59  ;;  %v14330_v24 = vld [vmem:[%s19282_s20 + $0x14b8] sm:$0xf0] }
 0x4fb   : > { %10641 = vmatpush.bf16.msra.mxu2 %v13885_v35  ;;  %v18104_v56 = vld [vmem:[%s19282_s20 + $0x14ac] sm:$0xf]  ;;  %v14458_v5 = vld [vmem:[%s19282_s20 + $0x15b8] sm:$0xf0] }
 0x4fc   : > { %10616 = vmatpush.bf16.msra.mxu0 %v13613_v23  ;;  %v18136_v35 = vld [vmem:[%s19282_s20 + $0x15ac] sm:$0xf]  ;;  %v14586_v46 = vld [vmem:[%s19282_s20 + $0x16b8] sm:$0xf0]  ;;  %v14333_v12 = vor.u32 %v18104_v56, %v14330_v24 }
 0x4fd   : > { %10629 = vmatpush.bf16.msra.mxu1 %v13741_v31  ;;  %v18168_v27 = vld [vmem:[%s19282_s20 + $0x16ac] sm:$0xf]  ;;  %v14461_v49 = vor.u32 %v18136_v35, %v14458_v5  ;;  %v14186_v57 = vld [vmem:[%s19282_s20 + $0x1398] sm:$0xf0]  ;;  %v10423_v32 = vpop.f32.mrf.mxu1 }
 0x4fe   : > { %10655 = vmatpush.bf16.msra.mxu3 %v13997_v36  ;;  %v18068_v44 = vld [vmem:[%s19282_s20 + $0x138c] sm:$0xf]  ;;  %v14314_v62 = vld [vmem:[%s19282_s20 + $0x1498] sm:$0xf0] }
 0x4ff   : > { %10642 = vmatpush.bf16.msra.mxu2 %v13869_v7  ;;  %10617 = vmatmul.bf16.vlgmr.msra.gmra.mxu0 %v19608_v61  ;;  %v14205_v61 = vor.u32 %v18072_v34, %v14202_v8  ;;  %v18132_v39 = vld [vmem:[%s19282_s20 + $0x158c] sm:$0xf]  ;;  %v14442_v1 = vld [vmem:[%s19282_s20 + $0x1598] sm:$0xf0]  ;;  %v14189_v11 = vor.u32 %v18068_v44, %v14186_v57 }
 0x500   : > { %10661 = vmatpush.bf16.msrb.mxu0 %v14237_v63  ;;  %10630 = vmatmul.bf16.vlgmr.msra.gmra.mxu1 %v19689_v21  ;;  %v14589_v21 = vor.u32 %v18168_v27, %v14586_v46  ;;  %v18164_v22 = vld [vmem:[%s19282_s20 + $0x168c] sm:$0xf]  ;;  %v14570_v3 = vld [vmem:[%s19282_s20 + $0x1698] sm:$0xf0]  ;;  %v14445_v0 = vor.u32 %v18132_v39, %v14442_v1 }
 0x501   : > { %10674 = vmatpush.bf16.msrb.mxu1 %v14365_v9  ;;  %10656 = vmatmul.bf16.vlgmr.msra.gmra.mxu3 %v19693_v25  ;;  %v10410_v25 = vpop.f32.mrf.mxu0  ;;  %v18064_v31 = vld [vmem:[%s19282_s20 + $0x136c] sm:$0xf]  ;;  %v14170_v7 = vld [vmem:[%s19282_s20 + $0x1378] sm:$0xf0]  ;;  %v14573_v36 = vor.u32 %v18164_v22, %v14570_v3 }
 0x502   : > { %10700 = vmatpush.bf16.msrb.mxu3 %v14621_v60  ;;  %10643 = vmatmul.bf16.vlgmr.msra.gmra.mxu2 %v19695_v26  ;;  %v18100_v26 = vld [vmem:[%s19282_s20 + $0x148c] sm:$0xf]  ;;  %v22030_v23 = vadd.f32 %v10410_v25, %v21975_v43  ;;  %v14298_v63 = vld [vmem:[%s19282_s20 + $0x1478] sm:$0xf0]  ;;  %v14173_v33 = vor.u32 %v18064_v31, %v14170_v7 }
 0x503   : > { %10687 = vmatpush.bf16.msrb.mxu2 %v14493_v29  ;;  %v14317_v48 = vor.u32 %v18100_v26, %v14314_v62  ;;  %v18096_v38 = vld [vmem:[%s19282_s20 + $0x146c] sm:$0xf]  ;;  %v14426_v43 = vld [vmem:[%s19282_s20 + $0x1578] sm:$0xf0] }
 0x504   : > { %10662 = vmatpush.bf16.msrb.mxu0 %v14221_v41  ;;  %v18128_v9 = vld [vmem:[%s19282_s20 + $0x156c] sm:$0xf]  ;;  %v14554_v45 = vld [vmem:[%s19282_s20 + $0x1678] sm:$0xf0]  ;;  %v14301_v4 = vor.u32 %v18096_v38, %v14298_v63  ;;  %v10449_v34 = vpop.f32.mrf.mxu3 }
 0x505   : > { %10675 = vmatpush.bf16.msrb.mxu1 %v14349_v13  ;;  %v18160_v29 = vld [vmem:[%s19282_s20 + $0x166c] sm:$0xf]  ;;  %v14429_v60 = vor.u32 %v18128_v9, %v14426_v43  ;;  %v14154_v55 = vld [vmem:[%s19282_s20 + $0x1358] sm:$0xf0]  ;;  %v10425_v44 = vpop.f32.mrf.mxu1 }
 0x506   : > { %10701 = vmatpush.bf16.msrb.mxu3 %v14605_v28  ;;  %v18060_v58 = vld [vmem:[%s19282_s20 + $0x134c] sm:$0xf]  ;;  %v14557_v2 = vor.u32 %v18160_v29, %v14554_v45  ;;  %v14282_v59 = vld [vmem:[%s19282_s20 + $0x1458] sm:$0xf0] }
 0x507   : > { %10688 = vmatpush.bf16.msrb.mxu2 %v14477_v40  ;;  %v18092_v14 = vld [vmem:[%s19282_s20 + $0x144c] sm:$0xf]  ;;  %v14410_v13 = vld [vmem:[%s19282_s20 + $0x1558] sm:$0xf0]  ;;  %v10436_v40 = vpop.f32.mrf.mxu2  ;;  %v14157_v35 = vor.u32 %v18060_v58, %v14154_v55 }
 0x508   : > { %10663 = vmatpush.bf16.msrb.mxu0 %v14205_v61  ;;  %v18124_v41 = vld [vmem:[%s19282_s20 + $0x154c] sm:$0xf]  ;;  %v14538_v56 = vld [vmem:[%s19282_s20 + $0x1658] sm:$0xf0]  ;;  %v10437_v28 = vadd.f32 %v10436_v40, %v10423_v32  ;;  %v14285_v5 = vor.u32 %v18092_v14, %v14282_v59 }
 0x509   : > { %10676 = vmatpush.bf16.msrb.mxu1 %v14333_v12  ;;  %v18156_v8 = vld [vmem:[%s19282_s20 + $0x164c] sm:$0xf]  ;;  %v10412_v24 = vpop.f32.mrf.mxu0  ;;  %v14413_v27 = vor.u32 %v18124_v41, %v14410_v13  ;;  %v14138_v61 = vld [vmem:[%s19282_s20 + $0x1338] sm:$0xf0] }
 0x50a   : > { %10702 = vmatpush.bf16.msrb.mxu3 %v14589_v21  ;;  %v18056_v46 = vld [vmem:[%s19282_s20 + $0x132c] sm:$0xf]  ;;  %v14541_v57 = vor.u32 %v18156_v8, %v14538_v56  ;;  %v14266_v26 = vld [vmem:[%s19282_s20 + $0x1438] sm:$0xf0] }
 0x50b   : > { %10689 = vmatpush.bf16.msrb.mxu2 %v14461_v49  ;;  %v18088_v12 = vld [vmem:[%s19282_s20 + $0x142c] sm:$0xf]  ;;  %v22051_v49 = vadd.f32 %v10449_v34, %v10437_v28  ;;  %v14394_v62 = vld [vmem:[%s19282_s20 + $0x1538] sm:$0xf0]  ;;  %v14141_v25 = vor.u32 %v18056_v46, %v14138_v61 }
 0x50c   : > { %10664 = vmatpush.bf16.msrb.mxu0 %v14189_v11  ;;  %v18120_v21 = vld [vmem:[%s19282_s20 + $0x152c] sm:$0xf]  ;;  %v14522_v1 = vld [vmem:[%s19282_s20 + $0x1638] sm:$0xf0]  ;;  %v14269_v11 = vor.u32 %v18088_v12, %v14266_v26  ;;  %v10451_v43 = vpop.f32.mrf.mxu3 }
 0x50d   : > { %10677 = vmatpush.bf16.msrb.mxu1 %v14317_v48  ;;  %v18152_v39 = vld [vmem:[%s19282_s20 + $0x162c] sm:$0xf]  ;;  %v14122_v3 = vld [vmem:[%s19282_s20 + $0x1318] sm:$0xf0]  ;;  %v14397_v48 = vor.u32 %v18120_v21, %v14394_v62 }
 0x50e   : > { %10703 = vmatpush.bf16.msrb.mxu3 %v14573_v36  ;;  %v18052_v22 = vld [vmem:[%s19282_s20 + $0x130c] sm:$0xf]  ;;  %v14250_v31 = vld [vmem:[%s19282_s20 + $0x1418] sm:$0xf0]  ;;  %v14525_v38 = vor.u32 %v18152_v39, %v14522_v1 }
 0x50f   : > { %10690 = vmatpush.bf16.msrb.mxu2 %v14445_v0  ;;  %v18084_v0 = vld [vmem:[%s19282_s20 + $0x140c] sm:$0xf]  ;;  %v14378_v32 = vld [vmem:[%s19282_s20 + $0x1518] sm:$0xf0]  ;;  %v10438_v9 = vpop.f32.mrf.mxu2 }
 0x510   : > { %10665 = vmatpush.bf16.msrb.mxu0 %v14173_v33  ;;  %v18116_v7 = vld [vmem:[%s19282_s20 + $0x150c] sm:$0xf]  ;;  %v14506_v63 = vld [vmem:[%s19282_s20 + $0x1618] sm:$0xf0]  ;;  %v14253_v14 = vor.u32 %v18084_v0, %v14250_v31 }
 0x511   : > { %10678 = vmatpush.bf16.msrb.mxu1 %v14301_v4  ;;  %v18148_v36 = vld [vmem:[%s19282_s20 + $0x160c] sm:$0xf]  ;;  %v14746_v45 = vld [vmem:[%s19282_s20 + $0x17f8] sm:$0xf0]  ;;  %v14125_v4 = vor.u32 %v18052_v22, %v14122_v3 }
 0x512   : > { %10704 = vmatpush.bf16.msrb.mxu3 %v14557_v2  ;;  %v18208_v29 = vld [vmem:[%s19282_s20 + $0x17ec] sm:$0xf]  ;;  %v15002_v55 = vld [vmem:[%s19282_s20 + $0x19f8] sm:$0xf0]  ;;  %v14381_v2 = vor.u32 %v18116_v7, %v14378_v32  ;;  %v14509_v13 = vor.u32 %v18148_v36, %v14506_v63 }
 0x513   : > { %10691 = vmatpush.bf16.msrb.mxu2 %v14429_v60  ;;  %v18240_v33 = vld [vmem:[%s19282_s20 + $0x18ec] sm:$0xf]  ;;  %v14874_v60 = vld [vmem:[%s19282_s20 + $0x18f8] sm:$0xf0]  ;;  %v14749_v40 = vor.u32 %v18208_v29, %v14746_v45 }
 0x514   : > { %10666 = vmatpush.bf16.msrb.mxu0 %v14157_v35  ;;  %v18272_v58 = vld [vmem:[%s19282_s20 + $0x19ec] sm:$0xf]  ;;  %v15130_v41 = vld [vmem:[%s19282_s20 + $0x1af8] sm:$0xf0]  ;;  %v14877_v34 = vor.u32 %v18240_v33, %v14874_v60 }
 0x515   : > { %10679 = vmatpush.bf16.msrb.mxu1 %v14285_v5  ;;  %v18304_v59 = vld [vmem:[%s19282_s20 + $0x1aec] sm:$0xf]  ;;  %v15005_v8 = vor.u32 %v18272_v58, %v15002_v55  ;;  %v14730_v28 = vld [vmem:[%s19282_s20 + $0x17d8] sm:$0xf0] }
 0x516   : > { %10705 = vmatpush.bf16.msrb.mxu3 %v14541_v57  ;;  %v18204_v56 = vld [vmem:[%s19282_s20 + $0x17cc] sm:$0xf]  ;;  %v15133_v35 = vor.u32 %v18304_v59, %v15130_v41  ;;  %v14858_v5 = vld [vmem:[%s19282_s20 + $0x18d8] sm:$0xf0] }
 0x517   : > { %10692 = vmatpush.bf16.msrb.mxu2 %v14413_v27  ;;  %v18236_v24 = vld [vmem:[%s19282_s20 + $0x18cc] sm:$0xf]  ;;  %v14986_v46 = vld [vmem:[%s19282_s20 + $0x19d8] sm:$0xf0]  ;;  %v14733_v44 = vor.u32 %v18204_v56, %v14730_v28 }
 0x518   : > { %10667 = vmatpush.bf16.msrb.mxu0 %v14141_v25  ;;  %v18268_v27 = vld [vmem:[%s19282_s20 + $0x19cc] sm:$0xf]  ;;  %v15114_v12 = vld [vmem:[%s19282_s20 + $0x1ad8] sm:$0xf0]  ;;  %v14861_v57 = vor.u32 %v18236_v24, %v14858_v5 }
 0x519   : > { %10680 = vmatpush.bf16.msrb.mxu1 %v14269_v11  ;;  %v18300_v61 = vld [vmem:[%s19282_s20 + $0x1acc] sm:$0xf]  ;;  %v14989_v26 = vor.u32 %v18268_v27, %v14986_v46  ;;  %v14714_v62 = vld [vmem:[%s19282_s20 + $0x17b8] sm:$0xf0] }
 0x51a   : > { %10706 = vmatpush.bf16.msrb.mxu3 %v14525_v38  ;;  %v18200_v21 = vld [vmem:[%s19282_s20 + $0x17ac] sm:$0xf]  ;;  %v15117_v1 = vor.u32 %v18300_v61, %v15114_v12  ;;  %v14842_v25 = vld [vmem:[%s19282_s20 + $0x18b8] sm:$0xf0] }
 0x51b   : > { %10693 = vmatpush.bf16.msrb.mxu2 %v14397_v48  ;;  %v18232_v39 = vld [vmem:[%s19282_s20 + $0x18ac] sm:$0xf]  ;;  %v14970_v3 = vld [vmem:[%s19282_s20 + $0x19b8] sm:$0xf0] }
 0x51c   : > { %10668 = vmatpush.bf16.msrb.mxu0 %v14125_v4  ;;  %v18264_v22 = vld [vmem:[%s19282_s20 + $0x19ac] sm:$0xf]  ;;  %v15098_v48 = vld [vmem:[%s19282_s20 + $0x1ab8] sm:$0xf0]  ;;  %v14845_v0 = vor.u32 %v18232_v39, %v14842_v25  ;;  %v10462_v29 = vpop.f32.mrf.mxu0 }
 0x51d   : > { %10681 = vmatpush.bf16.msrb.mxu1 %v14253_v14  ;;  %v18296_v11 = vld [vmem:[%s19282_s20 + $0x1aac] sm:$0xf]  ;;  %v14973_v31 = vor.u32 %v18264_v22, %v14970_v3  ;;  %v14698_v38 = vld [vmem:[%s19282_s20 + $0x1798] sm:$0xf0]  ;;  %v10463_v55 = vadd.f32 %v10462_v29, %v22051_v49  ;;  %v10475_v14 = vpop.f32.mrf.mxu1 }
 0x51e   : > { %10707 = vmatpush.bf16.msrb.mxu3 %v14509_v13  ;;  %v18196_v7 = vld [vmem:[%s19282_s20 + $0x178c] sm:$0xf]  ;;  %v14826_v32 = vld [vmem:[%s19282_s20 + $0x1898] sm:$0xf0] }
 0x51f   : > { %10694 = vmatpush.bf16.msrb.mxu2 %v14381_v2  ;;  %10669 = vmatmul.bf16.vlgmr.msrb.gmra.mxu0 %v19697_v30  ;;  %v14717_v30 = vor.u32 %v18200_v21, %v14714_v62  ;;  %v18260_v36 = vld [vmem:[%s19282_s20 + $0x198c] sm:$0xf]  ;;  %v14954_v63 = vld [vmem:[%s19282_s20 + $0x1998] sm:$0xf0]  ;;  %v14701_v43 = vor.u32 %v18196_v7, %v14698_v38 }
 0x520   : > { %10713 = vmatpush.bf16.msra.mxu0 %v14749_v40  ;;  %10682 = vmatmul.bf16.vlgmr.msrb.gmra.mxu1 %v19755_v15  ;;  %v15101_v15 = vor.u32 %v18296_v11, %v15098_v48  ;;  %v18292_v9 = vld [vmem:[%s19282_s20 + $0x1a8c] sm:$0xf]  ;;  %v14957_v33 = vor.u32 %v18260_v36, %v14954_v63  ;;  %v14682_v60 = vld [vmem:[%s19282_s20 + $0x1778] sm:$0xf0] }
 0x521   : > { %10726 = vmatpush.bf16.msra.mxu1 %v14877_v34  ;;  %10708 = vmatmul.bf16.vlgmr.msrb.gmra.mxu3 %v19757_v16  ;;  %v15082_v16 = vld [vmem:[%s19282_s20 + $0x1a98] sm:$0xf0]  ;;  %v18192_v4 = vld [vmem:[%s19282_s20 + $0x176c] sm:$0xf] }
 0x522   : > { %10752 = vmatpush.bf16.msra.mxu3 %v15133_v35  ;;  %10695 = vmatmul.bf16.vlgmr.msrb.gmra.mxu2 %v19759_v19  ;;  %v18228_v19 = vld [vmem:[%s19282_s20 + $0x188c] sm:$0xf]  ;;  %v15085_v2 = vor.u32 %v18292_v9, %v15082_v16  ;;  %v14810_v59 = vld [vmem:[%s19282_s20 + $0x1878] sm:$0xf0]  ;;  %v14685_v56 = vor.u32 %v18192_v4, %v14682_v60 }
 0x523   : > { %10739 = vmatpush.bf16.msra.mxu2 %v15005_v8  ;;  %v14829_v45 = vor.u32 %v18228_v19, %v14826_v32  ;;  %v18224_v58 = vld [vmem:[%s19282_s20 + $0x186c] sm:$0xf]  ;;  %v14938_v13 = vld [vmem:[%s19282_s20 + $0x1978] sm:$0xf0]  ;;  %v10476_v8 = vadd.f32 %v10475_v14, %v10463_v55 }
 0x524   : > { %10714 = vmatpush.bf16.msra.mxu0 %v14733_v44  ;;  %v18256_v41 = vld [vmem:[%s19282_s20 + $0x196c] sm:$0xf]  ;;  %v15066_v34 = vld [vmem:[%s19282_s20 + $0x1a78] sm:$0xf0]  ;;  %v14813_v49 = vor.u32 %v18224_v58, %v14810_v59  ;;  %v10464_v25 = vpop.f32.mrf.mxu0 }
 0x525   : > { %10727 = vmatpush.bf16.msra.mxu1 %v14861_v57  ;;  %v18288_v40 = vld [vmem:[%s19282_s20 + $0x1a6c] sm:$0xf]  ;;  %v14941_v28 = vor.u32 %v18256_v41, %v14938_v13  ;;  %v14666_v35 = vld [vmem:[%s19282_s20 + $0x1758] sm:$0xf0]  ;;  %v10488_v27 = vpop.f32.mrf.mxu2 }
 0x526   : > { %10753 = vmatpush.bf16.msra.mxu3 %v15117_v1  ;;  %v18188_v24 = vld [vmem:[%s19282_s20 + $0x174c] sm:$0xf]  ;;  %v15069_v46 = vor.u32 %v18288_v40, %v15066_v34  ;;  %v14794_v61 = vld [vmem:[%s19282_s20 + $0x1858] sm:$0xf0]  ;;  %v10489_v57 = vadd.f32 %v10488_v27, %v10476_v8 }
 0x527   : > { %10740 = vmatpush.bf16.msra.mxu2 %v14989_v26  ;;  %v18220_v5 = vld [vmem:[%s19282_s20 + $0x184c] sm:$0xf]  ;;  %v14922_v44 = vld [vmem:[%s19282_s20 + $0x1958] sm:$0xf0]  ;;  %v10501_v26 = vpop.f32.mrf.mxu3  ;;  %v14669_v39 = vor.u32 %v18188_v24, %v14666_v35 }
 0x528   : > { %10715 = vmatpush.bf16.msra.mxu0 %v14717_v30  ;;  %v18252_v12 = vld [vmem:[%s19282_s20 + $0x194c] sm:$0xf]  ;;  %v15050_v62 = vld [vmem:[%s19282_s20 + $0x1a58] sm:$0xf0]  ;;  %v22119_v1 = vadd.f32 %v10501_v26, %v10489_v57  ;;  %v14797_v22 = vor.u32 %v18220_v5, %v14794_v61 }
 0x529   : > { %10728 = vmatpush.bf16.msra.mxu1 %v14845_v0  ;;  %v18284_v21 = vld [vmem:[%s19282_s20 + $0x1a4c] sm:$0xf]  ;;  %v14925_v3 = vor.u32 %v18252_v12, %v14922_v44  ;;  %v14650_v48 = vld [vmem:[%s19282_s20 + $0x1738] sm:$0xf0]  ;;  %v10477_v0 = vpop.f32.mrf.mxu1 }
 0x52a   : > { %10754 = vmatpush.bf16.msra.mxu3 %v15101_v15  ;;  %v18184_v11 = vld [vmem:[%s19282_s20 + $0x172c] sm:$0xf]  ;;  %v14778_v7 = vld [vmem:[%s19282_s20 + $0x1838] sm:$0xf0] }
 0x52b   : > { %10741 = vmatpush.bf16.msra.mxu2 %v14973_v31  ;;  %v18216_v30 = vld [vmem:[%s19282_s20 + $0x182c] sm:$0xf]  ;;  %v15053_v31 = vor.u32 %v18284_v21, %v15050_v62  ;;  %v14906_v19 = vld [vmem:[%s19282_s20 + $0x1938] sm:$0xf0]  ;;  %v14653_v36 = vor.u32 %v18184_v11, %v14650_v48 }
 0x52c   : > { %10716 = vmatpush.bf16.msra.mxu0 %v14701_v43  ;;  %v18248_v38 = vld [vmem:[%s19282_s20 + $0x192c] sm:$0xf]  ;;  %v15034_v32 = vld [vmem:[%s19282_s20 + $0x1a38] sm:$0xf0]  ;;  %v14781_v16 = vor.u32 %v18216_v30, %v14778_v7 }
 0x52d   : > { %10729 = vmatpush.bf16.msra.mxu1 %v14829_v45  ;;  %v18280_v15 = vld [vmem:[%s19282_s20 + $0x1a2c] sm:$0xf]  ;;  %v14634_v9 = vld [vmem:[%s19282_s20 + $0x1718] sm:$0xf0]  ;;  %v14909_v43 = vor.u32 %v18248_v38, %v14906_v19  ;;  %v10490_v4 = vpop.f32.mrf.mxu2 }
 0x52e   : > { %10755 = vmatpush.bf16.msra.mxu3 %v15085_v2  ;;  %v18180_v63 = vld [vmem:[%s19282_s20 + $0x170c] sm:$0xf]  ;;  %v14762_v45 = vld [vmem:[%s19282_s20 + $0x1818] sm:$0xf0]  ;;  %v15037_v60 = vor.u32 %v18280_v15, %v15034_v32 }
 0x52f   : > { %10742 = vmatpush.bf16.msra.mxu2 %v14957_v33  ;;  %v18212_v29 = vld [vmem:[%s19282_s20 + $0x180c] sm:$0xf]  ;;  %v14890_v58 = vld [vmem:[%s19282_s20 + $0x1918] sm:$0xf0]  ;;  %v10503_v2 = vpop.f32.mrf.mxu3  ;;  %v14637_v40 = vor.u32 %v18180_v63, %v14634_v9 }
 0x530   : > { %10717 = vmatpush.bf16.msra.mxu0 %v14685_v56  ;;  %v18244_v33 = vld [vmem:[%s19282_s20 + $0x190c] sm:$0xf]  ;;  %v15018_v14 = vld [vmem:[%s19282_s20 + $0x1a18] sm:$0xf0] }
 0x531   : > { %10730 = vmatpush.bf16.msra.mxu1 %v14813_v49  ;;  %v18276_v55 = vld [vmem:[%s19282_s20 + $0x1a0c] sm:$0xf]  ;;  %v15258_v41 = vld [vmem:[%s19282_s20 + $0x1bf8] sm:$0xf0]  ;;  %v14765_v49 = vor.u32 %v18212_v29, %v14762_v45 }
 0x532   : > { %10756 = vmatpush.bf16.msra.mxu3 %v15069_v46  ;;  %v18336_v59 = vld [vmem:[%s19282_s20 + $0x1bec] sm:$0xf]  ;;  %v15386_v34 = vld [vmem:[%s19282_s20 + $0x1cf8] sm:$0xf0]  ;;  %v15021_v5 = vor.u32 %v18276_v55, %v15018_v14 }
 0x533   : > { %10743 = vmatpush.bf16.msra.mxu2 %v14941_v28  ;;  %v18368_v13 = vld [vmem:[%s19282_s20 + $0x1cec] sm:$0xf]  ;;  %v15514_v56 = vld [vmem:[%s19282_s20 + $0x1df8] sm:$0xf0]  ;;  %v14893_v28 = vor.u32 %v18244_v33, %v14890_v58  ;;  %v15261_v27 = vor.u32 %v18336_v59, %v15258_v41 }
 0x534   : > { %10718 = vmatpush.bf16.msra.mxu0 %v14669_v39  ;;  %v18400_v8 = vld [vmem:[%s19282_s20 + $0x1dec] sm:$0xf]  ;;  %v15642_v35 = vld [vmem:[%s19282_s20 + $0x1ef8] sm:$0xf0]  ;;  %v15389_v46 = vor.u32 %v18368_v13, %v15386_v34 }
 0x535   : > { %10731 = vmatpush.bf16.msra.mxu1 %v14797_v22  ;;  %v18432_v24 = vld [vmem:[%s19282_s20 + $0x1eec] sm:$0xf]  ;;  %v15517_v61 = vor.u32 %v18400_v8, %v15514_v56  ;;  %v15242_v44 = vld [vmem:[%s19282_s20 + $0x1bd8] sm:$0xf0] }
 0x536   : > { %10757 = vmatpush.bf16.msra.mxu3 %v15053_v31  ;;  %v18332_v12 = vld [vmem:[%s19282_s20 + $0x1bcc] sm:$0xf]  ;;  %v15645_v26 = vor.u32 %v18432_v24, %v15642_v35  ;;  %v15370_v21 = vld [vmem:[%s19282_s20 + $0x1cd8] sm:$0xf0] }
 0x537   : > { %10744 = vmatpush.bf16.msra.mxu2 %v14925_v3  ;;  %v18364_v57 = vld [vmem:[%s19282_s20 + $0x1ccc] sm:$0xf]  ;;  %v15498_v39 = vld [vmem:[%s19282_s20 + $0x1dd8] sm:$0xf0]  ;;  %v15245_v3 = vor.u32 %v18332_v12, %v15242_v44 }
 0x538   : > { %10719 = vmatpush.bf16.msra.mxu0 %v14653_v36  ;;  %v18396_v62 = vld [vmem:[%s19282_s20 + $0x1dcc] sm:$0xf]  ;;  %v15626_v22 = vld [vmem:[%s19282_s20 + $0x1ed8] sm:$0xf0]  ;;  %v15373_v11 = vor.u32 %v18364_v57, %v15370_v21 }
 0x539   : > { %10732 = vmatpush.bf16.msra.mxu1 %v14781_v16  ;;  %v18428_v25 = vld [vmem:[%s19282_s20 + $0x1ecc] sm:$0xf]  ;;  %v15501_v48 = vor.u32 %v18396_v62, %v15498_v39  ;;  %v15226_v0 = vld [vmem:[%s19282_s20 + $0x1bb8] sm:$0xf0] }
 0x53a   : > { %10758 = vmatpush.bf16.msra.mxu3 %v15037_v60  ;;  %v18328_v30 = vld [vmem:[%s19282_s20 + $0x1bac] sm:$0xf]  ;;  %v15629_v7 = vor.u32 %v18428_v25, %v15626_v22  ;;  %v15354_v38 = vld [vmem:[%s19282_s20 + $0x1cb8] sm:$0xf0] }
 0x53b   : > { %10745 = vmatpush.bf16.msra.mxu2 %v14909_v43  ;;  %v18360_v31 = vld [vmem:[%s19282_s20 + $0x1cac] sm:$0xf]  ;;  %v15482_v15 = vld [vmem:[%s19282_s20 + $0x1db8] sm:$0xf0] }
 0x53c   : > { %10720 = vmatpush.bf16.msra.mxu0 %v14637_v40  ;;  %v18392_v19 = vld [vmem:[%s19282_s20 + $0x1dac] sm:$0xf]  ;;  %v15610_v36 = vld [vmem:[%s19282_s20 + $0x1eb8] sm:$0xf0]  ;;  %v15357_v63 = vor.u32 %v18360_v31, %v15354_v38 }
 0x53d   : > { %10733 = vmatpush.bf16.msra.mxu1 %v14765_v49  ;;  %v18424_v32 = vld [vmem:[%s19282_s20 + $0x1eac] sm:$0xf]  ;;  %v15485_v9 = vor.u32 %v18392_v19, %v15482_v15  ;;  %v15210_v43 = vld [vmem:[%s19282_s20 + $0x1b98] sm:$0xf0]  ;;  %v10527_v14 = vpop.f32.mrf.mxu1 }
 0x53e   : > { %10759 = vmatpush.bf16.msra.mxu3 %v15021_v5  ;;  %v18324_v16 = vld [vmem:[%s19282_s20 + $0x1b8c] sm:$0xf]  ;;  %v15338_v29 = vld [vmem:[%s19282_s20 + $0x1c98] sm:$0xf0] }
 0x53f   : > { %10746 = vmatpush.bf16.msra.mxu2 %v14893_v28  ;;  %10721 = vmatmul.bf16.vlgmr.msra.gmra.mxu0 %v19761_v20  ;;  %v15229_v20 = vor.u32 %v18328_v30, %v15226_v0  ;;  %v18388_v45 = vld [vmem:[%s19282_s20 + $0x1d8c] sm:$0xf]  ;;  %v15466_v33 = vld [vmem:[%s19282_s20 + $0x1d98] sm:$0xf0]  ;;  %v15213_v55 = vor.u32 %v18324_v16, %v15210_v43 }
 0x540   : > { %10765 = vmatpush.bf16.msrb.mxu0 %v15261_v27  ;;  %10734 = vmatmul.bf16.vlgmr.msra.gmra.mxu1 %v19847_v47  ;;  %v15613_v47 = vor.u32 %v18424_v32, %v15610_v36  ;;  %v18420_v4 = vld [vmem:[%s19282_s20 + $0x1e8c] sm:$0xf]  ;;  %v15594_v60 = vld [vmem:[%s19282_s20 + $0x1e98] sm:$0xf0]  ;;  %v15469_v59 = vor.u32 %v18388_v45, %v15466_v33 }
 0x541   : > { %10778 = vmatpush.bf16.msrb.mxu1 %v15389_v46  ;;  %10760 = vmatmul.bf16.vlgmr.msra.gmra.mxu3 %v19851_v50  ;;  %v10514_v50 = vpop.f32.mrf.mxu0  ;;  %v18320_v41 = vld [vmem:[%s19282_s20 + $0x1b6c] sm:$0xf]  ;;  %v15194_v13 = vld [vmem:[%s19282_s20 + $0x1b78] sm:$0xf0]  ;;  %v15597_v34 = vor.u32 %v18420_v4, %v15594_v60 }
 0x542   : > { %10804 = vmatpush.bf16.msrb.mxu3 %v15645_v26  ;;  %10747 = vmatmul.bf16.vlgmr.msra.gmra.mxu2 %v19853_v51  ;;  %v18356_v51 = vld [vmem:[%s19282_s20 + $0x1c8c] sm:$0xf]  ;;  %v10515_v58 = vadd.f32 %v10514_v50, %v22119_v1  ;;  %v15322_v56 = vld [vmem:[%s19282_s20 + $0x1c78] sm:$0xf0]  ;;  %v15197_v35 = vor.u32 %v18320_v41, %v15194_v13 }
 0x543   : > { %10791 = vmatpush.bf16.msrb.mxu2 %v15517_v61  ;;  %v15341_v2 = vor.u32 %v18356_v51, %v15338_v29  ;;  %v18352_v40 = vld [vmem:[%s19282_s20 + $0x1c6c] sm:$0xf]  ;;  %v15450_v1 = vld [vmem:[%s19282_s20 + $0x1d78] sm:$0xf0] }
 0x544   : > { %10766 = vmatpush.bf16.msrb.mxu0 %v15245_v3  ;;  %v10528_v8 = vadd.f32 %v10527_v14, %v10515_v58  ;;  %v18384_v49 = vld [vmem:[%s19282_s20 + $0x1d6c] sm:$0xf]  ;;  %v15578_v24 = vld [vmem:[%s19282_s20 + $0x1e78] sm:$0xf0]  ;;  %v15325_v5 = vor.u32 %v18352_v40, %v15322_v56  ;;  %v10553_v25 = vpop.f32.mrf.mxu3 }
 0x545   : > { %10779 = vmatpush.bf16.msrb.mxu1 %v15373_v11  ;;  %v18416_v28 = vld [vmem:[%s19282_s20 + $0x1e6c] sm:$0xf]  ;;  %v15453_v27 = vor.u32 %v18384_v49, %v15450_v1  ;;  %v15178_v61 = vld [vmem:[%s19282_s20 + $0x1b58] sm:$0xf0]  ;;  %v10540_v57 = vpop.f32.mrf.mxu2  ;;  %v10529_v30 = vpop.f32.mrf.mxu1 }
 0x546   : > { %10805 = vmatpush.bf16.msrb.mxu3 %v15629_v7  ;;  %v18316_v46 = vld [vmem:[%s19282_s20 + $0x1b4c] sm:$0xf]  ;;  %v15581_v44 = vor.u32 %v18416_v28, %v15578_v24  ;;  %v15306_v26 = vld [vmem:[%s19282_s20 + $0x1c58] sm:$0xf0]  ;;  %v10541_v39 = vadd.f32 %v10540_v57, %v10528_v8 }
 0x547   : > { %10792 = vmatpush.bf16.msrb.mxu2 %v15501_v48  ;;  %v18348_v12 = vld [vmem:[%s19282_s20 + $0x1c4c] sm:$0xf]  ;;  %v15434_v62 = vld [vmem:[%s19282_s20 + $0x1d58] sm:$0xf0]  ;;  %v15181_v48 = vor.u32 %v18316_v46, %v15178_v61 }
 0x548   : > { %10767 = vmatpush.bf16.msrb.mxu0 %v15229_v20  ;;  %v18380_v21 = vld [vmem:[%s19282_s20 + $0x1d4c] sm:$0xf]  ;;  %v15562_v3 = vld [vmem:[%s19282_s20 + $0x1e58] sm:$0xf0]  ;;  %v22190_v0 = vadd.f32 %v10553_v25, %v10541_v39  ;;  %v15309_v31 = vor.u32 %v18348_v12, %v15306_v26 }
 0x549   : > { %10780 = vmatpush.bf16.msrb.mxu1 %v15357_v63  ;;  %v18412_v22 = vld [vmem:[%s19282_s20 + $0x1e4c] sm:$0xf]  ;;  %v10516_v11 = vpop.f32.mrf.mxu0  ;;  %v15437_v7 = vor.u32 %v18380_v21, %v15434_v62  ;;  %v15162_v19 = vld [vmem:[%s19282_s20 + $0x1b38] sm:$0xf0] }
 0x54a   : > { %10806 = vmatpush.bf16.msrb.mxu3 %v15613_v47  ;;  %v18312_v38 = vld [vmem:[%s19282_s20 + $0x1b2c] sm:$0xf]  ;;  %v15565_v32 = vor.u32 %v18412_v22, %v15562_v3  ;;  %v15290_v36 = vld [vmem:[%s19282_s20 + $0x1c38] sm:$0xf0] }
 0x54b   : > { %10793 = vmatpush.bf16.msrb.mxu2 %v15485_v9  ;;  %v18344_v15 = vld [vmem:[%s19282_s20 + $0x1c2c] sm:$0xf]  ;;  %v15418_v63 = vld [vmem:[%s19282_s20 + $0x1d38] sm:$0xf0]  ;;  %v15165_v43 = vor.u32 %v18312_v38, %v15162_v19 }
 0x54c   : > { %10768 = vmatpush.bf16.msrb.mxu0 %v15213_v55  ;;  %v18376_v20 = vld [vmem:[%s19282_s20 + $0x1d2c] sm:$0xf]  ;;  %v15546_v16 = vld [vmem:[%s19282_s20 + $0x1e38] sm:$0xf0]  ;;  %v15293_v29 = vor.u32 %v18344_v15, %v15290_v36  ;;  %v10555_v40 = vpop.f32.mrf.mxu3 }
 0x54d   : > { %10781 = vmatpush.bf16.msrb.mxu1 %v15341_v2  ;;  %v18408_v9 = vld [vmem:[%s19282_s20 + $0x1e2c] sm:$0xf]  ;;  %v15146_v47 = vld [vmem:[%s19282_s20 + $0x1b18] sm:$0xf0]  ;;  %v15421_v45 = vor.u32 %v18376_v20, %v15418_v63  ;;  %v10542_v2 = vpop.f32.mrf.mxu2 }
 0x54e   : > { %10807 = vmatpush.bf16.msrb.mxu3 %v15597_v34  ;;  %v18308_v51 = vld [vmem:[%s19282_s20 + $0x1b0c] sm:$0xf]  ;;  %v15274_v50 = vld [vmem:[%s19282_s20 + $0x1c18] sm:$0xf0]  ;;  %v15549_v60 = vor.u32 %v18408_v9, %v15546_v16 }
 0x54f   : > { %10794 = vmatpush.bf16.msrb.mxu2 %v15469_v59  ;;  %v18340_v33 = vld [vmem:[%s19282_s20 + $0x1c0c] sm:$0xf]  ;;  %v15402_v58 = vld [vmem:[%s19282_s20 + $0x1d18] sm:$0xf0]  ;;  %v15149_v34 = vor.u32 %v18308_v51, %v15146_v47 }
 0x550   : > { %10769 = vmatpush.bf16.msrb.mxu0 %v15197_v35  ;;  %v18372_v4 = vld [vmem:[%s19282_s20 + $0x1d0c] sm:$0xf]  ;;  %v15530_v14 = vld [vmem:[%s19282_s20 + $0x1e18] sm:$0xf0]  ;;  %v15277_v1 = vor.u32 %v18340_v33, %v15274_v50 }
 0x551   : > { %10782 = vmatpush.bf16.msrb.mxu1 %v15325_v5  ;;  %v18404_v55 = vld [vmem:[%s19282_s20 + $0x1e0c] sm:$0xf]  ;;  %v15770_v41 = vld [vmem:[%s19282_s20 + $0x1ff8] sm:$0xf0]  ;;  %v15405_v28 = vor.u32 %v18372_v4, %v15402_v58 }
 0x552   : > { %10808 = vmatpush.bf16.msrb.mxu3 %v15581_v44  ;;  %v18464_v59 = vld [vmem:[%s19282_s20 + $0x1fec] sm:$0xf]  ;;  %v15898_v8 = vld [vmem:[%s19282_s20 + $0x20f8] sm:$0xf0]  ;;  %v15533_v5 = vor.u32 %v18404_v55, %v15530_v14 }
 0x553   : > { %10795 = vmatpush.bf16.msrb.mxu2 %v15453_v27  ;;  %v18496_v13 = vld [vmem:[%s19282_s20 + $0x20ec] sm:$0xf]  ;;  %v16026_v49 = vld [vmem:[%s19282_s20 + $0x21f8] sm:$0xf0]  ;;  %v15773_v27 = vor.u32 %v18464_v59, %v15770_v41 }
 0x554   : > { %10770 = vmatpush.bf16.msrb.mxu0 %v15181_v48  ;;  %v18528_v56 = vld [vmem:[%s19282_s20 + $0x21ec] sm:$0xf]  ;;  %v16154_v35 = vld [vmem:[%s19282_s20 + $0x22f8] sm:$0xf0]  ;;  %v15901_v46 = vor.u32 %v18496_v13, %v15898_v8 }
 0x555   : > { %10783 = vmatpush.bf16.msrb.mxu1 %v15309_v31  ;;  %v18560_v24 = vld [vmem:[%s19282_s20 + $0x22ec] sm:$0xf]  ;;  %v16029_v61 = vor.u32 %v18528_v56, %v16026_v49  ;;  %v15754_v44 = vld [vmem:[%s19282_s20 + $0x1fd8] sm:$0xf0] }
 0x556   : > { %10809 = vmatpush.bf16.msrb.mxu3 %v15565_v32  ;;  %v18460_v12 = vld [vmem:[%s19282_s20 + $0x1fcc] sm:$0xf]  ;;  %v16157_v26 = vor.u32 %v18560_v24, %v16154_v35  ;;  %v15882_v21 = vld [vmem:[%s19282_s20 + $0x20d8] sm:$0xf0] }
 0x557   : > { %10796 = vmatpush.bf16.msrb.mxu2 %v15437_v7  ;;  %v18492_v57 = vld [vmem:[%s19282_s20 + $0x20cc] sm:$0xf]  ;;  %v16010_v39 = vld [vmem:[%s19282_s20 + $0x21d8] sm:$0xf0]  ;;  %v15757_v3 = vor.u32 %v18460_v12, %v15754_v44 }
 0x558   : > { %10771 = vmatpush.bf16.msrb.mxu0 %v15165_v43  ;;  %v18524_v62 = vld [vmem:[%s19282_s20 + $0x21cc] sm:$0xf]  ;;  %v16138_v22 = vld [vmem:[%s19282_s20 + $0x22d8] sm:$0xf0]  ;;  %v15885_v11 = vor.u32 %v18492_v57, %v15882_v21 }
 0x559   : > { %10784 = vmatpush.bf16.msrb.mxu1 %v15293_v29  ;;  %v18556_v25 = vld [vmem:[%s19282_s20 + $0x22cc] sm:$0xf]  ;;  %v16013_v48 = vor.u32 %v18524_v62, %v16010_v39  ;;  %v15738_v31 = vld [vmem:[%s19282_s20 + $0x1fb8] sm:$0xf0] }
 0x55a   : > { %10810 = vmatpush.bf16.msrb.mxu3 %v15549_v60  ;;  %v18456_v30 = vld [vmem:[%s19282_s20 + $0x1fac] sm:$0xf]  ;;  %v16141_v38 = vor.u32 %v18556_v25, %v16138_v22  ;;  %v15866_v19 = vld [vmem:[%s19282_s20 + $0x20b8] sm:$0xf0] }
 0x55b   : > { %10797 = vmatpush.bf16.msrb.mxu2 %v15421_v45  ;;  %v18488_v7 = vld [vmem:[%s19282_s20 + $0x20ac] sm:$0xf]  ;;  %v15994_v32 = vld [vmem:[%s19282_s20 + $0x21b8] sm:$0xf0] }
 0x55c   : > { %10772 = vmatpush.bf16.msrb.mxu0 %v15149_v34  ;;  %v18520_v15 = vld [vmem:[%s19282_s20 + $0x21ac] sm:$0xf]  ;;  %v16122_v20 = vld [vmem:[%s19282_s20 + $0x22b8] sm:$0xf0]  ;;  %v15869_v63 = vor.u32 %v18488_v7, %v15866_v19 }
 0x55d   : > { %10785 = vmatpush.bf16.msrb.mxu1 %v15277_v1  ;;  %v18552_v36 = vld [vmem:[%s19282_s20 + $0x22ac] sm:$0xf]  ;;  %v15997_v9 = vor.u32 %v18520_v15, %v15994_v32  ;;  %v15722_v43 = vld [vmem:[%s19282_s20 + $0x1f98] sm:$0xf0]  ;;  %v10579_v60 = vpop.f32.mrf.mxu1 }
 0x55e   : > { %10811 = vmatpush.bf16.msrb.mxu3 %v15533_v5  ;;  %v18452_v16 = vld [vmem:[%s19282_s20 + $0x1f8c] sm:$0xf]  ;;  %v15850_v51 = vld [vmem:[%s19282_s20 + $0x2098] sm:$0xf0] }
 0x55f   : > { %10798 = vmatpush.bf16.msrb.mxu2 %v15405_v28  ;;  %10773 = vmatmul.bf16.vlgmr.msrb.gmra.mxu0 %v19855_v52  ;;  %v15741_v52 = vor.u32 %v18456_v30, %v15738_v31  ;;  %v18516_v47 = vld [vmem:[%s19282_s20 + $0x218c] sm:$0xf]  ;;  %v15978_v29 = vld [vmem:[%s19282_s20 + $0x2198] sm:$0xf0]  ;;  %v15725_v4 = vor.u32 %v18452_v16, %v15722_v43 }
 0x560   : > { %10817 = vmatpush.bf16.msra.mxu0 %v15773_v27  ;;  %10786 = vmatmul.bf16.vlgmr.msrb.gmra.mxu1 %v19916_v6  ;;  %v16125_v6 = vor.u32 %v18552_v36, %v16122_v20  ;;  %v18548_v45 = vld [vmem:[%s19282_s20 + $0x228c] sm:$0xf]  ;;  %v16106_v33 = vld [vmem:[%s19282_s20 + $0x2298] sm:$0xf0]  ;;  %v15981_v55 = vor.u32 %v18516_v47, %v15978_v29 }
 0x561   : > { %10830 = vmatpush.bf16.msra.mxu1 %v15901_v46  ;;  %10812 = vmatmul.bf16.vlgmr.msrb.gmra.mxu3 %v22586_v37  ;;  %v10566_v37 = vpop.f32.mrf.mxu0  ;;  %v18448_v14 = vld [vmem:[%s19282_s20 + $0x1f6c] sm:$0xf]  ;;  %v15706_v2 = vld [vmem:[%s19282_s20 + $0x1f78] sm:$0xf0]  ;;  %v16109_v41 = vor.u32 %v18548_v45, %v16106_v33 }
 0x562   : > { %10856 = vmatpush.bf16.msra.mxu3 %v16157_v26  ;;  %10799 = vmatmul.bf16.vlgmr.msrb.gmra.mxu2 %v19920_v10  ;;  %v18484_v10 = vld [vmem:[%s19282_s20 + $0x208c] sm:$0xf]  ;;  %v10567_v50 = vadd.f32 %v10566_v37, %v22190_v0  ;;  %v15834_v40 = vld [vmem:[%s19282_s20 + $0x2078] sm:$0xf0]  ;;  %v15709_v49 = vor.u32 %v18448_v14, %v15706_v2 }
 0x563   : > { %10843 = vmatpush.bf16.msra.mxu2 %v16029_v61  ;;  %v15853_v58 = vor.u32 %v18484_v10, %v15850_v51  ;;  %v18480_v59 = vld [vmem:[%s19282_s20 + $0x206c] sm:$0xf]  ;;  %v15962_v0 = vld [vmem:[%s19282_s20 + $0x2178] sm:$0xf0] }
 0x564   : > { %10818 = vmatpush.bf16.msra.mxu0 %v15757_v3  ;;  %v10580_v13 = vadd.f32 %v10579_v60, %v10567_v50  ;;  %v18512_v34 = vld [vmem:[%s19282_s20 + $0x216c] sm:$0xf]  ;;  %v16090_v56 = vld [vmem:[%s19282_s20 + $0x2278] sm:$0xf0]  ;;  %v15837_v1 = vor.u32 %v18480_v59, %v15834_v40  ;;  %v10605_v26 = vpop.f32.mrf.mxu3 }
 0x565   : > { %10831 = vmatpush.bf16.msra.mxu1 %v15885_v11  ;;  %v18544_v8 = vld [vmem:[%s19282_s20 + $0x226c] sm:$0xf]  ;;  %v15965_v28 = vor.u32 %v18512_v34, %v15962_v0  ;;  %v15690_v35 = vld [vmem:[%s19282_s20 + $0x1f58] sm:$0xf0]  ;;  %v10592_v46 = vpop.f32.mrf.mxu2  ;;  %v10581_v22 = vpop.f32.mrf.mxu1 }
 0x566   : > { %10857 = vmatpush.bf16.msra.mxu3 %v16141_v38  ;;  %v18444_v24 = vld [vmem:[%s19282_s20 + $0x1f4c] sm:$0xf]  ;;  %v16093_v27 = vor.u32 %v18544_v8, %v16090_v56  ;;  %v15818_v61 = vld [vmem:[%s19282_s20 + $0x2058] sm:$0xf0]  ;;  %v10593_v57 = vadd.f32 %v10592_v46, %v10580_v13 }
 0x567   : > { %10844 = vmatpush.bf16.msra.mxu2 %v16013_v48  ;;  %v18476_v5 = vld [vmem:[%s19282_s20 + $0x204c] sm:$0xf]  ;;  %v15946_v44 = vld [vmem:[%s19282_s20 + $0x2158] sm:$0xf0]  ;;  %v15693_v25 = vor.u32 %v18444_v24, %v15690_v35 }
 0x568   : > { %10819 = vmatpush.bf16.msra.mxu0 %v15741_v52  ;;  %v18508_v12 = vld [vmem:[%s19282_s20 + $0x214c] sm:$0xf]  ;;  %v16074_v62 = vld [vmem:[%s19282_s20 + $0x2258] sm:$0xf0]  ;;  %v22261_v3 = vadd.f32 %v10605_v26, %v10593_v57  ;;  %v15821_v11 = vor.u32 %v18476_v5, %v15818_v61 }
 0x569   : > { %10832 = vmatpush.bf16.msra.mxu1 %v15869_v63  ;;  %v18540_v21 = vld [vmem:[%s19282_s20 + $0x224c] sm:$0xf]  ;;  %v10568_v39 = vpop.f32.mrf.mxu0  ;;  %v15949_v48 = vor.u32 %v18508_v12, %v15946_v44  ;;  %v15674_v31 = vld [vmem:[%s19282_s20 + $0x1f38] sm:$0xf0] }
 0x56a   : > { %10858 = vmatpush.bf16.msra.mxu3 %v16125_v6  ;;  %v18440_v30 = vld [vmem:[%s19282_s20 + $0x1f2c] sm:$0xf]  ;;  %v16077_v38 = vor.u32 %v18540_v21, %v16074_v62  ;;  %v15802_v19 = vld [vmem:[%s19282_s20 + $0x2038] sm:$0xf0] }
 0x56b   : > { %10845 = vmatpush.bf16.msra.mxu2 %v15997_v9  ;;  %v18472_v7 = vld [vmem:[%s19282_s20 + $0x202c] sm:$0xf]  ;;  %v15930_v32 = vld [vmem:[%s19282_s20 + $0x2138] sm:$0xf0]  ;;  %v15677_v52 = vor.u32 %v18440_v30, %v15674_v31 }
 0x56c   : > { %10820 = vmatpush.bf16.msra.mxu0 %v15725_v4  ;;  %v18504_v15 = vld [vmem:[%s19282_s20 + $0x212c] sm:$0xf]  ;;  %v16058_v20 = vld [vmem:[%s19282_s20 + $0x2238] sm:$0xf0]  ;;  %v15805_v16 = vor.u32 %v18472_v7, %v15802_v19 }
 0x56d   : > { %10833 = vmatpush.bf16.msra.mxu1 %v15853_v58  ;;  %v18536_v36 = vld [vmem:[%s19282_s20 + $0x222c] sm:$0xf]  ;;  %v15658_v9 = vld [vmem:[%s19282_s20 + $0x1f18] sm:$0xf0]  ;;  %v15933_v43 = vor.u32 %v18504_v15, %v15930_v32  ;;  %v10594_v33 = vpop.f32.mrf.mxu2  ;;  %v10607_v58 = vpop.f32.mrf.mxu3 }
 0x56e   : > { %10859 = vmatpush.bf16.msra.mxu3 %v16109_v41  ;;  %v18436_v63 = vld [vmem:[%s19282_s20 + $0x1f0c] sm:$0xf]  ;;  %v15786_v6 = vld [vmem:[%s19282_s20 + $0x2018] sm:$0xf0]  ;;  %v16061_v47 = vor.u32 %v18536_v36, %v16058_v20 }
 0x56f   : > { %10846 = vmatpush.bf16.msra.mxu2 %v15981_v55  ;;  %v18468_v10 = vld [vmem:[%s19282_s20 + $0x200c] sm:$0xf]  ;;  %v15914_v29 = vld [vmem:[%s19282_s20 + $0x2118] sm:$0xf0]  ;;  %v15661_v55 = vor.u32 %v18436_v63, %v15658_v9 }
 0x570   : > { %10821 = vmatpush.bf16.msra.mxu0 %v15709_v49  ;;  %v18500_v51 = vld [vmem:[%s19282_s20 + $0x210c] sm:$0xf]  ;;  %v16042_v45 = vld [vmem:[%s19282_s20 + $0x2218] sm:$0xf0]  ;;  %v15789_v41 = vor.u32 %v18468_v10, %v15786_v6 }
 0x571   : > { %10834 = vmatpush.bf16.msra.mxu1 %v15837_v1  ;;  %v18532_v37 = vld [vmem:[%s19282_s20 + $0x220c] sm:$0xf]  ;;  %v16282_v4 = vld [vmem:[%s19282_s20 + $0x23f8] sm:$0xf0]  ;;  %v15917_v13 = vor.u32 %v18500_v51, %v15914_v29 }
 0x572   : > { %10860 = vmatpush.bf16.msra.mxu3 %v16093_v27  ;;  %v18592_v50 = vld [vmem:[%s19282_s20 + $0x23ec] sm:$0xf]  ;;  %v16410_v14 = vld [vmem:[%s19282_s20 + $0x24f8] sm:$0xf0]  ;;  %v16045_v0 = vor.u32 %v18532_v37, %v16042_v45 }
 0x573   : > { %10847 = vmatpush.bf16.msra.mxu2 %v15965_v28  ;;  %v18624_v60 = vld [vmem:[%s19282_s20 + $0x24ec] sm:$0xf]  ;;  %v16538_v59 = vld [vmem:[%s19282_s20 + $0x25f8] sm:$0xf0]  ;;  %v16285_v8 = vor.u32 %v18592_v50, %v16282_v4 }
 0x574   : > { %10822 = vmatpush.bf16.msra.mxu0 %v15693_v25  ;;  %v18656_v2 = vld [vmem:[%s19282_s20 + $0x25ec] sm:$0xf]  ;;  %v16666_v34 = vld [vmem:[%s19282_s20 + $0x26f8] sm:$0xf0]  ;;  %v16413_v56 = vor.u32 %v18624_v60, %v16410_v14 }
 0x575   : > { %10835 = vmatpush.bf16.msra.mxu1 %v15821_v11  ;;  %v18688_v40 = vld [vmem:[%s19282_s20 + $0x26ec] sm:$0xf]  ;;  %v16541_v49 = vor.u32 %v18656_v2, %v16538_v59  ;;  %v16266_v28 = vld [vmem:[%s19282_s20 + $0x23d8] sm:$0xf0] }
 0x576   : > { %10861 = vmatpush.bf16.msra.mxu3 %v16077_v38  ;;  %v18588_v1 = vld [vmem:[%s19282_s20 + $0x23cc] sm:$0xf]  ;;  %v16669_v35 = vor.u32 %v18688_v40, %v16666_v34  ;;  %v16394_v5 = vld [vmem:[%s19282_s20 + $0x24d8] sm:$0xf0] }
 0x577   : > { %10848 = vmatpush.bf16.msra.mxu2 %v15949_v48  ;;  %v18620_v24 = vld [vmem:[%s19282_s20 + $0x24cc] sm:$0xf]  ;;  %v16522_v46 = vld [vmem:[%s19282_s20 + $0x25d8] sm:$0xf0]  ;;  %v16269_v44 = vor.u32 %v18588_v1, %v16266_v28 }
 0x578   : > { %10823 = vmatpush.bf16.msra.mxu0 %v15677_v52  ;;  %v18652_v27 = vld [vmem:[%s19282_s20 + $0x25cc] sm:$0xf]  ;;  %v16650_v12 = vld [vmem:[%s19282_s20 + $0x26d8] sm:$0xf0]  ;;  %v16397_v57 = vor.u32 %v18620_v24, %v16394_v5 }
 0x579   : > { %10836 = vmatpush.bf16.msra.mxu1 %v15805_v16  ;;  %v18684_v61 = vld [vmem:[%s19282_s20 + $0x26cc] sm:$0xf]  ;;  %v16525_v26 = vor.u32 %v18652_v27, %v16522_v46  ;;  %v16250_v62 = vld [vmem:[%s19282_s20 + $0x23b8] sm:$0xf0] }
 0x57a   : > { %10862 = vmatpush.bf16.msra.mxu3 %v16061_v47  ;;  %v18584_v21 = vld [vmem:[%s19282_s20 + $0x23ac] sm:$0xf]  ;;  %v16653_v25 = vor.u32 %v18684_v61, %v16650_v12  ;;  %v16378_v22 = vld [vmem:[%s19282_s20 + $0x24b8] sm:$0xf0] }
 0x57b   : > { %10849 = vmatpush.bf16.msra.mxu2 %v15933_v43  ;;  %v18616_v39 = vld [vmem:[%s19282_s20 + $0x24ac] sm:$0xf]  ;;  %v16506_v48 = vld [vmem:[%s19282_s20 + $0x25b8] sm:$0xf0] }
 0x57c   : > { %10824 = vmatpush.bf16.msra.mxu0 %v15661_v55  ;;  %v18648_v11 = vld [vmem:[%s19282_s20 + $0x25ac] sm:$0xf]  ;;  %v22597_v30 = vld [vmem:[#allocation16_spill] sm:$0xff]  ;;  %v16381_v38 = vor.u32 %v18616_v39, %v16378_v22 }
 0x57d   : > { %10837 = vmatpush.bf16.msra.mxu1 %v15789_v41  ;;  %v18680_v31 = vld [vmem:[%s19282_s20 + $0x26ac] sm:$0xf]  ;;  %v16634_v7 = vld [vmem:[%s19282_s20 + $0x26b8] sm:$0xf0]  ;;  %v16509_v19 = vor.u32 %v18648_v11, %v16506_v48  ;;  %v10631_v6 = vpop.f32.mrf.mxu1 }
 0x57e   : > { %10863 = vmatpush.bf16.msra.mxu3 %v16045_v0  ;;  %v18580_v15 = vld [vmem:[%s19282_s20 + $0x238c] sm:$0xf]  ;;  %v16234_v32 = vld [vmem:[%s19282_s20 + $0x2398] sm:$0xf0]  ;;  %v16637_v36 = vor.u32 %v18680_v31, %v16634_v7 }
 0x57f   : > { %10850 = vmatpush.bf16.msra.mxu2 %v15917_v13  ;;  %10825 = vmatmul.bf16.vlgmr.msra.gmra.mxu0 %v22593_v18  ;;  %v16253_v18 = vor.u32 %v18584_v21, %v16250_v62  ;;  %v16362_v20 = vld [vmem:[%s19282_s20 + $0x2498] sm:$0xf0]  ;;  %v18644_v52 = vld [vmem:[%s19282_s20 + $0x258c] sm:$0xf]  ;;  %v16237_v10 = vor.u32 %v18580_v15, %v16234_v32 }
 0x580   : > { %10869 = vmatpush.bf16.msrb.mxu0 %v16285_v8  ;;  %10838 = vmatmul.bf16.vlgmr.msra.gmra.mxu1 %v22597_v30  ;;  %v16490_v63 = vld [vmem:[%s19282_s20 + $0x2598] sm:$0xf0]  ;;  %v18676_v9 = vld [vmem:[%s19282_s20 + $0x268c] sm:$0xf] }
 0x581   : > { %10882 = vmatpush.bf16.msrb.mxu1 %v16413_v56  ;;  %10864 = vmatmul.bf16.vlgmr.msra.gmra.mxu3 %v22594_v17  ;;  %v10618_v17 = vpop.f32.mrf.mxu0  ;;  %v16618_v16 = vld [vmem:[%s19282_s20 + $0x2698] sm:$0xf0]  ;;  %v16493_v47 = vor.u32 %v18644_v52, %v16490_v63  ;;  %v18576_v29 = vld [vmem:[%s19282_s20 + $0x236c] sm:$0xf] }
 0x582   : > { %10908 = vmatpush.bf16.msrb.mxu3 %v16669_v35  ;;  %10851 = vmatmul.bf16.vlgmr.msra.gmra.mxu2 %v22588_v42  ;;  %v18612_v42 = vld [vmem:[%s19282_s20 + $0x248c] sm:$0xf]  ;;  %v10619_v43 = vadd.f32 %v10618_v17, %v22261_v3  ;;  %v16218_v37 = vld [vmem:[%s19282_s20 + $0x2378] sm:$0xf0]  ;;  %v16621_v33 = vor.u32 %v18676_v9, %v16618_v16 }
 0x583   : > { %10895 = vmatpush.bf16.msrb.mxu2 %v16541_v49  ;;  %v16365_v51 = vor.u32 %v18612_v42, %v16362_v20  ;;  %v18608_v45 = vld [vmem:[%s19282_s20 + $0x246c] sm:$0xf]  ;;  %v16346_v4 = vld [vmem:[%s19282_s20 + $0x2478] sm:$0xf0]  ;;  %v16221_v14 = vor.u32 %v18576_v29, %v16218_v37 }
 0x584   : > { %10870 = vmatpush.bf16.msrb.mxu0 %v16269_v44  ;;  %v10632_v50 = vadd.f32 %v10631_v6, %v10619_v43  ;;  %v18640_v60 = vld [vmem:[%s19282_s20 + $0x256c] sm:$0xf]  ;;  %v16474_v3 = vld [vmem:[%s19282_s20 + $0x2578] sm:$0xf0]  ;;  %v16349_v2 = vor.u32 %v18608_v45, %v16346_v4  ;;  %v10657_v28 = vpop.f32.mrf.mxu3 }
 0x585   : > { %10883 = vmatpush.bf16.msrb.mxu1 %v16397_v57  ;;  %v18672_v58 = vld [vmem:[%s19282_s20 + $0x266c] sm:$0xf]  ;;  %v16602_v55 = vld [vmem:[%s19282_s20 + $0x2678] sm:$0xf0]  ;;  %v16477_v59 = vor.u32 %v18640_v60, %v16474_v3  ;;  %v10644_v0 = vpop.f32.mrf.mxu2  ;;  %v10633_v46 = vpop.f32.mrf.mxu1 }
 0x586   : > { %10909 = vmatpush.bf16.msrb.mxu3 %v16653_v25  ;;  %v18572_v41 = vld [vmem:[%s19282_s20 + $0x234c] sm:$0xf]  ;;  %v16202_v13 = vld [vmem:[%s19282_s20 + $0x2358] sm:$0xf0]  ;;  %v16605_v34 = vor.u32 %v18672_v58, %v16602_v55  ;;  %v10645_v1 = vadd.f32 %v10644_v0, %v10632_v50 }
 0x587   : > { %10896 = vmatpush.bf16.msrb.mxu2 %v16525_v26  ;;  %v18604_v40 = vld [vmem:[%s19282_s20 + $0x244c] sm:$0xf]  ;;  %v16330_v8 = vld [vmem:[%s19282_s20 + $0x2458] sm:$0xf0]  ;;  %v16205_v27 = vor.u32 %v18572_v41, %v16202_v13 }
 0x588   : > { %10871 = vmatpush.bf16.msrb.mxu0 %v16253_v18  ;;  %v18636_v56 = vld [vmem:[%s19282_s20 + $0x254c] sm:$0xf]  ;;  %v16458_v49 = vld [vmem:[%s19282_s20 + $0x2558] sm:$0xf0]  ;;  %v22332_v61 = vadd.f32 %v10657_v28, %v10645_v1  ;;  %v16333_v12 = vor.u32 %v18604_v40, %v16330_v8 }
 0x589   : > { %10884 = vmatpush.bf16.msrb.mxu1 %v16381_v38  ;;  %v18668_v24 = vld [vmem:[%s19282_s20 + $0x264c] sm:$0xf]  ;;  %v16586_v35 = vld [vmem:[%s19282_s20 + $0x2658] sm:$0xf0]  ;;  %v10620_v5 = vpop.f32.mrf.mxu0  ;;  %v16461_v44 = vor.u32 %v18636_v56, %v16458_v49 }
 0x58a   : > { %10910 = vmatpush.bf16.msrb.mxu3 %v16637_v36  ;;  %v18568_v57 = vld [vmem:[%s19282_s20 + $0x232c] sm:$0xf]  ;;  %v16186_v26 = vld [vmem:[%s19282_s20 + $0x2338] sm:$0xf0]  ;;  %v16589_v62 = vor.u32 %v18668_v24, %v16586_v35 }
 0x58b   : > { %10897 = vmatpush.bf16.msrb.mxu2 %v16509_v19  ;;  %v18600_v21 = vld [vmem:[%s19282_s20 + $0x242c] sm:$0xf]  ;;  %v16314_v39 = vld [vmem:[%s19282_s20 + $0x2438] sm:$0xf0]  ;;  %v16189_v30 = vor.u32 %v18568_v57, %v16186_v26 }
 0x58c   : > { %10872 = vmatpush.bf16.msrb.mxu0 %v16237_v10  ;;  %v18632_v25 = vld [vmem:[%s19282_s20 + $0x252c] sm:$0xf]  ;;  %v16442_v22 = vld [vmem:[%s19282_s20 + $0x2538] sm:$0xf0]  ;;  %v16317_v18 = vor.u32 %v18600_v21, %v16314_v39  ;;  %v10659_v43 = vpop.f32.mrf.mxu3 }
 0x58d   : > { %10885 = vmatpush.bf16.msrb.mxu1 %v16365_v51  ;;  %v18664_v11 = vld [vmem:[%s19282_s20 + $0x262c] sm:$0xf]  ;;  %v16570_v48 = vld [vmem:[%s19282_s20 + $0x2638] sm:$0xf0]  ;;  %v16445_v38 = vor.u32 %v18632_v25, %v16442_v22  ;;  %v10646_v63 = vpop.f32.mrf.mxu2 }
 0x58e   : > { %10911 = vmatpush.bf16.msrb.mxu3 %v16621_v33  ;;  %v18564_v31 = vld [vmem:[%s19282_s20 + $0x230c] sm:$0xf]  ;;  %v16170_v7 = vld [vmem:[%s19282_s20 + $0x2318] sm:$0xf0]  ;;  %v16573_v42 = vor.u32 %v18664_v11, %v16570_v48 }
 0x58f   : > { %10898 = vmatpush.bf16.msrb.mxu2 %v16493_v47  ;;  %v18596_v19 = vld [vmem:[%s19282_s20 + $0x240c] sm:$0xf]  ;;  %v16298_v15 = vld [vmem:[%s19282_s20 + $0x2418] sm:$0xf0]  ;;  %v16173_v10 = vor.u32 %v18564_v31, %v16170_v7 }
 0x590   : > { %10873 = vmatpush.bf16.msrb.mxu0 %v16221_v14  ;;  %v18628_v32 = vld [vmem:[%s19282_s20 + $0x250c] sm:$0xf]  ;;  %v16426_v36 = vld [vmem:[%s19282_s20 + $0x2518] sm:$0xf0]  ;;  %v16301_v29 = vor.u32 %v18596_v19, %v16298_v15 }
 0x591   : > { %10886 = vmatpush.bf16.msrb.mxu1 %v16349_v2  ;;  %v18660_v20 = vld [vmem:[%s19282_s20 + $0x260c] sm:$0xf]  ;;  %v16554_v52 = vld [vmem:[%s19282_s20 + $0x2618] sm:$0xf0]  ;;  %v16429_v37 = vor.u32 %v18628_v32, %v16426_v36 }
 0x592   : > { %10912 = vmatpush.bf16.msrb.mxu3 %v16605_v34  ;;  %v18720_v17 = vld [vmem:[%s19282_s20 + $0x27ec] sm:$0xf]  ;;  %v16794_v9 = vld [vmem:[%s19282_s20 + $0x27f8] sm:$0xf0]  ;;  %v16557_v50 = vor.u32 %v18660_v20, %v16554_v52 }
 0x593   : > { %10899 = vmatpush.bf16.msrb.mxu2 %v16477_v59  ;;  %v18752_v16 = vld [vmem:[%s19282_s20 + $0x28ec] sm:$0xf]  ;;  %v16922_v6 = vld [vmem:[%s19282_s20 + $0x28f8] sm:$0xf0]  ;;  %v16797_v4 = vor.u32 %v18720_v17, %v16794_v9 }
 0x594   : > { %10874 = vmatpush.bf16.msrb.mxu0 %v16205_v27  ;;  %v18784_v51 = vld [vmem:[%s19282_s20 + $0x29ec] sm:$0xf]  ;;  %v17050_v47 = vld [vmem:[%s19282_s20 + $0x29f8] sm:$0xf0]  ;;  %v16925_v60 = vor.u32 %v18752_v16, %v16922_v6 }
 0x595   : > { %10887 = vmatpush.bf16.msrb.mxu1 %v16333_v12  ;;  %v18816_v45 = vld [vmem:[%s19282_s20 + $0x2aec] sm:$0xf]  ;;  %v17178_v33 = vld [vmem:[%s19282_s20 + $0x2af8] sm:$0xf0]  ;;  %v17053_v3 = vor.u32 %v18784_v51, %v17050_v47 }
 0x596   : > { %10913 = vmatpush.bf16.msrb.mxu3 %v16589_v62  ;;  %v18716_v58 = vld [vmem:[%s19282_s20 + $0x27cc] sm:$0xf]  ;;  %v16778_v55 = vld [vmem:[%s19282_s20 + $0x27d8] sm:$0xf0]  ;;  %v17181_v2 = vor.u32 %v18816_v45, %v17178_v33 }
 0x597   : > { %10900 = vmatpush.bf16.msrb.mxu2 %v16461_v44  ;;  %v18748_v14 = vld [vmem:[%s19282_s20 + $0x28cc] sm:$0xf]  ;;  %v16906_v59 = vld [vmem:[%s19282_s20 + $0x28d8] sm:$0xf0]  ;;  %v16781_v0 = vor.u32 %v18716_v58, %v16778_v55 }
 0x598   : > { %10875 = vmatpush.bf16.msrb.mxu0 %v16189_v30  ;;  %v18780_v41 = vld [vmem:[%s19282_s20 + $0x29cc] sm:$0xf]  ;;  %v17034_v13 = vld [vmem:[%s19282_s20 + $0x29d8] sm:$0xf0]  ;;  %v16909_v8 = vor.u32 %v18748_v14, %v16906_v59 }
 0x599   : > { %10888 = vmatpush.bf16.msrb.mxu1 %v16317_v18  ;;  %v18812_v40 = vld [vmem:[%s19282_s20 + $0x2acc] sm:$0xf]  ;;  %v17162_v34 = vld [vmem:[%s19282_s20 + $0x2ad8] sm:$0xf0]  ;;  %v17037_v56 = vor.u32 %v18780_v41, %v17034_v13 }
 0x59a   : > { %10914 = vmatpush.bf16.msrb.mxu3 %v16573_v42  ;;  %v18712_v49 = vld [vmem:[%s19282_s20 + $0x27ac] sm:$0xf]  ;;  %v16762_v1 = vld [vmem:[%s19282_s20 + $0x27b8] sm:$0xf0]  ;;  %v17165_v35 = vor.u32 %v18812_v40, %v17162_v34 }
 0x59b   : > { %10901 = vmatpush.bf16.msrb.mxu2 %v16445_v38  ;;  %v18744_v28 = vld [vmem:[%s19282_s20 + $0x28ac] sm:$0xf]  ;;  %v16890_v5 = vld [vmem:[%s19282_s20 + $0x28b8] sm:$0xf0]  ;;  %v16765_v21 = vor.u32 %v18712_v49, %v16762_v1 }
 0x59c   : > { %10876 = vmatpush.bf16.msrb.mxu0 %v16173_v10  ;;  %v22598_v24 = vld [vmem:[#allocation19_spill] sm:$0xff]  ;;  %v17018_v46 = vld [vmem:[%s19282_s20 + $0x29b8] sm:$0xf0]  ;;  %v16893_v62 = vor.u32 %v18744_v28, %v16890_v5 }
 0x59d   : > { %10889 = vmatpush.bf16.msrb.mxu1 %v16301_v29  ;;  %v18776_v27 = vld [vmem:[%s19282_s20 + $0x29ac] sm:$0xf]  ;;  %v22599_v12 = vld [vmem:[#allocation21_spill] sm:$0xff]  ;;  %v22600_v44 = vld [vmem:[#allocation20_spill] sm:$0xff]  ;;  %v10683_v32 = vpop.f32.mrf.mxu1 }
 0x59e   : > { %10915 = vmatpush.bf16.msrb.mxu3 %v16557_v50  ;;  %v18808_v57 = vld [vmem:[%s19282_s20 + $0x2aac] sm:$0xf]  ;;  %v17146_v26 = vld [vmem:[%s19282_s20 + $0x2ab8] sm:$0xf0]  ;;  %v17021_v39 = vor.u32 %v18776_v27, %v17018_v46 }
 0x59f   : > { %10902 = vmatpush.bf16.msrb.mxu2 %v16429_v37  ;;  %10877 = vmatmul.bf16.vlgmr.msrb.gmra.mxu0 %v22598_v24  ;;  %v18708_v25 = vld [vmem:[%s19282_s20 + $0x278c] sm:$0xf]  ;;  %v16746_v22 = vld [vmem:[%s19282_s20 + $0x2798] sm:$0xf0]  ;;  %v17149_v48 = vor.u32 %v18808_v57, %v17146_v26 }
 0x5a0   : > { %10921 = vmatpush.bf16.msra.mxu0 %v16797_v4  ;;  %10890 = vmatmul.bf16.vlgmr.msrb.gmra.mxu1 %v22600_v44  ;;  %v18740_v11 = vld [vmem:[%s19282_s20 + $0x288c] sm:$0xf]  ;;  %v16874_v30 = vld [vmem:[%s19282_s20 + $0x2898] sm:$0xf0]  ;;  %v16749_v15 = vor.u32 %v18708_v25, %v16746_v22 }
 0x5a1   : > { %10934 = vmatpush.bf16.msra.mxu1 %v16925_v60  ;;  %10916 = vmatmul.bf16.vlgmr.msrb.gmra.mxu3 %v20077_v53  ;;  %v18772_v31 = vld [vmem:[%s19282_s20 + $0x298c] sm:$0xf]  ;;  %v17002_v7 = vld [vmem:[%s19282_s20 + $0x2998] sm:$0xf0]  ;;  %v10670_v53 = vpop.f32.mrf.mxu0  ;;  %v16877_v42 = vor.u32 %v18740_v11, %v16874_v30 }
 0x5a2   : > { %10960 = vmatpush.bf16.msra.mxu3 %v17181_v2  ;;  %10903 = vmatmul.bf16.vlgmr.msrb.gmra.mxu2 %v22599_v12  ;;  %v18804_v18 = vld [vmem:[%s19282_s20 + $0x2a8c] sm:$0xf]  ;;  %v17130_v38 = vld [vmem:[%s19282_s20 + $0x2a98] sm:$0xf0]  ;;  %v10671_v19 = vadd.f32 %v10670_v53, %v22332_v61  ;;  %v17005_v36 = vor.u32 %v18772_v31, %v17002_v7 }
 0x5a3   : > { %10947 = vmatpush.bf16.msra.mxu2 %v17053_v3  ;;  %v18704_v20 = vld [vmem:[%s19282_s20 + $0x276c] sm:$0xf]  ;;  %v16730_v52 = vld [vmem:[%s19282_s20 + $0x2778] sm:$0xf0]  ;;  %v17133_v17 = vor.u32 %v18804_v18, %v17130_v38 }
 0x5a4   : > { %10922 = vmatpush.bf16.msra.mxu0 %v16781_v0  ;;  %v18736_v63 = vld [vmem:[%s19282_s20 + $0x286c] sm:$0xf]  ;;  %v10684_v9 = vadd.f32 %v10683_v32, %v10671_v19  ;;  %v16858_v16 = vld [vmem:[%s19282_s20 + $0x2878] sm:$0xf0]  ;;  %v16733_v51 = vor.u32 %v18704_v20, %v16730_v52  ;;  %v10709_v14 = vpop.f32.mrf.mxu3 }
 0x5a5   : > { %10935 = vmatpush.bf16.msra.mxu1 %v16909_v8  ;;  %v18768_v43 = vld [vmem:[%s19282_s20 + $0x296c] sm:$0xf]  ;;  %v16986_v61 = vld [vmem:[%s19282_s20 + $0x2978] sm:$0xf0]  ;;  %v16861_v47 = vor.u32 %v18736_v63, %v16858_v16  ;;  %v10696_v4 = vpop.f32.mrf.mxu2  ;;  %v10685_v40 = vpop.f32.mrf.mxu1 }
 0x5a6   : > { %10961 = vmatpush.bf16.msra.mxu3 %v17165_v35  ;;  %v18800_v10 = vld [vmem:[%s19282_s20 + $0x2a6c] sm:$0xf]  ;;  %v17114_v6 = vld [vmem:[%s19282_s20 + $0x2a78] sm:$0xf0]  ;;  %v16989_v29 = vor.u32 %v18768_v43, %v16986_v61  ;;  %v10697_v55 = vadd.f32 %v10696_v4, %v10684_v9 }
 0x5a7   : > { %10948 = vmatpush.bf16.msra.mxu2 %v17037_v56  ;;  %v18700_v37 = vld [vmem:[%s19282_s20 + $0x274c] sm:$0xf]  ;;  %v16714_v45 = vld [vmem:[%s19282_s20 + $0x2758] sm:$0xf0]  ;;  %v17117_v50 = vor.u32 %v18800_v10, %v17114_v6 }
 0x5a8   : > { %10923 = vmatpush.bf16.msra.mxu0 %v16765_v21  ;;  %v18732_v33 = vld [vmem:[%s19282_s20 + $0x284c] sm:$0xf]  ;;  %v16842_v60 = vld [vmem:[%s19282_s20 + $0x2858] sm:$0xf0]  ;;  %v16717_v13 = vor.u32 %v18700_v37, %v16714_v45  ;;  %v10710_v34 = vadd.f32 %v10709_v14, %v10697_v55 }
 0x5a9   : > { %10936 = vmatpush.bf16.msra.mxu1 %v16893_v62  ;;  %v18764_v3 = vld [vmem:[%s19282_s20 + $0x294c] sm:$0xf]  ;;  %v16970_v58 = vld [vmem:[%s19282_s20 + $0x2958] sm:$0xf0]  ;;  %v10672_v41 = vpop.f32.mrf.mxu0  ;;  %v16845_v0 = vor.u32 %v18732_v33, %v16842_v60 }
 0x5aa   : > { %10962 = vmatpush.bf16.msra.mxu3 %v17149_v48  ;;  %v18796_v2 = vld [vmem:[%s19282_s20 + $0x2a4c] sm:$0xf]  ;;  %v17098_v59 = vld [vmem:[%s19282_s20 + $0x2a58] sm:$0xf0]  ;;  %v16973_v8 = vor.u32 %v18764_v3, %v16970_v58 }
 0x5ab   : > { %10949 = vmatpush.bf16.msra.mxu2 %v17021_v39  ;;  %v18696_v56 = vld [vmem:[%s19282_s20 + $0x272c] sm:$0xf]  ;;  %v16698_v49 = vld [vmem:[%s19282_s20 + $0x2738] sm:$0xf0]  ;;  %v17101_v28 = vor.u32 %v18796_v2, %v17098_v59 }
 0x5ac   : > { %10924 = vmatpush.bf16.msra.mxu0 %v16749_v15  ;;  %v18728_v1 = vld [vmem:[%s19282_s20 + $0x282c] sm:$0xf]  ;;  %v16826_v24 = vld [vmem:[%s19282_s20 + $0x2838] sm:$0xf0]  ;;  %v16701_v12 = vor.u32 %v18696_v56, %v16698_v49  ;;  %v10711_v7 = vpop.f32.mrf.mxu3 }
 0x5ad   : > { %10937 = vmatpush.bf16.msra.mxu1 %v16877_v42  ;;  %v18760_v35 = vld [vmem:[%s19282_s20 + $0x292c] sm:$0xf]  ;;  %v16954_v5 = vld [vmem:[%s19282_s20 + $0x2938] sm:$0xf0]  ;;  %v16829_v44 = vor.u32 %v18728_v1, %v16826_v24  ;;  %v10698_v48 = vpop.f32.mrf.mxu2  ;;  %v18968_v42 = vld [vmem:[#allocation1 + $0x12] sm:$0xff] }
 0x5ae   : > { %10963 = vmatpush.bf16.msra.mxu3 %v17133_v17  ;;  %v18792_v27 = vld [vmem:[%s19282_s20 + $0x2a2c] sm:$0xf]  ;;  %v17082_v46 = vld [vmem:[%s19282_s20 + $0x2a38] sm:$0xf0]  ;;  %v16957_v57 = vor.u32 %v18760_v35, %v16954_v5 }
 0x5af   : > { %10950 = vmatpush.bf16.msra.mxu2 %v17005_v36  ;;  %v18692_v26 = vld [vmem:[%s19282_s20 + $0x270c] sm:$0xf]  ;;  %v16682_v21 = vld [vmem:[%s19282_s20 + $0x2718] sm:$0xf0]  ;;  %v17085_v39 = vor.u32 %v18792_v27, %v17082_v46 }
 0x5b0   : > { %10925 = vmatpush.bf16.msra.mxu0 %v16733_v51  ;;  %v18724_v62 = vld [vmem:[%s19282_s20 + $0x280c] sm:$0xf]  ;;  %v16810_v25 = vld [vmem:[%s19282_s20 + $0x2818] sm:$0xf0]  ;;  %v16685_v53 = vor.u32 %v18692_v26, %v16682_v21 }
 0x5b1   : > { %10938 = vmatpush.bf16.msra.mxu1 %v16861_v47  ;;  %v18756_v22 = vld [vmem:[%s19282_s20 + $0x290c] sm:$0xf]  ;;  %v16938_v11 = vld [vmem:[%s19282_s20 + $0x2918] sm:$0xf0]  ;;  %v16813_v18 = vor.u32 %v18724_v62, %v16810_v25 }
 0x5b2   : > { %10964 = vmatpush.bf16.msra.mxu3 %v17117_v50  ;;  %v18788_v30 = vld [vmem:[%s19282_s20 + $0x2a0c] sm:$0xf]  ;;  %v17066_v31 = vld [vmem:[%s19282_s20 + $0x2a18] sm:$0xf0]  ;;  %v16941_v38 = vor.u32 %v18756_v22, %v16938_v11 }
 0x5b3   : > { %10951 = vmatpush.bf16.msra.mxu2 %v16989_v29  ;;  %v17069_v19 = vor.u32 %v18788_v30, %v17066_v31  ;;  %v18966_v15 = vld [vmem:[#allocation1] sm:$0xff]  ;;  %v18967_v32 = vld [vmem:[#allocation1 + $0x9] sm:$0xff] }
 0x5b4   : > { %10926 = vmatpush.bf16.msra.mxu0 %v16717_v13 }
 0x5b5   : > { %10939 = vmatpush.bf16.msra.mxu1 %v16845_v0 }
 0x5b6   : > { %10965 = vmatpush.bf16.msra.mxu3 %v17101_v28 }
 0x5b7   : > { %10952 = vmatpush.bf16.msra.mxu2 %v16973_v8 }
 0x5b8   : > { %10927 = vmatpush.bf16.msra.mxu0 %v16701_v12 }
 0x5b9   : > { %10940 = vmatpush.bf16.msra.mxu1 %v16829_v44 }
 0x5ba   : > { %10966 = vmatpush.bf16.msra.mxu3 %v17085_v39 }
 0x5bb   : > { %10953 = vmatpush.bf16.msra.mxu2 %v16957_v57 }
 0x5bc   : > { %10928 = vmatpush.bf16.msra.mxu0 %v16685_v53  ;;  %v10722_v36 = vpop.f32.mrf.mxu0 }
 0x5bd   : > { %10941 = vmatpush.bf16.msra.mxu1 %v16813_v18  ;;  %v10723_v20 = vadd.f32 %v10722_v36, %v10710_v34  ;;  %v10735_v52 = vpop.f32.mrf.mxu1 }
 0x5be   : > { %10967 = vmatpush.bf16.msra.mxu3 %v17069_v19 }
 0x5bf   : > { %10954 = vmatpush.bf16.msra.mxu2 %v16941_v38  ;;  %10929 = vmatmul.bf16.vlgmr.msra.gmra.mxu0 %v20081_v54  ;;  %v10736_v63 = vadd.f32 %v10735_v52, %v10723_v20  ;;  %v10978_v38 = vrot.slane %v22030_v23, 4 }
 0x5c0   : > { %10942 = vmatmul.bf16.vlgmr.msra.gmra.mxu1 %v18966_v15  ;;  %v376_v15 = vld [vmem:[#allocation2] sm:$0xff] }
 0x5c1   : > { %10968 = vmatmul.bf16.vlgmr.msra.gmra.mxu3 %v18968_v42  ;;  %v22601_v42 = vld [vmem:[#allocation14_spill] sm:$0xff] }
 0x5c2   : > { %10955 = vmatmul.bf16.vlgmr.msra.gmra.mxu2 %v18967_v32 }
 0x5c4   : > { %v10761_v16 = vpop.f32.mrf.mxu3  ;;  %v10724_v43 = vpop.f32.mrf.mxu0 }
 0x5c5   : > { %v10748_v17 = vpop.f32.mrf.mxu2  ;;  %v10737_v61 = vpop.f32.mrf.mxu1 }
 0x5c6   : > { %v10749_v9 = vadd.f32 %v10748_v17, %v10736_v63 }
 0x5c8   : > { %v10762_v10 = vadd.f32 %v10761_v16, %v10749_v9 }
 0x5cc   : > { %v10763_v51 = vpop.f32.mrf.mxu3 }
 0x5cd   : > { %v10750_v6 = vpop.f32.mrf.mxu2 }
 0x5dc   : > { %v10774_v47 = vpop.f32.mrf.mxu0 }
 0x5dd   : > { %v10775_v54 = vadd.f32 %v10774_v47, %v10762_v10  ;;  %v10787_v29 = vpop.f32.mrf.mxu1 }
 0x5df   : > { %v10788_v37 = vadd.f32 %v10787_v29, %v10775_v54 }
 0x5e4   : > { %v10813_v50 = vpop.f32.mrf.mxu3  ;;  %v10776_v4 = vpop.f32.mrf.mxu0 }
 0x5e5   : > { %v10800_v45 = vpop.f32.mrf.mxu2  ;;  %v10789_v60 = vpop.f32.mrf.mxu1 }
 0x5e6   : > { %v10801_v33 = vadd.f32 %v10800_v45, %v10788_v37 }
 0x5e8   : > { %v10814_v3 = vadd.f32 %v10813_v50, %v10801_v33 }
 0x5ec   : > { %v10815_v55 = vpop.f32.mrf.mxu3 }
 0x5ed   : > { %v10802_v58 = vpop.f32.mrf.mxu2 }
 0x5fc   : > { %v10826_v14 = vpop.f32.mrf.mxu0 }
 0x5fd   : > { %v10839_v2 = vpop.f32.mrf.mxu1  ;;  %v10827_v49 = vadd.f32 %v10826_v14, %v10814_v3 }
 0x5ff   : > { %v10840_v5 = vadd.f32 %v10839_v2, %v10827_v49 }
 0x604   : > { %v10865_v41 = vpop.f32.mrf.mxu3  ;;  %v10828_v13 = vpop.f32.mrf.mxu0 }
 0x605   : > { %v10852_v59 = vpop.f32.mrf.mxu2  ;;  %v10841_v40 = vpop.f32.mrf.mxu1 }
 0x606   : > { %v10853_v27 = vadd.f32 %v10852_v59, %v10840_v5 }
 0x608   : > { %v10866_v44 = vadd.f32 %v10865_v41, %v10853_v27 }
 0x60c   : > { %v10867_v0 = vpop.f32.mrf.mxu3 }
 0x60d   : > { %v10854_v34 = vpop.f32.mrf.mxu2 }
 0x61c   : > { %v10878_v8 = vpop.f32.mrf.mxu0 }
 0x61d   : > { %v10891_v56 = vpop.f32.mrf.mxu1  ;;  %v10879_v57 = vadd.f32 %v10878_v8, %v10866_v44 }
 0x61f   : > { %v10892_v26 = vadd.f32 %v10891_v56, %v10879_v57 }
 0x624   : > { %v10917_v28 = vpop.f32.mrf.mxu3  ;;  %v10880_v24 = vpop.f32.mrf.mxu0 }
 0x625   : > { %v10904_v1 = vpop.f32.mrf.mxu2  ;;  %v10893_v35 = vpop.f32.mrf.mxu1 }
 0x626   : > { %v10905_v21 = vadd.f32 %v10904_v1, %v10892_v26 }
 0x628   : > { %v10918_v62 = vadd.f32 %v10917_v28, %v10905_v21 }
 0x62c   : > { %v10919_v12 = vpop.f32.mrf.mxu3 }
 0x62d   : > { %v10906_v46 = vpop.f32.mrf.mxu2 }
 0x63c   : > { %v10930_v39 = vpop.f32.mrf.mxu0 }
 0x63d   : > { %v10943_v25 = vpop.f32.mrf.mxu1  ;;  %v10931_v22 = vadd.f32 %v10930_v39, %v10918_v62 }
 0x63f   : > { %v10944_v11 = vadd.f32 %v10943_v25, %v10931_v22 }
 0x644   : > { %v10969_v31 = vpop.f32.mrf.mxu3  ;;  %v10932_v7 = vpop.f32.mrf.mxu0 }
 0x645   : > { %v10956_v48 = vpop.f32.mrf.mxu2  ;;  %v10945_v53 = vpop.f32.mrf.mxu1 }
 0x646   : > { %v10957_v30 = vadd.f32 %v10956_v48, %v10944_v11 }
 0x648   : > { %v10970_v18 = vadd.f32 %v10969_v31, %v10957_v30 }
 0x64a   : > { %v10979_v19 = vrot.slane %v10970_v18, 2 }
 0x64c   : > { %v10983_v32 = vsel %vm10982_vm4, %v10978_v38, %v10979_v19  ;;  %v10971_v63 = vpop.f32.mrf.mxu3  ;;  %10992 = sbr.rel (%p17182_p1) target bundleno = 1972 (0x7b4), region = 72 }
 0x64d   : > { %v10985_v36 = vsel %vm10984_vm5, %v22601_v42, %v10983_v32  ;;  %v10958_v20 = vpop.f32.mrf.mxu2 }
 0x64e   : > { %v10987_v52 = vadd.f32 %v10985_v36, %v376_v15 }
 0x650   : > { %10988 = vst [vmem:[#allocation2] sm:$0xff] %v10987_v52 }
 0x651   : > { %v17241_v17 = vld [vmem:[#allocation8 + $0x70] sm:$0xf]  ;;  %v18834_v9 = vld [vmem:[#allocation8 + $0x74] sm:$0xf0]  ;;  %v17233_v29 = vld [vmem:[#allocation8 + $0x60] sm:$0xf] }
 0x652   : > { %v17305_v16 = vld [vmem:[#allocation8 + $0xf0] sm:$0xf]  ;;  %v17242_v43 = vor.u32 %v18834_v9, %v17241_v17  ;;  %v18850_v61 = vld [vmem:[#allocation8 + $0xf4] sm:$0xf0]  ;;  %v18832_v45 = vld [vmem:[#allocation8 + $0x64] sm:$0xf0] }
 0x653   : > { %v17369_v10 = vld [vmem:[#allocation8 + $0x170] sm:$0xf]  ;;  %v18866_v23 = vld [vmem:[#allocation8 + $0x174] sm:$0xf0]  ;;  %v17306_v6 = vor.u32 %v18850_v61, %v17305_v16  ;;  %v17297_v33 = vld [vmem:[#allocation8 + $0xe0] sm:$0xf]  ;;  %v17234_v4 = vor.u32 %v18832_v45, %v17233_v29 }
 0x654   : > { %v17370_v51 = vor.u32 %v18866_v23, %v17369_v10  ;;  %v17433_v47 = vld [vmem:[#allocation8 + $0x1f0] sm:$0xf]  ;;  %v18882_v54 = vld [vmem:[#allocation8 + $0x1f4] sm:$0xf0]  ;;  %11399 = vmatpush.bf16.msra.mxu0 %v17242_v43  ;;  %v18848_v50 = vld [vmem:[#allocation8 + $0xe4] sm:$0xf0] }
 0x655   : > { %v17434_v37 = vor.u32 %v18882_v54, %v17433_v47  ;;  %11412 = vmatpush.bf16.msra.mxu1 %v17306_v6  ;;  %v17298_v60 = vor.u32 %v18848_v50, %v17297_v33  ;;  %v17361_v3 = vld [vmem:[#allocation8 + $0x160] sm:$0xf]  ;;  %v18864_v58 = vld [vmem:[#allocation8 + $0x164] sm:$0xf0]  ;;  %v17225_v59 = vld [vmem:[#allocation8 + $0x50] sm:$0xf] }
 0x656   : > { %11425 = vmatpush.bf16.msra.mxu2 %v17370_v51  ;;  %v17425_v55 = vld [vmem:[#allocation8 + $0x1e0] sm:$0xf]  ;;  %v17362_v14 = vor.u32 %v18864_v58, %v17361_v3  ;;  %v18880_v2 = vld [vmem:[#allocation8 + $0x1e4] sm:$0xf0]  ;;  %v18830_v41 = vld [vmem:[#allocation8 + $0x54] sm:$0xf0] }
 0x657   : > { %11438 = vmatpush.bf16.msra.mxu3 %v17434_v37  ;;  %v17426_v13 = vor.u32 %v18880_v2, %v17425_v55  ;;  %v17289_v40 = vld [vmem:[#allocation8 + $0xd0] sm:$0xf]  ;;  %v18846_v34 = vld [vmem:[#allocation8 + $0xd4] sm:$0xf0]  ;;  %v17226_v8 = vor.u32 %v18830_v41, %v17225_v59  ;;  %v17217_v35 = vld [vmem:[#allocation8 + $0x40] sm:$0xf] }
 0x658   : > { %v17353_v0 = vld [vmem:[#allocation8 + $0x150] sm:$0xf]  ;;  %11400 = vmatpush.bf16.msra.mxu0 %v17234_v4  ;;  %v18862_v56 = vld [vmem:[#allocation8 + $0x154] sm:$0xf0]  ;;  %v17290_v28 = vor.u32 %v18846_v34, %v17289_v40  ;;  %v18828_v5 = vld [vmem:[#allocation8 + $0x44] sm:$0xf0] }
 0x659   : > { %v17417_v49 = vld [vmem:[#allocation8 + $0x1d0] sm:$0xf]  ;;  %v18878_v1 = vld [vmem:[#allocation8 + $0x1d4] sm:$0xf0]  ;;  %11413 = vmatpush.bf16.msra.mxu1 %v17298_v60  ;;  %v17354_v24 = vor.u32 %v18862_v56, %v17353_v0  ;;  %v17281_v27 = vld [vmem:[#allocation8 + $0xc0] sm:$0xf]  ;;  %v17218_v62 = vor.u32 %v18828_v5, %v17217_v35 }
 0x65a   : > { %11426 = vmatpush.bf16.msra.mxu2 %v17362_v14  ;;  %v17418_v46 = vor.u32 %v18878_v1, %v17417_v49  ;;  %v18844_v12 = vld [vmem:[#allocation8 + $0xc4] sm:$0xf0]  ;;  %v17345_v44 = vld [vmem:[#allocation8 + $0x140] sm:$0xf]  ;;  %v17209_v22 = vld [vmem:[#allocation8 + $0x30] sm:$0xf] }
 0x65b   : > { %11439 = vmatpush.bf16.msra.mxu3 %v17426_v13  ;;  %v18860_v57 = vld [vmem:[#allocation8 + $0x144] sm:$0xf0]  ;;  %v17409_v26 = vld [vmem:[#allocation8 + $0x1c0] sm:$0xf]  ;;  %v17282_v39 = vor.u32 %v18844_v12, %v17281_v27  ;;  %v18826_v11 = vld [vmem:[#allocation8 + $0x34] sm:$0xf0] }
 0x65c   : > { %v18876_v21 = vld [vmem:[#allocation8 + $0x1c4] sm:$0xf0]  ;;  %11401 = vmatpush.bf16.msra.mxu0 %v17226_v8  ;;  %v17346_v25 = vor.u32 %v18860_v57, %v17345_v44  ;;  %v17273_v48 = vld [vmem:[#allocation8 + $0xb0] sm:$0xf]  ;;  %v18842_v31 = vld [vmem:[#allocation8 + $0xb4] sm:$0xf0]  ;;  %v17210_v19 = vor.u32 %v18826_v11, %v17209_v22 }
 0x65d   : > { %11414 = vmatpush.bf16.msra.mxu1 %v17290_v28  ;;  %v17410_v30 = vor.u32 %v18876_v21, %v17409_v26  ;;  %v17337_v7 = vld [vmem:[#allocation8 + $0x130] sm:$0xf]  ;;  %v18858_v53 = vld [vmem:[#allocation8 + $0x134] sm:$0xf0]  ;;  %v17274_v15 = vor.u32 %v18842_v31, %v17273_v48  ;;  %v17201_v42 = vld [vmem:[#allocation8 + $0x20] sm:$0xf] }
 0x65e   : > { %11427 = vmatpush.bf16.msra.mxu2 %v17354_v24  ;;  %v17401_v18 = vld [vmem:[#allocation8 + $0x1b0] sm:$0xf]  ;;  %v18874_v38 = vld [vmem:[#allocation8 + $0x1b4] sm:$0xf0]  ;;  %v17338_v32 = vor.u32 %v18858_v53, %v17337_v7  ;;  %v18824_v36 = vld [vmem:[#allocation8 + $0x24] sm:$0xf0] }
 0x65f   : > { %11440 = vmatpush.bf16.msra.mxu3 %v17418_v46  ;;  %v17265_v20 = vld [vmem:[#allocation8 + $0xa0] sm:$0xf]  ;;  %v17402_v52 = vor.u32 %v18874_v38, %v17401_v18  ;;  %v18840_v63 = vld [vmem:[#allocation8 + $0xa4] sm:$0xf0]  ;;  %v17202_v61 = vor.u32 %v18824_v36, %v17201_v42  ;;  %v17193_v6 = vld [vmem:[#allocation8 + $0x10] sm:$0xf] }
 0x660   : > { %11402 = vmatpush.bf16.msra.mxu0 %v17218_v62  ;;  %v17329_v17 = vld [vmem:[#allocation8 + $0x120] sm:$0xf]  ;;  %v18856_v9 = vld [vmem:[#allocation8 + $0x124] sm:$0xf0]  ;;  %v17266_v10 = vor.u32 %v18840_v63, %v17265_v20  ;;  %v18822_v51 = vld [vmem:[#allocation8 + $0x14] sm:$0xf0] }
 0x661   : > { %11415 = vmatpush.bf16.msra.mxu1 %v17282_v39  ;;  %v17393_v16 = vld [vmem:[#allocation8 + $0x1a0] sm:$0xf]  ;;  %v18872_v43 = vld [vmem:[#allocation8 + $0x1a4] sm:$0xf0]  ;;  %v17330_v23 = vor.u32 %v18856_v9, %v17329_v17  ;;  %v17257_v47 = vld [vmem:[#allocation8 + $0x90] sm:$0xf]  ;;  %v17194_v60 = vor.u32 %v18822_v51, %v17193_v6 }
 0x662   : > { %11428 = vmatpush.bf16.msra.mxu2 %v17346_v25  ;;  %v17394_v54 = vor.u32 %v18872_v43, %v17393_v16  ;;  %v18838_v29 = vld [vmem:[#allocation8 + $0x94] sm:$0xf0]  ;;  %v17321_v37 = vld [vmem:[#allocation8 + $0x110] sm:$0xf]  ;;  %v17185_v4 = vld [vmem:[#allocation8] sm:$0xf] }
 0x663   : > { %11441 = vmatpush.bf16.msra.mxu3 %v17410_v30  ;;  %v18854_v45 = vld [vmem:[#allocation8 + $0x114] sm:$0xf0]  ;;  %v17385_v33 = vld [vmem:[#allocation8 + $0x190] sm:$0xf]  ;;  %v18820_v3 = vld [vmem:[#allocation8 + $0x4] sm:$0xf0]  ;;  %v17258_v14 = vor.u32 %v18838_v29, %v17257_v47 }
 0x664   : > { %11403 = vmatpush.bf16.msra.mxu0 %v17210_v19  ;;  %v18870_v50 = vld [vmem:[#allocation8 + $0x194] sm:$0xf0]  ;;  %v17249_v58 = vld [vmem:[#allocation8 + $0x80] sm:$0xf]  ;;  %v18836_v55 = vld [vmem:[#allocation8 + $0x84] sm:$0xf0]  ;;  %v17322_v2 = vor.u32 %v18854_v45, %v17321_v37  ;;  %v17186_v28 = vor.u32 %v18820_v3, %v17185_v4 }
 0x665   : > { %11416 = vmatpush.bf16.msra.mxu1 %v17274_v15  ;;  %v17313_v59 = vld [vmem:[#allocation8 + $0x100] sm:$0xf]  ;;  %v18852_v41 = vld [vmem:[#allocation8 + $0x104] sm:$0xf0]  ;;  %v17386_v40 = vor.u32 %v18870_v50, %v17385_v33  ;;  %v18833_v0 = vld [vmem:[#allocation8 + $0x74] sm:$0xf]  ;;  %v17250_v27 = vor.u32 %v18836_v55, %v17249_v58 }
 0x666   : > { %11429 = vmatpush.bf16.msra.mxu2 %v17338_v32  ;;  %v17377_v13 = vld [vmem:[#allocation8 + $0x180] sm:$0xf]  ;;  %v18868_v34 = vld [vmem:[#allocation8 + $0x184] sm:$0xf0]  ;;  %v17243_v8 = vld [vmem:[#allocation8 + $0x78] sm:$0xf0]  ;;  %v17314_v46 = vor.u32 %v18852_v41, %v17313_v59 }
 0x667   : > { %11442 = vmatpush.bf16.msra.mxu3 %v17402_v52  ;;  %v18849_v56 = vld [vmem:[#allocation8 + $0xf4] sm:$0xf]  ;;  %v17307_v49 = vld [vmem:[#allocation8 + $0xf8] sm:$0xf0]  ;;  %v17378_v57 = vor.u32 %v18868_v34, %v17377_v13  ;;  %v17246_v26 = vor.u32 %v18833_v0, %v17243_v8  ;;  %v18831_v39 = vld [vmem:[#allocation8 + $0x64] sm:$0xf] }
 0x668   : > { %11404 = vmatpush.bf16.msra.mxu0 %v17202_v61  ;;  %v10993_v1 = vld [vmem:[#allocation2] sm:$0xff]  ;;  %v17371_v35 = vld [vmem:[#allocation8 + $0x178] sm:$0xf0]  ;;  %v17310_v21 = vor.u32 %v18849_v56, %v17307_v49  ;;  %v17235_v25 = vld [vmem:[#allocation8 + $0x68] sm:$0xf0]  ;;  %vm11586_vm6 = vcmask 1024  }
 0x669   : > { %11417 = vmatpush.bf16.msra.mxu1 %v17266_v10  ;;  %v18865_v24 = vld [vmem:[#allocation8 + $0x174] sm:$0xf]  ;;  %v10994_v5 = vmax.f32 %v10993_v1, 0.0  ;;  %v17435_v44 = vld [vmem:[#allocation8 + $0x1f8] sm:$0xf0]  ;;  %v17238_v18 = vor.u32 %v18831_v39, %v17235_v25 }
 0x66a   : > { %11430 = vmatpush.bf16.msra.mxu2 %v17330_v23  ;;  %v18881_v12 = vld [vmem:[#allocation8 + $0x1f4] sm:$0xf]  ;;  %v17374_v62 = vor.u32 %v18865_v24, %v17371_v35  ;;  %v18847_v22 = vld [vmem:[#allocation8 + $0xe4] sm:$0xf]  ;;  %v17299_v48 = vld [vmem:[#allocation8 + $0xe8] sm:$0xf0] }
 0x66b   : > { %11443 = vmatpush.bf16.msra.mxu3 %v17394_v54  ;;  %10996 = vst [vmem:[#allocation1] ss:$4 sm:$0xff] %v10994_v5  ;;  %v17438_v11 = vor.u32 %v18881_v12, %v17435_v44  ;;  %v18863_v30 = vld [vmem:[#allocation8 + $0x164] sm:$0xf]  ;;  %v17363_v31 = vld [vmem:[#allocation8 + $0x168] sm:$0xf0]  ;;  %v17302_v15 = vor.u32 %v18847_v22, %v17299_v48 }
 0x66c   : > { %11405 = vmatpush.bf16.msra.mxu0 %v17194_v60  ;;  %v18879_v7 = vld [vmem:[#allocation8 + $0x1e4] sm:$0xf]  ;;  %v17427_v53 = vld [vmem:[#allocation8 + $0x1e8] sm:$0xf0]  ;;  %v18829_v38 = vld [vmem:[#allocation8 + $0x54] sm:$0xf]  ;;  %v17366_v32 = vor.u32 %v18863_v30, %v17363_v31 }
 0x66d   : > { %11418 = vmatpush.bf16.msra.mxu1 %v17258_v14  ;;  %v17227_v19 = vld [vmem:[#allocation8 + $0x58] sm:$0xf0]  ;;  %v18845_v42 = vld [vmem:[#allocation8 + $0xd4] sm:$0xf]  ;;  %v17430_v52 = vor.u32 %v18879_v7, %v17427_v53  ;;  %v18827_v45 = vld [vmem:[#allocation8 + $0x44] sm:$0xf] }
 0x66e   : > { %11431 = vmatpush.bf16.msra.mxu2 %v17322_v2  ;;  %v17291_v36 = vld [vmem:[#allocation8 + $0xd8] sm:$0xf0]  ;;  %v18861_v20 = vld [vmem:[#allocation8 + $0x154] sm:$0xf]  ;;  %v17230_v10 = vor.u32 %v18829_v38, %v17227_v19  ;;  %v17219_v33 = vld [vmem:[#allocation8 + $0x48] sm:$0xf0] }
 0x66f   : > { %11444 = vmatpush.bf16.msra.mxu3 %v17386_v40  ;;  %v17355_v63 = vld [vmem:[#allocation8 + $0x158] sm:$0xf0]  ;;  %v18877_v17 = vld [vmem:[#allocation8 + $0x1d4] sm:$0xf]  ;;  %v17294_v23 = vor.u32 %v18845_v42, %v17291_v36  ;;  %v18843_v50 = vld [vmem:[#allocation8 + $0xc4] sm:$0xf]  ;;  %v17222_v2 = vor.u32 %v18827_v45, %v17219_v33 }
 0x670   : > { %11406 = vmatpush.bf16.msra.mxu0 %v17186_v28  ;;  %v17419_v9 = vld [vmem:[#allocation8 + $0x1d8] sm:$0xf0]  ;;  %v17358_v54 = vor.u32 %v18861_v20, %v17355_v63  ;;  %v17283_v60 = vld [vmem:[#allocation8 + $0xc8] sm:$0xf0]  ;;  %v18859_v3 = vld [vmem:[#allocation8 + $0x144] sm:$0xf] }
 0x671   : > { %11419 = vmatpush.bf16.msra.mxu1 %v17250_v27  ;;  %v17422_v4 = vor.u32 %v18877_v17, %v17419_v9  ;;  %v17347_v58 = vld [vmem:[#allocation8 + $0x148] sm:$0xf0]  ;;  %v18875_v55 = vld [vmem:[#allocation8 + $0x1c4] sm:$0xf]  ;;  %v17286_v59 = vor.u32 %v18843_v50, %v17283_v60  ;;  %v18825_v13 = vld [vmem:[#allocation8 + $0x34] sm:$0xf] }
 0x672   : > { %11432 = vmatpush.bf16.msra.mxu2 %v17314_v46  ;;  %v10999_v16 = vld.sshfl [vmem:[#allocation1 + $0x10] sm:$0xff pattern:$0x73625140]  ;;  %v10997_v43 = vld.sshfl [vmem:[#allocation1] sm:$0xff pattern:$0x73625140]  ;;  %v17350_v41 = vor.u32 %v18859_v3, %v17347_v58 }
 0x673   : > { %11445 = vmatpush.bf16.msra.mxu3 %v17378_v57  ;;  %v22423_v61 = vpack.c.bf16 %v10999_v16, %v10999_v16  ;;  %v22425_v6 = vpack.c.bf16 %v10997_v43, %v10997_v43  ;;  %v11000_v51 = vld.sshfl [vmem:[#allocation1 + $0x18] sm:$0xff pattern:$0x73625140]  ;;  %v10998_v47 = vld.sshfl [vmem:[#allocation1 + $0x8] sm:$0xff pattern:$0x73625140] }
 0x674   : > { %11451 = vmatpush.bf16.msrb.mxu0 %v17246_v26  ;;  %v22427_v29 = vpack.c.bf16 %v11000_v51, %v11000_v51  ;;  %v22429_v37 = vpack.c.bf16 %v10998_v47, %v10998_v47  ;;  %v17411_v14 = vld [vmem:[#allocation8 + $0x1c8] sm:$0xf0]  ;;  %v17211_v40 = vld [vmem:[#allocation8 + $0x38] sm:$0xf0]  ;;  %v18841_v34 = vld [vmem:[#allocation8 + $0xb4] sm:$0xf] }
 0x675   : > { %11464 = vmatpush.bf16.msrb.mxu1 %v17310_v21  ;;  %11433 = vmatmul.bf16.vlgmr.msra.gmra.mxu2 %v22423_v61  ;;  %v17414_v0 = vor.u32 %v18875_v55, %v17411_v14  ;;  %v17275_v8 = vld [vmem:[#allocation8 + $0xb8] sm:$0xf0]  ;;  %v18857_v56 = vld [vmem:[#allocation8 + $0x134] sm:$0xf]  ;;  %v17214_v24 = vor.u32 %v18825_v13, %v17211_v40  ;;  %v18823_v27 = vld [vmem:[#allocation8 + $0x24] sm:$0xf] }
 0x676   : > { %11477 = vmatpush.bf16.msrb.mxu2 %v17374_v62  ;;  %11407 = vmatmul.bf16.vlgmr.msra.gmra.mxu0 %v22425_v6  ;;  %v17339_v49 = vld [vmem:[#allocation8 + $0x138] sm:$0xf0]  ;;  %v18873_v1 = vld [vmem:[#allocation8 + $0x1b4] sm:$0xf]  ;;  %v17278_v35 = vor.u32 %v18841_v34, %v17275_v8  ;;  %v17203_v46 = vld [vmem:[#allocation8 + $0x28] sm:$0xf0] }
 0x677   : > { %11490 = vmatpush.bf16.msrb.mxu3 %v17438_v11  ;;  %11420 = vmatmul.bf16.vlgmr.msra.gmra.mxu1 %v22429_v37  ;;  %v17403_v28 = vld [vmem:[#allocation8 + $0x1b8] sm:$0xf0]  ;;  %v17342_v5 = vor.u32 %v18857_v56, %v17339_v49  ;;  %v18839_v12 = vld [vmem:[#allocation8 + $0xa4] sm:$0xf]  ;;  %v17267_v57 = vld [vmem:[#allocation8 + $0xa8] sm:$0xf0]  ;;  %v17206_v25 = vor.u32 %v18823_v27, %v17203_v46 }
 0x678   : > { %11452 = vmatpush.bf16.msrb.mxu0 %v17238_v18  ;;  %11446 = vmatmul.bf16.vlgmr.msra.gmra.mxu3 %v22427_v29  ;;  %v17406_v44 = vor.u32 %v18873_v1, %v17403_v28  ;;  %v18855_v26 = vld [vmem:[#allocation8 + $0x124] sm:$0xf]  ;;  %v17331_v21 = vld [vmem:[#allocation8 + $0x128] sm:$0xf0]  ;;  %v17270_v22 = vor.u32 %v18839_v12, %v17267_v57  ;;  %v18821_v48 = vld [vmem:[#allocation8 + $0x14] sm:$0xf] }
 0x679   : > { %11465 = vmatpush.bf16.msrb.mxu1 %v17302_v15  ;;  %v18871_v62 = vld [vmem:[#allocation8 + $0x1a4] sm:$0xf]  ;;  %v17395_v39 = vld [vmem:[#allocation8 + $0x1a8] sm:$0xf0]  ;;  %v17334_v11 = vor.u32 %v18855_v26, %v17331_v21  ;;  %v17195_v30 = vld [vmem:[#allocation8 + $0x18] sm:$0xf0] }
 0x67a   : > { %11478 = vmatpush.bf16.msrb.mxu2 %v17366_v32  ;;  %v18837_v31 = vld [vmem:[#allocation8 + $0x94] sm:$0xf]  ;;  %v17398_v7 = vor.u32 %v18871_v62, %v17395_v39  ;;  %v17259_v53 = vld [vmem:[#allocation8 + $0x98] sm:$0xf0]  ;;  %v17198_v32 = vor.u32 %v18821_v48, %v17195_v30  ;;  %v18819_v20 = vld [vmem:[#allocation8 + $0x4] sm:$0xf] }
 0x67b   : > { %11491 = vmatpush.bf16.msrb.mxu3 %v17430_v52  ;;  %v18853_v18 = vld [vmem:[#allocation8 + $0x114] sm:$0xf]  ;;  %v17323_v38 = vld [vmem:[#allocation8 + $0x118] sm:$0xf0]  ;;  %v17262_v42 = vor.u32 %v18837_v31, %v17259_v53  ;;  %v17187_v52 = vld [vmem:[#allocation8 + $0x8] sm:$0xf0] }
 0x67c   : > { %11453 = vmatpush.bf16.msrb.mxu0 %v17230_v10  ;;  %v18869_v19 = vld [vmem:[#allocation8 + $0x194] sm:$0xf]  ;;  %v17387_v15 = vld [vmem:[#allocation8 + $0x198] sm:$0xf0]  ;;  %v17326_v36 = vor.u32 %v18853_v18, %v17323_v38  ;;  %v18835_v63 = vld [vmem:[#allocation8 + $0x84] sm:$0xf]  ;;  %v17190_v51 = vor.u32 %v18819_v20, %v17187_v52 }
 0x67d   : > { %11466 = vmatpush.bf16.msrb.mxu1 %v17294_v23  ;;  %v17390_v17 = vor.u32 %v18869_v19, %v17387_v15  ;;  %v17251_v9 = vld [vmem:[#allocation8 + $0x88] sm:$0xf0]  ;;  %v18851_v16 = vld [vmem:[#allocation8 + $0x104] sm:$0xf]  ;;  %v11519_v50 = vld [vmem:[%s22556_s5 + $0x70] sm:$0xff] }
 0x67e   : > { %11479 = vmatpush.bf16.msrb.mxu2 %v17358_v54  ;;  %v17315_v43 = vld [vmem:[#allocation8 + $0x108] sm:$0xf0]  ;;  %v18867_v10 = vld [vmem:[#allocation8 + $0x184] sm:$0xf]  ;;  %v17254_v47 = vor.u32 %v18835_v63, %v17251_v9  ;;  %v11511_v55 = vld [vmem:[%s22556_s5 + $0x30] sm:$0xff] }
 0x67f   : > { %11492 = vmatpush.bf16.msrb.mxu3 %v17422_v4  ;;  %v17379_v23 = vld [vmem:[#allocation8 + $0x188] sm:$0xf0]  ;;  %v17318_v54 = vor.u32 %v18851_v16, %v17315_v43  ;;  %v11520_v33 = vld [vmem:[%s22556_s5 + $0x78] sm:$0xff]  ;;  %v11518_v4 = vld [vmem:[%s22556_s5 + $0x68] sm:$0xff] }
 0x680   : > { %11454 = vmatpush.bf16.msrb.mxu0 %v17222_v2  ;;  %v17382_v45 = vor.u32 %v18867_v10, %v17379_v23  ;;  %v11517_v60 = vld [vmem:[%s22556_s5 + $0x60] sm:$0xff]  ;;  %v11512_v3 = vld [vmem:[%s22556_s5 + $0x38] sm:$0xff]  ;;  %v11535_v14 = vld [vmem:[%s22556_s5 + $0xf0] sm:$0xff] }
 0x681   : > { %11467 = vmatpush.bf16.msrb.mxu1 %v17286_v59  ;;  %v11536_v58 = vld [vmem:[%s22556_s5 + $0xf8] sm:$0xff]  ;;  %v11510_v2 = vld [vmem:[%s22556_s5 + $0x28] sm:$0xff]  ;;  %v11533_v13 = vld [vmem:[%s22556_s5 + $0xe0] sm:$0xff] }
 0x682   : > { %11480 = vmatpush.bf16.msrb.mxu2 %v17350_v41  ;;  %v11534_v59 = vld [vmem:[%s22556_s5 + $0xe8] sm:$0xff]  ;;  %v11509_v41 = vld [vmem:[%s22556_s5 + $0x20] sm:$0xff]  ;;  %v11508_v40 = vld [vmem:[%s22556_s5 + $0x18] sm:$0xff] }
 0x683   : > { %11493 = vmatpush.bf16.msrb.mxu3 %v17414_v0  ;;  %v11532_v34 = vld [vmem:[%s22556_s5 + $0xd8] sm:$0xff]  ;;  %v11507_v0 = vld [vmem:[%s22556_s5 + $0x10] sm:$0xff]  ;;  %v11506_v56 = vld [vmem:[%s22556_s5 + $0x8] sm:$0xff] }
 0x684   : > { %11455 = vmatpush.bf16.msrb.mxu0 %v17214_v24  ;;  %v11531_v8 = vld [vmem:[%s22556_s5 + $0xd0] sm:$0xff]  ;;  %v11530_v49 = vld [vmem:[%s22556_s5 + $0xc8] sm:$0xff]  ;;  %v11505_v1 = vld [vmem:[%s22556_s5] sm:$0xff] }
 0x685   : > { %11468 = vmatpush.bf16.msrb.mxu1 %v17278_v35  ;;  %v11529_v28 = vld [vmem:[%s22556_s5 + $0xc0] sm:$0xff]  ;;  %v11528_v24 = vld [vmem:[%s22556_s5 + $0xb8] sm:$0xff]  ;;  %v11527_v35 = vld [vmem:[%s22556_s5 + $0xb0] sm:$0xff] }
 0x686   : > { %11481 = vmatpush.bf16.msrb.mxu2 %v17342_v5  ;;  %v11073_v5 = vld [vmem:[#allocation9] sm:$0x3]  ;;  %v11526_v27 = vld [vmem:[%s22556_s5 + $0xa8] sm:$0xff]  ;;  %v11525_v46 = vld [vmem:[%s22556_s5 + $0xa0] sm:$0xff] }
 0x687   : > { %11494 = vmatpush.bf16.msrb.mxu3 %v17406_v44  ;;  %v11075_v12 = vperm.slane %v11073_v5, 0  ;;  %v11524_v44 = vld [vmem:[%s22556_s5 + $0x98] sm:$0xff]  ;;  %v11523_v62 = vld [vmem:[%s22556_s5 + $0x90] sm:$0xff]  ;;  %v11076_v15 = vperm.slane %v11073_v5, 1 }
 0x688   : > { %11456 = vmatpush.bf16.msrb.mxu0 %v17206_v25  ;;  %v11522_v25 = vld [vmem:[%s22556_s5 + $0x88] sm:$0xff] }
 0x689   : > { %11469 = vmatpush.bf16.msrb.mxu1 %v17270_v22  ;;  %v11521_v22 = vld [vmem:[%s22556_s5 + $0x80] sm:$0xff] }
 0x68a   : > { %11482 = vmatpush.bf16.msrb.mxu2 %v17334_v11 }
 0x68b   : > { %11495 = vmatpush.bf16.msrb.mxu3 %v17398_v7 }
 0x68c   : > { %11457 = vmatpush.bf16.msrb.mxu0 %v17198_v32 }
 0x68d   : > { %11470 = vmatpush.bf16.msrb.mxu1 %v17262_v42 }
 0x68e   : > { %11483 = vmatpush.bf16.msrb.mxu2 %v17326_v36 }
 0x68f   : > { %11496 = vmatpush.bf16.msrb.mxu3 %v17390_v17 }
 0x690   : > { %11458 = vmatpush.bf16.msrb.mxu0 %v17190_v51 }
 0x691   : > { %11471 = vmatpush.bf16.msrb.mxu1 %v17254_v47  ;;  %v18969_v47 = vld [vmem:[#allocation3] ss:$0 sm:$0xff] }
 0x692   : > { %11484 = vmatpush.bf16.msrb.mxu2 %v17318_v54 }
 0x693   : > { %11497 = vmatpush.bf16.msrb.mxu3 %v17382_v45  ;;  %11459 = vmatmul.bf16.vlgmr.msrb.gmra.mxu0 %v22425_v6  ;;  %v11516_v6 = vld [vmem:[%s22556_s5 + $0x58] sm:$0xff] }
 0x694   : > { %11541 = vmatpush.msra.mxu0 %v11520_v33  ;;  %11472 = vmatmul.bf16.vlgmr.msrb.gmra.mxu1 %v22429_v37  ;;  %v11513_v37 = vld [vmem:[%s22556_s5 + $0x40] sm:$0xff] }
 0x695   : > { %11485 = vmatmul.bf16.vlgmr.msrb.gmra.mxu2 %v22423_v61  ;;  %v11515_v61 = vld [vmem:[%s22556_s5 + $0x50] sm:$0xff]  ;;  %11561 = vmatpush.msra.mxu1 %v11536_v58 }
 0x696   : > { %11498 = vmatmul.bf16.vlgmr.msrb.gmra.mxu3 %v22427_v29  ;;  %11542 = vmatpush.msra.mxu0 %v11519_v50  ;;  %v11514_v29 = vld [vmem:[%s22556_s5 + $0x48] sm:$0xff] }
 0x697   : > { %11562 = vmatpush.msra.mxu1 %v11535_v14 }
 0x698   : > { %11543 = vmatpush.msra.mxu0 %v11518_v4 }
 0x699   : > { %11563 = vmatpush.msra.mxu1 %v11534_v59 }
 0x69a   : > { %11544 = vmatpush.msra.mxu0 %v11517_v60 }
 0x69b   : > { %11564 = vmatpush.msra.mxu1 %v11533_v13 }
 0x69c   : > { %11545 = vmatpush.msra.mxu0 %v11516_v6 }
 0x69d   : > { %11565 = vmatpush.msra.mxu1 %v11532_v34 }
 0x69e   : > { %11546 = vmatpush.msra.mxu0 %v11515_v61 }
 0x69f   : > { %11566 = vmatpush.msra.mxu1 %v11531_v8 }
 0x6a0   : > { %11547 = vmatpush.msra.mxu0 %v11514_v29 }
 0x6a1   : > { %11567 = vmatpush.msra.mxu1 %v11530_v49 }
 0x6a2   : > { %11548 = vmatpush.msra.mxu0 %v11513_v37 }
 0x6a3   : > { %11568 = vmatpush.msra.mxu1 %v11529_v28 }
 0x6a4   : > { %11549 = vmatpush.msra.mxu0 %v11512_v3 }
 0x6a5   : > { %11569 = vmatpush.msra.mxu1 %v11528_v24 }
 0x6a6   : > { %11550 = vmatpush.msra.mxu0 %v11511_v55 }
 0x6a7   : > { %11570 = vmatpush.msra.mxu1 %v11527_v35 }
 0x6a8   : > { %11551 = vmatpush.msra.mxu0 %v11510_v2 }
 0x6a9   : > { %11571 = vmatpush.msra.mxu1 %v11526_v27 }
 0x6aa   : > { %11552 = vmatpush.msra.mxu0 %v11509_v41 }
 0x6ab   : > { %11572 = vmatpush.msra.mxu1 %v11525_v46 }
 0x6ac   : > { %11553 = vmatpush.msra.mxu0 %v11508_v40 }
 0x6ad   : > { %11573 = vmatpush.msra.mxu1 %v11524_v44 }
 0x6ae   : > { %11554 = vmatpush.msra.mxu0 %v11507_v0 }
 0x6af   : > { %11574 = vmatpush.msra.mxu1 %v11523_v62 }
 0x6b0   : > { %11555 = vmatpush.msra.mxu0 %v11506_v56 }
 0x6b1   : > { %11575 = vmatpush.msra.mxu1 %v11522_v25 }
 0x6b2   : > { %11556 = vmatpush.msra.mxu0 %v11505_v1 }
 0x6b3   : > { %11576 = vmatpush.msra.mxu1 %v11521_v22 }
 0x6f3   : > { %v11408_v57 = vpop.f32.mrf.mxu0 }
 0x6f4   : > { %v11409_v26 = vadd.f32 %v11408_v57, %v11075_v12  ;;  %v11421_v21 = vpop.f32.mrf.mxu1 }
 0x6f6   : > { %v11422_v39 = vadd.f32 %v11421_v21, %v11409_v26 }
 0x6f8   : > { %v11434_v11 = vpop.f32.mrf.mxu2 }
 0x6f9   : > { %v11435_v48 = vadd.f32 %v11434_v11, %v11422_v39 }
 0x6fb   : > { %v11447_v30 = vpop.f32.mrf.mxu3  ;;  %v11410_v7 = vpop.f32.mrf.mxu0 }
 0x6fc   : > { %v11448_v31 = vadd.f32 %v11447_v30, %v11435_v48  ;;  %v11423_v53 = vpop.f32.mrf.mxu1 }
 0x6fe   : > { %v11503_v18 = vmax.f32 %v11448_v31, 0.0 }
 0x700   : > { %11557 = vmatmul.f32.vlgmr.msra.gmra.mxu0 %v11503_v18  ;;  %v11436_v38 = vpop.f32.mrf.mxu2 }
 0x703   : > { %v11449_v19 = vpop.f32.mrf.mxu3 }
 0x710   : > { %v11460_v32 = vpop.f32.mrf.mxu0 }
 0x711   : > { %v11461_v42 = vadd.f32 %v11460_v32, %v11076_v15  ;;  %v11473_v36 = vpop.f32.mrf.mxu1 }
 0x713   : > { %v11474_v20 = vadd.f32 %v11473_v36, %v11461_v42 }
 0x718   : > { %v11486_v52 = vpop.f32.mrf.mxu2  ;;  %v11462_v9 = vpop.f32.mrf.mxu0 }
 0x719   : > { %v11487_v63 = vadd.f32 %v11486_v52, %v11474_v20  ;;  %v11499_v17 = vpop.f32.mrf.mxu3  ;;  %v11475_v16 = vpop.f32.mrf.mxu1 }
 0x71b   : > { %v11500_v43 = vadd.f32 %v11499_v17, %v11487_v63 }
 0x71d   : > { %v11504_v10 = vmax.f32 %v11500_v43, 0.0 }
 0x71f   : > { %11577 = vmatmul.f32.vlgmr.msra.gmra.mxu1 %v11504_v10 }
 0x720   : > { %v11488_v23 = vpop.f32.mrf.mxu2 }
 0x721   : > { %v11501_v51 = vpop.f32.mrf.mxu3 }
 0x77d   : > { %v11558_v54 = vpop.f32.mrf.mxu0 }
 0x77e   : > { %v11559_v45 = vadd.f32 %v18969_v47, %v11558_v54 }
 0x79c   : > { %v11578_v33 = vpop.f32.mrf.mxu1 }
 0x79d   : > { %v11579_v50 = vadd.f32 %v11578_v33, %v11559_v45 }
 0x79f   : > { %v11581_v4 = vsub.f32 0.0, %v11579_v50 }
 0x7a1   : > { %v11582_v60 = vmul.f32 1.442695, %v11581_v4 }
 0x7a3   : > { %18970 = vpow2.f32 %v11582_v60 }
 0x7a9   : > { %v18971_v6 = vpop.eup %18970 }
 0x7aa   : > { %v11584_v61 = vadd.f32 1.0, %v18971_v6 }
 0x7ac   : > { %18972 = vrcp.f32 %v11584_v61 }
 0x7b2   : > { %v18973_v29 = vpop.eup %18972 }
 0x7b3   : > { %11587 = vst.msk [vmem:[%s22558_s7] sm:$0x3] %vm11586_vm6, %v18973_v29 }
 0x7b4 PF: > { %p21_p4 = scmp.ge.s32.totalorder %s19248_s8, 5   ;;  %s22602_s26 = smov %s19128_s27 }
 0x7b5   : > { %s22603_s27 = smov %s19132_s28  ;;  %s22604_s28 = smov %s19258_s12 }
 0x7b6   : > { %s22605_s29 = smov %s19248_s8  ;;  %23 = sbr.rel (!%p21_p4) target bundleno = 8 (0x8), region = 107 }
 0x7bb   :  { %11599 = vsyncpa [#allocation5], 1 }
 0x7bc   :  { %11601 = vsyncpa [#allocation5 + $0x1], 1 }
 0x7bd   :  { %11602 = vsyncpa [#allocation7], 1 }
 0x7be   :  { %11603 = vsyncpa [#allocation10], 1 }

</bundles_post_ra>
